<compile_context>
chip_gen: v6e
topology: v6e:2x2x1
jax: 0.10.0
libtpu: 0.0.40
codegen_flags: <defaults>
</compile_context>

<pallas_src>
import jax
import jax.numpy as jnp
import numpy as np
from jax.experimental import pallas as pl
from jax.experimental.pallas import tpu as pltpu

EPS = 1e-5


def double_conv_kernel(x_ref, w1_ref, g1_ref, bt1_ref, w2_ref, g2_ref, bt2_ref,
                       out_ref, xpad_ref, p1_ref, ypad_ref, p2_ref):
    """Fused double_conv forward.

    x_ref   : (N, H, W, Cin)          unpadded NHWC input
    w*_ref  : (9*Cin, Cout)/(9*Cout, Cout)  im2col-layout weights (kh, kw, ci) x co
    g*,bt*  : (1, Cout)               BN gamma/beta
    out_ref : (N, H, W, Cout)
    xpad_ref: (N, H+2, W+2, Cin)      halo scratch for conv1
    p1_ref  : (N, H, W, 9*Cin)        im2col patches for conv1
    ypad_ref: (N, H+2, W+2, Cout)     halo scratch for conv2
    p2_ref  : (N, H, W, 9*Cout)       im2col patches for conv2
    """
    N, H, W, Cin = x_ref.shape
    Cout = out_ref.shape[-1]

    def fill_halo(pad_ref, c):
        # Zero only the four thin halo slabs, never the whole padded buffer.
        z_row = jnp.zeros((N, 1, W + 2, c), jnp.float32)
        z_col = jnp.zeros((N, H + 2, 1, c), jnp.float32)
        pad_ref[:, 0:1, :, :] = z_row
        pad_ref[:, H + 1:H + 2, :, :] = z_row
        pad_ref[:, :, 0:1, :] = z_col
        pad_ref[:, :, W + 1:W + 2, :] = z_col

    def conv_bn_relu(pad_ref, p_ref, w_ref, g_ref, bt_ref, c_in):
        # im2col: write the 9 shifted taps into the patch scratch once.
        for kh in range(3):
            for kw in range(3):
                t = kh * 3 + kw
                p_ref[:, :, :, t * c_in:(t + 1) * c_in] = (
                    pad_ref[:, kh:kh + H, kw:kw + W, :].astype(p_ref.dtype))
        # Single fat-K MXU contraction (K = 9*c_in), f32 accumulation.
        y = jnp.einsum('nhwk,ko->nhwo', p_ref[...], w_ref[...],
                       preferred_element_type=jnp.float32)
        # Conv bias intentionally omitted: exactly cancelled by training-mode BN mean.
        # Training-mode BN (batch stats, biased variance) folded into one affine pass.
        mean = jnp.mean(y, axis=(0, 1, 2), keepdims=True)            # (1,1,1,C)
        mean_sq = jnp.mean(y * y, axis=(0, 1, 2), keepdims=True)     # (1,1,1,C)
        var = mean_sq - mean * mean
        scale = g_ref[...] * jax.lax.rsqrt(var + EPS)                 # (1,1,1,C)
        shift = bt_ref[...] - mean * scale                            # (1,1,1,C)
        return jnp.maximum(y * scale + shift, 0.0)

    # --- block 1: build halo in VMEM, conv -> BN -> ReLU ---
    fill_halo(xpad_ref, Cin)
    xpad_ref[:, 1:H + 1, 1:W + 1, :] = x_ref[...].astype(jnp.float32)
    y1 = conv_bn_relu(xpad_ref, p1_ref, w1_ref, g1_ref, bt1_ref, Cin)

    # --- block 2: write y1 straight into the conv2 halo interior ---
    fill_halo(ypad_ref, Cout)
    ypad_ref[:, 1:H + 1, 1:W + 1, :] = y1
    y2 = conv_bn_relu(ypad_ref, p2_ref, w2_ref, g2_ref, bt2_ref, Cout)
    out_ref[...] = y2.astype(out_ref.dtype)


def inconv_forward(x_nchw, params, *, use_bf16_matmul=False):
    """PyTorch-equivalent inconv forward (mobilenet=False path). NCHW f32 in/out.

    use_bf16_matmul: cast matmul operands to bf16 (f32 accumulate) — recommended on
    v6e/v7x where the MXU bf16 path is ~2x f32; keep False on v5e.
    """
    w1, b1, g1, bt1, w2, b2, g2, bt2 = params
    # b1, b2 (conv biases) are not passed to the kernel: with training-mode BN the
    # bias is exactly cancelled by the batch-mean subtraction (verified vs. ref below).
    del b1, b2
    N, Cin, H, W = x_nchw.shape
    Cout = w1.shape[-1]

    mm_dtype = jnp.bfloat16 if use_bf16_matmul else jnp.float32
    x_nhwc = jnp.transpose(x_nchw, (0, 2, 3, 1))
    # Hoist im2col weight layout + dtype cast out of the kernel: (3,3,Ci,Co) -> (9*Ci,Co)
    w1m = w1.reshape(9 * Cin, Cout).astype(mm_dtype)
    w2m = w2.reshape(9 * Cout, Cout).astype(mm_dtype)

    bpe = jnp.dtype(mm_dtype).itemsize
    scratch_bytes = (N * (H + 2) * (W + 2) * (Cin + Cout) * 4
                     + N * H * W * 9 * (Cin + Cout) * bpe)
    io_bytes = (4 * N * H * W * (Cin + Cout)
                + bpe * 9 * Cout * (Cin + Cout) + 16 * Cout)
    vmem_limit = int(min(64 * 2**20, max(32 * 2**20, 2 * (scratch_bytes + 2 * io_bytes))))

    cost = pl.CostEstimate(
        flops=2 * N * H * W * 9 * Cout * (Cin + Cout),
        transcendentals=2 * Cout,
        bytes_accessed=io_bytes)

    out_nhwc = pl.pallas_call(
        double_conv_kernel,
        out_shape=jax.ShapeDtypeStruct((N, H, W, Cout), jnp.float32),
        in_specs=[pl.BlockSpec(memory_space=pltpu.MemorySpace.VMEM)] * 7,
        out_specs=pl.BlockSpec(memory_space=pltpu.MemorySpace.VMEM),
        scratch_shapes=[
            pltpu.VMEM((N, H + 2, W + 2, Cin), jnp.float32),   # padded input
            pltpu.VMEM((N, H, W, 9 * Cin), mm_dtype),          # im2col patches, conv1
            pltpu.VMEM((N, H + 2, W + 2, Cout), jnp.float32),  # padded intermediate
            pltpu.VMEM((N, H, W, 9 * Cout), mm_dtype),         # im2col patches, conv2
        ],
        compiler_params=pltpu.CompilerParams(vmem_limit_bytes=vmem_limit),
        cost_estimate=cost,
    )(x_nhwc, w1m, g1, bt1, w2m, g2, bt2)

    return jnp.transpose(out_nhwc, (0, 3, 1, 2))  # back to NCHW


def ref_forward(x_nchw, params):
    """Pure-JAX reference. NOTE: includes the conv biases, so the allclose check
    also proves the in-kernel bias elision is numerically exact."""
    w1, b1, g1, bt1, w2, b2, g2, bt2 = params
    x = jnp.transpose(x_nchw, (0, 2, 3, 1))

    def block(x, w, b, g, bt):
        y = jax.lax.conv_general_dilated(
            x, w, window_strides=(1, 1), padding='SAME',
            dimension_numbers=('NHWC', 'HWIO', 'NHWC')) + b
        mean = y.mean(axis=(0, 1, 2), keepdims=True)
        var = ((y - mean) ** 2).mean(axis=(0, 1, 2), keepdims=True)  # biased
        y = g * (y - mean) / jnp.sqrt(var + EPS) + bt
        return jnp.maximum(y, 0.0)

    y = block(x, w1, b1, g1, bt1)
    y = block(y, w2, b2, g2, bt2)
    return jnp.transpose(y, (0, 3, 1, 2))


def make_params(key, in_ch, out_ch):
    """Deterministic synthetic parameters (shapes as in the PyTorch module)."""
    k1, k2, k3, k4 = jax.random.split(key, 4)
    w1 = 0.1 * jax.random.normal(k1, (3, 3, in_ch, out_ch), jnp.float32)
    b1 = 0.1 * jax.random.normal(k2, (1, out_ch), jnp.float32)   # conv bias (cancelled by BN)
    w2 = 0.1 * jax.random.normal(k3, (3, 3, out_ch, out_ch), jnp.float32)
    b2 = 0.1 * jax.random.normal(k4, (1, out_ch), jnp.float32)
    g1 = jnp.ones((1, out_ch), jnp.float32)    # BN gamma (default init)
    bt1 = jnp.zeros((1, out_ch), jnp.float32)  # BN beta
    g2 = jnp.ones((1, out_ch), jnp.float32)
    bt2 = jnp.zeros((1, out_ch), jnp.float32)
    return (w1, b1, g1, bt1, w2, b2, g2, bt2)


if __name__ == "__main__":
    key = jax.random.PRNGKey(0)
    kx, kp = jax.random.split(key)

    N, Cin, Cout, H, W = 2, 4, 8, 16, 16
    x = jax.random.normal(kx, (N, Cin, H, W), jnp.float32)
    params = make_params(kp, Cin, Cout)

    out = jax.block_until_ready(inconv_forward(x, params))
    ref = jax.block_until_ready(ref_forward(x, params))

    assert out.shape == (N, Cout, H, W), out.shape
    np.testing.assert_allclose(np.asarray(out), np.asarray(ref),
                               rtol=1e-4, atol=2e-4)
    print("KERNEL_OK")
</pallas_src>

<mosaic_0001>
module attributes {stable_mosaic.version = 11 : i64} {
  func.func @double_conv_kernel(%arg0: memref<2x16x16x4xf32, #tpu.memory_space<vmem>>, %arg1: memref<36x8xf32, #tpu.memory_space<vmem>>, %arg2: memref<1x8xf32, #tpu.memory_space<vmem>>, %arg3: memref<1x8xf32, #tpu.memory_space<vmem>>, %arg4: memref<72x8xf32, #tpu.memory_space<vmem>>, %arg5: memref<1x8xf32, #tpu.memory_space<vmem>>, %arg6: memref<1x8xf32, #tpu.memory_space<vmem>>, %arg7: memref<2x16x16x8xf32, #tpu.memory_space<vmem>>, %arg8: memref<2x18x18x4xf32, #tpu.memory_space<vmem>>, %arg9: memref<2x16x16x36xf32, #tpu.memory_space<vmem>>, %arg10: memref<2x18x18x8xf32, #tpu.memory_space<vmem>>, %arg11: memref<2x16x16x72xf32, #tpu.memory_space<vmem>>) attributes {dimension_semantics = [], scalar_prefetch = 0 : i64, scratch_operands = 4 : i64, tpu.core_type = #tpu.core_type<tc>} {
    %cst = arith.constant 0.000000e+00 : f32
    %0 = vector.broadcast %cst : f32 to vector<2x1x18x4xf32>
    %cst_0 = arith.constant 0.000000e+00 : f32
    %1 = vector.broadcast %cst_0 : f32 to vector<2x18x1x4xf32>
    %c0 = arith.constant 0 : index
    %c0_1 = arith.constant 0 : index
    %c0_2 = arith.constant 0 : index
    %c0_3 = arith.constant 0 : index
    %2 = vector.load %arg8[%c0, %c0_1, %c0_2, %c0_3] : memref<2x18x18x4xf32, #tpu.memory_space<vmem>>, vector<2x1x18x4xf32>
    tpu.vector_store %arg8[%c0, %c0_1, %c0_2, %c0_3], %0 {strides = array<i32>} : memref<2x18x18x4xf32, #tpu.memory_space<vmem>>, vector<2x1x18x4xf32>,
    %c0_4 = arith.constant 0 : index
    %c17 = arith.constant 17 : index
    %c0_5 = arith.constant 0 : index
    %c0_6 = arith.constant 0 : index
    %3 = vector.load %arg8[%c0_4, %c17, %c0_5, %c0_6] : memref<2x18x18x4xf32, #tpu.memory_space<vmem>>, vector<2x1x18x4xf32>
    tpu.vector_store %arg8[%c0_4, %c17, %c0_5, %c0_6], %0 {strides = array<i32>} : memref<2x18x18x4xf32, #tpu.memory_space<vmem>>, vector<2x1x18x4xf32>,
    %c0_7 = arith.constant 0 : index
    %c0_8 = arith.constant 0 : index
    %c0_9 = arith.constant 0 : index
    %c0_10 = arith.constant 0 : index
    %4 = vector.load %arg8[%c0_7, %c0_8, %c0_9, %c0_10] : memref<2x18x18x4xf32, #tpu.memory_space<vmem>>, vector<2x18x1x4xf32>
    tpu.vector_store %arg8[%c0_7, %c0_8, %c0_9, %c0_10], %1 {strides = array<i32>} : memref<2x18x18x4xf32, #tpu.memory_space<vmem>>, vector<2x18x1x4xf32>,
    %c0_11 = arith.constant 0 : index
    %c0_12 = arith.constant 0 : index
    %c17_13 = arith.constant 17 : index
    %c0_14 = arith.constant 0 : index
    %5 = vector.load %arg8[%c0_11, %c0_12, %c17_13, %c0_14] : memref<2x18x18x4xf32, #tpu.memory_space<vmem>>, vector<2x18x1x4xf32>
    tpu.vector_store %arg8[%c0_11, %c0_12, %c17_13, %c0_14], %1 {strides = array<i32>} : memref<2x18x18x4xf32, #tpu.memory_space<vmem>>, vector<2x18x1x4xf32>,
    %c0_15 = arith.constant 0 : index
    %c0_16 = arith.constant 0 : index
    %c0_17 = arith.constant 0 : index
    %c0_18 = arith.constant 0 : index
    %6 = vector.load %arg0[%c0_15, %c0_16, %c0_17, %c0_18] : memref<2x16x16x4xf32, #tpu.memory_space<vmem>>, vector<2x16x16x4xf32>
    %c0_19 = arith.constant 0 : index
    %c1 = arith.constant 1 : index
    %c1_20 = arith.constant 1 : index
    %c0_21 = arith.constant 0 : index
    %7 = vector.load %arg8[%c0_19, %c1, %c1_20, %c0_21] : memref<2x18x18x4xf32, #tpu.memory_space<vmem>>, vector<2x16x16x4xf32>
    tpu.vector_store %arg8[%c0_19, %c1, %c1_20, %c0_21], %6 {strides = array<i32>} : memref<2x18x18x4xf32, #tpu.memory_space<vmem>>, vector<2x16x16x4xf32>,
    %c0_22 = arith.constant 0 : index
    %c0_23 = arith.constant 0 : index
    %c0_24 = arith.constant 0 : index
    %c0_25 = arith.constant 0 : index
    %8 = vector.load %arg8[%c0_22, %c0_23, %c0_24, %c0_25] : memref<2x18x18x4xf32, #tpu.memory_space<vmem>>, vector<2x16x16x4xf32>
    %c0_26 = arith.constant 0 : index
    %c0_27 = arith.constant 0 : index
    %c0_28 = arith.constant 0 : index
    %c0_29 = arith.constant 0 : index
    %9 = vector.load %arg9[%c0_26, %c0_27, %c0_28, %c0_29] : memref<2x16x16x36xf32, #tpu.memory_space<vmem>>, vector<2x16x16x4xf32>
    tpu.vector_store %arg9[%c0_26, %c0_27, %c0_28, %c0_29], %8 {strides = array<i32>} : memref<2x16x16x36xf32, #tpu.memory_space<vmem>>, vector<2x16x16x4xf32>,
    %c0_30 = arith.constant 0 : index
    %c0_31 = arith.constant 0 : index
    %c1_32 = arith.constant 1 : index
    %c0_33 = arith.constant 0 : index
    %10 = vector.load %arg8[%c0_30, %c0_31, %c1_32, %c0_33] : memref<2x18x18x4xf32, #tpu.memory_space<vmem>>, vector<2x16x16x4xf32>
    %c0_34 = arith.constant 0 : index
    %c0_35 = arith.constant 0 : index
    %c0_36 = arith.constant 0 : index
    %c4 = arith.constant 4 : index
    %11 = vector.load %arg9[%c0_34, %c0_35, %c0_36, %c4] : memref<2x16x16x36xf32, #tpu.memory_space<vmem>>, vector<2x16x16x4xf32>
    tpu.vector_store %arg9[%c0_34, %c0_35, %c0_36, %c4], %10 {strides = array<i32>} : memref<2x16x16x36xf32, #tpu.memory_space<vmem>>, vector<2x16x16x4xf32>,
    %c0_37 = arith.constant 0 : index
    %c0_38 = arith.constant 0 : index
    %c2 = arith.constant 2 : index
    %c0_39 = arith.constant 0 : index
    %12 = vector.load %arg8[%c0_37, %c0_38, %c2, %c0_39] : memref<2x18x18x4xf32, #tpu.memory_space<vmem>>, vector<2x16x16x4xf32>
    %c0_40 = arith.constant 0 : index
    %c0_41 = arith.constant 0 : index
    %c0_42 = arith.constant 0 : index
    %c8 = arith.constant 8 : index
    %13 = vector.load %arg9[%c0_40, %c0_41, %c0_42, %c8] : memref<2x16x16x36xf32, #tpu.memory_space<vmem>>, vector<2x16x16x4xf32>
    tpu.vector_store %arg9[%c0_40, %c0_41, %c0_42, %c8], %12 {strides = array<i32>} : memref<2x16x16x36xf32, #tpu.memory_space<vmem>>, vector<2x16x16x4xf32>,
    %c0_43 = arith.constant 0 : index
    %c1_44 = arith.constant 1 : index
    %c0_45 = arith.constant 0 : index
    %c0_46 = arith.constant 0 : index
    %14 = vector.load %arg8[%c0_43, %c1_44, %c0_45, %c0_46] : memref<2x18x18x4xf32, #tpu.memory_space<vmem>>, vector<2x16x16x4xf32>
    %c0_47 = arith.constant 0 : index
    %c0_48 = arith.constant 0 : index
    %c0_49 = arith.constant 0 : index
    %c12 = arith.constant 12 : index
    %15 = vector.load %arg9[%c0_47, %c0_48, %c0_49, %c12] : memref<2x16x16x36xf32, #tpu.memory_space<vmem>>, vector<2x16x16x4xf32>
    tpu.vector_store %arg9[%c0_47, %c0_48, %c0_49, %c12], %14 {strides = array<i32>} : memref<2x16x16x36xf32, #tpu.memory_space<vmem>>, vector<2x16x16x4xf32>,
    %c0_50 = arith.constant 0 : index
    %c1_51 = arith.constant 1 : index
    %c1_52 = arith.constant 1 : index
    %c0_53 = arith.constant 0 : index
    %16 = vector.load %arg8[%c0_50, %c1_51, %c1_52, %c0_53] : memref<2x18x18x4xf32, #tpu.memory_space<vmem>>, vector<2x16x16x4xf32>
    %c0_54 = arith.constant 0 : index
    %c0_55 = arith.constant 0 : index
    %c0_56 = arith.constant 0 : index
    %c16 = arith.constant 16 : index
    %17 = vector.load %arg9[%c0_54, %c0_55, %c0_56, %c16] : memref<2x16x16x36xf32, #tpu.memory_space<vmem>>, vector<2x16x16x4xf32>
    tpu.vector_store %arg9[%c0_54, %c0_55, %c0_56, %c16], %16 {strides = array<i32>} : memref<2x16x16x36xf32, #tpu.memory_space<vmem>>, vector<2x16x16x4xf32>,
    %c0_57 = arith.constant 0 : index
    %c1_58 = arith.constant 1 : index
    %c2_59 = arith.constant 2 : index
    %c0_60 = arith.constant 0 : index
    %18 = vector.load %arg8[%c0_57, %c1_58, %c2_59, %c0_60] : memref<2x18x18x4xf32, #tpu.memory_space<vmem>>, vector<2x16x16x4xf32>
    %c0_61 = arith.constant 0 : index
    %c0_62 = arith.constant 0 : index
    %c0_63 = arith.constant 0 : index
    %c20 = arith.constant 20 : index
    %19 = vector.load %arg9[%c0_61, %c0_62, %c0_63, %c20] : memref<2x16x16x36xf32, #tpu.memory_space<vmem>>, vector<2x16x16x4xf32>
    tpu.vector_store %arg9[%c0_61, %c0_62, %c0_63, %c20], %18 {strides = array<i32>} : memref<2x16x16x36xf32, #tpu.memory_space<vmem>>, vector<2x16x16x4xf32>,
    %c0_64 = arith.constant 0 : index
    %c2_65 = arith.constant 2 : index
    %c0_66 = arith.constant 0 : index
    %c0_67 = arith.constant 0 : index
    %20 = vector.load %arg8[%c0_64, %c2_65, %c0_66, %c0_67] : memref<2x18x18x4xf32, #tpu.memory_space<vmem>>, vector<2x16x16x4xf32>
    %c0_68 = arith.constant 0 : index
    %c0_69 = arith.constant 0 : index
    %c0_70 = arith.constant 0 : index
    %c24 = arith.constant 24 : index
    %21 = vector.load %arg9[%c0_68, %c0_69, %c0_70, %c24] : memref<2x16x16x36xf32, #tpu.memory_space<vmem>>, vector<2x16x16x4xf32>
    tpu.vector_store %arg9[%c0_68, %c0_69, %c0_70, %c24], %20 {strides = array<i32>} : memref<2x16x16x36xf32, #tpu.memory_space<vmem>>, vector<2x16x16x4xf32>,
    %c0_71 = arith.constant 0 : index
    %c2_72 = arith.constant 2 : index
    %c1_73 = arith.constant 1 : index
    %c0_74 = arith.constant 0 : index
    %22 = vector.load %arg8[%c0_71, %c2_72, %c1_73, %c0_74] : memref<2x18x18x4xf32, #tpu.memory_space<vmem>>, vector<2x16x16x4xf32>
    %c0_75 = arith.constant 0 : index
    %c0_76 = arith.constant 0 : index
    %c0_77 = arith.constant 0 : index
    %c28 = arith.constant 28 : index
    %23 = vector.load %arg9[%c0_75, %c0_76, %c0_77, %c28] : memref<2x16x16x36xf32, #tpu.memory_space<vmem>>, vector<2x16x16x4xf32>
    tpu.vector_store %arg9[%c0_75, %c0_76, %c0_77, %c28], %22 {strides = array<i32>} : memref<2x16x16x36xf32, #tpu.memory_space<vmem>>, vector<2x16x16x4xf32>,
    %c0_78 = arith.constant 0 : index
    %c2_79 = arith.constant 2 : index
    %c2_80 = arith.constant 2 : index
    %c0_81 = arith.constant 0 : index
    %24 = vector.load %arg8[%c0_78, %c2_79, %c2_80, %c0_81] : memref<2x18x18x4xf32, #tpu.memory_space<vmem>>, vector<2x16x16x4xf32>
    %c0_82 = arith.constant 0 : index
    %c0_83 = arith.constant 0 : index
    %c0_84 = arith.constant 0 : index
    %c32 = arith.constant 32 : index
    %25 = vector.load %arg9[%c0_82, %c0_83, %c0_84, %c32] : memref<2x16x16x36xf32, #tpu.memory_space<vmem>>, vector<2x16x16x4xf32>
    tpu.vector_store %arg9[%c0_82, %c0_83, %c0_84, %c32], %24 {strides = array<i32>} : memref<2x16x16x36xf32, #tpu.memory_space<vmem>>, vector<2x16x16x4xf32>,
    %c0_85 = arith.constant 0 : index
    %c0_86 = arith.constant 0 : index
    %c0_87 = arith.constant 0 : index
    %c0_88 = arith.constant 0 : index
    %26 = vector.load %arg9[%c0_85, %c0_86, %c0_87, %c0_88] : memref<2x16x16x36xf32, #tpu.memory_space<vmem>>, vector<2x16x16x36xf32>
    %c0_89 = arith.constant 0 : index
    %c0_90 = arith.constant 0 : index
    %27 = vector.load %arg1[%c0_89, %c0_90] : memref<36x8xf32, #tpu.memory_space<vmem>>, vector<36x8xf32>
    "tpu.trace_start"() <{level = 10 : i32, message = "nhwk,ko->nhwo"}> : () -> ()
    %cst_91 = arith.constant dense<0.000000e+00> : vector<2x16x16x8xf32>
    %28 = tpu.matmul %26, %27, %cst_91 {dimension_numbers = #tpu.dot_dimension_numbers<[3], [0], [0, 1, 2], [1], [0, 0, 0, 1, 0, 2, 1, 1], [], []>} : vector<2x16x16x36xf32>, vector<36x8xf32>, vector<2x16x16x8xf32> -> vector<2x16x16x8xf32>
    "tpu.trace_stop"() : () -> ()
    %cst_92 = arith.constant dense<0.000000e+00> : vector<8xf32>
    %29 = vector.multi_reduction <add>, %28, %cst_92 [0, 1, 2] : vector<2x16x16x8xf32> to vector<8xf32>
    %30 = vector.shape_cast %29 : vector<8xf32> to vector<1x1x1x8xf32>
    %cst_93 = arith.constant 5.120000e+02 : f32
    %31 = vector.broadcast %cst_93 : f32 to vector<1x1x1x8xf32>
    %32 = arith.divf %30, %31 : vector<1x1x1x8xf32>
    %33 = arith.mulf %28, %28 : vector<2x16x16x8xf32>
    %cst_94 = arith.constant dense<0.000000e+00> : vector<8xf32>
    %34 = vector.multi_reduction <add>, %33, %cst_94 [0, 1, 2] : vector<2x16x16x8xf32> to vector<8xf32>
    %35 = vector.shape_cast %34 : vector<8xf32> to vector<1x1x1x8xf32>
    %cst_95 = arith.constant 5.120000e+02 : f32
    %36 = vector.broadcast %cst_95 : f32 to vector<1x1x1x8xf32>
    %37 = arith.divf %35, %36 : vector<1x1x1x8xf32>
    %38 = arith.mulf %32, %32 : vector<1x1x1x8xf32>
    %39 = arith.subf %37, %38 : vector<1x1x1x8xf32>
    %c0_96 = arith.constant 0 : index
    %c0_97 = arith.constant 0 : index
    %40 = vector.load %arg2[%c0_96, %c0_97] : memref<1x8xf32, #tpu.memory_space<vmem>>, vector<1x8xf32>
    %cst_98 = arith.constant 9.99999974E-6 : f32
    %41 = vector.broadcast %cst_98 : f32 to vector<1x1x1x8xf32>
    %42 = arith.addf %39, %41 : vector<1x1x1x8xf32>
    %43 = math.rsqrt %42 : vector<1x1x1x8xf32>
    %44 = vector.shape_cast %40 : vector<1x8xf32> to vector<1x1x1x8xf32>
    %45 = arith.mulf %44, %43 : vector<1x1x1x8xf32>
    %c0_99 = arith.constant 0 : index
    %c0_100 = arith.constant 0 : index
    %46 = vector.load %arg3[%c0_99, %c0_100] : memref<1x8xf32, #tpu.memory_space<vmem>>, vector<1x8xf32>
    %47 = arith.mulf %32, %45 : vector<1x1x1x8xf32>
    %48 = vector.shape_cast %46 : vector<1x8xf32> to vector<1x1x1x8xf32>
    %49 = arith.subf %48, %47 : vector<1x1x1x8xf32>
    %50 = vector.broadcast %45 : vector<1x1x1x8xf32> to vector<2x16x16x8xf32>
    %51 = arith.mulf %28, %50 : vector<2x16x16x8xf32>
    %52 = vector.broadcast %49 : vector<1x1x1x8xf32> to vector<2x16x16x8xf32>
    %53 = arith.addf %51, %52 : vector<2x16x16x8xf32>
    %cst_101 = arith.constant 0.000000e+00 : f32
    %54 = vector.broadcast %cst_101 : f32 to vector<2x16x16x8xf32>
    %55 = arith.maximumf %53, %54 : vector<2x16x16x8xf32>
    %cst_102 = arith.constant 0.000000e+00 : f32
    %56 = vector.broadcast %cst_102 : f32 to vector<2x1x18x8xf32>
    %cst_103 = arith.constant 0.000000e+00 : f32
    %57 = vector.broadcast %cst_103 : f32 to vector<2x18x1x8xf32>
    %c0_104 = arith.constant 0 : index
    %c0_105 = arith.constant 0 : index
    %c0_106 = arith.constant 0 : index
    %c0_107 = arith.constant 0 : index
    %58 = vector.load %arg10[%c0_104, %c0_105, %c0_106, %c0_107] : memref<2x18x18x8xf32, #tpu.memory_space<vmem>>, vector<2x1x18x8xf32>
    tpu.vector_store %arg10[%c0_104, %c0_105, %c0_106, %c0_107], %56 {strides = array<i32>} : memref<2x18x18x8xf32, #tpu.memory_space<vmem>>, vector<2x1x18x8xf32>,
    %c0_108 = arith.constant 0 : index
    %c17_109 = arith.constant 17 : index
    %c0_110 = arith.constant 0 : index
    %c0_111 = arith.constant 0 : index
    %59 = vector.load %arg10[%c0_108, %c17_109, %c0_110, %c0_111] : memref<2x18x18x8xf32, #tpu.memory_space<vmem>>, vector<2x1x18x8xf32>
    tpu.vector_store %arg10[%c0_108, %c17_109, %c0_110, %c0_111], %56 {strides = array<i32>} : memref<2x18x18x8xf32, #tpu.memory_space<vmem>>, vector<2x1x18x8xf32>,
    %c0_112 = arith.constant 0 : index
    %c0_113 = arith.constant 0 : index
    %c0_114 = arith.constant 0 : index
    %c0_115 = arith.constant 0 : index
    %60 = vector.load %arg10[%c0_112, %c0_113, %c0_114, %c0_115] : memref<2x18x18x8xf32, #tpu.memory_space<vmem>>, vector<2x18x1x8xf32>
    tpu.vector_store %arg10[%c0_112, %c0_113, %c0_114, %c0_115], %57 {strides = array<i32>} : memref<2x18x18x8xf32, #tpu.memory_space<vmem>>, vector<2x18x1x8xf32>,
    %c0_116 = arith.constant 0 : index
    %c0_117 = arith.constant 0 : index
    %c17_118 = arith.constant 17 : index
    %c0_119 = arith.constant 0 : index
    %61 = vector.load %arg10[%c0_116, %c0_117, %c17_118, %c0_119] : memref<2x18x18x8xf32, #tpu.memory_space<vmem>>, vector<2x18x1x8xf32>
    tpu.vector_store %arg10[%c0_116, %c0_117, %c17_118, %c0_119], %57 {strides = array<i32>} : memref<2x18x18x8xf32, #tpu.memory_space<vmem>>, vector<2x18x1x8xf32>,
    %c0_120 = arith.constant 0 : index
    %c1_121 = arith.constant 1 : index
    %c1_122 = arith.constant 1 : index
    %c0_123 = arith.constant 0 : index
    %62 = vector.load %arg10[%c0_120, %c1_121, %c1_122, %c0_123] : memref<2x18x18x8xf32, #tpu.memory_space<vmem>>, vector<2x16x16x8xf32>
    tpu.vector_store %arg10[%c0_120, %c1_121, %c1_122, %c0_123], %55 {strides = array<i32>} : memref<2x18x18x8xf32, #tpu.memory_space<vmem>>, vector<2x16x16x8xf32>,
    %c0_124 = arith.constant 0 : index
    %c0_125 = arith.constant 0 : index
    %c0_126 = arith.constant 0 : index
    %c0_127 = arith.constant 0 : index
    %63 = vector.load %arg10[%c0_124, %c0_125, %c0_126, %c0_127] : memref<2x18x18x8xf32, #tpu.memory_space<vmem>>, vector<2x16x16x8xf32>
    %c0_128 = arith.constant 0 : index
    %c0_129 = arith.constant 0 : index
    %c0_130 = arith.constant 0 : index
    %c0_131 = arith.constant 0 : index
    %64 = vector.load %arg11[%c0_128, %c0_129, %c0_130, %c0_131] : memref<2x16x16x72xf32, #tpu.memory_space<vmem>>, vector<2x16x16x8xf32>
    tpu.vector_store %arg11[%c0_128, %c0_129, %c0_130, %c0_131], %63 {strides = array<i32>} : memref<2x16x16x72xf32, #tpu.memory_space<vmem>>, vector<2x16x16x8xf32>,
    %c0_132 = arith.constant 0 : index
    %c0_133 = arith.constant 0 : index
    %c1_134 = arith.constant 1 : index
    %c0_135 = arith.constant 0 : index
    %65 = vector.load %arg10[%c0_132, %c0_133, %c1_134, %c0_135] : memref<2x18x18x8xf32, #tpu.memory_space<vmem>>, vector<2x16x16x8xf32>
    %c0_136 = arith.constant 0 : index
    %c0_137 = arith.constant 0 : index
    %c0_138 = arith.constant 0 : index
    %c8_139 = arith.constant 8 : index
    %66 = vector.load %arg11[%c0_136, %c0_137, %c0_138, %c8_139] : memref<2x16x16x72xf32, #tpu.memory_space<vmem>>, vector<2x16x16x8xf32>
    tpu.vector_store %arg11[%c0_136, %c0_137, %c0_138, %c8_139], %65 {strides = array<i32>} : memref<2x16x16x72xf32, #tpu.memory_space<vmem>>, vector<2x16x16x8xf32>,
    %c0_140 = arith.constant 0 : index
    %c0_141 = arith.constant 0 : index
    %c2_142 = arith.constant 2 : index
    %c0_143 = arith.constant 0 : index
    %67 = vector.load %arg10[%c0_140, %c0_141, %c2_142, %c0_143] : memref<2x18x18x8xf32, #tpu.memory_space<vmem>>, vector<2x16x16x8xf32>
    %c0_144 = arith.constant 0 : index
    %c0_145 = arith.constant 0 : index
    %c0_146 = arith.constant 0 : index
    %c16_147 = arith.constant 16 : index
    %68 = vector.load %arg11[%c0_144, %c0_145, %c0_146, %c16_147] : memref<2x16x16x72xf32, #tpu.memory_space<vmem>>, vector<2x16x16x8xf32>
    tpu.vector_store %arg11[%c0_144, %c0_145, %c0_146, %c16_147], %67 {strides = array<i32>} : memref<2x16x16x72xf32, #tpu.memory_space<vmem>>, vector<2x16x16x8xf32>,
    %c0_148 = arith.constant 0 : index
    %c1_149 = arith.constant 1 : index
    %c0_150 = arith.constant 0 : index
    %c0_151 = arith.constant 0 : index
    %69 = vector.load %arg10[%c0_148, %c1_149, %c0_150, %c0_151] : memref<2x18x18x8xf32, #tpu.memory_space<vmem>>, vector<2x16x16x8xf32>
    %c0_152 = arith.constant 0 : index
    %c0_153 = arith.constant 0 : index
    %c0_154 = arith.constant 0 : index
    %c24_155 = arith.constant 24 : index
    %70 = vector.load %arg11[%c0_152, %c0_153, %c0_154, %c24_155] : memref<2x16x16x72xf32, #tpu.memory_space<vmem>>, vector<2x16x16x8xf32>
    tpu.vector_store %arg11[%c0_152, %c0_153, %c0_154, %c24_155], %69 {strides = array<i32>} : memref<2x16x16x72xf32, #tpu.memory_space<vmem>>, vector<2x16x16x8xf32>,
    %c0_156 = arith.constant 0 : index
    %c1_157 = arith.constant 1 : index
    %c1_158 = arith.constant 1 : index
    %c0_159 = arith.constant 0 : index
    %71 = vector.load %arg10[%c0_156, %c1_157, %c1_158, %c0_159] : memref<2x18x18x8xf32, #tpu.memory_space<vmem>>, vector<2x16x16x8xf32>
    %c0_160 = arith.constant 0 : index
    %c0_161 = arith.constant 0 : index
    %c0_162 = arith.constant 0 : index
    %c32_163 = arith.constant 32 : index
    %72 = vector.load %arg11[%c0_160, %c0_161, %c0_162, %c32_163] : memref<2x16x16x72xf32, #tpu.memory_space<vmem>>, vector<2x16x16x8xf32>
    tpu.vector_store %arg11[%c0_160, %c0_161, %c0_162, %c32_163], %71 {strides = array<i32>} : memref<2x16x16x72xf32, #tpu.memory_space<vmem>>, vector<2x16x16x8xf32>,
    %c0_164 = arith.constant 0 : index
    %c1_165 = arith.constant 1 : index
    %c2_166 = arith.constant 2 : index
    %c0_167 = arith.constant 0 : index
    %73 = vector.load %arg10[%c0_164, %c1_165, %c2_166, %c0_167] : memref<2x18x18x8xf32, #tpu.memory_space<vmem>>, vector<2x16x16x8xf32>
    %c0_168 = arith.constant 0 : index
    %c0_169 = arith.constant 0 : index
    %c0_170 = arith.constant 0 : index
    %c40 = arith.constant 40 : index
    %74 = vector.load %arg11[%c0_168, %c0_169, %c0_170, %c40] : memref<2x16x16x72xf32, #tpu.memory_space<vmem>>, vector<2x16x16x8xf32>
    tpu.vector_store %arg11[%c0_168, %c0_169, %c0_170, %c40], %73 {strides = array<i32>} : memref<2x16x16x72xf32, #tpu.memory_space<vmem>>, vector<2x16x16x8xf32>,
    %c0_171 = arith.constant 0 : index
    %c2_172 = arith.constant 2 : index
    %c0_173 = arith.constant 0 : index
    %c0_174 = arith.constant 0 : index
    %75 = vector.load %arg10[%c0_171, %c2_172, %c0_173, %c0_174] : memref<2x18x18x8xf32, #tpu.memory_space<vmem>>, vector<2x16x16x8xf32>
    %c0_175 = arith.constant 0 : index
    %c0_176 = arith.constant 0 : index
    %c0_177 = arith.constant 0 : index
    %c48 = arith.constant 48 : index
    %76 = vector.load %arg11[%c0_175, %c0_176, %c0_177, %c48] : memref<2x16x16x72xf32, #tpu.memory_space<vmem>>, vector<2x16x16x8xf32>
    tpu.vector_store %arg11[%c0_175, %c0_176, %c0_177, %c48], %75 {strides = array<i32>} : memref<2x16x16x72xf32, #tpu.memory_space<vmem>>, vector<2x16x16x8xf32>,
    %c0_178 = arith.constant 0 : index
    %c2_179 = arith.constant 2 : index
    %c1_180 = arith.constant 1 : index
    %c0_181 = arith.constant 0 : index
    %77 = vector.load %arg10[%c0_178, %c2_179, %c1_180, %c0_181] : memref<2x18x18x8xf32, #tpu.memory_space<vmem>>, vector<2x16x16x8xf32>
    %c0_182 = arith.constant 0 : index
    %c0_183 = arith.constant 0 : index
    %c0_184 = arith.constant 0 : index
    %c56 = arith.constant 56 : index
    %78 = vector.load %arg11[%c0_182, %c0_183, %c0_184, %c56] : memref<2x16x16x72xf32, #tpu.memory_space<vmem>>, vector<2x16x16x8xf32>
    tpu.vector_store %arg11[%c0_182, %c0_183, %c0_184, %c56], %77 {strides = array<i32>} : memref<2x16x16x72xf32, #tpu.memory_space<vmem>>, vector<2x16x16x8xf32>,
    %c0_185 = arith.constant 0 : index
    %c2_186 = arith.constant 2 : index
    %c2_187 = arith.constant 2 : index
    %c0_188 = arith.constant 0 : index
    %79 = vector.load %arg10[%c0_185, %c2_186, %c2_187, %c0_188] : memref<2x18x18x8xf32, #tpu.memory_space<vmem>>, vector<2x16x16x8xf32>
    %c0_189 = arith.constant 0 : index
    %c0_190 = arith.constant 0 : index
    %c0_191 = arith.constant 0 : index
    %c64 = arith.constant 64 : index
    %80 = vector.load %arg11[%c0_189, %c0_190, %c0_191, %c64] : memref<2x16x16x72xf32, #tpu.memory_space<vmem>>, vector<2x16x16x8xf32>
    tpu.vector_store %arg11[%c0_189, %c0_190, %c0_191, %c64], %79 {strides = array<i32>} : memref<2x16x16x72xf32, #tpu.memory_space<vmem>>, vector<2x16x16x8xf32>,
    %c0_192 = arith.constant 0 : index
    %c0_193 = arith.constant 0 : index
    %c0_194 = arith.constant 0 : index
    %c0_195 = arith.constant 0 : index
    %81 = vector.load %arg11[%c0_192, %c0_193, %c0_194, %c0_195] : memref<2x16x16x72xf32, #tpu.memory_space<vmem>>, vector<2x16x16x72xf32>
    %c0_196 = arith.constant 0 : index
    %c0_197 = arith.constant 0 : index
    %82 = vector.load %arg4[%c0_196, %c0_197] : memref<72x8xf32, #tpu.memory_space<vmem>>, vector<72x8xf32>
    "tpu.trace_start"() <{level = 10 : i32, message = "nhwk,ko->nhwo"}> : () -> ()
    %cst_198 = arith.constant dense<0.000000e+00> : vector<2x16x16x8xf32>
    %83 = tpu.matmul %81, %82, %cst_198 {dimension_numbers = #tpu.dot_dimension_numbers<[3], [0], [0, 1, 2], [1], [0, 0, 0, 1, 0, 2, 1, 1], [], []>} : vector<2x16x16x72xf32>, vector<72x8xf32>, vector<2x16x16x8xf32> -> vector<2x16x16x8xf32>
    "tpu.trace_stop"() : () -> ()
    %cst_199 = arith.constant dense<0.000000e+00> : vector<8xf32>
    %84 = vector.multi_reduction <add>, %83, %cst_199 [0, 1, 2] : vector<2x16x16x8xf32> to vector<8xf32>
    %85 = vector.shape_cast %84 : vector<8xf32> to vector<1x1x1x8xf32>
    %cst_200 = arith.constant 5.120000e+02 : f32
    %86 = vector.broadcast %cst_200 : f32 to vector<1x1x1x8xf32>
    %87 = arith.divf %85, %86 : vector<1x1x1x8xf32>
    %88 = arith.mulf %83, %83 : vector<2x16x16x8xf32>
    %cst_201 = arith.constant dense<0.000000e+00> : vector<8xf32>
    %89 = vector.multi_reduction <add>, %88, %cst_201 [0, 1, 2] : vector<2x16x16x8xf32> to vector<8xf32>
    %90 = vector.shape_cast %89 : vector<8xf32> to vector<1x1x1x8xf32>
    %cst_202 = arith.constant 5.120000e+02 : f32
    %91 = vector.broadcast %cst_202 : f32 to vector<1x1x1x8xf32>
    %92 = arith.divf %90, %91 : vector<1x1x1x8xf32>
    %93 = arith.mulf %87, %87 : vector<1x1x1x8xf32>
    %94 = arith.subf %92, %93 : vector<1x1x1x8xf32>
    %c0_203 = arith.constant 0 : index
    %c0_204 = arith.constant 0 : index
    %95 = vector.load %arg5[%c0_203, %c0_204] : memref<1x8xf32, #tpu.memory_space<vmem>>, vector<1x8xf32>
    %cst_205 = arith.constant 9.99999974E-6 : f32
    %96 = vector.broadcast %cst_205 : f32 to vector<1x1x1x8xf32>
    %97 = arith.addf %94, %96 : vector<1x1x1x8xf32>
    %98 = math.rsqrt %97 : vector<1x1x1x8xf32>
    %99 = vector.shape_cast %95 : vector<1x8xf32> to vector<1x1x1x8xf32>
    %100 = arith.mulf %99, %98 : vector<1x1x1x8xf32>
    %c0_206 = arith.constant 0 : index
    %c0_207 = arith.constant 0 : index
    %101 = vector.load %arg6[%c0_206, %c0_207] : memref<1x8xf32, #tpu.memory_space<vmem>>, vector<1x8xf32>
    %102 = arith.mulf %87, %100 : vector<1x1x1x8xf32>
    %103 = vector.shape_cast %101 : vector<1x8xf32> to vector<1x1x1x8xf32>
    %104 = arith.subf %103, %102 : vector<1x1x1x8xf32>
    %105 = vector.broadcast %100 : vector<1x1x1x8xf32> to vector<2x16x16x8xf32>
    %106 = arith.mulf %83, %105 : vector<2x16x16x8xf32>
    %107 = vector.broadcast %104 : vector<1x1x1x8xf32> to vector<2x16x16x8xf32>
    %108 = arith.addf %106, %107 : vector<2x16x16x8xf32>
    %cst_208 = arith.constant 0.000000e+00 : f32
    %109 = vector.broadcast %cst_208 : f32 to vector<2x16x16x8xf32>
    %110 = arith.maximumf %108, %109 : vector<2x16x16x8xf32>
    %c0_209 = arith.constant 0 : index
    %c0_210 = arith.constant 0 : index
    %c0_211 = arith.constant 0 : index
    %c0_212 = arith.constant 0 : index
    %111 = vector.load %arg7[%c0_209, %c0_210, %c0_211, %c0_212] : memref<2x16x16x8xf32, #tpu.memory_space<vmem>>, vector<2x16x16x8xf32>
    tpu.vector_store %arg7[%c0_209, %c0_210, %c0_211, %c0_212], %110 {strides = array<i32>} : memref<2x16x16x8xf32, #tpu.memory_space<vmem>>, vector<2x16x16x8xf32>,
    return
  }
}

</mosaic_0001>

<bundles_post_ra>
// kernel: tpu_custom_call.1
= control target key start
LH: loop header
LB: loop body
LE: loop exit
PB: predicated region body
PF: predicated region fallthrough
CT: control target
= control target key end

     0   :  { %vm26_vm0 = vcmask 31744   ;;  %vm41_vm1 = vcmask 24576   ;;  %vm29_vm2 = vcmask 25600   ;;  %v15848_v0 = vmov 0.0   ;;  %s9806_s22 = smov 4   ;;  %s9807_s10 = smov 8   ;;  %s15840_s0 = inlined_call_operand.vmem [shape: f32[2,16,16,4], index: 0, kind: input, shape index: {}]   ;;  %s15841_s1 = inlined_call_operand.vmem [shape: f32[36,8], index: 1, kind: input, shape index: {}]   ;;  %s15842_s2 = inlined_call_operand.vmem [shape: f32[1,8], index: 2, kind: input, shape index: {}]   ;;  %s15843_s3 = inlined_call_operand.vmem [shape: f32[1,8], index: 3, kind: input, shape index: {}]   ;;  %s15844_s4 = inlined_call_operand.vmem [shape: f32[72,8], index: 4, kind: input, shape index: {}]   ;;  %s15845_s5 = inlined_call_operand.vmem [shape: f32[1,8], index: 5, kind: input, shape index: {}]   ;;  %s15846_s6 = inlined_call_operand.vmem [shape: f32[1,8], index: 6, kind: input, shape index: {}]   ;;  %s15847_s7 = inlined_call_operand.vmem [shape: f32[2,16,16,8], index: 7, kind: output, shape index: {}]  }
   0x1   :  { %27 = vst.msk [vmem:[#allocation2] sm:$0xff] %vm26_vm0, %v15848_v0  ;;  %28 = vst.msk [vmem:[#allocation2 + $0x8] sm:$0xff] %vm26_vm0, %v15848_v0  ;;  %v114_v1 = vld [vmem:[%s15840_s0] sm:$0xff]  ;;  %v115_v2 = vld [vmem:[%s15840_s0 + $0x8] sm:$0xff]  ;;  %vm691_vm3 = vcmask 64544   ;;  %vm1076_vm4 = vcmask 97344  }
   0x2   :  { %31 = vst.msk [vmem:[#allocation2 + $0x1b0] sm:$0xff] %vm26_vm0, %v15848_v0  ;;  %32 = vst.msk [vmem:[#allocation2 + $0x1b8] sm:$0xff] %vm26_vm0, %v15848_v0  ;;  %v116_v3 = vld [vmem:[%s15840_s0 + $0x10] sm:$0xff]  ;;  %v117_v4 = vld [vmem:[%s15840_s0 + $0x18] sm:$0xff]  ;;  %vm1461_vm5 = vcmask 130144   ;;  %s9809_s18 = smov 16  }
   0x3   :  { %35 = vst.msk [vmem:[#allocation2 + $0x198] sm:$0xff] %vm26_vm0, %v15848_v0  ;;  %36 = vst.msk [vmem:[#allocation2 + $0x1a0] sm:$0xff] %vm26_vm0, %v15848_v0  ;;  %v118_v5 = vld [vmem:[%s15840_s0 + $0x20] sm:$0xff]  ;;  %v119_v6 = vld [vmem:[%s15840_s0 + $0x28] sm:$0xff]  ;;  %vm1846_vm6 = vcmask 162944   ;;  %s9810_s19 = smov 20  }
   0x4   :  { %38 = vst.msk [vmem:[#allocation2 + $0x348] sm:$0xff] %vm26_vm0, %v15848_v0  ;;  %39 = vst.msk [vmem:[#allocation2 + $0x350] sm:$0xff] %vm26_vm0, %v15848_v0  ;;  %v120_v7 = vld [vmem:[%s15840_s0 + $0x30] sm:$0xff]  ;;  %v121_v8 = vld [vmem:[%s15840_s0 + $0x38] sm:$0xff]  ;;  %vm2231_vm7 = vcmask 195744   ;;  %s9811_s20 = smov 24  }
   0x5   :  { %43 = vst.msk [vmem:[#allocation2 + $0x18] sm:$0x1] %vm41_vm1, %v15848_v0  ;;  %44 = vst.msk [vmem:[#allocation2 + $0x30] sm:$0x1] %vm41_vm1, %v15848_v0  ;;  %v122_v9 = vld [vmem:[%s15840_s0 + $0x40] sm:$0xff]  ;;  %v123_v10 = vld [vmem:[%s15840_s0 + $0x48] sm:$0xff] }
   0x6   :  { %45 = vst.msk [vmem:[#allocation2 + $0x48] sm:$0x1] %vm41_vm1, %v15848_v0  ;;  %46 = vst.msk [vmem:[#allocation2 + $0x60] sm:$0x1] %vm41_vm1, %v15848_v0  ;;  %v124_v11 = vld [vmem:[%s15840_s0 + $0x50] sm:$0xff]  ;;  %v125_v12 = vld [vmem:[%s15840_s0 + $0x58] sm:$0xff] }
   0x7   :  { %47 = vst.msk [vmem:[#allocation2 + $0x78] sm:$0x1] %vm41_vm1, %v15848_v0  ;;  %48 = vst.msk [vmem:[#allocation2 + $0x90] sm:$0x1] %vm41_vm1, %v15848_v0  ;;  %v126_v13 = vld [vmem:[%s15840_s0 + $0x60] sm:$0xff]  ;;  %v127_v14 = vld [vmem:[%s15840_s0 + $0x68] sm:$0xff] }
   0x8   :  { %49 = vst.msk [vmem:[#allocation2 + $0xa8] sm:$0x1] %vm41_vm1, %v15848_v0  ;;  %50 = vst.msk [vmem:[#allocation2 + $0xc0] sm:$0x1] %vm41_vm1, %v15848_v0  ;;  %v128_v15 = vld [vmem:[%s15840_s0 + $0x70] sm:$0xff]  ;;  %v129_v16 = vld [vmem:[%s15840_s0 + $0x78] sm:$0xff] }
   0x9   :  { %51 = vst.msk [vmem:[#allocation2 + $0xd8] sm:$0x1] %vm41_vm1, %v15848_v0  ;;  %52 = vst.msk [vmem:[#allocation2 + $0xf0] sm:$0x1] %vm41_vm1, %v15848_v0  ;;  %v130_v17 = vld [vmem:[%s15840_s0 + $0x80] sm:$0xff]  ;;  %v131_v18 = vld [vmem:[%s15840_s0 + $0x88] sm:$0xff] }
   0xa   :  { %53 = vst.msk [vmem:[#allocation2 + $0x108] sm:$0x1] %vm41_vm1, %v15848_v0  ;;  %54 = vst.msk [vmem:[#allocation2 + $0x120] sm:$0x1] %vm41_vm1, %v15848_v0  ;;  %v132_v19 = vld [vmem:[%s15840_s0 + $0x90] sm:$0xff]  ;;  %v133_v20 = vld [vmem:[%s15840_s0 + $0x98] sm:$0xff] }
   0xb   :  { %55 = vst.msk [vmem:[#allocation2 + $0x138] sm:$0x1] %vm41_vm1, %v15848_v0  ;;  %56 = vst.msk [vmem:[#allocation2 + $0x150] sm:$0x1] %vm41_vm1, %v15848_v0  ;;  %v134_v21 = vld [vmem:[%s15840_s0 + $0xa0] sm:$0xff]  ;;  %v135_v23 = vld [vmem:[%s15840_s0 + $0xa8] sm:$0xff] }
   0xc   :  { %57 = vst.msk [vmem:[#allocation2 + $0x168] sm:$0x1] %vm41_vm1, %v15848_v0  ;;  %58 = vst.msk [vmem:[#allocation2 + $0x180] sm:$0x1] %vm41_vm1, %v15848_v0  ;;  %v371_v22 = vld [vmem:[#allocation2 + $0x1] sm:$0xff]  ;;  %v136_v30 = vld [vmem:[%s15840_s0 + $0xb0] sm:$0xff] }
   0xd   :  { %61 = vst.msk [vmem:[#allocation2 + $0x1c8] sm:$0x1] %vm41_vm1, %v15848_v0  ;;  %62 = vst.msk [vmem:[#allocation2 + $0x1e0] sm:$0x1] %vm41_vm1, %v15848_v0  ;;  %499 = vrot.lane.b32.xlu0 %v371_v22, %s9806_s22  ;;  %v137_v31 = vld [vmem:[%s15840_s0 + $0xb8] sm:$0xff]  ;;  %v138_v32 = vld [vmem:[%s15840_s0 + $0xc0] sm:$0xff] }
   0xe   :  { %63 = vst.msk [vmem:[#allocation2 + $0x1f8] sm:$0x1] %vm41_vm1, %v15848_v0  ;;  %64 = vst.msk [vmem:[#allocation2 + $0x210] sm:$0x1] %vm41_vm1, %v15848_v0  ;;  %v139_v33 = vld [vmem:[%s15840_s0 + $0xc8] sm:$0xff]  ;;  %v140_v34 = vld [vmem:[%s15840_s0 + $0xd0] sm:$0xff] }
   0xf   :  { %65 = vst.msk [vmem:[#allocation2 + $0x228] sm:$0x1] %vm41_vm1, %v15848_v0  ;;  %66 = vst.msk [vmem:[#allocation2 + $0x240] sm:$0x1] %vm41_vm1, %v15848_v0  ;;  %v141_v35 = vld [vmem:[%s15840_s0 + $0xd8] sm:$0xff]  ;;  %v142_v36 = vld [vmem:[%s15840_s0 + $0xe0] sm:$0xff] }
  0x10   :  { %67 = vst.msk [vmem:[#allocation2 + $0x258] sm:$0x1] %vm41_vm1, %v15848_v0  ;;  %68 = vst.msk [vmem:[#allocation2 + $0x270] sm:$0x1] %vm41_vm1, %v15848_v0  ;;  %v143_v37 = vld [vmem:[%s15840_s0 + $0xe8] sm:$0xff]  ;;  %v146_v39 = vld [vmem:[%s15840_s0 + $0x100] sm:$0xff] }
  0x11   :  { %69 = vst.msk [vmem:[#allocation2 + $0x288] sm:$0x1] %vm41_vm1, %v15848_v0  ;;  %70 = vst.msk [vmem:[#allocation2 + $0x2a0] sm:$0x1] %vm41_vm1, %v15848_v0  ;;  %v147_v41 = vld [vmem:[%s15840_s0 + $0x108] sm:$0xff]  ;;  %v148_v42 = vld [vmem:[%s15840_s0 + $0x110] sm:$0xff] }
  0x12   :  { %71 = vst.msk [vmem:[#allocation2 + $0x2b8] sm:$0x1] %vm41_vm1, %v15848_v0  ;;  %72 = vst.msk [vmem:[#allocation2 + $0x2d0] sm:$0x1] %vm41_vm1, %v15848_v0  ;;  %v149_v43 = vld [vmem:[%s15840_s0 + $0x118] sm:$0xff]  ;;  %v150_v45 = vld [vmem:[%s15840_s0 + $0x120] sm:$0xff] }
  0x13   :  { %73 = vst.msk [vmem:[#allocation2 + $0x2e8] sm:$0x1] %vm41_vm1, %v15848_v0  ;;  %74 = vst.msk [vmem:[#allocation2 + $0x300] sm:$0x1] %vm41_vm1, %v15848_v0  ;;  %v151_v46 = vld [vmem:[%s15840_s0 + $0x128] sm:$0xff]  ;;  %v152_v47 = vld [vmem:[%s15840_s0 + $0x130] sm:$0xff] }
  0x14   :  { %75 = vst.msk [vmem:[#allocation2 + $0x318] sm:$0x1] %vm41_vm1, %v15848_v0  ;;  %76 = vst.msk [vmem:[#allocation2 + $0x330] sm:$0x1] %vm41_vm1, %v15848_v0  ;;  %v153_v48 = vld [vmem:[%s15840_s0 + $0x138] sm:$0xff]  ;;  %v154_v49 = vld [vmem:[%s15840_s0 + $0x140] sm:$0xff] }
  0x15   :  { %79 = vst.msk [vmem:[#allocation2 + $0x29] sm:$0x1] %vm41_vm1, %v15848_v0  ;;  %80 = vst.msk [vmem:[#allocation2 + $0x41] sm:$0x1] %vm41_vm1, %v15848_v0  ;;  %v155_v50 = vld [vmem:[%s15840_s0 + $0x148] sm:$0xff]  ;;  %v156_v51 = vld [vmem:[%s15840_s0 + $0x150] sm:$0xff] }
  0x16   :  { %81 = vst.msk [vmem:[#allocation2 + $0x59] sm:$0x1] %vm41_vm1, %v15848_v0  ;;  %82 = vst.msk [vmem:[#allocation2 + $0x71] sm:$0x1] %vm41_vm1, %v15848_v0  ;;  %v157_v52 = vld [vmem:[%s15840_s0 + $0x158] sm:$0xff]  ;;  %v158_v53 = vld [vmem:[%s15840_s0 + $0x160] sm:$0xff] }
  0x17   :  { %83 = vst.msk [vmem:[#allocation2 + $0x89] sm:$0x1] %vm41_vm1, %v15848_v0  ;;  %84 = vst.msk [vmem:[#allocation2 + $0xa1] sm:$0x1] %vm41_vm1, %v15848_v0  ;;  %v159_v54 = vld [vmem:[%s15840_s0 + $0x168] sm:$0xff]  ;;  %v160_v57 = vld [vmem:[%s15840_s0 + $0x170] sm:$0xff] }
  0x18   :  { %85 = vst.msk [vmem:[#allocation2 + $0xb9] sm:$0x1] %vm41_vm1, %v15848_v0  ;;  %86 = vst.msk [vmem:[#allocation2 + $0xd1] sm:$0x1] %vm41_vm1, %v15848_v0  ;;  %v161_v58 = vld [vmem:[%s15840_s0 + $0x178] sm:$0xff]  ;;  %v162_v62 = vld [vmem:[%s15840_s0 + $0x180] sm:$0xff] }
  0x19   :  { %87 = vst.msk [vmem:[#allocation2 + $0xe9] sm:$0x1] %vm41_vm1, %v15848_v0  ;;  %88 = vst.msk [vmem:[#allocation2 + $0x101] sm:$0x1] %vm41_vm1, %v15848_v0  ;;  %v163_v63 = vld [vmem:[%s15840_s0 + $0x188] sm:$0xff]  ;;  %vm2617_vm8 = vcmask 228544  }
  0x1a   :  { %89 = vst.msk [vmem:[#allocation2 + $0x119] sm:$0x1] %vm41_vm1, %v15848_v0  ;;  %90 = vst.msk [vmem:[#allocation2 + $0x131] sm:$0x1] %vm41_vm1, %v15848_v0  ;;  %s9812_s21 = smov 28   ;;  %vm3002_vm9 = vcmask 261344  }
  0x1b   :  { %91 = vst.msk [vmem:[#allocation2 + $0x149] sm:$0x1] %vm41_vm1, %v15848_v0  ;;  %92 = vst.msk [vmem:[#allocation2 + $0x161] sm:$0x1] %vm41_vm1, %v15848_v0  ;;  %vm3714_vm10 = vcmask 1043456   ;;  %vm3387_vm11 = vcmask 294144  }
  0x1c   :  { %93 = vst.msk [vmem:[#allocation2 + $0x179] sm:$0x1] %vm41_vm1, %v15848_v0  ;;  %94 = vst.msk [vmem:[#allocation2 + $0x191] sm:$0x1] %vm41_vm1, %v15848_v0  ;;  %vm3521_vm12 = vcmask 293888   ;;  %vm4103_vm13 = vcmask 64512  }
  0x1d   :  { %97 = vst.msk [vmem:[#allocation2 + $0x1d9] sm:$0x1] %vm41_vm1, %v15848_v0  ;;  %98 = vst.msk [vmem:[#allocation2 + $0x1f1] sm:$0x1] %vm41_vm1, %v15848_v0  ;;  %vm4652_vm14 = vcmask 58368   ;;  %vm4664_vm15 = vcmask 57344  }
  0x1e   :  { %99 = vst.msk [vmem:[#allocation2 + $0x209] sm:$0x1] %vm41_vm1, %v15848_v0  ;;  %100 = vst.msk [vmem:[#allocation2 + $0x221] sm:$0x1] %vm41_vm1, %v15848_v0  ;;  %s9816_s23 = smov 56   ;;  %s9817_s30 = smov 64  }
  0x1f   :  { %101 = vst.msk [vmem:[#allocation2 + $0x239] sm:$0x1] %vm41_vm1, %v15848_v0  ;;  %102 = vst.msk [vmem:[#allocation2 + $0x251] sm:$0x1] %vm41_vm1, %v15848_v0 }
  0x20   :  { %103 = vst.msk [vmem:[#allocation2 + $0x269] sm:$0x1] %vm41_vm1, %v15848_v0  ;;  %104 = vst.msk [vmem:[#allocation2 + $0x281] sm:$0x1] %vm41_vm1, %v15848_v0 }
  0x21   :  { %105 = vst.msk [vmem:[#allocation2 + $0x299] sm:$0x1] %vm41_vm1, %v15848_v0  ;;  %106 = vst.msk [vmem:[#allocation2 + $0x2b1] sm:$0x1] %vm41_vm1, %v15848_v0 }
  0x22   :  { %107 = vst.msk [vmem:[#allocation2 + $0x2c9] sm:$0x1] %vm41_vm1, %v15848_v0  ;;  %108 = vst.msk [vmem:[#allocation2 + $0x2e1] sm:$0x1] %vm41_vm1, %v15848_v0 }
  0x23   :  { %109 = vst.msk [vmem:[#allocation2 + $0x2f9] sm:$0x1] %vm41_vm1, %v15848_v0  ;;  %110 = vst.msk [vmem:[#allocation2 + $0x311] sm:$0x1] %vm41_vm1, %v15848_v0 }
  0x24   :  { %111 = vst.msk [vmem:[#allocation2 + $0x329] sm:$0x1] %vm41_vm1, %v15848_v0  ;;  %112 = vst.msk [vmem:[#allocation2 + $0x341] sm:$0x1] %vm41_vm1, %v15848_v0 }
  0x25   :  { %30 = vst.msk [vmem:[#allocation2 + $0x10] sm:$0x3] %vm29_vm2, %v15848_v0  ;;  %33 = vst.msk [vmem:[#allocation2 + $0x1c0] sm:$0x3] %vm29_vm2, %v15848_v0 }
  0x26   :  { %37 = vst.msk [vmem:[#allocation2 + $0x1a8] sm:$0x3] %vm29_vm2, %v15848_v0  ;;  %40 = vst.msk [vmem:[#allocation2 + $0x358] sm:$0x3] %vm29_vm2, %v15848_v0  ;;  %vm6020_vm2 = vcmask 261312  }
  0x27   :  { %42 = vst.msk [vmem:[#allocation2] sm:$0x1] %vm41_vm1, %v15848_v0  ;;  %59 = vst.msk [vmem:[#allocation2 + $0x198] sm:$0x1] %vm41_vm1, %v15848_v0 }
  0x28   :  { %179 = vst.msk [vmem:[#allocation2 + $0x19] sm:$0xff] %vm26_vm0, %v114_v1  ;;  %180 = vst.msk [vmem:[#allocation2 + $0x21] sm:$0xff] %vm26_vm0, %v115_v2  ;;  %v164_v1 = vld [vmem:[%s15840_s0 + $0x190] sm:$0xff]  ;;  %v165_v2 = vld [vmem:[%s15840_s0 + $0x198] sm:$0xff] }
  0x29   :  { %60 = vst.msk [vmem:[#allocation2 + $0x1b0] sm:$0x1] %vm41_vm1, %v15848_v0  ;;  %77 = vst.msk [vmem:[#allocation2 + $0x348] sm:$0x1] %vm41_vm1, %v15848_v0 }
  0x2a   :  { %78 = vst.msk [vmem:[#allocation2 + $0x11] sm:$0x1] %vm41_vm1, %v15848_v0  ;;  %95 = vst.msk [vmem:[#allocation2 + $0x1a9] sm:$0x1] %vm41_vm1, %v15848_v0 }
  0x2b   :  { %96 = vst.msk [vmem:[#allocation2 + $0x1c1] sm:$0x1] %vm41_vm1, %v15848_v0  ;;  %113 = vst.msk [vmem:[#allocation2 + $0x359] sm:$0x1] %vm41_vm1, %v15848_v0  ;;  %vm5635_vm1 = vcmask 195712  }
  0x2c   :  { %181 = vst.msk [vmem:[#allocation2 + $0x31] sm:$0xff] %vm26_vm0, %v116_v3  ;;  %182 = vst.msk [vmem:[#allocation2 + $0x39] sm:$0xff] %vm26_vm0, %v117_v4  ;;  %v372_v25 = vld [vmem:[#allocation2 + $0x9] sm:$0xff]  ;;  %v166_v3 = vld [vmem:[%s15840_s0 + $0x1a0] sm:$0xff] }
  0x2d   :  { %183 = vst.msk [vmem:[#allocation2 + $0x49] sm:$0xff] %vm26_vm0, %v118_v5  ;;  %184 = vst.msk [vmem:[#allocation2 + $0x51] sm:$0xff] %vm26_vm0, %v119_v6  ;;  %501 = vrot.lane.b32.xlu0 %v372_v25, %s9806_s22  ;;  %v167_v4 = vld [vmem:[%s15840_s0 + $0x1a8] sm:$0xff]  ;;  %v168_v5 = vld [vmem:[%s15840_s0 + $0x1b0] sm:$0xff] }
  0x2e   :  { %185 = vst.msk [vmem:[#allocation2 + $0x61] sm:$0xff] %vm26_vm0, %v120_v7  ;;  %186 = vst.msk [vmem:[#allocation2 + $0x69] sm:$0xff] %vm26_vm0, %v121_v8  ;;  %v169_v6 = vld [vmem:[%s15840_s0 + $0x1b8] sm:$0xff]  ;;  %v243_v8 = vld [vmem:[#allocation2] sm:$0xff] }
  0x2f   :  { %187 = vst.msk [vmem:[#allocation2 + $0x79] sm:$0xff] %vm26_vm0, %v122_v9  ;;  %188 = vst.msk [vmem:[#allocation2 + $0x81] sm:$0xff] %vm26_vm0, %v123_v10  ;;  %v373_v24 = vld [vmem:[#allocation2 + $0x19] sm:$0xff]  ;;  %v374_v26 = vld [vmem:[#allocation2 + $0x21] sm:$0xff] }
  0x30   :  { %189 = vst.msk [vmem:[#allocation2 + $0x91] sm:$0xff] %vm26_vm0, %v124_v11  ;;  %190 = vst.msk [vmem:[#allocation2 + $0x99] sm:$0xff] %vm26_vm0, %v125_v12  ;;  %503 = vrot.lane.b32.xlu1 %v373_v24, %s9806_s22  ;;  %v10257_v10 = vld [vmem:[#allocation2 + $0x18] sm:$0xff]  ;;  %v170_v11 = vld [vmem:[%s15840_s0 + $0x1c0] sm:$0xff] }
  0x31   :  { %191 = vst.msk [vmem:[#allocation2 + $0xa9] sm:$0xff] %vm26_vm0, %v126_v13  ;;  %192 = vst.msk [vmem:[#allocation2 + $0xb1] sm:$0xff] %vm26_vm0, %v127_v14  ;;  %v171_v12 = vld [vmem:[%s15840_s0 + $0x1c8] sm:$0xff] }
  0x32   :  { %193 = vst.msk [vmem:[#allocation2 + $0xc1] sm:$0xff] %vm26_vm0, %v128_v15  ;;  %194 = vst.msk [vmem:[#allocation2 + $0xc9] sm:$0xff] %vm26_vm0, %v129_v16  ;;  %v244_v14 = vld [vmem:[#allocation2 + $0x8] sm:$0xff]  ;;  %v10270_v15 = vld [vmem:[#allocation2 + $0x20] sm:$0xff] }
  0x33   :  { %195 = vst.msk [vmem:[#allocation2 + $0xd9] sm:$0xff] %vm26_vm0, %v130_v17  ;;  %196 = vst.msk [vmem:[#allocation2 + $0xe1] sm:$0xff] %vm26_vm0, %v131_v18  ;;  %v375_v27 = vld [vmem:[#allocation2 + $0x31] sm:$0xff]  ;;  %v376_v28 = vld [vmem:[#allocation2 + $0x39] sm:$0xff] }
  0x34   :  { %197 = vst.msk [vmem:[#allocation2 + $0xf1] sm:$0xff] %vm26_vm0, %v132_v19  ;;  %198 = vst.msk [vmem:[#allocation2 + $0xf9] sm:$0xff] %vm26_vm0, %v133_v20  ;;  %505 = vrot.lane.b32.xlu1 %v374_v26, %s9806_s22  ;;  %v377_v29 = vld [vmem:[#allocation2 + $0x49] sm:$0xff]  ;;  %507 = vrot.lane.b32.xlu0 %v375_v27, %s9806_s22  ;;  %v378_v38 = vld [vmem:[#allocation2 + $0x51] sm:$0xff] }
  0x35   :  { %199 = vst.msk [vmem:[#allocation2 + $0x109] sm:$0xff] %vm26_vm0, %v134_v21  ;;  %200 = vst.msk [vmem:[#allocation2 + $0x111] sm:$0xff] %vm26_vm0, %v135_v23  ;;  %v379_v40 = vld [vmem:[#allocation2 + $0x61] sm:$0xff]  ;;  %v380_v44 = vld [vmem:[#allocation2 + $0x69] sm:$0xff] }
  0x36   :  { %201 = vst.msk [vmem:[#allocation2 + $0x121] sm:$0xff] %vm26_vm0, %v136_v30  ;;  %202 = vst.msk [vmem:[#allocation2 + $0x129] sm:$0xff] %vm26_vm0, %v137_v31  ;;  %v381_v55 = vld [vmem:[#allocation2 + $0x79] sm:$0xff]  ;;  %v382_v56 = vld [vmem:[#allocation2 + $0x81] sm:$0xff] }
  0x37   :  { %203 = vst.msk [vmem:[#allocation2 + $0x139] sm:$0xff] %vm26_vm0, %v138_v32  ;;  %204 = vst.msk [vmem:[#allocation2 + $0x141] sm:$0xff] %vm26_vm0, %v139_v33  ;;  %v383_v59 = vld [vmem:[#allocation2 + $0x91] sm:$0xff]  ;;  %v384_v60 = vld [vmem:[#allocation2 + $0x99] sm:$0xff] }
  0x38   :  { %509 = vrot.lane.b32.xlu1 %v376_v28, %s9806_s22  ;;  %205 = vst.msk [vmem:[#allocation2 + $0x151] sm:$0xff] %vm26_vm0, %v140_v34  ;;  %206 = vst.msk [vmem:[#allocation2 + $0x159] sm:$0xff] %vm26_vm0, %v141_v35  ;;  %511 = vrot.lane.b32.xlu0 %v377_v29, %s9806_s22  ;;  %v385_v61 = vld [vmem:[#allocation2 + $0xa9] sm:$0xff]  ;;  %v386_v7 = vld [vmem:[#allocation2 + $0xb1] sm:$0xff] }
  0x39   :  { %207 = vst.msk [vmem:[#allocation2 + $0x169] sm:$0xff] %vm26_vm0, %v142_v36  ;;  %208 = vst.msk [vmem:[#allocation2 + $0x171] sm:$0xff] %vm26_vm0, %v143_v37  ;;  %v387_v9 = vld [vmem:[#allocation2 + $0xc1] sm:$0xff]  ;;  %v388_v13 = vld [vmem:[#allocation2 + $0xc9] sm:$0xff] }
  0x3a   :  { %211 = vst.msk [vmem:[#allocation2 + $0x1c9] sm:$0xff] %vm26_vm0, %v146_v39  ;;  %212 = vst.msk [vmem:[#allocation2 + $0x1d1] sm:$0xff] %vm26_vm0, %v147_v41  ;;  %v172_v16 = vld [vmem:[%s15840_s0 + $0x1d0] sm:$0xff]  ;;  %v173_v17 = vld [vmem:[%s15840_s0 + $0x1d8] sm:$0xff] }
  0x3b   :  { %213 = vst.msk [vmem:[#allocation2 + $0x1e1] sm:$0xff] %vm26_vm0, %v148_v42  ;;  %214 = vst.msk [vmem:[#allocation2 + $0x1e9] sm:$0xff] %vm26_vm0, %v149_v43  ;;  %v10283_v18 = vld [vmem:[#allocation2 + $0x30] sm:$0xff]  ;;  %v10285_v19 = vld [vmem:[#allocation2 + $0x38] sm:$0xff] }
  0x3c   :  { %513 = vrot.lane.b32.xlu1 %v378_v38, %s9806_s22  ;;  %215 = vst.msk [vmem:[#allocation2 + $0x1f9] sm:$0xff] %vm26_vm0, %v150_v45  ;;  %216 = vst.msk [vmem:[#allocation2 + $0x201] sm:$0xff] %vm26_vm0, %v151_v46  ;;  %515 = vrot.lane.b32.xlu0 %v379_v40, %s9806_s22  ;;  %v174_v20 = vld [vmem:[%s15840_s0 + $0x1e0] sm:$0xff]  ;;  %v175_v21 = vld [vmem:[%s15840_s0 + $0x1e8] sm:$0xff] }
  0x3d   :  { %217 = vst.msk [vmem:[#allocation2 + $0x211] sm:$0xff] %vm26_vm0, %v152_v47  ;;  %218 = vst.msk [vmem:[#allocation2 + $0x219] sm:$0xff] %vm26_vm0, %v153_v48  ;;  %v10298_v22 = vld [vmem:[#allocation2 + $0x48] sm:$0xff]  ;;  %v10304_v23 = vld [vmem:[#allocation2 + $0x50] sm:$0xff] }
  0x3e   :  { %219 = vst.msk [vmem:[#allocation2 + $0x229] sm:$0xff] %vm26_vm0, %v154_v49  ;;  %220 = vst.msk [vmem:[#allocation2 + $0x231] sm:$0xff] %vm26_vm0, %v155_v50  ;;  %v389_v24 = vld [vmem:[#allocation2 + $0xd9] sm:$0xff]  ;;  %v390_v25 = vld [vmem:[#allocation2 + $0xe1] sm:$0xff] }
  0x3f   :  { %221 = vst.msk [vmem:[#allocation2 + $0x241] sm:$0xff] %vm26_vm0, %v156_v51  ;;  %222 = vst.msk [vmem:[#allocation2 + $0x249] sm:$0xff] %vm26_vm0, %v157_v52  ;;  %v10310_v26 = vld [vmem:[#allocation2 + $0x60] sm:$0xff]  ;;  %v10314_v27 = vld [vmem:[#allocation2 + $0x68] sm:$0xff] }
  0x40   :  { %223 = vst.msk [vmem:[#allocation2 + $0x259] sm:$0xff] %vm26_vm0, %v158_v53  ;;  %224 = vst.msk [vmem:[#allocation2 + $0x261] sm:$0xff] %vm26_vm0, %v159_v54  ;;  %517 = vrot.lane.b32.xlu1 %v380_v44, %s9806_s22  ;;  %519 = vrot.lane.b32.xlu0 %v381_v55, %s9806_s22  ;;  %v391_v28 = vld [vmem:[#allocation2 + $0xf1] sm:$0xff]  ;;  %v10322_v30 = vld [vmem:[#allocation2 + $0x80] sm:$0xff] }
  0x41   :  { %225 = vst.msk [vmem:[#allocation2 + $0x271] sm:$0xff] %vm26_vm0, %v160_v57  ;;  %226 = vst.msk [vmem:[#allocation2 + $0x279] sm:$0xff] %vm26_vm0, %v161_v58  ;;  %v10320_v29 = vld [vmem:[#allocation2 + $0x78] sm:$0xff]  ;;  %v10328_v32 = vld [vmem:[#allocation2 + $0x90] sm:$0xff] }
  0x42   :  { %227 = vst.msk [vmem:[#allocation2 + $0x289] sm:$0xff] %vm26_vm0, %v162_v62  ;;  %228 = vst.msk [vmem:[#allocation2 + $0x291] sm:$0xff] %vm26_vm0, %v163_v63  ;;  %v392_v31 = vld [vmem:[#allocation2 + $0xf9] sm:$0xff]  ;;  %v10337_v34 = vld [vmem:[#allocation2 + $0xa8] sm:$0xff] }
  0x43   :  { %229 = vst.msk [vmem:[#allocation2 + $0x2a1] sm:$0xff] %vm26_vm0, %v164_v1  ;;  %230 = vst.msk [vmem:[#allocation2 + $0x2a9] sm:$0xff] %vm26_vm0, %v165_v2  ;;  %v10330_v33 = vld [vmem:[#allocation2 + $0x98] sm:$0xff]  ;;  %v393_v35 = vld [vmem:[#allocation2 + $0x109] sm:$0xff] }
  0x44   :  { %521 = vrot.lane.b32.xlu1 %v382_v56, %s9806_s22  ;;  %523 = vrot.lane.b32.xlu0 %v383_v59, %s9806_s22  ;;  %231 = vst.msk [vmem:[#allocation2 + $0x2b9] sm:$0xff] %vm26_vm0, %v166_v3  ;;  %232 = vst.msk [vmem:[#allocation2 + $0x2c1] sm:$0xff] %vm26_vm0, %v167_v4  ;;  %v10342_v36 = vld [vmem:[#allocation2 + $0xb0] sm:$0xff]  ;;  %v10346_v38 = vld [vmem:[#allocation2 + $0xc0] sm:$0xff] }
  0x45   :  { %233 = vst.msk [vmem:[#allocation2 + $0x2d1] sm:$0xff] %vm26_vm0, %v168_v5  ;;  %234 = vst.msk [vmem:[#allocation2 + $0x2d9] sm:$0xff] %vm26_vm0, %v169_v6  ;;  %v394_v37 = vld [vmem:[#allocation2 + $0x111] sm:$0xff]  ;;  %v10348_v39 = vld [vmem:[#allocation2 + $0xc8] sm:$0xff] }
  0x46   :  { %307 = vst.msk [vmem:[#allocation3] sm:$0xff] %vm26_vm0, %v243_v8  ;;  %309 = vst.msk [vmem:[#allocation3 + $0x10] sm:$0xff] %vm26_vm0, %v10257_v10  ;;  %v10354_v40 = vld [vmem:[#allocation2 + $0xd8] sm:$0xff]  ;;  %v10356_v41 = vld [vmem:[#allocation2 + $0xe0] sm:$0xff] }
  0x47   :  { %235 = vst.msk [vmem:[#allocation2 + $0x2e9] sm:$0xff] %vm26_vm0, %v170_v11  ;;  %236 = vst.msk [vmem:[#allocation2 + $0x2f1] sm:$0xff] %vm26_vm0, %v171_v12  ;;  %v10363_v42 = vld [vmem:[#allocation2 + $0xf0] sm:$0xff]  ;;  %v395_v43 = vld [vmem:[#allocation2 + $0x121] sm:$0xff] }
  0x48   :  { %525 = vrot.lane.b32.xlu1 %v384_v60, %s9806_s22  ;;  %527 = vrot.lane.b32.xlu0 %v385_v61, %s9806_s22  ;;  %308 = vst.msk [vmem:[#allocation3 + $0x8] sm:$0xff] %vm26_vm0, %v244_v14  ;;  %310 = vst.msk [vmem:[#allocation3 + $0x18] sm:$0xff] %vm26_vm0, %v10270_v15  ;;  %v10368_v44 = vld [vmem:[#allocation2 + $0xf8] sm:$0xff]  ;;  %v396_v45 = vld [vmem:[#allocation2 + $0x129] sm:$0xff] }
  0x49   :  { %237 = vst.msk [vmem:[#allocation2 + $0x301] sm:$0xff] %vm26_vm0, %v172_v16  ;;  %238 = vst.msk [vmem:[#allocation2 + $0x309] sm:$0xff] %vm26_vm0, %v173_v17  ;;  %v10372_v46 = vld [vmem:[#allocation2 + $0x108] sm:$0xff]  ;;  %v10374_v47 = vld [vmem:[#allocation2 + $0x110] sm:$0xff] }
  0x4a   :  { %311 = vst.msk [vmem:[#allocation3 + $0x20] sm:$0xff] %vm26_vm0, %v10283_v18  ;;  %312 = vst.msk [vmem:[#allocation3 + $0x28] sm:$0xff] %vm26_vm0, %v10285_v19  ;;  %v10380_v48 = vld [vmem:[#allocation2 + $0x120] sm:$0xff]  ;;  %v10382_v49 = vld [vmem:[#allocation2 + $0x128] sm:$0xff] }
  0x4b   :  { %239 = vst.msk [vmem:[#allocation2 + $0x319] sm:$0xff] %vm26_vm0, %v174_v20  ;;  %240 = vst.msk [vmem:[#allocation2 + $0x321] sm:$0xff] %vm26_vm0, %v175_v21  ;;  %v10389_v50 = vld [vmem:[#allocation2 + $0x138] sm:$0xff]  ;;  %v10394_v52 = vld [vmem:[#allocation2 + $0x140] sm:$0xff] }
  0x4c   :  { %529 = vrot.lane.b32.xlu1 %v386_v7, %s9806_s22  ;;  %313 = vst.msk [vmem:[#allocation3 + $0x30] sm:$0xff] %vm26_vm0, %v10298_v22  ;;  %531 = vrot.lane.b32.xlu0 %v387_v9, %s9806_s22  ;;  %314 = vst.msk [vmem:[#allocation3 + $0x38] sm:$0xff] %vm26_vm0, %v10304_v23  ;;  %v397_v51 = vld [vmem:[#allocation2 + $0x139] sm:$0xff]  ;;  %v398_v53 = vld [vmem:[#allocation2 + $0x141] sm:$0xff] }
  0x4d   :  { %315 = vst.msk [vmem:[#allocation3 + $0x40] sm:$0xff] %vm26_vm0, %v10310_v26  ;;  %316 = vst.msk [vmem:[#allocation3 + $0x48] sm:$0xff] %vm26_vm0, %v10314_v27  ;;  %v10398_v54 = vld [vmem:[#allocation2 + $0x150] sm:$0xff]  ;;  %v10400_v55 = vld [vmem:[#allocation2 + $0x158] sm:$0xff] }
  0x4e   :  { %317 = vst.msk [vmem:[#allocation3 + $0x50] sm:$0xff] %vm26_vm0, %v10320_v29  ;;  %318 = vst.msk [vmem:[#allocation3 + $0x58] sm:$0xff] %vm26_vm0, %v10322_v30  ;;  %v10406_v56 = vld [vmem:[#allocation2 + $0x168] sm:$0xff]  ;;  %v10408_v57 = vld [vmem:[#allocation2 + $0x170] sm:$0xff] }
  0x4f   :  { %319 = vst.msk [vmem:[#allocation3 + $0x60] sm:$0xff] %vm26_vm0, %v10328_v32  ;;  %320 = vst.msk [vmem:[#allocation3 + $0x68] sm:$0xff] %vm26_vm0, %v10330_v33  ;;  %v275_v58 = vld [vmem:[#allocation2 + $0x1b0] sm:$0xff]  ;;  %v276_v60 = vld [vmem:[#allocation2 + $0x1b8] sm:$0xff] }
  0x50   :  { %533 = vrot.lane.b32.xlu1 %v388_v13, %s9806_s22  ;;  %535 = vrot.lane.b32.xlu0 %v389_v24, %s9806_s22  ;;  %321 = vst.msk [vmem:[#allocation3 + $0x70] sm:$0xff] %vm26_vm0, %v10337_v34  ;;  %322 = vst.msk [vmem:[#allocation3 + $0x78] sm:$0xff] %vm26_vm0, %v10342_v36  ;;  %v399_v59 = vld [vmem:[#allocation2 + $0x151] sm:$0xff]  ;;  %v400_v61 = vld [vmem:[#allocation2 + $0x159] sm:$0xff] }
  0x51   :  { %323 = vst.msk [vmem:[#allocation3 + $0x80] sm:$0xff] %vm26_vm0, %v10346_v38  ;;  %324 = vst.msk [vmem:[#allocation3 + $0x88] sm:$0xff] %vm26_vm0, %v10348_v39  ;;  %v10418_v62 = vld [vmem:[#allocation2 + $0x1c8] sm:$0xff]  ;;  %v10420_v63 = vld [vmem:[#allocation2 + $0x1d0] sm:$0xff] }
  0x52   :  { %325 = vst.msk [vmem:[#allocation3 + $0x90] sm:$0xff] %vm26_vm0, %v10354_v40  ;;  %326 = vst.msk [vmem:[#allocation3 + $0x98] sm:$0xff] %vm26_vm0, %v10356_v41  ;;  %v401_v1 = vld [vmem:[#allocation2 + $0x169] sm:$0xff]  ;;  %v10428_v2 = vld [vmem:[#allocation2 + $0x1e0] sm:$0xff] }
  0x53   :  { %327 = vst.msk [vmem:[#allocation3 + $0xa0] sm:$0xff] %vm26_vm0, %v10363_v42  ;;  %328 = vst.msk [vmem:[#allocation3 + $0xa8] sm:$0xff] %vm26_vm0, %v10368_v44  ;;  %v402_v3 = vld [vmem:[#allocation2 + $0x171] sm:$0xff]  ;;  %v10432_v4 = vld [vmem:[#allocation2 + $0x1e8] sm:$0xff] }
  0x54   :  { %537 = vrot.lane.b32.xlu1 %v390_v25, %s9806_s22  ;;  %539 = vrot.lane.b32.xlu0 %v391_v28, %s9806_s22  ;;  %329 = vst.msk [vmem:[#allocation3 + $0xb0] sm:$0xff] %vm26_vm0, %v10372_v46  ;;  %330 = vst.msk [vmem:[#allocation3 + $0xb8] sm:$0xff] %vm26_vm0, %v10374_v47  ;;  %v403_v5 = vld [vmem:[#allocation2 + $0x1b1] sm:$0xff]  ;;  %v404_v7 = vld [vmem:[#allocation2 + $0x1b9] sm:$0xff] }
  0x55   :  { %331 = vst.msk [vmem:[#allocation3 + $0xc0] sm:$0xff] %vm26_vm0, %v10380_v48  ;;  %332 = vst.msk [vmem:[#allocation3 + $0xc8] sm:$0xff] %vm26_vm0, %v10382_v49  ;;  %v10438_v6 = vld [vmem:[#allocation2 + $0x1f8] sm:$0xff]  ;;  %v10442_v8 = vld [vmem:[#allocation2 + $0x200] sm:$0xff] }
  0x56   :  { %333 = vst.msk [vmem:[#allocation3 + $0xd0] sm:$0xff] %vm26_vm0, %v10389_v50  ;;  %334 = vst.msk [vmem:[#allocation3 + $0xd8] sm:$0xff] %vm26_vm0, %v10394_v52  ;;  %v405_v9 = vld [vmem:[#allocation2 + $0x1c9] sm:$0xff]  ;;  %v406_v12 = vld [vmem:[#allocation2 + $0x1d1] sm:$0xff] }
  0x57   :  { %335 = vst.msk [vmem:[#allocation3 + $0xe0] sm:$0xff] %vm26_vm0, %v10398_v54  ;;  %336 = vst.msk [vmem:[#allocation3 + $0xe8] sm:$0xff] %vm26_vm0, %v10400_v55  ;;  %v10448_v11 = vld [vmem:[#allocation2 + $0x210] sm:$0xff]  ;;  %v10452_v13 = vld [vmem:[#allocation2 + $0x218] sm:$0xff] }
  0x58   :  { %541 = vrot.lane.b32.xlu1 %v392_v31, %s9806_s22  ;;  %543 = vrot.lane.b32.xlu0 %v393_v35, %s9806_s22  ;;  %337 = vst.msk [vmem:[#allocation3 + $0xf0] sm:$0xff] %vm26_vm0, %v10406_v56  ;;  %338 = vst.msk [vmem:[#allocation3 + $0xf8] sm:$0xff] %vm26_vm0, %v10408_v57  ;;  %v407_v14 = vld [vmem:[#allocation2 + $0x1e1] sm:$0xff]  ;;  %v408_v17 = vld [vmem:[#allocation2 + $0x1e9] sm:$0xff] }
  0x59   :  { %339 = vst.msk [vmem:[#allocation3 + $0x100] sm:$0xff] %vm26_vm0, %v275_v58  ;;  %340 = vst.msk [vmem:[#allocation3 + $0x108] sm:$0xff] %vm26_vm0, %v276_v60  ;;  %v10458_v16 = vld [vmem:[#allocation2 + $0x228] sm:$0xff]  ;;  %v10462_v20 = vld [vmem:[#allocation2 + $0x230] sm:$0xff] }
  0x5a   :  { %341 = vst.msk [vmem:[#allocation3 + $0x110] sm:$0xff] %vm26_vm0, %v10418_v62  ;;  %342 = vst.msk [vmem:[#allocation3 + $0x118] sm:$0xff] %vm26_vm0, %v10420_v63  ;;  %v409_v21 = vld [vmem:[#allocation2 + $0x1f9] sm:$0xff]  ;;  %v410_v25 = vld [vmem:[#allocation2 + $0x201] sm:$0xff] }
  0x5b   :  { %343 = vst.msk [vmem:[#allocation3 + $0x120] sm:$0xff] %vm26_vm0, %v10428_v2  ;;  %344 = vst.msk [vmem:[#allocation3 + $0x128] sm:$0xff] %vm26_vm0, %v10432_v4  ;;  %v10468_v24 = vld [vmem:[#allocation2 + $0x240] sm:$0xff]  ;;  %v10472_v28 = vld [vmem:[#allocation2 + $0x248] sm:$0xff] }
  0x5c   :  { %545 = vrot.lane.b32.xlu1 %v394_v37, %s9806_s22  ;;  %547 = vrot.lane.b32.xlu0 %v395_v43, %s9806_s22  ;;  %345 = vst.msk [vmem:[#allocation3 + $0x130] sm:$0xff] %vm26_vm0, %v10438_v6  ;;  %346 = vst.msk [vmem:[#allocation3 + $0x138] sm:$0xff] %vm26_vm0, %v10442_v8  ;;  %v411_v31 = vld [vmem:[#allocation2 + $0x211] sm:$0xff]  ;;  %v412_v37 = vld [vmem:[#allocation2 + $0x219] sm:$0xff] }
  0x5d   :  { %347 = vst.msk [vmem:[#allocation3 + $0x140] sm:$0xff] %vm26_vm0, %v10448_v11  ;;  %348 = vst.msk [vmem:[#allocation3 + $0x148] sm:$0xff] %vm26_vm0, %v10452_v13  ;;  %v10478_v35 = vld [vmem:[#allocation2 + $0x258] sm:$0xff]  ;;  %v10482_v43 = vld [vmem:[#allocation2 + $0x260] sm:$0xff] }
  0x5e   :  { %349 = vst.msk [vmem:[#allocation3 + $0x150] sm:$0xff] %vm26_vm0, %v10458_v16  ;;  %350 = vst.msk [vmem:[#allocation3 + $0x158] sm:$0xff] %vm26_vm0, %v10462_v20  ;;  %v10492_v58 = vld [vmem:[#allocation2 + $0x278] sm:$0xff]  ;;  %v10498_v60 = vld [vmem:[#allocation2 + $0x288] sm:$0xff] }
  0x5f   :  { %351 = vst.msk [vmem:[#allocation3 + $0x160] sm:$0xff] %vm26_vm0, %v10468_v24  ;;  %352 = vst.msk [vmem:[#allocation3 + $0x168] sm:$0xff] %vm26_vm0, %v10472_v28  ;;  %v10562_v0 = vld [vmem:[#allocation2 + $0x320] sm:$0xff] }
  0x60   :  { %549 = vrot.lane.b32.xlu1 %v396_v45, %s9806_s22  ;;  %551 = vrot.lane.b32.xlu0 %v397_v51, %s9806_s22  ;;  %353 = vst.msk [vmem:[#allocation3 + $0x170] sm:$0xff] %vm26_vm0, %v10478_v35  ;;  %354 = vst.msk [vmem:[#allocation3 + $0x178] sm:$0xff] %vm26_vm0, %v10482_v43  ;;  %v413_v45 = vld [vmem:[#allocation2 + $0x229] sm:$0xff] }
  0x61   :  { %v10488_v51 = vld [vmem:[#allocation2 + $0x270] sm:$0xff]  ;;  %356 = vst.msk [vmem:[#allocation3 + $0x188] sm:$0xff] %vm26_vm0, %v10492_v58  ;;  %357 = vst.msk [vmem:[#allocation3 + $0x190] sm:$0xff] %vm26_vm0, %v10498_v60 }
  0x62   :  { %355 = vst.msk [vmem:[#allocation3 + $0x180] sm:$0xff] %vm26_vm0, %v10488_v51  ;;  %15917 = vst [vmem:[#allocation11_spill] sm:$0xff] %v10562_v0 }
  0x63   :  { %370 = vst.msk [vmem:[#allocation3 + $0x1f8] sm:$0xff] %vm26_vm0, %v10562_v0  ;;  %v432_v0 = vld [vmem:[#allocation2 + $0x309] sm:$0xff] }
  0x64   :  { %553 = vrot.lane.b32.xlu1 %v398_v53, %s9806_s22  ;;  %555 = vrot.lane.b32.xlu0 %v399_v59, %s9806_s22  ;;  %v414_v53 = vld [vmem:[#allocation2 + $0x231] sm:$0xff]  ;;  %v415_v59 = vld [vmem:[#allocation2 + $0x241] sm:$0xff] }
  0x68   :  { %557 = vrot.lane.b32.xlu1 %v400_v61, %s9806_s22  ;;  %559 = vrot.lane.b32.xlu0 %v401_v1, %s9806_s22  ;;  %v416_v61 = vld [vmem:[#allocation2 + $0x249] sm:$0xff] }
  0x69   :  { %v10502_v1 = vld [vmem:[#allocation2 + $0x290] sm:$0xff] }
  0x6a   :  { %358 = vst.msk [vmem:[#allocation3 + $0x198] sm:$0xff] %vm26_vm0, %v10502_v1 }
  0x6c   :  { %561 = vrot.lane.b32.xlu1 %v402_v3, %s9806_s22  ;;  %563 = vrot.lane.b32.xlu0 %v403_v5, %s9806_s22  ;;  %v417_v3 = vld [vmem:[#allocation2 + $0x259] sm:$0xff] }
  0x6d   :  { %v10508_v5 = vld [vmem:[#allocation2 + $0x2a0] sm:$0xff] }
  0x6e   :  { %359 = vst.msk [vmem:[#allocation3 + $0x1a0] sm:$0xff] %vm26_vm0, %v10508_v5 }
  0x70   :  { %565 = vrot.lane.b32.xlu1 %v404_v7, %s9806_s22  ;;  %567 = vrot.lane.b32.xlu0 %v405_v9, %s9806_s22  ;;  %v418_v7 = vld [vmem:[#allocation2 + $0x261] sm:$0xff] }
  0x71   :  { %v10512_v9 = vld [vmem:[#allocation2 + $0x2a8] sm:$0xff] }
  0x72   :  { %360 = vst.msk [vmem:[#allocation3 + $0x1a8] sm:$0xff] %vm26_vm0, %v10512_v9 }
  0x74   :  { %569 = vrot.lane.b32.xlu1 %v406_v12, %s9806_s22  ;;  %571 = vrot.lane.b32.xlu0 %v407_v14, %s9806_s22  ;;  %v419_v12 = vld [vmem:[#allocation2 + $0x271] sm:$0xff] }
  0x75   :  { %v10518_v14 = vld [vmem:[#allocation2 + $0x2b8] sm:$0xff] }
  0x76   :  { %361 = vst.msk [vmem:[#allocation3 + $0x1b0] sm:$0xff] %vm26_vm0, %v10518_v14 }
  0x78   :  { %573 = vrot.lane.b32.xlu1 %v408_v17, %s9806_s22  ;;  %575 = vrot.lane.b32.xlu0 %v409_v21, %s9806_s22  ;;  %v420_v17 = vld [vmem:[#allocation2 + $0x279] sm:$0xff] }
  0x79   :  { %v10522_v21 = vld [vmem:[#allocation2 + $0x2c0] sm:$0xff] }
  0x7a   :  { %362 = vst.msk [vmem:[#allocation3 + $0x1b8] sm:$0xff] %vm26_vm0, %v10522_v21 }
  0x7c   :  { %577 = vrot.lane.b32.xlu1 %v410_v25, %s9806_s22  ;;  %579 = vrot.lane.b32.xlu0 %v411_v31, %s9806_s22  ;;  %v421_v25 = vld [vmem:[#allocation2 + $0x289] sm:$0xff] }
  0x7d   :  { %v10528_v31 = vld [vmem:[#allocation2 + $0x2d0] sm:$0xff] }
  0x7e   :  { %363 = vst.msk [vmem:[#allocation3 + $0x1c0] sm:$0xff] %vm26_vm0, %v10528_v31 }
  0x80   :  { %581 = vrot.lane.b32.xlu1 %v412_v37, %s9806_s22  ;;  %583 = vrot.lane.b32.xlu0 %v413_v45, %s9806_s22  ;;  %v422_v37 = vld [vmem:[#allocation2 + $0x291] sm:$0xff] }
  0x81   :  { %v10532_v45 = vld [vmem:[#allocation2 + $0x2d8] sm:$0xff] }
  0x82   :  { %364 = vst.msk [vmem:[#allocation3 + $0x1c8] sm:$0xff] %vm26_vm0, %v10532_v45 }
  0x84   :  { %585 = vrot.lane.b32.xlu1 %v414_v53, %s9806_s22  ;;  %587 = vrot.lane.b32.xlu0 %v415_v59, %s9806_s22  ;;  %v423_v53 = vld [vmem:[#allocation2 + $0x2a1] sm:$0xff] }
  0x85   :  { %v10538_v59 = vld [vmem:[#allocation2 + $0x2e8] sm:$0xff] }
  0x86   :  { %15912 = vst [vmem:[#allocation6_spill] sm:$0xff] %v10538_v59  ;;  %365 = vst.msk [vmem:[#allocation3 + $0x1d0] sm:$0xff] %vm26_vm0, %v10538_v59  ;;  %v434_v59 = vld [vmem:[#allocation2 + $0x321] sm:$0xff] }
  0x88   :  { %589 = vrot.lane.b32.xlu1 %v416_v61, %s9806_s22  ;;  %591 = vrot.lane.b32.xlu0 %v417_v3, %s9806_s22  ;;  %v424_v61 = vld [vmem:[#allocation2 + $0x2a9] sm:$0xff] }
  0x89   :  { %v10542_v3 = vld [vmem:[#allocation2 + $0x2f0] sm:$0xff] }
  0x8a   :  { %15913 = vst [vmem:[#allocation7_spill] sm:$0xff] %v10542_v3  ;;  %366 = vst.msk [vmem:[#allocation3 + $0x1d8] sm:$0xff] %vm26_vm0, %v10542_v3 }
  0x8c   :  { %593 = vrot.lane.b32.xlu1 %v418_v7, %s9806_s22  ;;  %595 = vrot.lane.b32.xlu0 %v419_v12, %s9806_s22  ;;  %v425_v7 = vld [vmem:[#allocation2 + $0x2b9] sm:$0xff] }
  0x8d   :  { %v10548_v12 = vld [vmem:[#allocation2 + $0x300] sm:$0xff] }
  0x8e   :  { %15914 = vst [vmem:[#allocation8_spill] sm:$0xff] %v10548_v12  ;;  %367 = vst.msk [vmem:[#allocation3 + $0x1e0] sm:$0xff] %vm26_vm0, %v10548_v12 }
  0x90   :  { %597 = vrot.lane.b32.xlu1 %v420_v17, %s9806_s22  ;;  %599 = vrot.lane.b32.xlu0 %v421_v25, %s9806_s22  ;;  %v426_v17 = vld [vmem:[#allocation2 + $0x2c1] sm:$0xff] }
  0x91   :  { %v10552_v25 = vld [vmem:[#allocation2 + $0x308] sm:$0xff] }
  0x92   :  { %15915 = vst [vmem:[#allocation9_spill] sm:$0xff] %v10552_v25  ;;  %368 = vst.msk [vmem:[#allocation3 + $0x1e8] sm:$0xff] %vm26_vm0, %v10552_v25  ;;  %v500_v25 = vpop.permute.xlu0 %499 }
  0x93   :  { %692 = vst.msk [vmem:[#allocation3] sm:$0xff] %vm691_vm3, %v500_v25  ;;  %v433_v25 = vld [vmem:[#allocation2 + $0x319] sm:$0xff] }
  0x94   :  { %601 = vrot.lane.b32.xlu1 %v422_v37, %s9806_s22  ;;  %603 = vrot.lane.b32.xlu0 %v423_v53, %s9806_s22  ;;  %v427_v37 = vld [vmem:[#allocation2 + $0x2d1] sm:$0xff] }
  0x95   :  { %v10558_v53 = vld [vmem:[#allocation2 + $0x318] sm:$0xff] }
  0x96   :  { %15916 = vst [vmem:[#allocation10_spill] sm:$0xff] %v10558_v53  ;;  %369 = vst.msk [vmem:[#allocation3 + $0x1f0] sm:$0xff] %vm26_vm0, %v10558_v53  ;;  %v431_v53 = vld [vmem:[#allocation2 + $0x301] sm:$0xff] }
  0x98   :  { %605 = vrot.lane.b32.xlu1 %v424_v61, %s9806_s22  ;;  %607 = vrot.lane.b32.xlu0 %v425_v7, %s9806_s22  ;;  %v428_v61 = vld [vmem:[#allocation2 + $0x2d9] sm:$0xff]  ;;  %v429_v7 = vld [vmem:[#allocation2 + $0x2e9] sm:$0xff] }
  0x9c   :  { %609 = vrot.lane.b32.xlu1 %v426_v17, %s9806_s22  ;;  %611 = vrot.lane.b32.xlu0 %v427_v37, %s9806_s22  ;;  %v430_v17 = vld [vmem:[#allocation2 + $0x2f1] sm:$0xff] }
  0x9f   :  { %v502_v3 = vpop.permute.xlu0 %501 }
  0xa0   :  { %613 = vrot.lane.b32.xlu1 %v428_v61, %s9806_s22  ;;  %615 = vrot.lane.b32.xlu0 %v429_v7, %s9806_s22  ;;  %693 = vst.msk [vmem:[#allocation3 + $0x8] sm:$0xff] %vm691_vm3, %v502_v3  ;;  %v756_v3 = vld [vmem:[#allocation2 + $0x2] sm:$0xff] }
  0xa2   :  { %v504_v12 = vpop.permute.xlu1 %503 }
  0xa3   :  { %694 = vst.msk [vmem:[#allocation3 + $0x10] sm:$0xff] %vm691_vm3, %v504_v12 }
  0xa4   :  { %617 = vrot.lane.b32.xlu1 %v430_v17, %s9806_s22  ;;  %619 = vrot.lane.b32.xlu0 %v431_v53, %s9806_s22  ;;  %v757_v17 = vld [vmem:[#allocation2 + $0xa] sm:$0xff] }
  0xa6   :  { %v506_v37 = vpop.permute.xlu1 %505  ;;  %v508_v61 = vpop.permute.xlu0 %507 }
  0xa7   :  { %695 = vst.msk [vmem:[#allocation3 + $0x18] sm:$0xff] %vm691_vm3, %v506_v37  ;;  %696 = vst.msk [vmem:[#allocation3 + $0x20] sm:$0xff] %vm691_vm3, %v508_v61  ;;  %v759_v61 = vld [vmem:[#allocation2 + $0x22] sm:$0xff] }
  0xa8   :  { %621 = vrot.lane.b32.xlu1 %v432_v0, %s9806_s22  ;;  %623 = vrot.lane.b32.xlu0 %v433_v25, %s9806_s22  ;;  %v758_v0 = vld [vmem:[#allocation2 + $0x1a] sm:$0xff] }
  0xaa   :  { %v510_v12 = vpop.permute.xlu1 %509  ;;  %v512_v7 = vpop.permute.xlu0 %511 }
  0xab   :  { %697 = vst.msk [vmem:[#allocation3 + $0x28] sm:$0xff] %vm691_vm3, %v510_v12  ;;  %698 = vst.msk [vmem:[#allocation3 + $0x30] sm:$0xff] %vm691_vm3, %v512_v7  ;;  %v761_v7 = vld [vmem:[#allocation2 + $0x3a] sm:$0xff] }
  0xac   :  { %625 = vrot.lane.b32.xlu1 %v434_v59, %s9806_s22  ;;  %884 = vrot.lane.b32.xlu0 %v756_v3, %s9807_s10  ;;  %v760_v59 = vld [vmem:[#allocation2 + $0x32] sm:$0xff] }
  0xae   :  { %v514_v53 = vpop.permute.xlu1 %513  ;;  %v516_v37 = vpop.permute.xlu0 %515 }
  0xaf   :  { %699 = vst.msk [vmem:[#allocation3 + $0x38] sm:$0xff] %vm691_vm3, %v514_v53  ;;  %700 = vst.msk [vmem:[#allocation3 + $0x40] sm:$0xff] %vm691_vm3, %v516_v37  ;;  %v763_v37 = vld [vmem:[#allocation2 + $0x52] sm:$0xff] }
  0xb0   :  { %886 = vrot.lane.b32.xlu1 %v757_v17, %s9807_s10  ;;  %888 = vrot.lane.b32.xlu0 %v758_v0, %s9807_s10  ;;  %v762_v17 = vld [vmem:[#allocation2 + $0x4a] sm:$0xff] }
  0xb2   :  { %v518_v25 = vpop.permute.xlu1 %517  ;;  %v520_v12 = vpop.permute.xlu0 %519 }
  0xb3   :  { %701 = vst.msk [vmem:[#allocation3 + $0x48] sm:$0xff] %vm691_vm3, %v518_v25  ;;  %702 = vst.msk [vmem:[#allocation3 + $0x50] sm:$0xff] %vm691_vm3, %v520_v12  ;;  %v765_v12 = vld [vmem:[#allocation2 + $0x6a] sm:$0xff] }
  0xb4   :  { %890 = vrot.lane.b32.xlu1 %v759_v61, %s9807_s10  ;;  %892 = vrot.lane.b32.xlu0 %v760_v59, %s9807_s10  ;;  %v764_v61 = vld [vmem:[#allocation2 + $0x62] sm:$0xff] }
  0xb6   :  { %v522_v3 = vpop.permute.xlu1 %521  ;;  %v524_v53 = vpop.permute.xlu0 %523 }
  0xb7   :  { %703 = vst.msk [vmem:[#allocation3 + $0x58] sm:$0xff] %vm691_vm3, %v522_v3  ;;  %704 = vst.msk [vmem:[#allocation3 + $0x60] sm:$0xff] %vm691_vm3, %v524_v53  ;;  %v767_v53 = vld [vmem:[#allocation2 + $0x82] sm:$0xff] }
  0xb8   :  { %894 = vrot.lane.b32.xlu1 %v761_v7, %s9807_s10  ;;  %896 = vrot.lane.b32.xlu0 %v762_v17, %s9807_s10  ;;  %v766_v7 = vld [vmem:[#allocation2 + $0x7a] sm:$0xff] }
  0xba   :  { %v526_v0 = vpop.permute.xlu1 %525  ;;  %v528_v25 = vpop.permute.xlu0 %527 }
  0xbb   :  { %705 = vst.msk [vmem:[#allocation3 + $0x68] sm:$0xff] %vm691_vm3, %v526_v0  ;;  %706 = vst.msk [vmem:[#allocation3 + $0x70] sm:$0xff] %vm691_vm3, %v528_v25  ;;  %v769_v25 = vld [vmem:[#allocation2 + $0x9a] sm:$0xff] }
  0xbc   :  { %898 = vrot.lane.b32.xlu1 %v763_v37, %s9807_s10  ;;  %900 = vrot.lane.b32.xlu0 %v764_v61, %s9807_s10  ;;  %v768_v37 = vld [vmem:[#allocation2 + $0x92] sm:$0xff] }
  0xbe   :  { %v530_v59 = vpop.permute.xlu1 %529  ;;  %v532_v3 = vpop.permute.xlu0 %531 }
  0xbf   :  { %707 = vst.msk [vmem:[#allocation3 + $0x78] sm:$0xff] %vm691_vm3, %v530_v59  ;;  %708 = vst.msk [vmem:[#allocation3 + $0x80] sm:$0xff] %vm691_vm3, %v532_v3  ;;  %v771_v3 = vld [vmem:[#allocation2 + $0xb2] sm:$0xff] }
  0xc0   :  { %902 = vrot.lane.b32.xlu1 %v765_v12, %s9807_s10  ;;  %904 = vrot.lane.b32.xlu0 %v766_v7, %s9807_s10  ;;  %v770_v12 = vld [vmem:[#allocation2 + $0xaa] sm:$0xff] }
  0xc2   :  { %v534_v17 = vpop.permute.xlu1 %533  ;;  %v536_v0 = vpop.permute.xlu0 %535 }
  0xc3   :  { %709 = vst.msk [vmem:[#allocation3 + $0x88] sm:$0xff] %vm691_vm3, %v534_v17  ;;  %710 = vst.msk [vmem:[#allocation3 + $0x90] sm:$0xff] %vm691_vm3, %v536_v0  ;;  %v773_v0 = vld [vmem:[#allocation2 + $0xca] sm:$0xff] }
  0xc4   :  { %906 = vrot.lane.b32.xlu1 %v767_v53, %s9807_s10  ;;  %908 = vrot.lane.b32.xlu0 %v768_v37, %s9807_s10  ;;  %v772_v53 = vld [vmem:[#allocation2 + $0xc2] sm:$0xff] }
  0xc6   :  { %v538_v61 = vpop.permute.xlu1 %537  ;;  %v540_v59 = vpop.permute.xlu0 %539 }
  0xc7   :  { %711 = vst.msk [vmem:[#allocation3 + $0x98] sm:$0xff] %vm691_vm3, %v538_v61  ;;  %712 = vst.msk [vmem:[#allocation3 + $0xa0] sm:$0xff] %vm691_vm3, %v540_v59  ;;  %v775_v59 = vld [vmem:[#allocation2 + $0xe2] sm:$0xff] }
  0xc8   :  { %910 = vrot.lane.b32.xlu1 %v769_v25, %s9807_s10  ;;  %912 = vrot.lane.b32.xlu0 %v770_v12, %s9807_s10  ;;  %v774_v25 = vld [vmem:[#allocation2 + $0xda] sm:$0xff] }
  0xca   :  { %v542_v7 = vpop.permute.xlu1 %541  ;;  %v544_v17 = vpop.permute.xlu0 %543 }
  0xcb   :  { %713 = vst.msk [vmem:[#allocation3 + $0xa8] sm:$0xff] %vm691_vm3, %v542_v7  ;;  %714 = vst.msk [vmem:[#allocation3 + $0xb0] sm:$0xff] %vm691_vm3, %v544_v17  ;;  %v777_v17 = vld [vmem:[#allocation2 + $0xfa] sm:$0xff] }
  0xcc   :  { %914 = vrot.lane.b32.xlu1 %v771_v3, %s9807_s10  ;;  %916 = vrot.lane.b32.xlu0 %v772_v53, %s9807_s10  ;;  %v776_v3 = vld [vmem:[#allocation2 + $0xf2] sm:$0xff] }
  0xce   :  { %v546_v37 = vpop.permute.xlu1 %545  ;;  %v548_v61 = vpop.permute.xlu0 %547 }
  0xcf   :  { %715 = vst.msk [vmem:[#allocation3 + $0xb8] sm:$0xff] %vm691_vm3, %v546_v37  ;;  %716 = vst.msk [vmem:[#allocation3 + $0xc0] sm:$0xff] %vm691_vm3, %v548_v61  ;;  %v779_v61 = vld [vmem:[#allocation2 + $0x112] sm:$0xff] }
  0xd0   :  { %918 = vrot.lane.b32.xlu1 %v773_v0, %s9807_s10  ;;  %920 = vrot.lane.b32.xlu0 %v774_v25, %s9807_s10  ;;  %v778_v0 = vld [vmem:[#allocation2 + $0x10a] sm:$0xff] }
  0xd2   :  { %v550_v12 = vpop.permute.xlu1 %549  ;;  %v552_v7 = vpop.permute.xlu0 %551 }
  0xd3   :  { %717 = vst.msk [vmem:[#allocation3 + $0xc8] sm:$0xff] %vm691_vm3, %v550_v12  ;;  %718 = vst.msk [vmem:[#allocation3 + $0xd0] sm:$0xff] %vm691_vm3, %v552_v7  ;;  %v781_v7 = vld [vmem:[#allocation2 + $0x12a] sm:$0xff] }
  0xd4   :  { %922 = vrot.lane.b32.xlu1 %v775_v59, %s9807_s10  ;;  %924 = vrot.lane.b32.xlu0 %v776_v3, %s9807_s10  ;;  %v780_v59 = vld [vmem:[#allocation2 + $0x122] sm:$0xff] }
  0xd6   :  { %v554_v53 = vpop.permute.xlu1 %553  ;;  %v556_v37 = vpop.permute.xlu0 %555 }
  0xd7   :  { %719 = vst.msk [vmem:[#allocation3 + $0xd8] sm:$0xff] %vm691_vm3, %v554_v53  ;;  %720 = vst.msk [vmem:[#allocation3 + $0xe0] sm:$0xff] %vm691_vm3, %v556_v37  ;;  %v783_v37 = vld [vmem:[#allocation2 + $0x142] sm:$0xff] }
  0xd8   :  { %926 = vrot.lane.b32.xlu1 %v777_v17, %s9807_s10  ;;  %928 = vrot.lane.b32.xlu0 %v778_v0, %s9807_s10  ;;  %v782_v17 = vld [vmem:[#allocation2 + $0x13a] sm:$0xff] }
  0xda   :  { %v558_v25 = vpop.permute.xlu1 %557  ;;  %v560_v12 = vpop.permute.xlu0 %559 }
  0xdb   :  { %721 = vst.msk [vmem:[#allocation3 + $0xe8] sm:$0xff] %vm691_vm3, %v558_v25  ;;  %722 = vst.msk [vmem:[#allocation3 + $0xf0] sm:$0xff] %vm691_vm3, %v560_v12  ;;  %v145_v25 = vld [vmem:[%s15840_s0 + $0xf8] sm:$0xff] }
  0xdc   :  { %930 = vrot.lane.b32.xlu1 %v779_v61, %s9807_s10  ;;  %932 = vrot.lane.b32.xlu0 %v780_v59, %s9807_s10  ;;  %v144_v61 = vld [vmem:[%s15840_s0 + $0xf0] sm:$0xff]  ;;  %210 = vst.msk [vmem:[#allocation2 + $0x189] sm:$0xff] %vm26_vm0, %v145_v25 }
  0xdd   :  { %209 = vst.msk [vmem:[#allocation2 + $0x181] sm:$0xff] %vm26_vm0, %v144_v61  ;;  %v784_v59 = vld [vmem:[#allocation2 + $0x152] sm:$0xff] }
  0xde   :  { %v562_v3 = vpop.permute.xlu1 %561  ;;  %v564_v53 = vpop.permute.xlu0 %563  ;;  %v788_v61 = vld [vmem:[#allocation2 + $0x1b2] sm:$0xff] }
  0xdf   :  { %723 = vst.msk [vmem:[#allocation3 + $0xf8] sm:$0xff] %vm691_vm3, %v562_v3  ;;  %724 = vst.msk [vmem:[#allocation3 + $0x100] sm:$0xff] %vm691_vm3, %v564_v53 }
  0xe0   :  { %934 = vrot.lane.b32.xlu1 %v781_v7, %s9807_s10  ;;  %936 = vrot.lane.b32.xlu0 %v782_v17, %s9807_s10  ;;  %v785_v7 = vld [vmem:[#allocation2 + $0x15a] sm:$0xff]  ;;  %v786_v17 = vld [vmem:[#allocation2 + $0x16a] sm:$0xff] }
  0xe2   :  { %v566_v0 = vpop.permute.xlu1 %565  ;;  %v568_v12 = vpop.permute.xlu0 %567 }
  0xe3   :  { %725 = vst.msk [vmem:[#allocation3 + $0x108] sm:$0xff] %vm691_vm3, %v566_v0  ;;  %726 = vst.msk [vmem:[#allocation3 + $0x110] sm:$0xff] %vm691_vm3, %v568_v12  ;;  %v787_v0 = vld [vmem:[#allocation2 + $0x172] sm:$0xff]  ;;  %v789_v12 = vld [vmem:[#allocation2 + $0x1ba] sm:$0xff] }
  0xe4   :  { %938 = vrot.lane.b32.xlu1 %v783_v37, %s9807_s10  ;;  %940 = vrot.lane.b32.xlu0 %v784_v59, %s9807_s10 }
  0xe6   :  { %v570_v3 = vpop.permute.xlu1 %569  ;;  %v572_v53 = vpop.permute.xlu0 %571 }
  0xe7   :  { %727 = vst.msk [vmem:[#allocation3 + $0x118] sm:$0xff] %vm691_vm3, %v570_v3  ;;  %728 = vst.msk [vmem:[#allocation3 + $0x120] sm:$0xff] %vm691_vm3, %v572_v53  ;;  %v791_v53 = vld [vmem:[#allocation2 + $0x1d2] sm:$0xff] }
  0xe8   :  { %942 = vrot.lane.b32.xlu1 %v785_v7, %s9807_s10  ;;  %944 = vrot.lane.b32.xlu0 %v786_v17, %s9807_s10  ;;  %v790_v7 = vld [vmem:[#allocation2 + $0x1ca] sm:$0xff] }
  0xea   :  { %v574_v37 = vpop.permute.xlu1 %573  ;;  %v576_v25 = vpop.permute.xlu0 %575 }
  0xeb   :  { %729 = vst.msk [vmem:[#allocation3 + $0x128] sm:$0xff] %vm691_vm3, %v574_v37  ;;  %730 = vst.msk [vmem:[#allocation3 + $0x130] sm:$0xff] %vm691_vm3, %v576_v25  ;;  %v793_v25 = vld [vmem:[#allocation2 + $0x1ea] sm:$0xff] }
  0xec   :  { %946 = vrot.lane.b32.xlu1 %v787_v0, %s9807_s10  ;;  %948 = vrot.lane.b32.xlu0 %v788_v61, %s9807_s10  ;;  %v792_v0 = vld [vmem:[#allocation2 + $0x1e2] sm:$0xff] }
  0xee   :  { %v578_v59 = vpop.permute.xlu1 %577  ;;  %v580_v3 = vpop.permute.xlu0 %579 }
  0xef   :  { %731 = vst.msk [vmem:[#allocation3 + $0x138] sm:$0xff] %vm691_vm3, %v578_v59  ;;  %732 = vst.msk [vmem:[#allocation3 + $0x140] sm:$0xff] %vm691_vm3, %v580_v3  ;;  %v795_v3 = vld [vmem:[#allocation2 + $0x202] sm:$0xff] }
  0xf0   :  { %950 = vrot.lane.b32.xlu1 %v789_v12, %s9807_s10  ;;  %952 = vrot.lane.b32.xlu0 %v790_v7, %s9807_s10  ;;  %v794_v12 = vld [vmem:[#allocation2 + $0x1fa] sm:$0xff] }
  0xf2   :  { %v582_v17 = vpop.permute.xlu1 %581  ;;  %v584_v37 = vpop.permute.xlu0 %583 }
  0xf3   :  { %733 = vst.msk [vmem:[#allocation3 + $0x148] sm:$0xff] %vm691_vm3, %v582_v17  ;;  %734 = vst.msk [vmem:[#allocation3 + $0x150] sm:$0xff] %vm691_vm3, %v584_v37  ;;  %v797_v37 = vld [vmem:[#allocation2 + $0x21a] sm:$0xff] }
  0xf4   :  { %954 = vrot.lane.b32.xlu1 %v791_v53, %s9807_s10  ;;  %956 = vrot.lane.b32.xlu0 %v792_v0, %s9807_s10  ;;  %v796_v53 = vld [vmem:[#allocation2 + $0x212] sm:$0xff] }
  0xf6   :  { %v586_v61 = vpop.permute.xlu1 %585  ;;  %v588_v59 = vpop.permute.xlu0 %587 }
  0xf7   :  { %735 = vst.msk [vmem:[#allocation3 + $0x158] sm:$0xff] %vm691_vm3, %v586_v61  ;;  %736 = vst.msk [vmem:[#allocation3 + $0x160] sm:$0xff] %vm691_vm3, %v588_v59  ;;  %v799_v59 = vld [vmem:[#allocation2 + $0x232] sm:$0xff] }
  0xf8   :  { %958 = vrot.lane.b32.xlu1 %v793_v25, %s9807_s10  ;;  %960 = vrot.lane.b32.xlu0 %v794_v12, %s9807_s10  ;;  %v798_v25 = vld [vmem:[#allocation2 + $0x22a] sm:$0xff] }
  0xfa   :  { %v590_v7 = vpop.permute.xlu1 %589  ;;  %v592_v17 = vpop.permute.xlu0 %591 }
  0xfb   :  { %737 = vst.msk [vmem:[#allocation3 + $0x168] sm:$0xff] %vm691_vm3, %v590_v7  ;;  %738 = vst.msk [vmem:[#allocation3 + $0x170] sm:$0xff] %vm691_vm3, %v592_v17  ;;  %v801_v17 = vld [vmem:[#allocation2 + $0x24a] sm:$0xff] }
  0xfc   :  { %962 = vrot.lane.b32.xlu1 %v795_v3, %s9807_s10  ;;  %964 = vrot.lane.b32.xlu0 %v796_v53, %s9807_s10  ;;  %v800_v3 = vld [vmem:[#allocation2 + $0x242] sm:$0xff] }
  0xfe   :  { %v594_v0 = vpop.permute.xlu1 %593  ;;  %v596_v61 = vpop.permute.xlu0 %595 }
  0xff   :  { %739 = vst.msk [vmem:[#allocation3 + $0x178] sm:$0xff] %vm691_vm3, %v594_v0  ;;  %740 = vst.msk [vmem:[#allocation3 + $0x180] sm:$0xff] %vm691_vm3, %v596_v61  ;;  %v803_v61 = vld [vmem:[#allocation2 + $0x262] sm:$0xff] }
 0x100   :  { %966 = vrot.lane.b32.xlu1 %v797_v37, %s9807_s10  ;;  %968 = vrot.lane.b32.xlu0 %v798_v25, %s9807_s10  ;;  %v802_v37 = vld [vmem:[#allocation2 + $0x25a] sm:$0xff] }
 0x102   :  { %v598_v12 = vpop.permute.xlu1 %597  ;;  %v600_v7 = vpop.permute.xlu0 %599 }
 0x103   :  { %741 = vst.msk [vmem:[#allocation3 + $0x188] sm:$0xff] %vm691_vm3, %v598_v12  ;;  %742 = vst.msk [vmem:[#allocation3 + $0x190] sm:$0xff] %vm691_vm3, %v600_v7  ;;  %v805_v7 = vld [vmem:[#allocation2 + $0x27a] sm:$0xff] }
 0x104   :  { %970 = vrot.lane.b32.xlu1 %v799_v59, %s9807_s10  ;;  %972 = vrot.lane.b32.xlu0 %v800_v3, %s9807_s10  ;;  %v804_v59 = vld [vmem:[#allocation2 + $0x272] sm:$0xff] }
 0x106   :  { %v602_v53 = vpop.permute.xlu1 %601  ;;  %v604_v0 = vpop.permute.xlu0 %603 }
 0x107   :  { %743 = vst.msk [vmem:[#allocation3 + $0x198] sm:$0xff] %vm691_vm3, %v602_v53  ;;  %744 = vst.msk [vmem:[#allocation3 + $0x1a0] sm:$0xff] %vm691_vm3, %v604_v0  ;;  %v807_v0 = vld [vmem:[#allocation2 + $0x292] sm:$0xff] }
 0x108   :  { %974 = vrot.lane.b32.xlu1 %v801_v17, %s9807_s10  ;;  %976 = vrot.lane.b32.xlu0 %v802_v37, %s9807_s10  ;;  %v806_v17 = vld [vmem:[#allocation2 + $0x28a] sm:$0xff] }
 0x10a   :  { %v606_v25 = vpop.permute.xlu1 %605  ;;  %v608_v12 = vpop.permute.xlu0 %607 }
 0x10b   :  { %745 = vst.msk [vmem:[#allocation3 + $0x1a8] sm:$0xff] %vm691_vm3, %v606_v25  ;;  %746 = vst.msk [vmem:[#allocation3 + $0x1b0] sm:$0xff] %vm691_vm3, %v608_v12  ;;  %v809_v12 = vld [vmem:[#allocation2 + $0x2aa] sm:$0xff] }
 0x10c   :  { %978 = vrot.lane.b32.xlu1 %v803_v61, %s9807_s10  ;;  %980 = vrot.lane.b32.xlu0 %v804_v59, %s9807_s10  ;;  %v808_v61 = vld [vmem:[#allocation2 + $0x2a2] sm:$0xff] }
 0x10e   :  { %v610_v3 = vpop.permute.xlu1 %609  ;;  %v612_v53 = vpop.permute.xlu0 %611 }
 0x10f   :  { %747 = vst.msk [vmem:[#allocation3 + $0x1b8] sm:$0xff] %vm691_vm3, %v610_v3  ;;  %748 = vst.msk [vmem:[#allocation3 + $0x1c0] sm:$0xff] %vm691_vm3, %v612_v53  ;;  %v811_v53 = vld [vmem:[#allocation2 + $0x2c2] sm:$0xff] }
 0x110   :  { %982 = vrot.lane.b32.xlu1 %v805_v7, %s9807_s10  ;;  %984 = vrot.lane.b32.xlu0 %v806_v17, %s9807_s10  ;;  %v810_v7 = vld [vmem:[#allocation2 + $0x2ba] sm:$0xff] }
 0x112   :  { %v614_v37 = vpop.permute.xlu1 %613  ;;  %v616_v25 = vpop.permute.xlu0 %615 }
 0x113   :  { %749 = vst.msk [vmem:[#allocation3 + $0x1c8] sm:$0xff] %vm691_vm3, %v614_v37  ;;  %750 = vst.msk [vmem:[#allocation3 + $0x1d0] sm:$0xff] %vm691_vm3, %v616_v25  ;;  %v813_v25 = vld [vmem:[#allocation2 + $0x2da] sm:$0xff] }
 0x114   :  { %986 = vrot.lane.b32.xlu1 %v807_v0, %s9807_s10  ;;  %988 = vrot.lane.b32.xlu0 %v808_v61, %s9807_s10  ;;  %v812_v0 = vld [vmem:[#allocation2 + $0x2d2] sm:$0xff] }
 0x116   :  { %v618_v59 = vpop.permute.xlu1 %617  ;;  %v620_v3 = vpop.permute.xlu0 %619 }
 0x117   :  { %751 = vst.msk [vmem:[#allocation3 + $0x1d8] sm:$0xff] %vm691_vm3, %v618_v59  ;;  %752 = vst.msk [vmem:[#allocation3 + $0x1e0] sm:$0xff] %vm691_vm3, %v620_v3  ;;  %v815_v3 = vld [vmem:[#allocation2 + $0x2f2] sm:$0xff] }
 0x118   :  { %990 = vrot.lane.b32.xlu1 %v809_v12, %s9807_s10  ;;  %992 = vrot.lane.b32.xlu0 %v810_v7, %s9807_s10  ;;  %v814_v12 = vld [vmem:[#allocation2 + $0x2ea] sm:$0xff] }
 0x11a   :  { %v622_v17 = vpop.permute.xlu1 %621  ;;  %v624_v37 = vpop.permute.xlu0 %623 }
 0x11b   :  { %753 = vst.msk [vmem:[#allocation3 + $0x1e8] sm:$0xff] %vm691_vm3, %v622_v17  ;;  %754 = vst.msk [vmem:[#allocation3 + $0x1f0] sm:$0xff] %vm691_vm3, %v624_v37  ;;  %v177_v17 = vld [vmem:[%s15840_s0 + $0x1f8] sm:$0xff] }
 0x11c   :  { %994 = vrot.lane.b32.xlu1 %v811_v53, %s9807_s10  ;;  %996 = vrot.lane.b32.xlu0 %v812_v0, %s9807_s10  ;;  %v176_v53 = vld [vmem:[%s15840_s0 + $0x1f0] sm:$0xff]  ;;  %v816_v0 = vld [vmem:[#allocation2 + $0x302] sm:$0xff]  ;;  %242 = vst.msk [vmem:[#allocation2 + $0x339] sm:$0xff] %vm26_vm0, %v177_v17  ;;  %s9808_s0 = smov 12  }
 0x11d   :  { %241 = vst.msk [vmem:[#allocation2 + $0x331] sm:$0xff] %vm26_vm0, %v176_v53  ;;  %vm5250_vm0 = vcmask 130112  }
 0x11e   :  { %v626_v61 = vpop.permute.xlu1 %625  ;;  %v885_v59 = vpop.permute.xlu0 %884 }
 0x11f   :  { %755 = vst.msk [vmem:[#allocation3 + $0x1f8] sm:$0xff] %vm691_vm3, %v626_v61  ;;  %vm6405_vm3 = vcmask 326912  }
 0x120   :  { %998 = vrot.lane.b32.xlu1 %v813_v25, %s9807_s10  ;;  %1077 = vst.msk [vmem:[#allocation3] sm:$0xff] %vm1076_vm4, %v885_v59  ;;  %1000 = vrot.lane.b32.xlu0 %v814_v12, %s9807_s10  ;;  %v817_v25 = vld [vmem:[#allocation2 + $0x30a] sm:$0xff]  ;;  %v818_v12 = vld [vmem:[#allocation2 + $0x31a] sm:$0xff] }
 0x122   :  { %v887_v7 = vpop.permute.xlu1 %886  ;;  %v889_v37 = vpop.permute.xlu0 %888 }
 0x123   :  { %1078 = vst.msk [vmem:[#allocation3 + $0x8] sm:$0xff] %vm1076_vm4, %v887_v7  ;;  %1079 = vst.msk [vmem:[#allocation3 + $0x10] sm:$0xff] %vm1076_vm4, %v889_v37  ;;  %v819_v7 = vld [vmem:[#allocation2 + $0x322] sm:$0xff] }
 0x124   :  { %1002 = vrot.lane.b32.xlu1 %v815_v3, %s9807_s10  ;;  %1004 = vrot.lane.b32.xlu0 %v816_v0, %s9807_s10 }
 0x126   :  { %v891_v61 = vpop.permute.xlu1 %890  ;;  %v893_v59 = vpop.permute.xlu0 %892 }
 0x127   :  { %1080 = vst.msk [vmem:[#allocation3 + $0x18] sm:$0xff] %vm1076_vm4, %v891_v61  ;;  %1081 = vst.msk [vmem:[#allocation3 + $0x20] sm:$0xff] %vm1076_vm4, %v893_v59 }
 0x128   :  { %1006 = vrot.lane.b32.xlu1 %v817_v25, %s9807_s10  ;;  %1008 = vrot.lane.b32.xlu0 %v818_v12, %s9807_s10  ;;  %v1172_v12 = vld [vmem:[#allocation2 + $0x188] sm:$0xff] }
 0x12a   :  { %v895_v3 = vpop.permute.xlu1 %894  ;;  %v897_v53 = vpop.permute.xlu0 %896 }
 0x12b   :  { %1082 = vst.msk [vmem:[#allocation3 + $0x28] sm:$0xff] %vm1076_vm4, %v895_v3  ;;  %1083 = vst.msk [vmem:[#allocation3 + $0x30] sm:$0xff] %vm1076_vm4, %v897_v53 }
 0x12c   :  { %1010 = vrot.lane.b32.xlu1 %v819_v7, %s9807_s10  ;;  %1269 = vrot.lane.b32.xlu0 %v10257_v10, %s9808_s0 }
 0x12e   :  { %v899_v17 = vpop.permute.xlu1 %898  ;;  %v901_v0 = vpop.permute.xlu0 %900 }
 0x12f   :  { %1084 = vst.msk [vmem:[#allocation3 + $0x38] sm:$0xff] %vm1076_vm4, %v899_v17  ;;  %1085 = vst.msk [vmem:[#allocation3 + $0x40] sm:$0xff] %vm1076_vm4, %v901_v0  ;;  %v15921_v17 = vld [vmem:[#allocation9_spill] sm:$0xff] }
 0x130   :  { %1271 = vrot.lane.b32.xlu1 %v10270_v15, %s9808_s0  ;;  %1273 = vrot.lane.b32.xlu0 %v10283_v18, %s9808_s0 }
 0x132   :  { %v903_v37 = vpop.permute.xlu1 %902  ;;  %v905_v25 = vpop.permute.xlu0 %904 }
 0x133   :  { %1086 = vst.msk [vmem:[#allocation3 + $0x48] sm:$0xff] %vm1076_vm4, %v903_v37  ;;  %1087 = vst.msk [vmem:[#allocation3 + $0x50] sm:$0xff] %vm1076_vm4, %v905_v25  ;;  %v15922_v25 = vld [vmem:[#allocation10_spill] sm:$0xff] }
 0x134   :  { %1275 = vrot.lane.b32.xlu1 %v10285_v19, %s9808_s0  ;;  %1277 = vrot.lane.b32.xlu0 %v10298_v22, %s9808_s0 }
 0x136   :  { %v907_v61 = vpop.permute.xlu1 %906  ;;  %v909_v10 = vpop.permute.xlu0 %908 }
 0x137   :  { %1088 = vst.msk [vmem:[#allocation3 + $0x58] sm:$0xff] %vm1076_vm4, %v907_v61  ;;  %1089 = vst.msk [vmem:[#allocation3 + $0x60] sm:$0xff] %vm1076_vm4, %v909_v10  ;;  %v15923_v61 = vld [vmem:[#allocation11_spill] sm:$0xff]  ;;  %v1203_v10 = vld [vmem:[#allocation2 + $0x330] sm:$0xff] }
 0x138   :  { %1279 = vrot.lane.b32.xlu1 %v10304_v23, %s9808_s0  ;;  %1281 = vrot.lane.b32.xlu0 %v10310_v26, %s9808_s0 }
 0x13a   :  { %v911_v15 = vpop.permute.xlu1 %910  ;;  %v913_v18 = vpop.permute.xlu0 %912 }
 0x13b   :  { %1090 = vst.msk [vmem:[#allocation3 + $0x68] sm:$0xff] %vm1076_vm4, %v911_v15  ;;  %1091 = vst.msk [vmem:[#allocation3 + $0x70] sm:$0xff] %vm1076_vm4, %v913_v18  ;;  %v1204_v18 = vld [vmem:[#allocation2 + $0x338] sm:$0xff] }
 0x13c   :  { %1283 = vrot.lane.b32.xlu1 %v10314_v27, %s9808_s0  ;;  %1285 = vrot.lane.b32.xlu0 %v10320_v29, %s9808_s0 }
 0x13e   :  { %v915_v19 = vpop.permute.xlu1 %914  ;;  %v917_v22 = vpop.permute.xlu0 %916 }
 0x13f   :  { %1092 = vst.msk [vmem:[#allocation3 + $0x78] sm:$0xff] %vm1076_vm4, %v915_v19  ;;  %1093 = vst.msk [vmem:[#allocation3 + $0x80] sm:$0xff] %vm1076_vm4, %v917_v22  ;;  %v1526_v22 = vld [vmem:[#allocation2 + $0x19] sm:$0xff] }
 0x140   :  { %1287 = vrot.lane.b32.xlu1 %v10322_v30, %s9808_s0  ;;  %1289 = vrot.lane.b32.xlu0 %v10328_v32, %s9808_s0 }
 0x142   :  { %v919_v23 = vpop.permute.xlu1 %918  ;;  %v921_v26 = vpop.permute.xlu0 %920 }
 0x143   :  { %1094 = vst.msk [vmem:[#allocation3 + $0x88] sm:$0xff] %vm1076_vm4, %v919_v23  ;;  %1095 = vst.msk [vmem:[#allocation3 + $0x90] sm:$0xff] %vm1076_vm4, %v921_v26  ;;  %v1527_v26 = vld [vmem:[#allocation2 + $0x21] sm:$0xff] }
 0x144   :  { %1291 = vrot.lane.b32.xlu1 %v10330_v33, %s9808_s0  ;;  %1293 = vrot.lane.b32.xlu0 %v10337_v34, %s9808_s0 }
 0x146   :  { %v923_v27 = vpop.permute.xlu1 %922  ;;  %v925_v29 = vpop.permute.xlu0 %924 }
 0x147   :  { %1096 = vst.msk [vmem:[#allocation3 + $0x98] sm:$0xff] %vm1076_vm4, %v923_v27  ;;  %1097 = vst.msk [vmem:[#allocation3 + $0xa0] sm:$0xff] %vm1076_vm4, %v925_v29  ;;  %v1528_v29 = vld [vmem:[#allocation2 + $0x31] sm:$0xff] }
 0x148   :  { %1295 = vrot.lane.b32.xlu1 %v10342_v36, %s9808_s0  ;;  %1297 = vrot.lane.b32.xlu0 %v10346_v38, %s9808_s0 }
 0x14a   :  { %v927_v30 = vpop.permute.xlu1 %926  ;;  %v929_v32 = vpop.permute.xlu0 %928 }
 0x14b   :  { %1098 = vst.msk [vmem:[#allocation3 + $0xa8] sm:$0xff] %vm1076_vm4, %v927_v30  ;;  %1099 = vst.msk [vmem:[#allocation3 + $0xb0] sm:$0xff] %vm1076_vm4, %v929_v32  ;;  %v1529_v32 = vld [vmem:[#allocation2 + $0x39] sm:$0xff] }
 0x14c   :  { %1299 = vrot.lane.b32.xlu1 %v10348_v39, %s9808_s0  ;;  %1301 = vrot.lane.b32.xlu0 %v10354_v40, %s9808_s0 }
 0x14e   :  { %v931_v33 = vpop.permute.xlu1 %930  ;;  %v933_v34 = vpop.permute.xlu0 %932 }
 0x14f   :  { %1100 = vst.msk [vmem:[#allocation3 + $0xb8] sm:$0xff] %vm1076_vm4, %v931_v33  ;;  %1101 = vst.msk [vmem:[#allocation3 + $0xc0] sm:$0xff] %vm1076_vm4, %v933_v34  ;;  %v1530_v34 = vld [vmem:[#allocation2 + $0x49] sm:$0xff] }
 0x150   :  { %1303 = vrot.lane.b32.xlu1 %v10356_v41, %s9808_s0  ;;  %1305 = vrot.lane.b32.xlu0 %v10363_v42, %s9808_s0 }
 0x152   :  { %v935_v36 = vpop.permute.xlu1 %934  ;;  %v937_v38 = vpop.permute.xlu0 %936 }
 0x153   :  { %1102 = vst.msk [vmem:[#allocation3 + $0xc8] sm:$0xff] %vm1076_vm4, %v935_v36  ;;  %1103 = vst.msk [vmem:[#allocation3 + $0xd0] sm:$0xff] %vm1076_vm4, %v937_v38  ;;  %v1531_v38 = vld [vmem:[#allocation2 + $0x51] sm:$0xff] }
 0x154   :  { %1307 = vrot.lane.b32.xlu1 %v10368_v44, %s9808_s0  ;;  %1309 = vrot.lane.b32.xlu0 %v10372_v46, %s9808_s0 }
 0x156   :  { %v939_v39 = vpop.permute.xlu1 %938  ;;  %v941_v40 = vpop.permute.xlu0 %940 }
 0x157   :  { %1104 = vst.msk [vmem:[#allocation3 + $0xd8] sm:$0xff] %vm1076_vm4, %v939_v39  ;;  %1105 = vst.msk [vmem:[#allocation3 + $0xe0] sm:$0xff] %vm1076_vm4, %v941_v40  ;;  %v1532_v40 = vld [vmem:[#allocation2 + $0x61] sm:$0xff] }
 0x158   :  { %1311 = vrot.lane.b32.xlu1 %v10374_v47, %s9808_s0  ;;  %1313 = vrot.lane.b32.xlu0 %v10380_v48, %s9808_s0 }
 0x15a   :  { %v943_v41 = vpop.permute.xlu1 %942  ;;  %v945_v42 = vpop.permute.xlu0 %944 }
 0x15b   :  { %1106 = vst.msk [vmem:[#allocation3 + $0xe8] sm:$0xff] %vm1076_vm4, %v943_v41  ;;  %1107 = vst.msk [vmem:[#allocation3 + $0xf0] sm:$0xff] %vm1076_vm4, %v945_v42  ;;  %v1533_v42 = vld [vmem:[#allocation2 + $0x69] sm:$0xff] }
 0x15c   :  { %1315 = vrot.lane.b32.xlu1 %v10382_v49, %s9808_s0  ;;  %1317 = vrot.lane.b32.xlu0 %v10389_v50, %s9808_s0  ;;  %v1171_v50 = vld [vmem:[#allocation2 + $0x180] sm:$0xff] }
 0x15e   :  { %v947_v44 = vpop.permute.xlu1 %946  ;;  %v949_v46 = vpop.permute.xlu0 %948 }
 0x15f   :  { %1108 = vst.msk [vmem:[#allocation3 + $0xf8] sm:$0xff] %vm1076_vm4, %v947_v44  ;;  %1109 = vst.msk [vmem:[#allocation3 + $0x100] sm:$0xff] %vm1076_vm4, %v949_v46  ;;  %v1534_v46 = vld [vmem:[#allocation2 + $0x79] sm:$0xff] }
 0x160   :  { %1319 = vrot.lane.b32.xlu1 %v10394_v52, %s9808_s0  ;;  %1321 = vrot.lane.b32.xlu0 %v10398_v54, %s9808_s0 }
 0x162   :  { %v951_v47 = vpop.permute.xlu1 %950  ;;  %v953_v48 = vpop.permute.xlu0 %952 }
 0x163   :  { %1110 = vst.msk [vmem:[#allocation3 + $0x108] sm:$0xff] %vm1076_vm4, %v951_v47  ;;  %1111 = vst.msk [vmem:[#allocation3 + $0x110] sm:$0xff] %vm1076_vm4, %v953_v48  ;;  %v1535_v48 = vld [vmem:[#allocation2 + $0x81] sm:$0xff] }
 0x164   :  { %1323 = vrot.lane.b32.xlu1 %v10400_v55, %s9808_s0  ;;  %1325 = vrot.lane.b32.xlu0 %v10406_v56, %s9808_s0 }
 0x166   :  { %v955_v49 = vpop.permute.xlu1 %954  ;;  %v957_v52 = vpop.permute.xlu0 %956 }
 0x167   :  { %1112 = vst.msk [vmem:[#allocation3 + $0x118] sm:$0xff] %vm1076_vm4, %v955_v49  ;;  %1113 = vst.msk [vmem:[#allocation3 + $0x120] sm:$0xff] %vm1076_vm4, %v957_v52 }
 0x168   :  { %1327 = vrot.lane.b32.xlu1 %v10408_v57, %s9808_s0  ;;  %1329 = vrot.lane.b32.xlu0 %v1171_v50, %s9808_s0  ;;  %v1536_v50 = vld [vmem:[#allocation2 + $0x91] sm:$0xff] }
 0x16a   :  { %v959_v54 = vpop.permute.xlu1 %958  ;;  %v961_v55 = vpop.permute.xlu0 %960 }
 0x16b   :  { %1114 = vst.msk [vmem:[#allocation3 + $0x128] sm:$0xff] %vm1076_vm4, %v959_v54  ;;  %1115 = vst.msk [vmem:[#allocation3 + $0x130] sm:$0xff] %vm1076_vm4, %v961_v55  ;;  %v1538_v55 = vld [vmem:[#allocation2 + $0xa9] sm:$0xff] }
 0x16c   :  { %1331 = vrot.lane.b32.xlu1 %v1172_v12, %s9808_s0  ;;  %1333 = vrot.lane.b32.xlu0 %v10418_v62, %s9808_s0  ;;  %v1537_v12 = vld [vmem:[#allocation2 + $0x99] sm:$0xff] }
 0x16e   :  { %v963_v59 = vpop.permute.xlu1 %962  ;;  %v965_v56 = vpop.permute.xlu0 %964 }
 0x16f   :  { %1116 = vst.msk [vmem:[#allocation3 + $0x138] sm:$0xff] %vm1076_vm4, %v963_v59  ;;  %1117 = vst.msk [vmem:[#allocation3 + $0x140] sm:$0xff] %vm1076_vm4, %v965_v56  ;;  %v1539_v56 = vld [vmem:[#allocation2 + $0xb1] sm:$0xff] }
 0x170   :  { %1335 = vrot.lane.b32.xlu1 %v10420_v63, %s9808_s0  ;;  %1337 = vrot.lane.b32.xlu0 %v10428_v2, %s9808_s0 }
 0x172   :  { %v967_v57 = vpop.permute.xlu1 %966  ;;  %v969_v7 = vpop.permute.xlu0 %968 }
 0x173   :  { %1118 = vst.msk [vmem:[#allocation3 + $0x148] sm:$0xff] %vm1076_vm4, %v967_v57  ;;  %1119 = vst.msk [vmem:[#allocation3 + $0x150] sm:$0xff] %vm1076_vm4, %v969_v7  ;;  %v1540_v7 = vld [vmem:[#allocation2 + $0xc1] sm:$0xff] }
 0x174   :  { %1339 = vrot.lane.b32.xlu1 %v10432_v4, %s9808_s0  ;;  %1341 = vrot.lane.b32.xlu0 %v10438_v6, %s9808_s0 }
 0x176   :  { %v971_v3 = vpop.permute.xlu1 %970  ;;  %v973_v62 = vpop.permute.xlu0 %972 }
 0x177   :  { %1120 = vst.msk [vmem:[#allocation3 + $0x158] sm:$0xff] %vm1076_vm4, %v971_v3  ;;  %1121 = vst.msk [vmem:[#allocation3 + $0x160] sm:$0xff] %vm1076_vm4, %v973_v62  ;;  %v1541_v62 = vld [vmem:[#allocation2 + $0xc9] sm:$0xff] }
 0x178   :  { %1343 = vrot.lane.b32.xlu1 %v10442_v8, %s9808_s0  ;;  %1345 = vrot.lane.b32.xlu0 %v10448_v11, %s9808_s0 }
 0x17a   :  { %v975_v63 = vpop.permute.xlu1 %974  ;;  %v977_v2 = vpop.permute.xlu0 %976 }
 0x17b   :  { %1122 = vst.msk [vmem:[#allocation3 + $0x168] sm:$0xff] %vm1076_vm4, %v975_v63  ;;  %1123 = vst.msk [vmem:[#allocation3 + $0x170] sm:$0xff] %vm1076_vm4, %v977_v2  ;;  %v1542_v2 = vld [vmem:[#allocation2 + $0xd9] sm:$0xff] }
 0x17c   :  { %1347 = vrot.lane.b32.xlu1 %v10452_v13, %s9808_s0  ;;  %1349 = vrot.lane.b32.xlu0 %v10458_v16, %s9808_s0 }
 0x17e   :  { %v979_v4 = vpop.permute.xlu1 %978  ;;  %v981_v6 = vpop.permute.xlu0 %980 }
 0x17f   :  { %1124 = vst.msk [vmem:[#allocation3 + $0x178] sm:$0xff] %vm1076_vm4, %v979_v4  ;;  %1125 = vst.msk [vmem:[#allocation3 + $0x180] sm:$0xff] %vm1076_vm4, %v981_v6  ;;  %v1543_v6 = vld [vmem:[#allocation2 + $0xe1] sm:$0xff] }
 0x180   :  { %1351 = vrot.lane.b32.xlu1 %v10462_v20, %s9808_s0  ;;  %1353 = vrot.lane.b32.xlu0 %v10468_v24, %s9808_s0 }
 0x182   :  { %v983_v8 = vpop.permute.xlu1 %982  ;;  %v985_v11 = vpop.permute.xlu0 %984 }
 0x183   :  { %1126 = vst.msk [vmem:[#allocation3 + $0x188] sm:$0xff] %vm1076_vm4, %v983_v8  ;;  %1127 = vst.msk [vmem:[#allocation3 + $0x190] sm:$0xff] %vm1076_vm4, %v985_v11  ;;  %v1544_v11 = vld [vmem:[#allocation2 + $0xf1] sm:$0xff] }
 0x184   :  { %1355 = vrot.lane.b32.xlu1 %v10472_v28, %s9808_s0  ;;  %1357 = vrot.lane.b32.xlu0 %v10478_v35, %s9808_s0 }
 0x186   :  { %v987_v13 = vpop.permute.xlu1 %986  ;;  %v989_v16 = vpop.permute.xlu0 %988 }
 0x187   :  { %1128 = vst.msk [vmem:[#allocation3 + $0x198] sm:$0xff] %vm1076_vm4, %v987_v13  ;;  %1129 = vst.msk [vmem:[#allocation3 + $0x1a0] sm:$0xff] %vm1076_vm4, %v989_v16  ;;  %v1545_v16 = vld [vmem:[#allocation2 + $0xf9] sm:$0xff] }
 0x188   :  { %1359 = vrot.lane.b32.xlu1 %v10482_v43, %s9808_s0  ;;  %1361 = vrot.lane.b32.xlu0 %v10488_v51, %s9808_s0 }
 0x18a   :  { %v991_v20 = vpop.permute.xlu1 %990  ;;  %v993_v24 = vpop.permute.xlu0 %992 }
 0x18b   :  { %1130 = vst.msk [vmem:[#allocation3 + $0x1a8] sm:$0xff] %vm1076_vm4, %v991_v20  ;;  %1131 = vst.msk [vmem:[#allocation3 + $0x1b0] sm:$0xff] %vm1076_vm4, %v993_v24  ;;  %v1546_v24 = vld [vmem:[#allocation2 + $0x109] sm:$0xff] }
 0x18c   :  { %1363 = vrot.lane.b32.xlu1 %v10492_v58, %s9808_s0  ;;  %1365 = vrot.lane.b32.xlu0 %v10498_v60, %s9808_s0 }
 0x18e   :  { %v995_v28 = vpop.permute.xlu1 %994  ;;  %v997_v35 = vpop.permute.xlu0 %996 }
 0x18f   :  { %1132 = vst.msk [vmem:[#allocation3 + $0x1b8] sm:$0xff] %vm1076_vm4, %v995_v28  ;;  %1133 = vst.msk [vmem:[#allocation3 + $0x1c0] sm:$0xff] %vm1076_vm4, %v997_v35  ;;  %v1547_v35 = vld [vmem:[#allocation2 + $0x111] sm:$0xff] }
 0x190   :  { %1367 = vrot.lane.b32.xlu1 %v10502_v1, %s9808_s0  ;;  %1369 = vrot.lane.b32.xlu0 %v10508_v5, %s9808_s0 }
 0x192   :  { %v999_v43 = vpop.permute.xlu1 %998  ;;  %v1001_v51 = vpop.permute.xlu0 %1000 }
 0x193   :  { %1134 = vst.msk [vmem:[#allocation3 + $0x1c8] sm:$0xff] %vm1076_vm4, %v999_v43  ;;  %1135 = vst.msk [vmem:[#allocation3 + $0x1d0] sm:$0xff] %vm1076_vm4, %v1001_v51  ;;  %v1548_v51 = vld [vmem:[#allocation2 + $0x121] sm:$0xff] }
 0x194   :  { %1371 = vrot.lane.b32.xlu1 %v10512_v9, %s9808_s0  ;;  %1373 = vrot.lane.b32.xlu0 %v10518_v14, %s9808_s0  ;;  %v15918_v14 = vld [vmem:[#allocation6_spill] sm:$0xff] }
 0x196   :  { %v1003_v58 = vpop.permute.xlu1 %1002  ;;  %v1005_v60 = vpop.permute.xlu0 %1004 }
 0x197   :  { %1136 = vst.msk [vmem:[#allocation3 + $0x1d8] sm:$0xff] %vm1076_vm4, %v1003_v58  ;;  %1137 = vst.msk [vmem:[#allocation3 + $0x1e0] sm:$0xff] %vm1076_vm4, %v1005_v60  ;;  %v1549_v60 = vld [vmem:[#allocation2 + $0x129] sm:$0xff] }
 0x198   :  { %1375 = vrot.lane.b32.xlu1 %v10522_v21, %s9808_s0  ;;  %1377 = vrot.lane.b32.xlu0 %v10528_v31, %s9808_s0  ;;  %v15919_v21 = vld [vmem:[#allocation7_spill] sm:$0xff] }
 0x19a   :  { %v1007_v1 = vpop.permute.xlu1 %1006  ;;  %v1009_v5 = vpop.permute.xlu0 %1008 }
 0x19b   :  { %1138 = vst.msk [vmem:[#allocation3 + $0x1e8] sm:$0xff] %vm1076_vm4, %v1007_v1  ;;  %1139 = vst.msk [vmem:[#allocation3 + $0x1f0] sm:$0xff] %vm1076_vm4, %v1009_v5  ;;  %v1550_v5 = vld [vmem:[#allocation2 + $0x139] sm:$0xff] }
 0x19c   :  { %1379 = vrot.lane.b32.xlu1 %v10532_v45, %s9808_s0  ;;  %1381 = vrot.lane.b32.xlu0 %v15918_v14, %s9808_s0  ;;  %v15920_v45 = vld [vmem:[#allocation8_spill] sm:$0xff]  ;;  %v1551_v14 = vld [vmem:[#allocation2 + $0x141] sm:$0xff] }
 0x19e   :  { %v1011_v9 = vpop.permute.xlu1 %1010  ;;  %v1270_v53 = vpop.permute.xlu0 %1269 }
 0x19f   :  { %1140 = vst.msk [vmem:[#allocation3 + $0x1f8] sm:$0xff] %vm1076_vm4, %v1011_v9  ;;  %vm6790_vm4 = vcmask 392512  }
 0x1a0   :  { %1383 = vrot.lane.b32.xlu1 %v15919_v21, %s9808_s0  ;;  %1462 = vst.msk [vmem:[#allocation3] sm:$0xff] %vm1461_vm5, %v1270_v53  ;;  %1385 = vrot.lane.b32.xlu0 %v15920_v45, %s9808_s0  ;;  %v1552_v53 = vld [vmem:[#allocation2 + $0x151] sm:$0xff]  ;;  %v1553_v45 = vld [vmem:[#allocation2 + $0x159] sm:$0xff] }
 0x1a2   :  { %v1272_v31 = vpop.permute.xlu1 %1271  ;;  %v1274_v0 = vpop.permute.xlu0 %1273 }
 0x1a3   :  { %1463 = vst.msk [vmem:[#allocation3 + $0x8] sm:$0xff] %vm1461_vm5, %v1272_v31  ;;  %1464 = vst.msk [vmem:[#allocation3 + $0x10] sm:$0xff] %vm1461_vm5, %v1274_v0  ;;  %v1554_v0 = vld [vmem:[#allocation2 + $0x169] sm:$0xff] }
 0x1a4   :  { %1387 = vrot.lane.b32.xlu1 %v15921_v17, %s9808_s0  ;;  %1389 = vrot.lane.b32.xlu0 %v15922_v25, %s9808_s0  ;;  %v1555_v25 = vld [vmem:[#allocation2 + $0x171] sm:$0xff] }
 0x1a6   :  { %v1276_v37 = vpop.permute.xlu1 %1275  ;;  %v1278_v15 = vpop.permute.xlu0 %1277 }
 0x1a7   :  { %1465 = vst.msk [vmem:[#allocation3 + $0x18] sm:$0xff] %vm1461_vm5, %v1276_v37  ;;  %1466 = vst.msk [vmem:[#allocation3 + $0x20] sm:$0xff] %vm1461_vm5, %v1278_v15 }
 0x1a8   :  { %1391 = vrot.lane.b32.xlu1 %v15923_v61, %s9808_s0  ;;  %1393 = vrot.lane.b32.xlu0 %v1203_v10, %s9808_s0  ;;  %v1556_v10 = vld [vmem:[#allocation2 + $0x181] sm:$0xff] }
 0x1aa   :  { %v1280_v19 = vpop.permute.xlu1 %1279  ;;  %v1282_v23 = vpop.permute.xlu0 %1281 }
 0x1ab   :  { %1467 = vst.msk [vmem:[#allocation3 + $0x28] sm:$0xff] %vm1461_vm5, %v1280_v19  ;;  %1468 = vst.msk [vmem:[#allocation3 + $0x30] sm:$0xff] %vm1461_vm5, %v1282_v23 }
 0x1ac   :  { %1395 = vrot.lane.b32.xlu1 %v1204_v18, %s9808_s0  ;;  %1654 = vrot.lane.b32.xlu0 %v1526_v22, %s9809_s18  ;;  %v1557_v18 = vld [vmem:[#allocation2 + $0x189] sm:$0xff]  ;;  %s9815_s0 = smov 48  }
 0x1ad   :  { %v1558_v22 = vld [vmem:[#allocation2 + $0x1c9] sm:$0xff] }
 0x1ae   :  { %v1284_v27 = vpop.permute.xlu1 %1283  ;;  %v1286_v30 = vpop.permute.xlu0 %1285 }
 0x1af   :  { %1469 = vst.msk [vmem:[#allocation3 + $0x38] sm:$0xff] %vm1461_vm5, %v1284_v27  ;;  %1470 = vst.msk [vmem:[#allocation3 + $0x40] sm:$0xff] %vm1461_vm5, %v1286_v30 }
 0x1b0   :  { %1656 = vrot.lane.b32.xlu1 %v1527_v26, %s9809_s18  ;;  %1658 = vrot.lane.b32.xlu0 %v1528_v29, %s9809_s18  ;;  %v1559_v26 = vld [vmem:[#allocation2 + $0x1d1] sm:$0xff]  ;;  %v1560_v29 = vld [vmem:[#allocation2 + $0x1e1] sm:$0xff] }
 0x1b2   :  { %v1288_v33 = vpop.permute.xlu1 %1287  ;;  %v1290_v36 = vpop.permute.xlu0 %1289 }
 0x1b3   :  { %1471 = vst.msk [vmem:[#allocation3 + $0x48] sm:$0xff] %vm1461_vm5, %v1288_v33  ;;  %1472 = vst.msk [vmem:[#allocation3 + $0x50] sm:$0xff] %vm1461_vm5, %v1290_v36 }
 0x1b4   :  { %1660 = vrot.lane.b32.xlu1 %v1529_v32, %s9809_s18  ;;  %1662 = vrot.lane.b32.xlu0 %v1530_v34, %s9809_s18  ;;  %v1561_v32 = vld [vmem:[#allocation2 + $0x1e9] sm:$0xff]  ;;  %v1562_v34 = vld [vmem:[#allocation2 + $0x1f9] sm:$0xff] }
 0x1b6   :  { %v1292_v39 = vpop.permute.xlu1 %1291  ;;  %v1294_v41 = vpop.permute.xlu0 %1293 }
 0x1b7   :  { %1473 = vst.msk [vmem:[#allocation3 + $0x58] sm:$0xff] %vm1461_vm5, %v1292_v39  ;;  %1474 = vst.msk [vmem:[#allocation3 + $0x60] sm:$0xff] %vm1461_vm5, %v1294_v41 }
 0x1b8   :  { %1664 = vrot.lane.b32.xlu1 %v1531_v38, %s9809_s18  ;;  %1666 = vrot.lane.b32.xlu0 %v1532_v40, %s9809_s18  ;;  %v1563_v38 = vld [vmem:[#allocation2 + $0x201] sm:$0xff]  ;;  %v1564_v40 = vld [vmem:[#allocation2 + $0x211] sm:$0xff] }
 0x1ba   :  { %v1296_v44 = vpop.permute.xlu1 %1295  ;;  %v1298_v47 = vpop.permute.xlu0 %1297 }
 0x1bb   :  { %1475 = vst.msk [vmem:[#allocation3 + $0x68] sm:$0xff] %vm1461_vm5, %v1296_v44  ;;  %1476 = vst.msk [vmem:[#allocation3 + $0x70] sm:$0xff] %vm1461_vm5, %v1298_v47 }
 0x1bc   :  { %1668 = vrot.lane.b32.xlu1 %v1533_v42, %s9809_s18  ;;  %1670 = vrot.lane.b32.xlu0 %v1534_v46, %s9809_s18  ;;  %v1565_v42 = vld [vmem:[#allocation2 + $0x219] sm:$0xff]  ;;  %v1566_v46 = vld [vmem:[#allocation2 + $0x229] sm:$0xff] }
 0x1be   :  { %v1300_v49 = vpop.permute.xlu1 %1299  ;;  %v1302_v52 = vpop.permute.xlu0 %1301 }
 0x1bf   :  { %1477 = vst.msk [vmem:[#allocation3 + $0x78] sm:$0xff] %vm1461_vm5, %v1300_v49  ;;  %1478 = vst.msk [vmem:[#allocation3 + $0x80] sm:$0xff] %vm1461_vm5, %v1302_v52 }
 0x1c0   :  { %1672 = vrot.lane.b32.xlu1 %v1535_v48, %s9809_s18  ;;  %1674 = vrot.lane.b32.xlu0 %v1536_v50, %s9809_s18  ;;  %v1567_v48 = vld [vmem:[#allocation2 + $0x231] sm:$0xff]  ;;  %v1568_v50 = vld [vmem:[#allocation2 + $0x241] sm:$0xff] }
 0x1c2   :  { %v1304_v54 = vpop.permute.xlu1 %1303  ;;  %v1306_v59 = vpop.permute.xlu0 %1305 }
 0x1c3   :  { %1479 = vst.msk [vmem:[#allocation3 + $0x88] sm:$0xff] %vm1461_vm5, %v1304_v54  ;;  %1480 = vst.msk [vmem:[#allocation3 + $0x90] sm:$0xff] %vm1461_vm5, %v1306_v59 }
 0x1c4   :  { %1676 = vrot.lane.b32.xlu1 %v1537_v12, %s9809_s18  ;;  %1678 = vrot.lane.b32.xlu0 %v1538_v55, %s9809_s18  ;;  %v1569_v12 = vld [vmem:[#allocation2 + $0x249] sm:$0xff]  ;;  %v1570_v55 = vld [vmem:[#allocation2 + $0x259] sm:$0xff] }
 0x1c6   :  { %v1308_v57 = vpop.permute.xlu1 %1307  ;;  %v1310_v3 = vpop.permute.xlu0 %1309 }
 0x1c7   :  { %1481 = vst.msk [vmem:[#allocation3 + $0x98] sm:$0xff] %vm1461_vm5, %v1308_v57  ;;  %1482 = vst.msk [vmem:[#allocation3 + $0xa0] sm:$0xff] %vm1461_vm5, %v1310_v3 }
 0x1c8   :  { %1680 = vrot.lane.b32.xlu1 %v1539_v56, %s9809_s18  ;;  %1682 = vrot.lane.b32.xlu0 %v1540_v7, %s9809_s18  ;;  %v1571_v56 = vld [vmem:[#allocation2 + $0x261] sm:$0xff]  ;;  %v1572_v7 = vld [vmem:[#allocation2 + $0x271] sm:$0xff] }
 0x1ca   :  { %v1312_v63 = vpop.permute.xlu1 %1311  ;;  %v1314_v4 = vpop.permute.xlu0 %1313 }
 0x1cb   :  { %1483 = vst.msk [vmem:[#allocation3 + $0xa8] sm:$0xff] %vm1461_vm5, %v1312_v63  ;;  %1484 = vst.msk [vmem:[#allocation3 + $0xb0] sm:$0xff] %vm1461_vm5, %v1314_v4 }
 0x1cc   :  { %1684 = vrot.lane.b32.xlu1 %v1541_v62, %s9809_s18  ;;  %1686 = vrot.lane.b32.xlu0 %v1542_v2, %s9809_s18  ;;  %v1573_v62 = vld [vmem:[#allocation2 + $0x279] sm:$0xff]  ;;  %v1574_v2 = vld [vmem:[#allocation2 + $0x289] sm:$0xff] }
 0x1ce   :  { %v1316_v8 = vpop.permute.xlu1 %1315  ;;  %v1318_v13 = vpop.permute.xlu0 %1317 }
 0x1cf   :  { %1485 = vst.msk [vmem:[#allocation3 + $0xb8] sm:$0xff] %vm1461_vm5, %v1316_v8  ;;  %1486 = vst.msk [vmem:[#allocation3 + $0xc0] sm:$0xff] %vm1461_vm5, %v1318_v13 }
 0x1d0   :  { %1688 = vrot.lane.b32.xlu1 %v1543_v6, %s9809_s18  ;;  %1690 = vrot.lane.b32.xlu0 %v1544_v11, %s9809_s18  ;;  %v1575_v6 = vld [vmem:[#allocation2 + $0x291] sm:$0xff]  ;;  %v1576_v11 = vld [vmem:[#allocation2 + $0x2a1] sm:$0xff] }
 0x1d2   :  { %v1320_v20 = vpop.permute.xlu1 %1319  ;;  %v1322_v28 = vpop.permute.xlu0 %1321 }
 0x1d3   :  { %1487 = vst.msk [vmem:[#allocation3 + $0xc8] sm:$0xff] %vm1461_vm5, %v1320_v20  ;;  %1488 = vst.msk [vmem:[#allocation3 + $0xd0] sm:$0xff] %vm1461_vm5, %v1322_v28 }
 0x1d4   :  { %1692 = vrot.lane.b32.xlu1 %v1545_v16, %s9809_s18  ;;  %1694 = vrot.lane.b32.xlu0 %v1546_v24, %s9809_s18  ;;  %v1577_v16 = vld [vmem:[#allocation2 + $0x2a9] sm:$0xff]  ;;  %v1578_v24 = vld [vmem:[#allocation2 + $0x2b9] sm:$0xff] }
 0x1d6   :  { %v1324_v43 = vpop.permute.xlu1 %1323  ;;  %v1326_v58 = vpop.permute.xlu0 %1325 }
 0x1d7   :  { %1489 = vst.msk [vmem:[#allocation3 + $0xd8] sm:$0xff] %vm1461_vm5, %v1324_v43  ;;  %1490 = vst.msk [vmem:[#allocation3 + $0xe0] sm:$0xff] %vm1461_vm5, %v1326_v58 }
 0x1d8   :  { %1696 = vrot.lane.b32.xlu1 %v1547_v35, %s9809_s18  ;;  %1698 = vrot.lane.b32.xlu0 %v1548_v51, %s9809_s18  ;;  %v1579_v35 = vld [vmem:[#allocation2 + $0x2c1] sm:$0xff]  ;;  %v1580_v51 = vld [vmem:[#allocation2 + $0x2d1] sm:$0xff] }
 0x1da   :  { %v1328_v1 = vpop.permute.xlu1 %1327  ;;  %v1330_v9 = vpop.permute.xlu0 %1329 }
 0x1db   :  { %1491 = vst.msk [vmem:[#allocation3 + $0xe8] sm:$0xff] %vm1461_vm5, %v1328_v1  ;;  %1492 = vst.msk [vmem:[#allocation3 + $0xf0] sm:$0xff] %vm1461_vm5, %v1330_v9 }
 0x1dc   :  { %1700 = vrot.lane.b32.xlu1 %v1549_v60, %s9809_s18  ;;  %1702 = vrot.lane.b32.xlu0 %v1550_v5, %s9809_s18  ;;  %v1581_v60 = vld [vmem:[#allocation2 + $0x2d9] sm:$0xff]  ;;  %v1582_v5 = vld [vmem:[#allocation2 + $0x2e9] sm:$0xff] }
 0x1de   :  { %v1332_v21 = vpop.permute.xlu1 %1331  ;;  %v1334_v31 = vpop.permute.xlu0 %1333 }
 0x1df   :  { %1493 = vst.msk [vmem:[#allocation3 + $0xf8] sm:$0xff] %vm1461_vm5, %v1332_v21  ;;  %1494 = vst.msk [vmem:[#allocation3 + $0x100] sm:$0xff] %vm1461_vm5, %v1334_v31 }
 0x1e0   :  { %1704 = vrot.lane.b32.xlu1 %v1551_v14, %s9809_s18  ;;  %1706 = vrot.lane.b32.xlu0 %v1552_v53, %s9809_s18  ;;  %v1583_v14 = vld [vmem:[#allocation2 + $0x2f1] sm:$0xff]  ;;  %v1584_v53 = vld [vmem:[#allocation2 + $0x301] sm:$0xff] }
 0x1e2   :  { %v1336_v17 = vpop.permute.xlu1 %1335  ;;  %v1338_v37 = vpop.permute.xlu0 %1337 }
 0x1e3   :  { %1495 = vst.msk [vmem:[#allocation3 + $0x108] sm:$0xff] %vm1461_vm5, %v1336_v17  ;;  %1496 = vst.msk [vmem:[#allocation3 + $0x110] sm:$0xff] %vm1461_vm5, %v1338_v37 }
 0x1e4   :  { %1708 = vrot.lane.b32.xlu1 %v1553_v45, %s9809_s18  ;;  %1710 = vrot.lane.b32.xlu0 %v1554_v0, %s9809_s18  ;;  %v1585_v45 = vld [vmem:[#allocation2 + $0x309] sm:$0xff]  ;;  %v1586_v0 = vld [vmem:[#allocation2 + $0x319] sm:$0xff] }
 0x1e6   :  { %v1340_v61 = vpop.permute.xlu1 %1339  ;;  %v1342_v15 = vpop.permute.xlu0 %1341 }
 0x1e7   :  { %1497 = vst.msk [vmem:[#allocation3 + $0x118] sm:$0xff] %vm1461_vm5, %v1340_v61  ;;  %1498 = vst.msk [vmem:[#allocation3 + $0x120] sm:$0xff] %vm1461_vm5, %v1342_v15 }
 0x1e8   :  { %1712 = vrot.lane.b32.xlu1 %v1555_v25, %s9809_s18  ;;  %1714 = vrot.lane.b32.xlu0 %v1556_v10, %s9809_s18  ;;  %v1587_v25 = vld [vmem:[#allocation2 + $0x321] sm:$0xff]  ;;  %v1588_v10 = vld [vmem:[#allocation2 + $0x331] sm:$0xff] }
 0x1ea   :  { %v1344_v19 = vpop.permute.xlu1 %1343  ;;  %v1346_v23 = vpop.permute.xlu0 %1345 }
 0x1eb   :  { %1499 = vst.msk [vmem:[#allocation3 + $0x128] sm:$0xff] %vm1461_vm5, %v1344_v19  ;;  %1500 = vst.msk [vmem:[#allocation3 + $0x130] sm:$0xff] %vm1461_vm5, %v1346_v23 }
 0x1ec   :  { %1716 = vrot.lane.b32.xlu1 %v1557_v18, %s9809_s18  ;;  %1718 = vrot.lane.b32.xlu0 %v1558_v22, %s9809_s18  ;;  %v1589_v18 = vld [vmem:[#allocation2 + $0x339] sm:$0xff] }
 0x1ed   :  { %v1911_v22 = vld [vmem:[#allocation2 + $0x1a] sm:$0xff] }
 0x1ee   :  { %v1348_v27 = vpop.permute.xlu1 %1347  ;;  %v1350_v30 = vpop.permute.xlu0 %1349 }
 0x1ef   :  { %1501 = vst.msk [vmem:[#allocation3 + $0x138] sm:$0xff] %vm1461_vm5, %v1348_v27  ;;  %1502 = vst.msk [vmem:[#allocation3 + $0x140] sm:$0xff] %vm1461_vm5, %v1350_v30 }
 0x1f0   :  { %1720 = vrot.lane.b32.xlu1 %v1559_v26, %s9809_s18  ;;  %1722 = vrot.lane.b32.xlu0 %v1560_v29, %s9809_s18  ;;  %v1912_v26 = vld [vmem:[#allocation2 + $0x22] sm:$0xff]  ;;  %v1913_v29 = vld [vmem:[#allocation2 + $0x32] sm:$0xff] }
 0x1f2   :  { %v1352_v33 = vpop.permute.xlu1 %1351  ;;  %v1354_v36 = vpop.permute.xlu0 %1353 }
 0x1f3   :  { %1503 = vst.msk [vmem:[#allocation3 + $0x148] sm:$0xff] %vm1461_vm5, %v1352_v33  ;;  %1504 = vst.msk [vmem:[#allocation3 + $0x150] sm:$0xff] %vm1461_vm5, %v1354_v36 }
 0x1f4   :  { %1724 = vrot.lane.b32.xlu1 %v1561_v32, %s9809_s18  ;;  %1726 = vrot.lane.b32.xlu0 %v1562_v34, %s9809_s18  ;;  %v1914_v32 = vld [vmem:[#allocation2 + $0x3a] sm:$0xff]  ;;  %v1915_v34 = vld [vmem:[#allocation2 + $0x4a] sm:$0xff] }
 0x1f6   :  { %v1356_v39 = vpop.permute.xlu1 %1355  ;;  %v1358_v41 = vpop.permute.xlu0 %1357 }
 0x1f7   :  { %1505 = vst.msk [vmem:[#allocation3 + $0x158] sm:$0xff] %vm1461_vm5, %v1356_v39  ;;  %1506 = vst.msk [vmem:[#allocation3 + $0x160] sm:$0xff] %vm1461_vm5, %v1358_v41 }
 0x1f8   :  { %1728 = vrot.lane.b32.xlu1 %v1563_v38, %s9809_s18  ;;  %1730 = vrot.lane.b32.xlu0 %v1564_v40, %s9809_s18  ;;  %v1916_v38 = vld [vmem:[#allocation2 + $0x52] sm:$0xff]  ;;  %v1917_v40 = vld [vmem:[#allocation2 + $0x62] sm:$0xff] }
 0x1fa   :  { %v1360_v44 = vpop.permute.xlu1 %1359  ;;  %v1362_v47 = vpop.permute.xlu0 %1361 }
 0x1fb   :  { %1507 = vst.msk [vmem:[#allocation3 + $0x168] sm:$0xff] %vm1461_vm5, %v1360_v44  ;;  %1508 = vst.msk [vmem:[#allocation3 + $0x170] sm:$0xff] %vm1461_vm5, %v1362_v47 }
 0x1fc   :  { %1732 = vrot.lane.b32.xlu1 %v1565_v42, %s9809_s18  ;;  %1734 = vrot.lane.b32.xlu0 %v1566_v46, %s9809_s18  ;;  %v1918_v42 = vld [vmem:[#allocation2 + $0x6a] sm:$0xff]  ;;  %v1919_v46 = vld [vmem:[#allocation2 + $0x7a] sm:$0xff] }
 0x1fe   :  { %v1364_v49 = vpop.permute.xlu1 %1363  ;;  %v1366_v52 = vpop.permute.xlu0 %1365 }
 0x1ff   :  { %1509 = vst.msk [vmem:[#allocation3 + $0x178] sm:$0xff] %vm1461_vm5, %v1364_v49  ;;  %1510 = vst.msk [vmem:[#allocation3 + $0x180] sm:$0xff] %vm1461_vm5, %v1366_v52 }
 0x200   :  { %1736 = vrot.lane.b32.xlu1 %v1567_v48, %s9809_s18  ;;  %1738 = vrot.lane.b32.xlu0 %v1568_v50, %s9809_s18  ;;  %v1920_v48 = vld [vmem:[#allocation2 + $0x82] sm:$0xff]  ;;  %v1921_v50 = vld [vmem:[#allocation2 + $0x92] sm:$0xff] }
 0x202   :  { %v1368_v54 = vpop.permute.xlu1 %1367  ;;  %v1370_v59 = vpop.permute.xlu0 %1369 }
 0x203   :  { %1511 = vst.msk [vmem:[#allocation3 + $0x188] sm:$0xff] %vm1461_vm5, %v1368_v54  ;;  %1512 = vst.msk [vmem:[#allocation3 + $0x190] sm:$0xff] %vm1461_vm5, %v1370_v59 }
 0x204   :  { %1740 = vrot.lane.b32.xlu1 %v1569_v12, %s9809_s18  ;;  %1742 = vrot.lane.b32.xlu0 %v1570_v55, %s9809_s18  ;;  %v1922_v12 = vld [vmem:[#allocation2 + $0x9a] sm:$0xff]  ;;  %v1923_v55 = vld [vmem:[#allocation2 + $0xaa] sm:$0xff] }
 0x206   :  { %v1372_v57 = vpop.permute.xlu1 %1371  ;;  %v1374_v3 = vpop.permute.xlu0 %1373 }
 0x207   :  { %1513 = vst.msk [vmem:[#allocation3 + $0x198] sm:$0xff] %vm1461_vm5, %v1372_v57  ;;  %1514 = vst.msk [vmem:[#allocation3 + $0x1a0] sm:$0xff] %vm1461_vm5, %v1374_v3 }
 0x208   :  { %1744 = vrot.lane.b32.xlu1 %v1571_v56, %s9809_s18  ;;  %1746 = vrot.lane.b32.xlu0 %v1572_v7, %s9809_s18  ;;  %v1924_v56 = vld [vmem:[#allocation2 + $0xb2] sm:$0xff]  ;;  %v1925_v7 = vld [vmem:[#allocation2 + $0xc2] sm:$0xff] }
 0x20a   :  { %v1376_v63 = vpop.permute.xlu1 %1375  ;;  %v1378_v4 = vpop.permute.xlu0 %1377 }
 0x20b   :  { %1515 = vst.msk [vmem:[#allocation3 + $0x1a8] sm:$0xff] %vm1461_vm5, %v1376_v63  ;;  %1516 = vst.msk [vmem:[#allocation3 + $0x1b0] sm:$0xff] %vm1461_vm5, %v1378_v4 }
 0x20c   :  { %1748 = vrot.lane.b32.xlu1 %v1573_v62, %s9809_s18  ;;  %1750 = vrot.lane.b32.xlu0 %v1574_v2, %s9809_s18  ;;  %v1926_v62 = vld [vmem:[#allocation2 + $0xca] sm:$0xff]  ;;  %v1927_v2 = vld [vmem:[#allocation2 + $0xda] sm:$0xff] }
 0x20e   :  { %v1380_v8 = vpop.permute.xlu1 %1379  ;;  %v1382_v13 = vpop.permute.xlu0 %1381 }
 0x20f   :  { %1517 = vst.msk [vmem:[#allocation3 + $0x1b8] sm:$0xff] %vm1461_vm5, %v1380_v8  ;;  %1518 = vst.msk [vmem:[#allocation3 + $0x1c0] sm:$0xff] %vm1461_vm5, %v1382_v13 }
 0x210   :  { %1752 = vrot.lane.b32.xlu1 %v1575_v6, %s9809_s18  ;;  %1754 = vrot.lane.b32.xlu0 %v1576_v11, %s9809_s18  ;;  %v1928_v6 = vld [vmem:[#allocation2 + $0xe2] sm:$0xff]  ;;  %v1929_v11 = vld [vmem:[#allocation2 + $0xf2] sm:$0xff] }
 0x212   :  { %v1384_v20 = vpop.permute.xlu1 %1383  ;;  %v1386_v28 = vpop.permute.xlu0 %1385 }
 0x213   :  { %1519 = vst.msk [vmem:[#allocation3 + $0x1c8] sm:$0xff] %vm1461_vm5, %v1384_v20  ;;  %1520 = vst.msk [vmem:[#allocation3 + $0x1d0] sm:$0xff] %vm1461_vm5, %v1386_v28 }
 0x214   :  { %1756 = vrot.lane.b32.xlu1 %v1577_v16, %s9809_s18  ;;  %1758 = vrot.lane.b32.xlu0 %v1578_v24, %s9809_s18  ;;  %v1930_v16 = vld [vmem:[#allocation2 + $0xfa] sm:$0xff]  ;;  %v1931_v24 = vld [vmem:[#allocation2 + $0x10a] sm:$0xff] }
 0x216   :  { %v1388_v43 = vpop.permute.xlu1 %1387  ;;  %v1390_v58 = vpop.permute.xlu0 %1389 }
 0x217   :  { %1521 = vst.msk [vmem:[#allocation3 + $0x1d8] sm:$0xff] %vm1461_vm5, %v1388_v43  ;;  %1522 = vst.msk [vmem:[#allocation3 + $0x1e0] sm:$0xff] %vm1461_vm5, %v1390_v58 }
 0x218   :  { %1760 = vrot.lane.b32.xlu1 %v1579_v35, %s9809_s18  ;;  %1762 = vrot.lane.b32.xlu0 %v1580_v51, %s9809_s18  ;;  %v1932_v35 = vld [vmem:[#allocation2 + $0x112] sm:$0xff]  ;;  %v1933_v51 = vld [vmem:[#allocation2 + $0x122] sm:$0xff] }
 0x21a   :  { %v1392_v1 = vpop.permute.xlu1 %1391  ;;  %v1394_v9 = vpop.permute.xlu0 %1393 }
 0x21b   :  { %1523 = vst.msk [vmem:[#allocation3 + $0x1e8] sm:$0xff] %vm1461_vm5, %v1392_v1  ;;  %1524 = vst.msk [vmem:[#allocation3 + $0x1f0] sm:$0xff] %vm1461_vm5, %v1394_v9 }
 0x21c   :  { %1764 = vrot.lane.b32.xlu1 %v1581_v60, %s9809_s18  ;;  %1766 = vrot.lane.b32.xlu0 %v1582_v5, %s9809_s18  ;;  %v1934_v60 = vld [vmem:[#allocation2 + $0x12a] sm:$0xff]  ;;  %v1935_v5 = vld [vmem:[#allocation2 + $0x13a] sm:$0xff] }
 0x21e   :  { %v1396_v21 = vpop.permute.xlu1 %1395  ;;  %v1655_v31 = vpop.permute.xlu0 %1654 }
 0x21f   :  { %1525 = vst.msk [vmem:[#allocation3 + $0x1f8] sm:$0xff] %vm1461_vm5, %v1396_v21  ;;  %vm7176_vm5 = vcmask 458112  }
 0x220   :  { %1768 = vrot.lane.b32.xlu1 %v1583_v14, %s9809_s18  ;;  %1847 = vst.msk [vmem:[#allocation3] sm:$0xff] %vm1846_vm6, %v1655_v31  ;;  %1770 = vrot.lane.b32.xlu0 %v1584_v53, %s9809_s18  ;;  %v1936_v14 = vld [vmem:[#allocation2 + $0x142] sm:$0xff]  ;;  %v1937_v53 = vld [vmem:[#allocation2 + $0x152] sm:$0xff] }
 0x222   :  { %v1657_v17 = vpop.permute.xlu1 %1656  ;;  %v1659_v37 = vpop.permute.xlu0 %1658 }
 0x223   :  { %1848 = vst.msk [vmem:[#allocation3 + $0x8] sm:$0xff] %vm1846_vm6, %v1657_v17  ;;  %1849 = vst.msk [vmem:[#allocation3 + $0x10] sm:$0xff] %vm1846_vm6, %v1659_v37 }
 0x224   :  { %1772 = vrot.lane.b32.xlu1 %v1585_v45, %s9809_s18  ;;  %1774 = vrot.lane.b32.xlu0 %v1586_v0, %s9809_s18  ;;  %v1938_v45 = vld [vmem:[#allocation2 + $0x15a] sm:$0xff]  ;;  %v1939_v0 = vld [vmem:[#allocation2 + $0x16a] sm:$0xff] }
 0x226   :  { %v1661_v61 = vpop.permute.xlu1 %1660  ;;  %v1663_v15 = vpop.permute.xlu0 %1662 }
 0x227   :  { %1850 = vst.msk [vmem:[#allocation3 + $0x18] sm:$0xff] %vm1846_vm6, %v1661_v61  ;;  %1851 = vst.msk [vmem:[#allocation3 + $0x20] sm:$0xff] %vm1846_vm6, %v1663_v15 }
 0x228   :  { %1776 = vrot.lane.b32.xlu1 %v1587_v25, %s9809_s18  ;;  %1778 = vrot.lane.b32.xlu0 %v1588_v10, %s9809_s18  ;;  %v1940_v25 = vld [vmem:[#allocation2 + $0x172] sm:$0xff]  ;;  %v1941_v10 = vld [vmem:[#allocation2 + $0x182] sm:$0xff] }
 0x22a   :  { %v1665_v19 = vpop.permute.xlu1 %1664  ;;  %v1667_v23 = vpop.permute.xlu0 %1666 }
 0x22b   :  { %1852 = vst.msk [vmem:[#allocation3 + $0x28] sm:$0xff] %vm1846_vm6, %v1665_v19  ;;  %1853 = vst.msk [vmem:[#allocation3 + $0x30] sm:$0xff] %vm1846_vm6, %v1667_v23 }
 0x22c   :  { %1780 = vrot.lane.b32.xlu1 %v1589_v18, %s9809_s18  ;;  %2039 = vrot.lane.b32.xlu0 %v1911_v22, %s9810_s19  ;;  %v1942_v18 = vld [vmem:[#allocation2 + $0x18a] sm:$0xff] }
 0x22d   :  { %v1943_v22 = vld [vmem:[#allocation2 + $0x1ca] sm:$0xff] }
 0x22e   :  { %v1669_v27 = vpop.permute.xlu1 %1668  ;;  %v1671_v30 = vpop.permute.xlu0 %1670 }
 0x22f   :  { %1854 = vst.msk [vmem:[#allocation3 + $0x38] sm:$0xff] %vm1846_vm6, %v1669_v27  ;;  %1855 = vst.msk [vmem:[#allocation3 + $0x40] sm:$0xff] %vm1846_vm6, %v1671_v30 }
 0x230   :  { %2041 = vrot.lane.b32.xlu1 %v1912_v26, %s9810_s19  ;;  %2043 = vrot.lane.b32.xlu0 %v1913_v29, %s9810_s19  ;;  %v1944_v26 = vld [vmem:[#allocation2 + $0x1d2] sm:$0xff]  ;;  %v1945_v29 = vld [vmem:[#allocation2 + $0x1e2] sm:$0xff] }
 0x232   :  { %v1673_v33 = vpop.permute.xlu1 %1672  ;;  %v1675_v36 = vpop.permute.xlu0 %1674 }
 0x233   :  { %1856 = vst.msk [vmem:[#allocation3 + $0x48] sm:$0xff] %vm1846_vm6, %v1673_v33  ;;  %1857 = vst.msk [vmem:[#allocation3 + $0x50] sm:$0xff] %vm1846_vm6, %v1675_v36 }
 0x234   :  { %2045 = vrot.lane.b32.xlu1 %v1914_v32, %s9810_s19  ;;  %2047 = vrot.lane.b32.xlu0 %v1915_v34, %s9810_s19  ;;  %v1946_v32 = vld [vmem:[#allocation2 + $0x1ea] sm:$0xff]  ;;  %v1947_v34 = vld [vmem:[#allocation2 + $0x1fa] sm:$0xff] }
 0x236   :  { %v1677_v39 = vpop.permute.xlu1 %1676  ;;  %v1679_v41 = vpop.permute.xlu0 %1678 }
 0x237   :  { %1858 = vst.msk [vmem:[#allocation3 + $0x58] sm:$0xff] %vm1846_vm6, %v1677_v39  ;;  %1859 = vst.msk [vmem:[#allocation3 + $0x60] sm:$0xff] %vm1846_vm6, %v1679_v41 }
 0x238   :  { %2049 = vrot.lane.b32.xlu1 %v1916_v38, %s9810_s19  ;;  %2051 = vrot.lane.b32.xlu0 %v1917_v40, %s9810_s19  ;;  %v1948_v38 = vld [vmem:[#allocation2 + $0x202] sm:$0xff]  ;;  %v1949_v40 = vld [vmem:[#allocation2 + $0x212] sm:$0xff] }
 0x23a   :  { %v1681_v44 = vpop.permute.xlu1 %1680  ;;  %v1683_v47 = vpop.permute.xlu0 %1682 }
 0x23b   :  { %1860 = vst.msk [vmem:[#allocation3 + $0x68] sm:$0xff] %vm1846_vm6, %v1681_v44  ;;  %1861 = vst.msk [vmem:[#allocation3 + $0x70] sm:$0xff] %vm1846_vm6, %v1683_v47 }
 0x23c   :  { %2053 = vrot.lane.b32.xlu1 %v1918_v42, %s9810_s19  ;;  %2055 = vrot.lane.b32.xlu0 %v1919_v46, %s9810_s19  ;;  %v1950_v42 = vld [vmem:[#allocation2 + $0x21a] sm:$0xff]  ;;  %v1951_v46 = vld [vmem:[#allocation2 + $0x22a] sm:$0xff] }
 0x23e   :  { %v1685_v49 = vpop.permute.xlu1 %1684  ;;  %v1687_v52 = vpop.permute.xlu0 %1686 }
 0x23f   :  { %1862 = vst.msk [vmem:[#allocation3 + $0x78] sm:$0xff] %vm1846_vm6, %v1685_v49  ;;  %1863 = vst.msk [vmem:[#allocation3 + $0x80] sm:$0xff] %vm1846_vm6, %v1687_v52 }
 0x240   :  { %2057 = vrot.lane.b32.xlu1 %v1920_v48, %s9810_s19  ;;  %2059 = vrot.lane.b32.xlu0 %v1921_v50, %s9810_s19  ;;  %v1952_v48 = vld [vmem:[#allocation2 + $0x232] sm:$0xff]  ;;  %v1953_v50 = vld [vmem:[#allocation2 + $0x242] sm:$0xff] }
 0x242   :  { %v1689_v54 = vpop.permute.xlu1 %1688  ;;  %v1691_v59 = vpop.permute.xlu0 %1690 }
 0x243   :  { %1864 = vst.msk [vmem:[#allocation3 + $0x88] sm:$0xff] %vm1846_vm6, %v1689_v54  ;;  %1865 = vst.msk [vmem:[#allocation3 + $0x90] sm:$0xff] %vm1846_vm6, %v1691_v59 }
 0x244   :  { %2061 = vrot.lane.b32.xlu1 %v1922_v12, %s9810_s19  ;;  %2063 = vrot.lane.b32.xlu0 %v1923_v55, %s9810_s19  ;;  %v1954_v12 = vld [vmem:[#allocation2 + $0x24a] sm:$0xff]  ;;  %v1955_v55 = vld [vmem:[#allocation2 + $0x25a] sm:$0xff] }
 0x246   :  { %v1693_v57 = vpop.permute.xlu1 %1692  ;;  %v1695_v3 = vpop.permute.xlu0 %1694 }
 0x247   :  { %1866 = vst.msk [vmem:[#allocation3 + $0x98] sm:$0xff] %vm1846_vm6, %v1693_v57  ;;  %1867 = vst.msk [vmem:[#allocation3 + $0xa0] sm:$0xff] %vm1846_vm6, %v1695_v3 }
 0x248   :  { %2065 = vrot.lane.b32.xlu1 %v1924_v56, %s9810_s19  ;;  %2067 = vrot.lane.b32.xlu0 %v1925_v7, %s9810_s19  ;;  %v1956_v56 = vld [vmem:[#allocation2 + $0x262] sm:$0xff]  ;;  %v1957_v7 = vld [vmem:[#allocation2 + $0x272] sm:$0xff] }
 0x24a   :  { %v1697_v63 = vpop.permute.xlu1 %1696  ;;  %v1699_v4 = vpop.permute.xlu0 %1698 }
 0x24b   :  { %1868 = vst.msk [vmem:[#allocation3 + $0xa8] sm:$0xff] %vm1846_vm6, %v1697_v63  ;;  %1869 = vst.msk [vmem:[#allocation3 + $0xb0] sm:$0xff] %vm1846_vm6, %v1699_v4 }
 0x24c   :  { %2069 = vrot.lane.b32.xlu1 %v1926_v62, %s9810_s19  ;;  %2071 = vrot.lane.b32.xlu0 %v1927_v2, %s9810_s19  ;;  %v1958_v62 = vld [vmem:[#allocation2 + $0x27a] sm:$0xff]  ;;  %v1959_v2 = vld [vmem:[#allocation2 + $0x28a] sm:$0xff] }
 0x24e   :  { %v1701_v8 = vpop.permute.xlu1 %1700  ;;  %v1703_v13 = vpop.permute.xlu0 %1702 }
 0x24f   :  { %1870 = vst.msk [vmem:[#allocation3 + $0xb8] sm:$0xff] %vm1846_vm6, %v1701_v8  ;;  %1871 = vst.msk [vmem:[#allocation3 + $0xc0] sm:$0xff] %vm1846_vm6, %v1703_v13 }
 0x250   :  { %2073 = vrot.lane.b32.xlu1 %v1928_v6, %s9810_s19  ;;  %2075 = vrot.lane.b32.xlu0 %v1929_v11, %s9810_s19  ;;  %v1960_v6 = vld [vmem:[#allocation2 + $0x292] sm:$0xff]  ;;  %v1961_v11 = vld [vmem:[#allocation2 + $0x2a2] sm:$0xff] }
 0x252   :  { %v1705_v20 = vpop.permute.xlu1 %1704  ;;  %v1707_v28 = vpop.permute.xlu0 %1706 }
 0x253   :  { %1872 = vst.msk [vmem:[#allocation3 + $0xc8] sm:$0xff] %vm1846_vm6, %v1705_v20  ;;  %1873 = vst.msk [vmem:[#allocation3 + $0xd0] sm:$0xff] %vm1846_vm6, %v1707_v28 }
 0x254   :  { %2077 = vrot.lane.b32.xlu1 %v1930_v16, %s9810_s19  ;;  %2079 = vrot.lane.b32.xlu0 %v1931_v24, %s9810_s19  ;;  %v1962_v16 = vld [vmem:[#allocation2 + $0x2aa] sm:$0xff]  ;;  %v1963_v24 = vld [vmem:[#allocation2 + $0x2ba] sm:$0xff] }
 0x256   :  { %v1709_v43 = vpop.permute.xlu1 %1708  ;;  %v1711_v58 = vpop.permute.xlu0 %1710 }
 0x257   :  { %1874 = vst.msk [vmem:[#allocation3 + $0xd8] sm:$0xff] %vm1846_vm6, %v1709_v43  ;;  %1875 = vst.msk [vmem:[#allocation3 + $0xe0] sm:$0xff] %vm1846_vm6, %v1711_v58 }
 0x258   :  { %2081 = vrot.lane.b32.xlu1 %v1932_v35, %s9810_s19  ;;  %2083 = vrot.lane.b32.xlu0 %v1933_v51, %s9810_s19  ;;  %v1964_v35 = vld [vmem:[#allocation2 + $0x2c2] sm:$0xff]  ;;  %v1965_v51 = vld [vmem:[#allocation2 + $0x2d2] sm:$0xff] }
 0x25a   :  { %v1713_v1 = vpop.permute.xlu1 %1712  ;;  %v1715_v9 = vpop.permute.xlu0 %1714 }
 0x25b   :  { %1876 = vst.msk [vmem:[#allocation3 + $0xe8] sm:$0xff] %vm1846_vm6, %v1713_v1  ;;  %1877 = vst.msk [vmem:[#allocation3 + $0xf0] sm:$0xff] %vm1846_vm6, %v1715_v9 }
 0x25c   :  { %2085 = vrot.lane.b32.xlu1 %v1934_v60, %s9810_s19  ;;  %2087 = vrot.lane.b32.xlu0 %v1935_v5, %s9810_s19  ;;  %v1966_v60 = vld [vmem:[#allocation2 + $0x2da] sm:$0xff]  ;;  %v1967_v5 = vld [vmem:[#allocation2 + $0x2ea] sm:$0xff] }
 0x25e   :  { %v1717_v21 = vpop.permute.xlu1 %1716  ;;  %v1719_v31 = vpop.permute.xlu0 %1718 }
 0x25f   :  { %1878 = vst.msk [vmem:[#allocation3 + $0xf8] sm:$0xff] %vm1846_vm6, %v1717_v21  ;;  %1879 = vst.msk [vmem:[#allocation3 + $0x100] sm:$0xff] %vm1846_vm6, %v1719_v31 }
 0x260   :  { %2089 = vrot.lane.b32.xlu1 %v1936_v14, %s9810_s19  ;;  %2091 = vrot.lane.b32.xlu0 %v1937_v53, %s9810_s19  ;;  %v1968_v14 = vld [vmem:[#allocation2 + $0x2f2] sm:$0xff]  ;;  %v1969_v53 = vld [vmem:[#allocation2 + $0x302] sm:$0xff] }
 0x262   :  { %v1721_v17 = vpop.permute.xlu1 %1720  ;;  %v1723_v37 = vpop.permute.xlu0 %1722 }
 0x263   :  { %1880 = vst.msk [vmem:[#allocation3 + $0x108] sm:$0xff] %vm1846_vm6, %v1721_v17  ;;  %1881 = vst.msk [vmem:[#allocation3 + $0x110] sm:$0xff] %vm1846_vm6, %v1723_v37 }
 0x264   :  { %2093 = vrot.lane.b32.xlu1 %v1938_v45, %s9810_s19  ;;  %2095 = vrot.lane.b32.xlu0 %v1939_v0, %s9810_s19  ;;  %v1970_v45 = vld [vmem:[#allocation2 + $0x30a] sm:$0xff]  ;;  %v1971_v0 = vld [vmem:[#allocation2 + $0x31a] sm:$0xff] }
 0x266   :  { %v1725_v61 = vpop.permute.xlu1 %1724  ;;  %v1727_v15 = vpop.permute.xlu0 %1726 }
 0x267   :  { %1882 = vst.msk [vmem:[#allocation3 + $0x118] sm:$0xff] %vm1846_vm6, %v1725_v61  ;;  %1883 = vst.msk [vmem:[#allocation3 + $0x120] sm:$0xff] %vm1846_vm6, %v1727_v15 }
 0x268   :  { %2097 = vrot.lane.b32.xlu1 %v1940_v25, %s9810_s19  ;;  %2099 = vrot.lane.b32.xlu0 %v1941_v10, %s9810_s19  ;;  %v1972_v25 = vld [vmem:[#allocation2 + $0x322] sm:$0xff]  ;;  %v1973_v10 = vld [vmem:[#allocation2 + $0x332] sm:$0xff] }
 0x26a   :  { %v1729_v19 = vpop.permute.xlu1 %1728  ;;  %v1731_v23 = vpop.permute.xlu0 %1730 }
 0x26b   :  { %1884 = vst.msk [vmem:[#allocation3 + $0x128] sm:$0xff] %vm1846_vm6, %v1729_v19  ;;  %1885 = vst.msk [vmem:[#allocation3 + $0x130] sm:$0xff] %vm1846_vm6, %v1731_v23 }
 0x26c   :  { %2101 = vrot.lane.b32.xlu1 %v1942_v18, %s9810_s19  ;;  %2103 = vrot.lane.b32.xlu0 %v1943_v22, %s9810_s19  ;;  %v1974_v18 = vld [vmem:[#allocation2 + $0x33a] sm:$0xff]  ;;  %v2297_v22 = vld [vmem:[#allocation2 + $0x30] sm:$0xff] }
 0x26e   :  { %v1733_v27 = vpop.permute.xlu1 %1732  ;;  %v1735_v30 = vpop.permute.xlu0 %1734 }
 0x26f   :  { %1886 = vst.msk [vmem:[#allocation3 + $0x138] sm:$0xff] %vm1846_vm6, %v1733_v27  ;;  %1887 = vst.msk [vmem:[#allocation3 + $0x140] sm:$0xff] %vm1846_vm6, %v1735_v30 }
 0x270   :  { %2105 = vrot.lane.b32.xlu1 %v1944_v26, %s9810_s19  ;;  %2107 = vrot.lane.b32.xlu0 %v1945_v29, %s9810_s19  ;;  %v2298_v26 = vld [vmem:[#allocation2 + $0x38] sm:$0xff]  ;;  %v2299_v29 = vld [vmem:[#allocation2 + $0x48] sm:$0xff] }
 0x272   :  { %v1737_v33 = vpop.permute.xlu1 %1736  ;;  %v1739_v36 = vpop.permute.xlu0 %1738 }
 0x273   :  { %1888 = vst.msk [vmem:[#allocation3 + $0x148] sm:$0xff] %vm1846_vm6, %v1737_v33  ;;  %1889 = vst.msk [vmem:[#allocation3 + $0x150] sm:$0xff] %vm1846_vm6, %v1739_v36 }
 0x274   :  { %2109 = vrot.lane.b32.xlu1 %v1946_v32, %s9810_s19  ;;  %2111 = vrot.lane.b32.xlu0 %v1947_v34, %s9810_s19  ;;  %v2300_v32 = vld [vmem:[#allocation2 + $0x50] sm:$0xff]  ;;  %v2301_v34 = vld [vmem:[#allocation2 + $0x60] sm:$0xff] }
 0x276   :  { %v1741_v39 = vpop.permute.xlu1 %1740  ;;  %v1743_v41 = vpop.permute.xlu0 %1742 }
 0x277   :  { %1890 = vst.msk [vmem:[#allocation3 + $0x158] sm:$0xff] %vm1846_vm6, %v1741_v39  ;;  %1891 = vst.msk [vmem:[#allocation3 + $0x160] sm:$0xff] %vm1846_vm6, %v1743_v41 }
 0x278   :  { %2113 = vrot.lane.b32.xlu1 %v1948_v38, %s9810_s19  ;;  %2115 = vrot.lane.b32.xlu0 %v1949_v40, %s9810_s19  ;;  %v2302_v38 = vld [vmem:[#allocation2 + $0x68] sm:$0xff]  ;;  %v2303_v40 = vld [vmem:[#allocation2 + $0x78] sm:$0xff] }
 0x27a   :  { %v1745_v44 = vpop.permute.xlu1 %1744  ;;  %v1747_v47 = vpop.permute.xlu0 %1746 }
 0x27b   :  { %1892 = vst.msk [vmem:[#allocation3 + $0x168] sm:$0xff] %vm1846_vm6, %v1745_v44  ;;  %1893 = vst.msk [vmem:[#allocation3 + $0x170] sm:$0xff] %vm1846_vm6, %v1747_v47 }
 0x27c   :  { %2117 = vrot.lane.b32.xlu1 %v1950_v42, %s9810_s19  ;;  %2119 = vrot.lane.b32.xlu0 %v1951_v46, %s9810_s19  ;;  %v2304_v42 = vld [vmem:[#allocation2 + $0x80] sm:$0xff]  ;;  %v2305_v46 = vld [vmem:[#allocation2 + $0x90] sm:$0xff] }
 0x27e   :  { %v1749_v49 = vpop.permute.xlu1 %1748  ;;  %v1751_v52 = vpop.permute.xlu0 %1750 }
 0x27f   :  { %1894 = vst.msk [vmem:[#allocation3 + $0x178] sm:$0xff] %vm1846_vm6, %v1749_v49  ;;  %1895 = vst.msk [vmem:[#allocation3 + $0x180] sm:$0xff] %vm1846_vm6, %v1751_v52 }
 0x280   :  { %2121 = vrot.lane.b32.xlu1 %v1952_v48, %s9810_s19  ;;  %2123 = vrot.lane.b32.xlu0 %v1953_v50, %s9810_s19  ;;  %v2306_v48 = vld [vmem:[#allocation2 + $0x98] sm:$0xff]  ;;  %v2307_v50 = vld [vmem:[#allocation2 + $0xa8] sm:$0xff] }
 0x282   :  { %v1753_v54 = vpop.permute.xlu1 %1752  ;;  %v1755_v59 = vpop.permute.xlu0 %1754 }
 0x283   :  { %1896 = vst.msk [vmem:[#allocation3 + $0x188] sm:$0xff] %vm1846_vm6, %v1753_v54  ;;  %1897 = vst.msk [vmem:[#allocation3 + $0x190] sm:$0xff] %vm1846_vm6, %v1755_v59 }
 0x284   :  { %2125 = vrot.lane.b32.xlu1 %v1954_v12, %s9810_s19  ;;  %2127 = vrot.lane.b32.xlu0 %v1955_v55, %s9810_s19  ;;  %v2308_v12 = vld [vmem:[#allocation2 + $0xb0] sm:$0xff]  ;;  %v2309_v55 = vld [vmem:[#allocation2 + $0xc0] sm:$0xff] }
 0x286   :  { %v1757_v57 = vpop.permute.xlu1 %1756  ;;  %v1759_v3 = vpop.permute.xlu0 %1758 }
 0x287   :  { %1898 = vst.msk [vmem:[#allocation3 + $0x198] sm:$0xff] %vm1846_vm6, %v1757_v57  ;;  %1899 = vst.msk [vmem:[#allocation3 + $0x1a0] sm:$0xff] %vm1846_vm6, %v1759_v3 }
 0x288   :  { %2129 = vrot.lane.b32.xlu1 %v1956_v56, %s9810_s19  ;;  %2131 = vrot.lane.b32.xlu0 %v1957_v7, %s9810_s19  ;;  %v2310_v56 = vld [vmem:[#allocation2 + $0xc8] sm:$0xff]  ;;  %v2311_v7 = vld [vmem:[#allocation2 + $0xd8] sm:$0xff] }
 0x28a   :  { %v1761_v63 = vpop.permute.xlu1 %1760  ;;  %v1763_v4 = vpop.permute.xlu0 %1762 }
 0x28b   :  { %1900 = vst.msk [vmem:[#allocation3 + $0x1a8] sm:$0xff] %vm1846_vm6, %v1761_v63  ;;  %1901 = vst.msk [vmem:[#allocation3 + $0x1b0] sm:$0xff] %vm1846_vm6, %v1763_v4 }
 0x28c   :  { %2133 = vrot.lane.b32.xlu1 %v1958_v62, %s9810_s19  ;;  %2135 = vrot.lane.b32.xlu0 %v1959_v2, %s9810_s19  ;;  %v2312_v62 = vld [vmem:[#allocation2 + $0xe0] sm:$0xff]  ;;  %v2313_v2 = vld [vmem:[#allocation2 + $0xf0] sm:$0xff] }
 0x28e   :  { %v1765_v8 = vpop.permute.xlu1 %1764  ;;  %v1767_v13 = vpop.permute.xlu0 %1766 }
 0x28f   :  { %1902 = vst.msk [vmem:[#allocation3 + $0x1b8] sm:$0xff] %vm1846_vm6, %v1765_v8  ;;  %1903 = vst.msk [vmem:[#allocation3 + $0x1c0] sm:$0xff] %vm1846_vm6, %v1767_v13 }
 0x290   :  { %2137 = vrot.lane.b32.xlu1 %v1960_v6, %s9810_s19  ;;  %2139 = vrot.lane.b32.xlu0 %v1961_v11, %s9810_s19  ;;  %v2314_v6 = vld [vmem:[#allocation2 + $0xf8] sm:$0xff]  ;;  %v2315_v11 = vld [vmem:[#allocation2 + $0x108] sm:$0xff] }
 0x292   :  { %v1769_v20 = vpop.permute.xlu1 %1768  ;;  %v1771_v28 = vpop.permute.xlu0 %1770 }
 0x293   :  { %1904 = vst.msk [vmem:[#allocation3 + $0x1c8] sm:$0xff] %vm1846_vm6, %v1769_v20  ;;  %1905 = vst.msk [vmem:[#allocation3 + $0x1d0] sm:$0xff] %vm1846_vm6, %v1771_v28 }
 0x294   :  { %2141 = vrot.lane.b32.xlu1 %v1962_v16, %s9810_s19  ;;  %2143 = vrot.lane.b32.xlu0 %v1963_v24, %s9810_s19  ;;  %v2316_v16 = vld [vmem:[#allocation2 + $0x110] sm:$0xff]  ;;  %v2317_v24 = vld [vmem:[#allocation2 + $0x120] sm:$0xff] }
 0x296   :  { %v1773_v43 = vpop.permute.xlu1 %1772  ;;  %v1775_v58 = vpop.permute.xlu0 %1774 }
 0x297   :  { %1906 = vst.msk [vmem:[#allocation3 + $0x1d8] sm:$0xff] %vm1846_vm6, %v1773_v43  ;;  %1907 = vst.msk [vmem:[#allocation3 + $0x1e0] sm:$0xff] %vm1846_vm6, %v1775_v58 }
 0x298   :  { %2145 = vrot.lane.b32.xlu1 %v1964_v35, %s9810_s19  ;;  %2147 = vrot.lane.b32.xlu0 %v1965_v51, %s9810_s19  ;;  %v2318_v35 = vld [vmem:[#allocation2 + $0x128] sm:$0xff]  ;;  %v2319_v51 = vld [vmem:[#allocation2 + $0x138] sm:$0xff] }
 0x29a   :  { %v1777_v1 = vpop.permute.xlu1 %1776  ;;  %v1779_v9 = vpop.permute.xlu0 %1778 }
 0x29b   :  { %1908 = vst.msk [vmem:[#allocation3 + $0x1e8] sm:$0xff] %vm1846_vm6, %v1777_v1  ;;  %1909 = vst.msk [vmem:[#allocation3 + $0x1f0] sm:$0xff] %vm1846_vm6, %v1779_v9 }
 0x29c   :  { %2149 = vrot.lane.b32.xlu1 %v1966_v60, %s9810_s19  ;;  %2151 = vrot.lane.b32.xlu0 %v1967_v5, %s9810_s19  ;;  %v2320_v60 = vld [vmem:[#allocation2 + $0x140] sm:$0xff]  ;;  %v2321_v5 = vld [vmem:[#allocation2 + $0x150] sm:$0xff] }
 0x29e   :  { %v1781_v21 = vpop.permute.xlu1 %1780  ;;  %v2040_v31 = vpop.permute.xlu0 %2039 }
 0x29f   :  { %1910 = vst.msk [vmem:[#allocation3 + $0x1f8] sm:$0xff] %vm1846_vm6, %v1781_v21  ;;  %vm7561_vm6 = vcmask 523712  }
 0x2a0   :  { %2153 = vrot.lane.b32.xlu1 %v1968_v14, %s9810_s19  ;;  %2232 = vst.msk [vmem:[#allocation3] sm:$0xff] %vm2231_vm7, %v2040_v31  ;;  %2155 = vrot.lane.b32.xlu0 %v1969_v53, %s9810_s19  ;;  %v2322_v14 = vld [vmem:[#allocation2 + $0x158] sm:$0xff]  ;;  %v2323_v53 = vld [vmem:[#allocation2 + $0x168] sm:$0xff] }
 0x2a2   :  { %v2042_v17 = vpop.permute.xlu1 %2041  ;;  %v2044_v37 = vpop.permute.xlu0 %2043 }
 0x2a3   :  { %2233 = vst.msk [vmem:[#allocation3 + $0x8] sm:$0xff] %vm2231_vm7, %v2042_v17  ;;  %2234 = vst.msk [vmem:[#allocation3 + $0x10] sm:$0xff] %vm2231_vm7, %v2044_v37 }
 0x2a4   :  { %2157 = vrot.lane.b32.xlu1 %v1970_v45, %s9810_s19  ;;  %2159 = vrot.lane.b32.xlu0 %v1971_v0, %s9810_s19  ;;  %v2324_v45 = vld [vmem:[#allocation2 + $0x170] sm:$0xff]  ;;  %v2325_v0 = vld [vmem:[#allocation2 + $0x180] sm:$0xff] }
 0x2a6   :  { %v2046_v61 = vpop.permute.xlu1 %2045  ;;  %v2048_v15 = vpop.permute.xlu0 %2047 }
 0x2a7   :  { %2235 = vst.msk [vmem:[#allocation3 + $0x18] sm:$0xff] %vm2231_vm7, %v2046_v61  ;;  %2236 = vst.msk [vmem:[#allocation3 + $0x20] sm:$0xff] %vm2231_vm7, %v2048_v15 }
 0x2a8   :  { %2161 = vrot.lane.b32.xlu1 %v1972_v25, %s9810_s19  ;;  %2163 = vrot.lane.b32.xlu0 %v1973_v10, %s9810_s19  ;;  %v2326_v25 = vld [vmem:[#allocation2 + $0x188] sm:$0xff]  ;;  %v2327_v10 = vld [vmem:[#allocation2 + $0x198] sm:$0xff] }
 0x2aa   :  { %v2050_v19 = vpop.permute.xlu1 %2049  ;;  %v2052_v23 = vpop.permute.xlu0 %2051 }
 0x2ab   :  { %2237 = vst.msk [vmem:[#allocation3 + $0x28] sm:$0xff] %vm2231_vm7, %v2050_v19  ;;  %2238 = vst.msk [vmem:[#allocation3 + $0x30] sm:$0xff] %vm2231_vm7, %v2052_v23 }
 0x2ac   :  { %2165 = vrot.lane.b32.xlu1 %v1974_v18, %s9810_s19  ;;  %2425 = vrot.lane.b32.xlu0 %v2297_v22, %s9811_s20  ;;  %v2328_v18 = vld [vmem:[#allocation2 + $0x1a0] sm:$0xff] }
 0x2ad   :  { %v2329_v22 = vld [vmem:[#allocation2 + $0x1e0] sm:$0xff] }
 0x2ae   :  { %v2054_v27 = vpop.permute.xlu1 %2053  ;;  %v2056_v30 = vpop.permute.xlu0 %2055 }
 0x2af   :  { %2239 = vst.msk [vmem:[#allocation3 + $0x38] sm:$0xff] %vm2231_vm7, %v2054_v27  ;;  %2240 = vst.msk [vmem:[#allocation3 + $0x40] sm:$0xff] %vm2231_vm7, %v2056_v30 }
 0x2b0   :  { %2427 = vrot.lane.b32.xlu1 %v2298_v26, %s9811_s20  ;;  %2429 = vrot.lane.b32.xlu0 %v2299_v29, %s9811_s20  ;;  %v2330_v26 = vld [vmem:[#allocation2 + $0x1e8] sm:$0xff]  ;;  %v2331_v29 = vld [vmem:[#allocation2 + $0x1f8] sm:$0xff] }
 0x2b2   :  { %v2058_v33 = vpop.permute.xlu1 %2057  ;;  %v2060_v36 = vpop.permute.xlu0 %2059 }
 0x2b3   :  { %2241 = vst.msk [vmem:[#allocation3 + $0x48] sm:$0xff] %vm2231_vm7, %v2058_v33  ;;  %2242 = vst.msk [vmem:[#allocation3 + $0x50] sm:$0xff] %vm2231_vm7, %v2060_v36 }
 0x2b4   :  { %2431 = vrot.lane.b32.xlu1 %v2300_v32, %s9811_s20  ;;  %2433 = vrot.lane.b32.xlu0 %v2301_v34, %s9811_s20  ;;  %v2332_v32 = vld [vmem:[#allocation2 + $0x200] sm:$0xff]  ;;  %v2333_v34 = vld [vmem:[#allocation2 + $0x210] sm:$0xff] }
 0x2b6   :  { %v2062_v39 = vpop.permute.xlu1 %2061  ;;  %v2064_v41 = vpop.permute.xlu0 %2063 }
 0x2b7   :  { %2243 = vst.msk [vmem:[#allocation3 + $0x58] sm:$0xff] %vm2231_vm7, %v2062_v39  ;;  %2244 = vst.msk [vmem:[#allocation3 + $0x60] sm:$0xff] %vm2231_vm7, %v2064_v41 }
 0x2b8   :  { %2435 = vrot.lane.b32.xlu1 %v2302_v38, %s9811_s20  ;;  %2437 = vrot.lane.b32.xlu0 %v2303_v40, %s9811_s20  ;;  %v2334_v38 = vld [vmem:[#allocation2 + $0x218] sm:$0xff]  ;;  %v2335_v40 = vld [vmem:[#allocation2 + $0x228] sm:$0xff] }
 0x2ba   :  { %v2066_v44 = vpop.permute.xlu1 %2065  ;;  %v2068_v47 = vpop.permute.xlu0 %2067 }
 0x2bb   :  { %2245 = vst.msk [vmem:[#allocation3 + $0x68] sm:$0xff] %vm2231_vm7, %v2066_v44  ;;  %2246 = vst.msk [vmem:[#allocation3 + $0x70] sm:$0xff] %vm2231_vm7, %v2068_v47 }
 0x2bc   :  { %2439 = vrot.lane.b32.xlu1 %v2304_v42, %s9811_s20  ;;  %2441 = vrot.lane.b32.xlu0 %v2305_v46, %s9811_s20  ;;  %v2336_v42 = vld [vmem:[#allocation2 + $0x230] sm:$0xff]  ;;  %v2337_v46 = vld [vmem:[#allocation2 + $0x240] sm:$0xff] }
 0x2be   :  { %v2070_v49 = vpop.permute.xlu1 %2069  ;;  %v2072_v52 = vpop.permute.xlu0 %2071 }
 0x2bf   :  { %2247 = vst.msk [vmem:[#allocation3 + $0x78] sm:$0xff] %vm2231_vm7, %v2070_v49  ;;  %2248 = vst.msk [vmem:[#allocation3 + $0x80] sm:$0xff] %vm2231_vm7, %v2072_v52 }
 0x2c0   :  { %2443 = vrot.lane.b32.xlu1 %v2306_v48, %s9811_s20  ;;  %2445 = vrot.lane.b32.xlu0 %v2307_v50, %s9811_s20  ;;  %v2338_v48 = vld [vmem:[#allocation2 + $0x248] sm:$0xff]  ;;  %v2339_v50 = vld [vmem:[#allocation2 + $0x258] sm:$0xff] }
 0x2c2   :  { %v2074_v54 = vpop.permute.xlu1 %2073  ;;  %v2076_v59 = vpop.permute.xlu0 %2075 }
 0x2c3   :  { %2249 = vst.msk [vmem:[#allocation3 + $0x88] sm:$0xff] %vm2231_vm7, %v2074_v54  ;;  %2250 = vst.msk [vmem:[#allocation3 + $0x90] sm:$0xff] %vm2231_vm7, %v2076_v59 }
 0x2c4   :  { %2447 = vrot.lane.b32.xlu1 %v2308_v12, %s9811_s20  ;;  %2449 = vrot.lane.b32.xlu0 %v2309_v55, %s9811_s20  ;;  %v2340_v12 = vld [vmem:[#allocation2 + $0x260] sm:$0xff]  ;;  %v2341_v55 = vld [vmem:[#allocation2 + $0x270] sm:$0xff] }
 0x2c6   :  { %v2078_v57 = vpop.permute.xlu1 %2077  ;;  %v2080_v3 = vpop.permute.xlu0 %2079 }
 0x2c7   :  { %2251 = vst.msk [vmem:[#allocation3 + $0x98] sm:$0xff] %vm2231_vm7, %v2078_v57  ;;  %2252 = vst.msk [vmem:[#allocation3 + $0xa0] sm:$0xff] %vm2231_vm7, %v2080_v3 }
 0x2c8   :  { %2451 = vrot.lane.b32.xlu1 %v2310_v56, %s9811_s20  ;;  %2453 = vrot.lane.b32.xlu0 %v2311_v7, %s9811_s20  ;;  %v2342_v56 = vld [vmem:[#allocation2 + $0x278] sm:$0xff]  ;;  %v2343_v7 = vld [vmem:[#allocation2 + $0x288] sm:$0xff] }
 0x2ca   :  { %v2082_v63 = vpop.permute.xlu1 %2081  ;;  %v2084_v4 = vpop.permute.xlu0 %2083 }
 0x2cb   :  { %2253 = vst.msk [vmem:[#allocation3 + $0xa8] sm:$0xff] %vm2231_vm7, %v2082_v63  ;;  %2254 = vst.msk [vmem:[#allocation3 + $0xb0] sm:$0xff] %vm2231_vm7, %v2084_v4 }
 0x2cc   :  { %2455 = vrot.lane.b32.xlu1 %v2312_v62, %s9811_s20  ;;  %2457 = vrot.lane.b32.xlu0 %v2313_v2, %s9811_s20  ;;  %v2344_v62 = vld [vmem:[#allocation2 + $0x290] sm:$0xff]  ;;  %v2345_v2 = vld [vmem:[#allocation2 + $0x2a0] sm:$0xff] }
 0x2ce   :  { %v2086_v8 = vpop.permute.xlu1 %2085  ;;  %v2088_v13 = vpop.permute.xlu0 %2087 }
 0x2cf   :  { %2255 = vst.msk [vmem:[#allocation3 + $0xb8] sm:$0xff] %vm2231_vm7, %v2086_v8  ;;  %2256 = vst.msk [vmem:[#allocation3 + $0xc0] sm:$0xff] %vm2231_vm7, %v2088_v13 }
 0x2d0   :  { %2459 = vrot.lane.b32.xlu1 %v2314_v6, %s9811_s20  ;;  %2461 = vrot.lane.b32.xlu0 %v2315_v11, %s9811_s20  ;;  %v2346_v6 = vld [vmem:[#allocation2 + $0x2a8] sm:$0xff]  ;;  %v2347_v11 = vld [vmem:[#allocation2 + $0x2b8] sm:$0xff] }
 0x2d2   :  { %v2090_v20 = vpop.permute.xlu1 %2089  ;;  %v2092_v28 = vpop.permute.xlu0 %2091 }
 0x2d3   :  { %2257 = vst.msk [vmem:[#allocation3 + $0xc8] sm:$0xff] %vm2231_vm7, %v2090_v20  ;;  %2258 = vst.msk [vmem:[#allocation3 + $0xd0] sm:$0xff] %vm2231_vm7, %v2092_v28 }
 0x2d4   :  { %2463 = vrot.lane.b32.xlu1 %v2316_v16, %s9811_s20  ;;  %2465 = vrot.lane.b32.xlu0 %v2317_v24, %s9811_s20  ;;  %v2348_v16 = vld [vmem:[#allocation2 + $0x2c0] sm:$0xff]  ;;  %v2349_v24 = vld [vmem:[#allocation2 + $0x2d0] sm:$0xff] }
 0x2d6   :  { %v2094_v43 = vpop.permute.xlu1 %2093  ;;  %v2096_v58 = vpop.permute.xlu0 %2095 }
 0x2d7   :  { %2259 = vst.msk [vmem:[#allocation3 + $0xd8] sm:$0xff] %vm2231_vm7, %v2094_v43  ;;  %2260 = vst.msk [vmem:[#allocation3 + $0xe0] sm:$0xff] %vm2231_vm7, %v2096_v58 }
 0x2d8   :  { %2467 = vrot.lane.b32.xlu1 %v2318_v35, %s9811_s20  ;;  %2469 = vrot.lane.b32.xlu0 %v2319_v51, %s9811_s20  ;;  %v2350_v35 = vld [vmem:[#allocation2 + $0x2d8] sm:$0xff]  ;;  %v2351_v51 = vld [vmem:[#allocation2 + $0x2e8] sm:$0xff] }
 0x2da   :  { %v2098_v1 = vpop.permute.xlu1 %2097  ;;  %v2100_v9 = vpop.permute.xlu0 %2099 }
 0x2db   :  { %2261 = vst.msk [vmem:[#allocation3 + $0xe8] sm:$0xff] %vm2231_vm7, %v2098_v1  ;;  %2262 = vst.msk [vmem:[#allocation3 + $0xf0] sm:$0xff] %vm2231_vm7, %v2100_v9 }
 0x2dc   :  { %2471 = vrot.lane.b32.xlu1 %v2320_v60, %s9811_s20  ;;  %2473 = vrot.lane.b32.xlu0 %v2321_v5, %s9811_s20  ;;  %v2352_v60 = vld [vmem:[#allocation2 + $0x2f0] sm:$0xff]  ;;  %v2353_v5 = vld [vmem:[#allocation2 + $0x300] sm:$0xff] }
 0x2de   :  { %v2102_v21 = vpop.permute.xlu1 %2101  ;;  %v2104_v31 = vpop.permute.xlu0 %2103 }
 0x2df   :  { %2263 = vst.msk [vmem:[#allocation3 + $0xf8] sm:$0xff] %vm2231_vm7, %v2102_v21  ;;  %2264 = vst.msk [vmem:[#allocation3 + $0x100] sm:$0xff] %vm2231_vm7, %v2104_v31 }
 0x2e0   :  { %2475 = vrot.lane.b32.xlu1 %v2322_v14, %s9811_s20  ;;  %2477 = vrot.lane.b32.xlu0 %v2323_v53, %s9811_s20  ;;  %v2354_v14 = vld [vmem:[#allocation2 + $0x308] sm:$0xff]  ;;  %v2355_v53 = vld [vmem:[#allocation2 + $0x318] sm:$0xff] }
 0x2e2   :  { %v2106_v17 = vpop.permute.xlu1 %2105  ;;  %v2108_v37 = vpop.permute.xlu0 %2107 }
 0x2e3   :  { %2265 = vst.msk [vmem:[#allocation3 + $0x108] sm:$0xff] %vm2231_vm7, %v2106_v17  ;;  %2266 = vst.msk [vmem:[#allocation3 + $0x110] sm:$0xff] %vm2231_vm7, %v2108_v37 }
 0x2e4   :  { %2479 = vrot.lane.b32.xlu1 %v2324_v45, %s9811_s20  ;;  %2481 = vrot.lane.b32.xlu0 %v2325_v0, %s9811_s20  ;;  %v2356_v45 = vld [vmem:[#allocation2 + $0x320] sm:$0xff]  ;;  %v2357_v0 = vld [vmem:[#allocation2 + $0x330] sm:$0xff] }
 0x2e6   :  { %v2110_v61 = vpop.permute.xlu1 %2109  ;;  %v2112_v15 = vpop.permute.xlu0 %2111 }
 0x2e7   :  { %2267 = vst.msk [vmem:[#allocation3 + $0x118] sm:$0xff] %vm2231_vm7, %v2110_v61  ;;  %2268 = vst.msk [vmem:[#allocation3 + $0x120] sm:$0xff] %vm2231_vm7, %v2112_v15 }
 0x2e8   :  { %2483 = vrot.lane.b32.xlu1 %v2326_v25, %s9811_s20  ;;  %2485 = vrot.lane.b32.xlu0 %v2327_v10, %s9811_s20  ;;  %v2358_v25 = vld [vmem:[#allocation2 + $0x338] sm:$0xff]  ;;  %v2359_v10 = vld [vmem:[#allocation2 + $0x348] sm:$0xff] }
 0x2ea   :  { %v2114_v19 = vpop.permute.xlu1 %2113  ;;  %v2116_v23 = vpop.permute.xlu0 %2115 }
 0x2eb   :  { %2269 = vst.msk [vmem:[#allocation3 + $0x128] sm:$0xff] %vm2231_vm7, %v2114_v19  ;;  %2270 = vst.msk [vmem:[#allocation3 + $0x130] sm:$0xff] %vm2231_vm7, %v2116_v23 }
 0x2ec   :  { %2487 = vrot.lane.b32.xlu1 %v2328_v18, %s9811_s20  ;;  %2489 = vrot.lane.b32.xlu0 %v2329_v22, %s9811_s20  ;;  %v2360_v18 = vld [vmem:[#allocation2 + $0x350] sm:$0xff] }
 0x2ed   :  { %v2682_v22 = vld [vmem:[#allocation2 + $0x31] sm:$0xff] }
 0x2ee   :  { %v2118_v27 = vpop.permute.xlu1 %2117  ;;  %v2120_v30 = vpop.permute.xlu0 %2119 }
 0x2ef   :  { %2271 = vst.msk [vmem:[#allocation3 + $0x138] sm:$0xff] %vm2231_vm7, %v2118_v27  ;;  %2272 = vst.msk [vmem:[#allocation3 + $0x140] sm:$0xff] %vm2231_vm7, %v2120_v30 }
 0x2f0   :  { %2491 = vrot.lane.b32.xlu1 %v2330_v26, %s9811_s20  ;;  %2493 = vrot.lane.b32.xlu0 %v2331_v29, %s9811_s20  ;;  %v2683_v26 = vld [vmem:[#allocation2 + $0x39] sm:$0xff]  ;;  %v2684_v29 = vld [vmem:[#allocation2 + $0x49] sm:$0xff] }
 0x2f2   :  { %v2122_v33 = vpop.permute.xlu1 %2121  ;;  %v2124_v36 = vpop.permute.xlu0 %2123 }
 0x2f3   :  { %2273 = vst.msk [vmem:[#allocation3 + $0x148] sm:$0xff] %vm2231_vm7, %v2122_v33  ;;  %2274 = vst.msk [vmem:[#allocation3 + $0x150] sm:$0xff] %vm2231_vm7, %v2124_v36 }
 0x2f4   :  { %2495 = vrot.lane.b32.xlu1 %v2332_v32, %s9811_s20  ;;  %2497 = vrot.lane.b32.xlu0 %v2333_v34, %s9811_s20  ;;  %v2685_v32 = vld [vmem:[#allocation2 + $0x51] sm:$0xff]  ;;  %v2686_v34 = vld [vmem:[#allocation2 + $0x61] sm:$0xff] }
 0x2f6   :  { %v2126_v39 = vpop.permute.xlu1 %2125  ;;  %v2128_v41 = vpop.permute.xlu0 %2127 }
 0x2f7   :  { %2275 = vst.msk [vmem:[#allocation3 + $0x158] sm:$0xff] %vm2231_vm7, %v2126_v39  ;;  %2276 = vst.msk [vmem:[#allocation3 + $0x160] sm:$0xff] %vm2231_vm7, %v2128_v41 }
 0x2f8   :  { %2499 = vrot.lane.b32.xlu1 %v2334_v38, %s9811_s20  ;;  %2501 = vrot.lane.b32.xlu0 %v2335_v40, %s9811_s20  ;;  %v2687_v38 = vld [vmem:[#allocation2 + $0x69] sm:$0xff]  ;;  %v2688_v40 = vld [vmem:[#allocation2 + $0x79] sm:$0xff] }
 0x2fa   :  { %v2130_v44 = vpop.permute.xlu1 %2129  ;;  %v2132_v47 = vpop.permute.xlu0 %2131 }
 0x2fb   :  { %2277 = vst.msk [vmem:[#allocation3 + $0x168] sm:$0xff] %vm2231_vm7, %v2130_v44  ;;  %2278 = vst.msk [vmem:[#allocation3 + $0x170] sm:$0xff] %vm2231_vm7, %v2132_v47 }
 0x2fc   :  { %2503 = vrot.lane.b32.xlu1 %v2336_v42, %s9811_s20  ;;  %2505 = vrot.lane.b32.xlu0 %v2337_v46, %s9811_s20  ;;  %v2689_v42 = vld [vmem:[#allocation2 + $0x81] sm:$0xff]  ;;  %v2690_v46 = vld [vmem:[#allocation2 + $0x91] sm:$0xff] }
 0x2fe   :  { %v2134_v49 = vpop.permute.xlu1 %2133  ;;  %v2136_v52 = vpop.permute.xlu0 %2135 }
 0x2ff   :  { %2279 = vst.msk [vmem:[#allocation3 + $0x178] sm:$0xff] %vm2231_vm7, %v2134_v49  ;;  %2280 = vst.msk [vmem:[#allocation3 + $0x180] sm:$0xff] %vm2231_vm7, %v2136_v52 }
 0x300   :  { %2507 = vrot.lane.b32.xlu1 %v2338_v48, %s9811_s20  ;;  %2509 = vrot.lane.b32.xlu0 %v2339_v50, %s9811_s20  ;;  %v2691_v48 = vld [vmem:[#allocation2 + $0x99] sm:$0xff]  ;;  %v2692_v50 = vld [vmem:[#allocation2 + $0xa9] sm:$0xff] }
 0x302   :  { %v2138_v54 = vpop.permute.xlu1 %2137  ;;  %v2140_v59 = vpop.permute.xlu0 %2139 }
 0x303   :  { %2281 = vst.msk [vmem:[#allocation3 + $0x188] sm:$0xff] %vm2231_vm7, %v2138_v54  ;;  %2282 = vst.msk [vmem:[#allocation3 + $0x190] sm:$0xff] %vm2231_vm7, %v2140_v59 }
 0x304   :  { %2511 = vrot.lane.b32.xlu1 %v2340_v12, %s9811_s20  ;;  %2513 = vrot.lane.b32.xlu0 %v2341_v55, %s9811_s20  ;;  %v2693_v12 = vld [vmem:[#allocation2 + $0xb1] sm:$0xff]  ;;  %v2694_v55 = vld [vmem:[#allocation2 + $0xc1] sm:$0xff] }
 0x306   :  { %v2142_v57 = vpop.permute.xlu1 %2141  ;;  %v2144_v3 = vpop.permute.xlu0 %2143 }
 0x307   :  { %2283 = vst.msk [vmem:[#allocation3 + $0x198] sm:$0xff] %vm2231_vm7, %v2142_v57  ;;  %2284 = vst.msk [vmem:[#allocation3 + $0x1a0] sm:$0xff] %vm2231_vm7, %v2144_v3 }
 0x308   :  { %2515 = vrot.lane.b32.xlu1 %v2342_v56, %s9811_s20  ;;  %2517 = vrot.lane.b32.xlu0 %v2343_v7, %s9811_s20  ;;  %v2695_v56 = vld [vmem:[#allocation2 + $0xc9] sm:$0xff]  ;;  %v2696_v7 = vld [vmem:[#allocation2 + $0xd9] sm:$0xff] }
 0x30a   :  { %v2146_v63 = vpop.permute.xlu1 %2145  ;;  %v2148_v4 = vpop.permute.xlu0 %2147 }
 0x30b   :  { %2285 = vst.msk [vmem:[#allocation3 + $0x1a8] sm:$0xff] %vm2231_vm7, %v2146_v63  ;;  %2286 = vst.msk [vmem:[#allocation3 + $0x1b0] sm:$0xff] %vm2231_vm7, %v2148_v4 }
 0x30c   :  { %2519 = vrot.lane.b32.xlu1 %v2344_v62, %s9811_s20  ;;  %2521 = vrot.lane.b32.xlu0 %v2345_v2, %s9811_s20  ;;  %v2697_v62 = vld [vmem:[#allocation2 + $0xe1] sm:$0xff]  ;;  %v2698_v2 = vld [vmem:[#allocation2 + $0xf1] sm:$0xff] }
 0x30e   :  { %v2150_v8 = vpop.permute.xlu1 %2149  ;;  %v2152_v13 = vpop.permute.xlu0 %2151 }
 0x30f   :  { %2287 = vst.msk [vmem:[#allocation3 + $0x1b8] sm:$0xff] %vm2231_vm7, %v2150_v8  ;;  %2288 = vst.msk [vmem:[#allocation3 + $0x1c0] sm:$0xff] %vm2231_vm7, %v2152_v13 }
 0x310   :  { %2523 = vrot.lane.b32.xlu1 %v2346_v6, %s9811_s20  ;;  %2525 = vrot.lane.b32.xlu0 %v2347_v11, %s9811_s20  ;;  %v2699_v6 = vld [vmem:[#allocation2 + $0xf9] sm:$0xff]  ;;  %v2700_v11 = vld [vmem:[#allocation2 + $0x109] sm:$0xff] }
 0x312   :  { %v2154_v20 = vpop.permute.xlu1 %2153  ;;  %v2156_v28 = vpop.permute.xlu0 %2155 }
 0x313   :  { %2289 = vst.msk [vmem:[#allocation3 + $0x1c8] sm:$0xff] %vm2231_vm7, %v2154_v20  ;;  %2290 = vst.msk [vmem:[#allocation3 + $0x1d0] sm:$0xff] %vm2231_vm7, %v2156_v28 }
 0x314   :  { %2527 = vrot.lane.b32.xlu1 %v2348_v16, %s9811_s20  ;;  %2529 = vrot.lane.b32.xlu0 %v2349_v24, %s9811_s20  ;;  %v2701_v16 = vld [vmem:[#allocation2 + $0x111] sm:$0xff]  ;;  %v2702_v24 = vld [vmem:[#allocation2 + $0x121] sm:$0xff] }
 0x316   :  { %v2158_v43 = vpop.permute.xlu1 %2157  ;;  %v2160_v58 = vpop.permute.xlu0 %2159 }
 0x317   :  { %2291 = vst.msk [vmem:[#allocation3 + $0x1d8] sm:$0xff] %vm2231_vm7, %v2158_v43  ;;  %2292 = vst.msk [vmem:[#allocation3 + $0x1e0] sm:$0xff] %vm2231_vm7, %v2160_v58 }
 0x318   :  { %2531 = vrot.lane.b32.xlu1 %v2350_v35, %s9811_s20  ;;  %2533 = vrot.lane.b32.xlu0 %v2351_v51, %s9811_s20  ;;  %v2703_v35 = vld [vmem:[#allocation2 + $0x129] sm:$0xff]  ;;  %v2704_v51 = vld [vmem:[#allocation2 + $0x139] sm:$0xff] }
 0x31a   :  { %v2162_v1 = vpop.permute.xlu1 %2161  ;;  %v2164_v9 = vpop.permute.xlu0 %2163 }
 0x31b   :  { %2293 = vst.msk [vmem:[#allocation3 + $0x1e8] sm:$0xff] %vm2231_vm7, %v2162_v1  ;;  %2294 = vst.msk [vmem:[#allocation3 + $0x1f0] sm:$0xff] %vm2231_vm7, %v2164_v9 }
 0x31c   :  { %2535 = vrot.lane.b32.xlu1 %v2352_v60, %s9811_s20  ;;  %2537 = vrot.lane.b32.xlu0 %v2353_v5, %s9811_s20  ;;  %v2705_v60 = vld [vmem:[#allocation2 + $0x141] sm:$0xff]  ;;  %v2706_v5 = vld [vmem:[#allocation2 + $0x151] sm:$0xff] }
 0x31e   :  { %v2166_v21 = vpop.permute.xlu1 %2165  ;;  %v2426_v31 = vpop.permute.xlu0 %2425 }
 0x31f   :  { %2295 = vst.msk [vmem:[#allocation3 + $0x1f8] sm:$0xff] %vm2231_vm7, %v2166_v21  ;;  %vm7946_vm7 = vcmask 589312  }
 0x320   :  { %2539 = vrot.lane.b32.xlu1 %v2354_v14, %s9811_s20  ;;  %2618 = vst.msk [vmem:[#allocation3] sm:$0xff] %vm2617_vm8, %v2426_v31  ;;  %2541 = vrot.lane.b32.xlu0 %v2355_v53, %s9811_s20  ;;  %v2707_v14 = vld [vmem:[#allocation2 + $0x159] sm:$0xff]  ;;  %v2708_v53 = vld [vmem:[#allocation2 + $0x169] sm:$0xff] }
 0x322   :  { %v2428_v17 = vpop.permute.xlu1 %2427  ;;  %v2430_v37 = vpop.permute.xlu0 %2429 }
 0x323   :  { %2619 = vst.msk [vmem:[#allocation3 + $0x8] sm:$0xff] %vm2617_vm8, %v2428_v17  ;;  %2620 = vst.msk [vmem:[#allocation3 + $0x10] sm:$0xff] %vm2617_vm8, %v2430_v37 }
 0x324   :  { %2543 = vrot.lane.b32.xlu1 %v2356_v45, %s9811_s20  ;;  %2545 = vrot.lane.b32.xlu0 %v2357_v0, %s9811_s20  ;;  %v2709_v45 = vld [vmem:[#allocation2 + $0x171] sm:$0xff]  ;;  %v2710_v0 = vld [vmem:[#allocation2 + $0x181] sm:$0xff] }
 0x326   :  { %v2432_v61 = vpop.permute.xlu1 %2431  ;;  %v2434_v15 = vpop.permute.xlu0 %2433 }
 0x327   :  { %2621 = vst.msk [vmem:[#allocation3 + $0x18] sm:$0xff] %vm2617_vm8, %v2432_v61  ;;  %2622 = vst.msk [vmem:[#allocation3 + $0x20] sm:$0xff] %vm2617_vm8, %v2434_v15 }
 0x328   :  { %2547 = vrot.lane.b32.xlu1 %v2358_v25, %s9811_s20  ;;  %2549 = vrot.lane.b32.xlu0 %v2359_v10, %s9811_s20  ;;  %v2711_v25 = vld [vmem:[#allocation2 + $0x189] sm:$0xff]  ;;  %v2712_v10 = vld [vmem:[#allocation2 + $0x199] sm:$0xff] }
 0x32a   :  { %v2436_v19 = vpop.permute.xlu1 %2435  ;;  %v2438_v23 = vpop.permute.xlu0 %2437 }
 0x32b   :  { %2623 = vst.msk [vmem:[#allocation3 + $0x28] sm:$0xff] %vm2617_vm8, %v2436_v19  ;;  %2624 = vst.msk [vmem:[#allocation3 + $0x30] sm:$0xff] %vm2617_vm8, %v2438_v23 }
 0x32c   :  { %2551 = vrot.lane.b32.xlu1 %v2360_v18, %s9811_s20  ;;  %2810 = vrot.lane.b32.xlu0 %v2682_v22, %s9812_s21  ;;  %v2713_v18 = vld [vmem:[#allocation2 + $0x1a1] sm:$0xff] }
 0x32d   :  { %v2714_v22 = vld [vmem:[#allocation2 + $0x1e1] sm:$0xff] }
 0x32e   :  { %v2440_v27 = vpop.permute.xlu1 %2439  ;;  %v2442_v30 = vpop.permute.xlu0 %2441 }
 0x32f   :  { %2625 = vst.msk [vmem:[#allocation3 + $0x38] sm:$0xff] %vm2617_vm8, %v2440_v27  ;;  %2626 = vst.msk [vmem:[#allocation3 + $0x40] sm:$0xff] %vm2617_vm8, %v2442_v30 }
 0x330   :  { %2812 = vrot.lane.b32.xlu1 %v2683_v26, %s9812_s21  ;;  %2814 = vrot.lane.b32.xlu0 %v2684_v29, %s9812_s21  ;;  %v2715_v26 = vld [vmem:[#allocation2 + $0x1e9] sm:$0xff]  ;;  %v2716_v29 = vld [vmem:[#allocation2 + $0x1f9] sm:$0xff] }
 0x332   :  { %v2444_v33 = vpop.permute.xlu1 %2443  ;;  %v2446_v36 = vpop.permute.xlu0 %2445 }
 0x333   :  { %2627 = vst.msk [vmem:[#allocation3 + $0x48] sm:$0xff] %vm2617_vm8, %v2444_v33  ;;  %2628 = vst.msk [vmem:[#allocation3 + $0x50] sm:$0xff] %vm2617_vm8, %v2446_v36 }
 0x334   :  { %2816 = vrot.lane.b32.xlu1 %v2685_v32, %s9812_s21  ;;  %2818 = vrot.lane.b32.xlu0 %v2686_v34, %s9812_s21  ;;  %v2717_v32 = vld [vmem:[#allocation2 + $0x201] sm:$0xff]  ;;  %v2718_v34 = vld [vmem:[#allocation2 + $0x211] sm:$0xff] }
 0x336   :  { %v2448_v39 = vpop.permute.xlu1 %2447  ;;  %v2450_v41 = vpop.permute.xlu0 %2449 }
 0x337   :  { %2629 = vst.msk [vmem:[#allocation3 + $0x58] sm:$0xff] %vm2617_vm8, %v2448_v39  ;;  %2630 = vst.msk [vmem:[#allocation3 + $0x60] sm:$0xff] %vm2617_vm8, %v2450_v41 }
 0x338   :  { %2820 = vrot.lane.b32.xlu1 %v2687_v38, %s9812_s21  ;;  %2822 = vrot.lane.b32.xlu0 %v2688_v40, %s9812_s21  ;;  %v2719_v38 = vld [vmem:[#allocation2 + $0x219] sm:$0xff]  ;;  %v2720_v40 = vld [vmem:[#allocation2 + $0x229] sm:$0xff] }
 0x33a   :  { %v2452_v44 = vpop.permute.xlu1 %2451  ;;  %v2454_v47 = vpop.permute.xlu0 %2453 }
 0x33b   :  { %2631 = vst.msk [vmem:[#allocation3 + $0x68] sm:$0xff] %vm2617_vm8, %v2452_v44  ;;  %2632 = vst.msk [vmem:[#allocation3 + $0x70] sm:$0xff] %vm2617_vm8, %v2454_v47 }
 0x33c   :  { %2824 = vrot.lane.b32.xlu1 %v2689_v42, %s9812_s21  ;;  %2826 = vrot.lane.b32.xlu0 %v2690_v46, %s9812_s21  ;;  %v2721_v42 = vld [vmem:[#allocation2 + $0x231] sm:$0xff]  ;;  %v2722_v46 = vld [vmem:[#allocation2 + $0x241] sm:$0xff] }
 0x33e   :  { %v2456_v49 = vpop.permute.xlu1 %2455  ;;  %v2458_v52 = vpop.permute.xlu0 %2457 }
 0x33f   :  { %2633 = vst.msk [vmem:[#allocation3 + $0x78] sm:$0xff] %vm2617_vm8, %v2456_v49  ;;  %2634 = vst.msk [vmem:[#allocation3 + $0x80] sm:$0xff] %vm2617_vm8, %v2458_v52 }
 0x340   :  { %2828 = vrot.lane.b32.xlu1 %v2691_v48, %s9812_s21  ;;  %2830 = vrot.lane.b32.xlu0 %v2692_v50, %s9812_s21  ;;  %v2723_v48 = vld [vmem:[#allocation2 + $0x249] sm:$0xff]  ;;  %v2724_v50 = vld [vmem:[#allocation2 + $0x259] sm:$0xff] }
 0x342   :  { %v2460_v54 = vpop.permute.xlu1 %2459  ;;  %v2462_v59 = vpop.permute.xlu0 %2461 }
 0x343   :  { %2635 = vst.msk [vmem:[#allocation3 + $0x88] sm:$0xff] %vm2617_vm8, %v2460_v54  ;;  %2636 = vst.msk [vmem:[#allocation3 + $0x90] sm:$0xff] %vm2617_vm8, %v2462_v59 }
 0x344   :  { %2832 = vrot.lane.b32.xlu1 %v2693_v12, %s9812_s21  ;;  %2834 = vrot.lane.b32.xlu0 %v2694_v55, %s9812_s21  ;;  %v2725_v12 = vld [vmem:[#allocation2 + $0x261] sm:$0xff]  ;;  %v2726_v55 = vld [vmem:[#allocation2 + $0x271] sm:$0xff] }
 0x346   :  { %v2464_v57 = vpop.permute.xlu1 %2463  ;;  %v2466_v3 = vpop.permute.xlu0 %2465 }
 0x347   :  { %2637 = vst.msk [vmem:[#allocation3 + $0x98] sm:$0xff] %vm2617_vm8, %v2464_v57  ;;  %2638 = vst.msk [vmem:[#allocation3 + $0xa0] sm:$0xff] %vm2617_vm8, %v2466_v3 }
 0x348   :  { %2836 = vrot.lane.b32.xlu1 %v2695_v56, %s9812_s21  ;;  %2838 = vrot.lane.b32.xlu0 %v2696_v7, %s9812_s21  ;;  %v2727_v56 = vld [vmem:[#allocation2 + $0x279] sm:$0xff]  ;;  %v2728_v7 = vld [vmem:[#allocation2 + $0x289] sm:$0xff] }
 0x34a   :  { %v2468_v63 = vpop.permute.xlu1 %2467  ;;  %v2470_v4 = vpop.permute.xlu0 %2469 }
 0x34b   :  { %2639 = vst.msk [vmem:[#allocation3 + $0xa8] sm:$0xff] %vm2617_vm8, %v2468_v63  ;;  %2640 = vst.msk [vmem:[#allocation3 + $0xb0] sm:$0xff] %vm2617_vm8, %v2470_v4 }
 0x34c   :  { %2840 = vrot.lane.b32.xlu1 %v2697_v62, %s9812_s21  ;;  %2842 = vrot.lane.b32.xlu0 %v2698_v2, %s9812_s21  ;;  %v2729_v62 = vld [vmem:[#allocation2 + $0x291] sm:$0xff]  ;;  %v2730_v2 = vld [vmem:[#allocation2 + $0x2a1] sm:$0xff] }
 0x34e   :  { %v2472_v8 = vpop.permute.xlu1 %2471  ;;  %v2474_v13 = vpop.permute.xlu0 %2473 }
 0x34f   :  { %2641 = vst.msk [vmem:[#allocation3 + $0xb8] sm:$0xff] %vm2617_vm8, %v2472_v8  ;;  %2642 = vst.msk [vmem:[#allocation3 + $0xc0] sm:$0xff] %vm2617_vm8, %v2474_v13 }
 0x350   :  { %2844 = vrot.lane.b32.xlu1 %v2699_v6, %s9812_s21  ;;  %2846 = vrot.lane.b32.xlu0 %v2700_v11, %s9812_s21  ;;  %v2731_v6 = vld [vmem:[#allocation2 + $0x2a9] sm:$0xff]  ;;  %v2732_v11 = vld [vmem:[#allocation2 + $0x2b9] sm:$0xff] }
 0x352   :  { %v2476_v20 = vpop.permute.xlu1 %2475  ;;  %v2478_v28 = vpop.permute.xlu0 %2477 }
 0x353   :  { %2643 = vst.msk [vmem:[#allocation3 + $0xc8] sm:$0xff] %vm2617_vm8, %v2476_v20  ;;  %2644 = vst.msk [vmem:[#allocation3 + $0xd0] sm:$0xff] %vm2617_vm8, %v2478_v28 }
 0x354   :  { %2848 = vrot.lane.b32.xlu1 %v2701_v16, %s9812_s21  ;;  %2850 = vrot.lane.b32.xlu0 %v2702_v24, %s9812_s21  ;;  %v2733_v16 = vld [vmem:[#allocation2 + $0x2c1] sm:$0xff]  ;;  %v2734_v24 = vld [vmem:[#allocation2 + $0x2d1] sm:$0xff] }
 0x356   :  { %v2480_v43 = vpop.permute.xlu1 %2479  ;;  %v2482_v58 = vpop.permute.xlu0 %2481 }
 0x357   :  { %2645 = vst.msk [vmem:[#allocation3 + $0xd8] sm:$0xff] %vm2617_vm8, %v2480_v43  ;;  %2646 = vst.msk [vmem:[#allocation3 + $0xe0] sm:$0xff] %vm2617_vm8, %v2482_v58 }
 0x358   :  { %2852 = vrot.lane.b32.xlu1 %v2703_v35, %s9812_s21  ;;  %2854 = vrot.lane.b32.xlu0 %v2704_v51, %s9812_s21  ;;  %v2735_v35 = vld [vmem:[#allocation2 + $0x2d9] sm:$0xff]  ;;  %v2736_v51 = vld [vmem:[#allocation2 + $0x2e9] sm:$0xff] }
 0x35a   :  { %v2484_v1 = vpop.permute.xlu1 %2483  ;;  %v2486_v9 = vpop.permute.xlu0 %2485 }
 0x35b   :  { %2647 = vst.msk [vmem:[#allocation3 + $0xe8] sm:$0xff] %vm2617_vm8, %v2484_v1  ;;  %2648 = vst.msk [vmem:[#allocation3 + $0xf0] sm:$0xff] %vm2617_vm8, %v2486_v9 }
 0x35c   :  { %2856 = vrot.lane.b32.xlu1 %v2705_v60, %s9812_s21  ;;  %2858 = vrot.lane.b32.xlu0 %v2706_v5, %s9812_s21  ;;  %v2737_v60 = vld [vmem:[#allocation2 + $0x2f1] sm:$0xff]  ;;  %v2738_v5 = vld [vmem:[#allocation2 + $0x301] sm:$0xff] }
 0x35e   :  { %v2488_v21 = vpop.permute.xlu1 %2487  ;;  %v2490_v31 = vpop.permute.xlu0 %2489 }
 0x35f   :  { %2649 = vst.msk [vmem:[#allocation3 + $0xf8] sm:$0xff] %vm2617_vm8, %v2488_v21  ;;  %2650 = vst.msk [vmem:[#allocation3 + $0x100] sm:$0xff] %vm2617_vm8, %v2490_v31  ;;  %v3520_v31 = vld [vmem:[%s15841_s1 + $0x20] sm:$0xf] }
 0x360   :  { %2860 = vrot.lane.b32.xlu1 %v2707_v14, %s9812_s21  ;;  %2862 = vrot.lane.b32.xlu0 %v2708_v53, %s9812_s21  ;;  %v2739_v14 = vld [vmem:[#allocation2 + $0x309] sm:$0xff]  ;;  %v2740_v53 = vld [vmem:[#allocation2 + $0x319] sm:$0xff] }
 0x361   :  { %9546 = vmatprep.subr.msk.mxu0 %vm3714_vm10, %v3520_v31 }
 0x362   :  { %v2492_v17 = vpop.permute.xlu1 %2491  ;;  %v2494_v37 = vpop.permute.xlu0 %2493  ;;  %9547 = vmatpush3.msk.msra.mxu0 %vm3714_vm10, %v3520_v31  ;;  %v3091_v31 = vld [vmem:[#allocation2 + $0x152] sm:$0xff] }
 0x363   :  { %2651 = vst.msk [vmem:[#allocation3 + $0x108] sm:$0xff] %vm2617_vm8, %v2492_v17  ;;  %2652 = vst.msk [vmem:[#allocation3 + $0x110] sm:$0xff] %vm2617_vm8, %v2494_v37  ;;  %v2741_v17 = vld [vmem:[#allocation2 + $0x321] sm:$0xff]  ;;  %v3519_v37 = vld [vmem:[%s15841_s1 + $0x18] sm:$0xff] }
 0x364   :  { %2864 = vrot.lane.b32.xlu1 %v2709_v45, %s9812_s21  ;;  %2866 = vrot.lane.b32.xlu0 %v2710_v0, %s9812_s21 }
 0x365   :  { %9548 = vmatprep.subr.mxu0 %v3519_v37 }
 0x366   :  { %v2496_v61 = vpop.permute.xlu1 %2495  ;;  %v2498_v15 = vpop.permute.xlu0 %2497  ;;  %9549 = vmatpush3.msra.mxu0 %v3519_v37  ;;  %v3093_v37 = vld [vmem:[#allocation2 + $0x16a] sm:$0xff] }
 0x367   :  { %2653 = vst.msk [vmem:[#allocation3 + $0x118] sm:$0xff] %vm2617_vm8, %v2496_v61  ;;  %2654 = vst.msk [vmem:[#allocation3 + $0x120] sm:$0xff] %vm2617_vm8, %v2498_v15  ;;  %v3518_v61 = vld [vmem:[%s15841_s1 + $0x10] sm:$0xff]  ;;  %v2743_v15 = vld [vmem:[#allocation2 + $0x339] sm:$0xff] }
 0x368   :  { %2868 = vrot.lane.b32.xlu1 %v2711_v25, %s9812_s21  ;;  %2870 = vrot.lane.b32.xlu0 %v2712_v10, %s9812_s21  ;;  %v2742_v25 = vld [vmem:[#allocation2 + $0x331] sm:$0xff] }
 0x369   :  { %9550 = vmatprep.subr.mxu0 %v3518_v61 }
 0x36a   :  { %v2500_v19 = vpop.permute.xlu1 %2499  ;;  %v2502_v23 = vpop.permute.xlu0 %2501  ;;  %9551 = vmatpush3.msra.mxu0 %v3518_v61  ;;  %v3094_v61 = vld [vmem:[#allocation2 + $0x172] sm:$0xff] }
 0x36b   :  { %2655 = vst.msk [vmem:[#allocation3 + $0x128] sm:$0xff] %vm2617_vm8, %v2500_v19  ;;  %2656 = vst.msk [vmem:[#allocation3 + $0x130] sm:$0xff] %vm2617_vm8, %v2502_v23  ;;  %v3517_v19 = vld [vmem:[%s15841_s1 + $0x8] sm:$0xff]  ;;  %v3516_v23 = vld [vmem:[%s15841_s1] sm:$0xff]  ;;  %s9813_s1 = smov 32  }
 0x36c   :  { %2872 = vrot.lane.b32.xlu1 %v2713_v18, %s9812_s21  ;;  %2874 = vrot.lane.b32.xlu0 %v2714_v22, %s9812_s21  ;;  %v2744_v22 = vld [vmem:[#allocation2 + $0x349] sm:$0xff] }
 0x36d   :  { %9552 = vmatprep.subr.mxu0 %v3517_v19 }
 0x36e   :  { %v2504_v27 = vpop.permute.xlu1 %2503  ;;  %v2506_v30 = vpop.permute.xlu0 %2505  ;;  %9553 = vmatpush3.msra.mxu0 %v3517_v19  ;;  %v3096_v19 = vld [vmem:[#allocation2 + $0x18a] sm:$0xff] }
 0x36f   :  { %2657 = vst.msk [vmem:[#allocation3 + $0x138] sm:$0xff] %vm2617_vm8, %v2504_v27  ;;  %2658 = vst.msk [vmem:[#allocation3 + $0x140] sm:$0xff] %vm2617_vm8, %v2506_v30  ;;  %v2745_v27 = vld [vmem:[#allocation2 + $0x351] sm:$0xff]  ;;  %9554 = vmatprep.subr.mxu0 %v3516_v23 }
 0x370   :  { %2876 = vrot.lane.b32.xlu1 %v2715_v26, %s9812_s21  ;;  %2878 = vrot.lane.b32.xlu0 %v2716_v29, %s9812_s21  ;;  %v3067_v30 = vld [vmem:[#allocation2 + $0x32] sm:$0xff] }
 0x371   :  { %9555 = vmatpush3.msra.mxu0 %v3516_v23  ;;  %v3097_v23 = vld [vmem:[#allocation2 + $0x19a] sm:$0xff] }
 0x372   :  { %v2508_v33 = vpop.permute.xlu1 %2507  ;;  %v2510_v36 = vpop.permute.xlu0 %2509 }
 0x373   :  { %2659 = vst.msk [vmem:[#allocation3 + $0x148] sm:$0xff] %vm2617_vm8, %v2508_v33  ;;  %2660 = vst.msk [vmem:[#allocation3 + $0x150] sm:$0xff] %vm2617_vm8, %v2510_v36  ;;  %v3068_v33 = vld [vmem:[#allocation2 + $0x3a] sm:$0xff]  ;;  %v3069_v36 = vld [vmem:[#allocation2 + $0x4a] sm:$0xff] }
 0x374   :  { %2880 = vrot.lane.b32.xlu1 %v2717_v32, %s9812_s21  ;;  %2882 = vrot.lane.b32.xlu0 %v2718_v34, %s9812_s21 }
 0x376   :  { %v2512_v39 = vpop.permute.xlu1 %2511  ;;  %v2514_v41 = vpop.permute.xlu0 %2513 }
 0x377   :  { %2661 = vst.msk [vmem:[#allocation3 + $0x158] sm:$0xff] %vm2617_vm8, %v2512_v39  ;;  %2662 = vst.msk [vmem:[#allocation3 + $0x160] sm:$0xff] %vm2617_vm8, %v2514_v41  ;;  %v3070_v39 = vld [vmem:[#allocation2 + $0x52] sm:$0xff]  ;;  %v3071_v41 = vld [vmem:[#allocation2 + $0x62] sm:$0xff] }
 0x378   :  { %2884 = vrot.lane.b32.xlu1 %v2719_v38, %s9812_s21  ;;  %2886 = vrot.lane.b32.xlu0 %v2720_v40, %s9812_s21 }
 0x37a   :  { %v2516_v44 = vpop.permute.xlu1 %2515  ;;  %v2518_v47 = vpop.permute.xlu0 %2517 }
 0x37b   :  { %2663 = vst.msk [vmem:[#allocation3 + $0x168] sm:$0xff] %vm2617_vm8, %v2516_v44  ;;  %2664 = vst.msk [vmem:[#allocation3 + $0x170] sm:$0xff] %vm2617_vm8, %v2518_v47  ;;  %v3072_v44 = vld [vmem:[#allocation2 + $0x6a] sm:$0xff]  ;;  %v3073_v47 = vld [vmem:[#allocation2 + $0x7a] sm:$0xff] }
 0x37c   :  { %2888 = vrot.lane.b32.xlu1 %v2721_v42, %s9812_s21  ;;  %2890 = vrot.lane.b32.xlu0 %v2722_v46, %s9812_s21 }
 0x37e   :  { %v2520_v49 = vpop.permute.xlu1 %2519  ;;  %v2522_v52 = vpop.permute.xlu0 %2521 }
 0x37f   :  { %2665 = vst.msk [vmem:[#allocation3 + $0x178] sm:$0xff] %vm2617_vm8, %v2520_v49  ;;  %2666 = vst.msk [vmem:[#allocation3 + $0x180] sm:$0xff] %vm2617_vm8, %v2522_v52  ;;  %v3074_v49 = vld [vmem:[#allocation2 + $0x82] sm:$0xff]  ;;  %v3075_v52 = vld [vmem:[#allocation2 + $0x92] sm:$0xff] }
 0x380   :  { %2892 = vrot.lane.b32.xlu1 %v2723_v48, %s9812_s21  ;;  %2894 = vrot.lane.b32.xlu0 %v2724_v50, %s9812_s21 }
 0x382   :  { %v2524_v54 = vpop.permute.xlu1 %2523  ;;  %v2526_v59 = vpop.permute.xlu0 %2525 }
 0x383   :  { %2667 = vst.msk [vmem:[#allocation3 + $0x188] sm:$0xff] %vm2617_vm8, %v2524_v54  ;;  %2668 = vst.msk [vmem:[#allocation3 + $0x190] sm:$0xff] %vm2617_vm8, %v2526_v59  ;;  %v3076_v54 = vld [vmem:[#allocation2 + $0x9a] sm:$0xff]  ;;  %v3077_v59 = vld [vmem:[#allocation2 + $0xaa] sm:$0xff] }
 0x384   :  { %2896 = vrot.lane.b32.xlu1 %v2725_v12, %s9812_s21  ;;  %2898 = vrot.lane.b32.xlu0 %v2726_v55, %s9812_s21 }
 0x386   :  { %v2528_v57 = vpop.permute.xlu1 %2527  ;;  %v2530_v3 = vpop.permute.xlu0 %2529 }
 0x387   :  { %2669 = vst.msk [vmem:[#allocation3 + $0x198] sm:$0xff] %vm2617_vm8, %v2528_v57  ;;  %2670 = vst.msk [vmem:[#allocation3 + $0x1a0] sm:$0xff] %vm2617_vm8, %v2530_v3  ;;  %v3078_v57 = vld [vmem:[#allocation2 + $0xb2] sm:$0xff]  ;;  %v3079_v3 = vld [vmem:[#allocation2 + $0xc2] sm:$0xff] }
 0x388   :  { %2900 = vrot.lane.b32.xlu1 %v2727_v56, %s9812_s21  ;;  %2902 = vrot.lane.b32.xlu0 %v2728_v7, %s9812_s21 }
 0x38a   :  { %v2532_v63 = vpop.permute.xlu1 %2531  ;;  %v2534_v4 = vpop.permute.xlu0 %2533 }
 0x38b   :  { %2671 = vst.msk [vmem:[#allocation3 + $0x1a8] sm:$0xff] %vm2617_vm8, %v2532_v63  ;;  %2672 = vst.msk [vmem:[#allocation3 + $0x1b0] sm:$0xff] %vm2617_vm8, %v2534_v4  ;;  %v3080_v63 = vld [vmem:[#allocation2 + $0xca] sm:$0xff]  ;;  %v3081_v4 = vld [vmem:[#allocation2 + $0xda] sm:$0xff] }
 0x38c   :  { %2904 = vrot.lane.b32.xlu1 %v2729_v62, %s9812_s21  ;;  %2906 = vrot.lane.b32.xlu0 %v2730_v2, %s9812_s21 }
 0x38e   :  { %v2536_v8 = vpop.permute.xlu1 %2535  ;;  %v2538_v13 = vpop.permute.xlu0 %2537 }
 0x38f   :  { %2673 = vst.msk [vmem:[#allocation3 + $0x1b8] sm:$0xff] %vm2617_vm8, %v2536_v8  ;;  %2674 = vst.msk [vmem:[#allocation3 + $0x1c0] sm:$0xff] %vm2617_vm8, %v2538_v13  ;;  %v3082_v8 = vld [vmem:[#allocation2 + $0xe2] sm:$0xff]  ;;  %v3083_v13 = vld [vmem:[#allocation2 + $0xf2] sm:$0xff] }
 0x390   :  { %2908 = vrot.lane.b32.xlu1 %v2731_v6, %s9812_s21  ;;  %2910 = vrot.lane.b32.xlu0 %v2732_v11, %s9812_s21 }
 0x392   :  { %v2540_v20 = vpop.permute.xlu1 %2539  ;;  %v2542_v28 = vpop.permute.xlu0 %2541 }
 0x393   :  { %2675 = vst.msk [vmem:[#allocation3 + $0x1c8] sm:$0xff] %vm2617_vm8, %v2540_v20  ;;  %2676 = vst.msk [vmem:[#allocation3 + $0x1d0] sm:$0xff] %vm2617_vm8, %v2542_v28  ;;  %v3084_v20 = vld [vmem:[#allocation2 + $0xfa] sm:$0xff]  ;;  %v3085_v28 = vld [vmem:[#allocation2 + $0x10a] sm:$0xff] }
 0x394   :  { %2912 = vrot.lane.b32.xlu1 %v2733_v16, %s9812_s21  ;;  %2914 = vrot.lane.b32.xlu0 %v2734_v24, %s9812_s21 }
 0x396   :  { %v2544_v43 = vpop.permute.xlu1 %2543  ;;  %v2546_v58 = vpop.permute.xlu0 %2545 }
 0x397   :  { %2677 = vst.msk [vmem:[#allocation3 + $0x1d8] sm:$0xff] %vm2617_vm8, %v2544_v43  ;;  %2678 = vst.msk [vmem:[#allocation3 + $0x1e0] sm:$0xff] %vm2617_vm8, %v2546_v58  ;;  %v3086_v43 = vld [vmem:[#allocation2 + $0x112] sm:$0xff]  ;;  %v3087_v58 = vld [vmem:[#allocation2 + $0x122] sm:$0xff] }
 0x398   :  { %2916 = vrot.lane.b32.xlu1 %v2735_v35, %s9812_s21  ;;  %2918 = vrot.lane.b32.xlu0 %v2736_v51, %s9812_s21 }
 0x39a   :  { %v2548_v1 = vpop.permute.xlu1 %2547  ;;  %v2550_v9 = vpop.permute.xlu0 %2549 }
 0x39b   :  { %2679 = vst.msk [vmem:[#allocation3 + $0x1e8] sm:$0xff] %vm2617_vm8, %v2548_v1  ;;  %2680 = vst.msk [vmem:[#allocation3 + $0x1f0] sm:$0xff] %vm2617_vm8, %v2550_v9  ;;  %v3088_v1 = vld [vmem:[#allocation2 + $0x12a] sm:$0xff]  ;;  %v3089_v9 = vld [vmem:[#allocation2 + $0x13a] sm:$0xff] }
 0x39c   :  { %2920 = vrot.lane.b32.xlu1 %v2737_v60, %s9812_s21  ;;  %2922 = vrot.lane.b32.xlu0 %v2738_v5, %s9812_s21 }
 0x39e   :  { %v2552_v21 = vpop.permute.xlu1 %2551  ;;  %v2811_v45 = vpop.permute.xlu0 %2810 }
 0x39f   :  { %2681 = vst.msk [vmem:[#allocation3 + $0x1f8] sm:$0xff] %vm2617_vm8, %v2552_v21  ;;  %v3090_v21 = vld [vmem:[#allocation2 + $0x142] sm:$0xff]  ;;  %vm8084_vm8 = vcmask 588800  }
 0x3a0   :  { %2924 = vrot.lane.b32.xlu1 %v2739_v14, %s9812_s21  ;;  %3003 = vst.msk [vmem:[#allocation3] sm:$0xff] %vm3002_vm9, %v2811_v45  ;;  %2926 = vrot.lane.b32.xlu0 %v2740_v53, %s9812_s21 }
 0x3a2   :  { %v2813_v0 = vpop.permute.xlu1 %2812  ;;  %v2815_v10 = vpop.permute.xlu0 %2814 }
 0x3a3   :  { %3004 = vst.msk [vmem:[#allocation3 + $0x8] sm:$0xff] %vm3002_vm9, %v2813_v0  ;;  %3005 = vst.msk [vmem:[#allocation3 + $0x10] sm:$0xff] %vm3002_vm9, %v2815_v10 }
 0x3a4   :  { %2928 = vrot.lane.b32.xlu1 %v2741_v17, %s9812_s21  ;;  %2930 = vrot.lane.b32.xlu0 %v2742_v25, %s9812_s21  ;;  %v3092_v17 = vld [vmem:[#allocation2 + $0x15a] sm:$0xff] }
 0x3a6   :  { %v2817_v18 = vpop.permute.xlu1 %2816  ;;  %v2819_v26 = vpop.permute.xlu0 %2818 }
 0x3a7   :  { %3006 = vst.msk [vmem:[#allocation3 + $0x18] sm:$0xff] %vm3002_vm9, %v2817_v18  ;;  %3007 = vst.msk [vmem:[#allocation3 + $0x20] sm:$0xff] %vm3002_vm9, %v2819_v26 }
 0x3a8   :  { %2932 = vrot.lane.b32.xlu1 %v2743_v15, %s9812_s21  ;;  %2934 = vrot.lane.b32.xlu0 %v2744_v22, %s9812_s21  ;;  %v3095_v15 = vld [vmem:[#allocation2 + $0x182] sm:$0xff] }
 0x3aa   :  { %v2821_v29 = vpop.permute.xlu1 %2820  ;;  %v2823_v32 = vpop.permute.xlu0 %2822 }
 0x3ab   :  { %3008 = vst.msk [vmem:[#allocation3 + $0x28] sm:$0xff] %vm3002_vm9, %v2821_v29  ;;  %3009 = vst.msk [vmem:[#allocation3 + $0x30] sm:$0xff] %vm3002_vm9, %v2823_v32 }
 0x3ac   :  { %2936 = vrot.lane.b32.xlu1 %v2745_v27, %s9812_s21  ;;  %3195 = vrot.lane.b32.xlu0 %v3067_v30, %s9813_s1  ;;  %v3098_v27 = vld [vmem:[#allocation2 + $0x1a2] sm:$0xff] }
 0x3ad   :  { %v3099_v30 = vld [vmem:[#allocation2 + $0x1e2] sm:$0xff] }
 0x3ae   :  { %v2825_v34 = vpop.permute.xlu1 %2824  ;;  %v2827_v38 = vpop.permute.xlu0 %2826 }
 0x3af   :  { %3010 = vst.msk [vmem:[#allocation3 + $0x38] sm:$0xff] %vm3002_vm9, %v2825_v34  ;;  %3011 = vst.msk [vmem:[#allocation3 + $0x40] sm:$0xff] %vm3002_vm9, %v2827_v38 }
 0x3b0   :  { %3197 = vrot.lane.b32.xlu1 %v3068_v33, %s9813_s1  ;;  %3199 = vrot.lane.b32.xlu0 %v3069_v36, %s9813_s1  ;;  %v3100_v33 = vld [vmem:[#allocation2 + $0x1ea] sm:$0xff]  ;;  %v3101_v36 = vld [vmem:[#allocation2 + $0x1fa] sm:$0xff] }
 0x3b2   :  { %v2829_v40 = vpop.permute.xlu1 %2828  ;;  %v2831_v42 = vpop.permute.xlu0 %2830 }
 0x3b3   :  { %3012 = vst.msk [vmem:[#allocation3 + $0x48] sm:$0xff] %vm3002_vm9, %v2829_v40  ;;  %3013 = vst.msk [vmem:[#allocation3 + $0x50] sm:$0xff] %vm3002_vm9, %v2831_v42 }
 0x3b4   :  { %3201 = vrot.lane.b32.xlu1 %v3070_v39, %s9813_s1  ;;  %3203 = vrot.lane.b32.xlu0 %v3071_v41, %s9813_s1  ;;  %v3102_v39 = vld [vmem:[#allocation2 + $0x202] sm:$0xff]  ;;  %v3103_v41 = vld [vmem:[#allocation2 + $0x212] sm:$0xff] }
 0x3b6   :  { %v2833_v46 = vpop.permute.xlu1 %2832  ;;  %v2835_v48 = vpop.permute.xlu0 %2834 }
 0x3b7   :  { %3014 = vst.msk [vmem:[#allocation3 + $0x58] sm:$0xff] %vm3002_vm9, %v2833_v46  ;;  %3015 = vst.msk [vmem:[#allocation3 + $0x60] sm:$0xff] %vm3002_vm9, %v2835_v48 }
 0x3b8   :  { %3205 = vrot.lane.b32.xlu1 %v3072_v44, %s9813_s1  ;;  %3207 = vrot.lane.b32.xlu0 %v3073_v47, %s9813_s1  ;;  %v3104_v44 = vld [vmem:[#allocation2 + $0x21a] sm:$0xff]  ;;  %v3105_v47 = vld [vmem:[#allocation2 + $0x22a] sm:$0xff] }
 0x3ba   :  { %v2837_v50 = vpop.permute.xlu1 %2836  ;;  %v2839_v12 = vpop.permute.xlu0 %2838 }
 0x3bb   :  { %3016 = vst.msk [vmem:[#allocation3 + $0x68] sm:$0xff] %vm3002_vm9, %v2837_v50  ;;  %3017 = vst.msk [vmem:[#allocation3 + $0x70] sm:$0xff] %vm3002_vm9, %v2839_v12 }
 0x3bc   :  { %3209 = vrot.lane.b32.xlu1 %v3074_v49, %s9813_s1  ;;  %3211 = vrot.lane.b32.xlu0 %v3075_v52, %s9813_s1  ;;  %v3106_v49 = vld [vmem:[#allocation2 + $0x232] sm:$0xff]  ;;  %v3107_v52 = vld [vmem:[#allocation2 + $0x242] sm:$0xff] }
 0x3be   :  { %v2841_v55 = vpop.permute.xlu1 %2840  ;;  %v2843_v56 = vpop.permute.xlu0 %2842 }
 0x3bf   :  { %3018 = vst.msk [vmem:[#allocation3 + $0x78] sm:$0xff] %vm3002_vm9, %v2841_v55  ;;  %3019 = vst.msk [vmem:[#allocation3 + $0x80] sm:$0xff] %vm3002_vm9, %v2843_v56 }
 0x3c0   :  { %3213 = vrot.lane.b32.xlu1 %v3076_v54, %s9813_s1  ;;  %3215 = vrot.lane.b32.xlu0 %v3077_v59, %s9813_s1  ;;  %v3108_v54 = vld [vmem:[#allocation2 + $0x24a] sm:$0xff]  ;;  %v3109_v59 = vld [vmem:[#allocation2 + $0x25a] sm:$0xff] }
 0x3c2   :  { %v2845_v7 = vpop.permute.xlu1 %2844  ;;  %v2847_v62 = vpop.permute.xlu0 %2846 }
 0x3c3   :  { %3020 = vst.msk [vmem:[#allocation3 + $0x88] sm:$0xff] %vm3002_vm9, %v2845_v7  ;;  %3021 = vst.msk [vmem:[#allocation3 + $0x90] sm:$0xff] %vm3002_vm9, %v2847_v62 }
 0x3c4   :  { %3217 = vrot.lane.b32.xlu1 %v3078_v57, %s9813_s1  ;;  %3219 = vrot.lane.b32.xlu0 %v3079_v3, %s9813_s1  ;;  %v3110_v57 = vld [vmem:[#allocation2 + $0x262] sm:$0xff]  ;;  %v3111_v3 = vld [vmem:[#allocation2 + $0x272] sm:$0xff] }
 0x3c6   :  { %v2849_v2 = vpop.permute.xlu1 %2848  ;;  %v2851_v6 = vpop.permute.xlu0 %2850 }
 0x3c7   :  { %3022 = vst.msk [vmem:[#allocation3 + $0x98] sm:$0xff] %vm3002_vm9, %v2849_v2  ;;  %3023 = vst.msk [vmem:[#allocation3 + $0xa0] sm:$0xff] %vm3002_vm9, %v2851_v6 }
 0x3c8   :  { %3221 = vrot.lane.b32.xlu1 %v3080_v63, %s9813_s1  ;;  %3223 = vrot.lane.b32.xlu0 %v3081_v4, %s9813_s1  ;;  %v3112_v63 = vld [vmem:[#allocation2 + $0x27a] sm:$0xff]  ;;  %v3113_v4 = vld [vmem:[#allocation2 + $0x28a] sm:$0xff] }
 0x3ca   :  { %v2853_v11 = vpop.permute.xlu1 %2852  ;;  %v2855_v16 = vpop.permute.xlu0 %2854 }
 0x3cb   :  { %3024 = vst.msk [vmem:[#allocation3 + $0xa8] sm:$0xff] %vm3002_vm9, %v2853_v11  ;;  %3025 = vst.msk [vmem:[#allocation3 + $0xb0] sm:$0xff] %vm3002_vm9, %v2855_v16 }
 0x3cc   :  { %3225 = vrot.lane.b32.xlu1 %v3082_v8, %s9813_s1  ;;  %3227 = vrot.lane.b32.xlu0 %v3083_v13, %s9813_s1  ;;  %v3114_v8 = vld [vmem:[#allocation2 + $0x292] sm:$0xff]  ;;  %v3115_v13 = vld [vmem:[#allocation2 + $0x2a2] sm:$0xff] }
 0x3ce   :  { %v2857_v24 = vpop.permute.xlu1 %2856  ;;  %v2859_v35 = vpop.permute.xlu0 %2858 }
 0x3cf   :  { %3026 = vst.msk [vmem:[#allocation3 + $0xb8] sm:$0xff] %vm3002_vm9, %v2857_v24  ;;  %3027 = vst.msk [vmem:[#allocation3 + $0xc0] sm:$0xff] %vm3002_vm9, %v2859_v35 }
 0x3d0   :  { %3229 = vrot.lane.b32.xlu1 %v3084_v20, %s9813_s1  ;;  %3231 = vrot.lane.b32.xlu0 %v3085_v28, %s9813_s1  ;;  %v3116_v20 = vld [vmem:[#allocation2 + $0x2aa] sm:$0xff]  ;;  %v3117_v28 = vld [vmem:[#allocation2 + $0x2ba] sm:$0xff] }
 0x3d2   :  { %v2861_v51 = vpop.permute.xlu1 %2860  ;;  %v2863_v60 = vpop.permute.xlu0 %2862 }
 0x3d3   :  { %3028 = vst.msk [vmem:[#allocation3 + $0xc8] sm:$0xff] %vm3002_vm9, %v2861_v51  ;;  %3029 = vst.msk [vmem:[#allocation3 + $0xd0] sm:$0xff] %vm3002_vm9, %v2863_v60 }
 0x3d4   :  { %3233 = vrot.lane.b32.xlu1 %v3086_v43, %s9813_s1  ;;  %3235 = vrot.lane.b32.xlu0 %v3087_v58, %s9813_s1  ;;  %v3118_v43 = vld [vmem:[#allocation2 + $0x2c2] sm:$0xff]  ;;  %v3119_v58 = vld [vmem:[#allocation2 + $0x2d2] sm:$0xff] }
 0x3d6   :  { %v2865_v5 = vpop.permute.xlu1 %2864  ;;  %v2867_v14 = vpop.permute.xlu0 %2866 }
 0x3d7   :  { %3030 = vst.msk [vmem:[#allocation3 + $0xd8] sm:$0xff] %vm3002_vm9, %v2865_v5  ;;  %3031 = vst.msk [vmem:[#allocation3 + $0xe0] sm:$0xff] %vm3002_vm9, %v2867_v14 }
 0x3d8   :  { %3237 = vrot.lane.b32.xlu1 %v3088_v1, %s9813_s1  ;;  %3239 = vrot.lane.b32.xlu0 %v3089_v9, %s9813_s1  ;;  %v3120_v1 = vld [vmem:[#allocation2 + $0x2da] sm:$0xff]  ;;  %v3121_v9 = vld [vmem:[#allocation2 + $0x2ea] sm:$0xff] }
 0x3da   :  { %v2869_v53 = vpop.permute.xlu1 %2868  ;;  %v2871_v45 = vpop.permute.xlu0 %2870 }
 0x3db   :  { %3032 = vst.msk [vmem:[#allocation3 + $0xe8] sm:$0xff] %vm3002_vm9, %v2869_v53  ;;  %3033 = vst.msk [vmem:[#allocation3 + $0xf0] sm:$0xff] %vm3002_vm9, %v2871_v45 }
 0x3dc   :  { %3241 = vrot.lane.b32.xlu1 %v3090_v21, %s9813_s1  ;;  %3243 = vrot.lane.b32.xlu0 %v3091_v31, %s9813_s1  ;;  %v3122_v21 = vld [vmem:[#allocation2 + $0x2f2] sm:$0xff]  ;;  %v3123_v31 = vld [vmem:[#allocation2 + $0x302] sm:$0xff] }
 0x3de   :  { %v2873_v0 = vpop.permute.xlu1 %2872  ;;  %v2875_v25 = vpop.permute.xlu0 %2874 }
 0x3df   :  { %3034 = vst.msk [vmem:[#allocation3 + $0xf8] sm:$0xff] %vm3002_vm9, %v2873_v0  ;;  %3035 = vst.msk [vmem:[#allocation3 + $0x100] sm:$0xff] %vm3002_vm9, %v2875_v25 }
 0x3e0   :  { %3245 = vrot.lane.b32.xlu1 %v3092_v17, %s9813_s1  ;;  %3247 = vrot.lane.b32.xlu0 %v3093_v37, %s9813_s1  ;;  %v3124_v17 = vld [vmem:[#allocation2 + $0x30a] sm:$0xff]  ;;  %v3125_v37 = vld [vmem:[#allocation2 + $0x31a] sm:$0xff] }
 0x3e2   :  { %v2877_v10 = vpop.permute.xlu1 %2876  ;;  %v2879_v18 = vpop.permute.xlu0 %2878 }
 0x3e3   :  { %3036 = vst.msk [vmem:[#allocation3 + $0x108] sm:$0xff] %vm3002_vm9, %v2877_v10  ;;  %3037 = vst.msk [vmem:[#allocation3 + $0x110] sm:$0xff] %vm3002_vm9, %v2879_v18 }
 0x3e4   :  { %3249 = vrot.lane.b32.xlu1 %v3094_v61, %s9813_s1  ;;  %3251 = vrot.lane.b32.xlu0 %v3095_v15, %s9813_s1  ;;  %v3126_v61 = vld [vmem:[#allocation2 + $0x322] sm:$0xff]  ;;  %v3127_v15 = vld [vmem:[#allocation2 + $0x332] sm:$0xff] }
 0x3e6   :  { %v2881_v22 = vpop.permute.xlu1 %2880  ;;  %v2883_v26 = vpop.permute.xlu0 %2882 }
 0x3e7   :  { %3038 = vst.msk [vmem:[#allocation3 + $0x118] sm:$0xff] %vm3002_vm9, %v2881_v22  ;;  %3039 = vst.msk [vmem:[#allocation3 + $0x120] sm:$0xff] %vm3002_vm9, %v2883_v26 }
 0x3e8   :  { %3253 = vrot.lane.b32.xlu1 %v3096_v19, %s9813_s1  ;;  %3255 = vrot.lane.b32.xlu0 %v3097_v23, %s9813_s1  ;;  %v3128_v19 = vld [vmem:[#allocation2 + $0x33a] sm:$0xff]  ;;  %v3129_v23 = vld [vmem:[#allocation2 + $0x34a] sm:$0xff] }
 0x3ea   :  { %v2885_v29 = vpop.permute.xlu1 %2884  ;;  %v2887_v32 = vpop.permute.xlu0 %2886 }
 0x3eb   :  { %3040 = vst.msk [vmem:[#allocation3 + $0x128] sm:$0xff] %vm3002_vm9, %v2885_v29  ;;  %3041 = vst.msk [vmem:[#allocation3 + $0x130] sm:$0xff] %vm3002_vm9, %v2887_v32  ;;  %v3130_v29 = vld [vmem:[#allocation2 + $0x352] sm:$0xff] }
 0x3ec   :  { %3257 = vrot.lane.b32.xlu1 %v3098_v27, %s9813_s1  ;;  %3259 = vrot.lane.b32.xlu0 %v3099_v30, %s9813_s1 }
 0x3ee   :  { %v2889_v34 = vpop.permute.xlu1 %2888  ;;  %v2891_v38 = vpop.permute.xlu0 %2890 }
 0x3ef   :  { %3042 = vst.msk [vmem:[#allocation3 + $0x138] sm:$0xff] %vm3002_vm9, %v2889_v34  ;;  %3043 = vst.msk [vmem:[#allocation3 + $0x140] sm:$0xff] %vm3002_vm9, %v2891_v38 }
 0x3f0   :  { %3261 = vrot.lane.b32.xlu1 %v3100_v33, %s9813_s1  ;;  %3263 = vrot.lane.b32.xlu0 %v3101_v36, %s9813_s1 }
 0x3f2   :  { %v2893_v40 = vpop.permute.xlu1 %2892  ;;  %v2895_v42 = vpop.permute.xlu0 %2894 }
 0x3f3   :  { %3044 = vst.msk [vmem:[#allocation3 + $0x148] sm:$0xff] %vm3002_vm9, %v2893_v40  ;;  %3045 = vst.msk [vmem:[#allocation3 + $0x150] sm:$0xff] %vm3002_vm9, %v2895_v42 }
 0x3f4   :  { %3265 = vrot.lane.b32.xlu1 %v3102_v39, %s9813_s1  ;;  %3267 = vrot.lane.b32.xlu0 %v3103_v41, %s9813_s1 }
 0x3f6   :  { %v2897_v46 = vpop.permute.xlu1 %2896  ;;  %v2899_v48 = vpop.permute.xlu0 %2898 }
 0x3f7   :  { %3046 = vst.msk [vmem:[#allocation3 + $0x158] sm:$0xff] %vm3002_vm9, %v2897_v46  ;;  %3047 = vst.msk [vmem:[#allocation3 + $0x160] sm:$0xff] %vm3002_vm9, %v2899_v48 }
 0x3f8   :  { %3269 = vrot.lane.b32.xlu1 %v3104_v44, %s9813_s1  ;;  %3271 = vrot.lane.b32.xlu0 %v3105_v47, %s9813_s1 }
 0x3fa   :  { %v2901_v50 = vpop.permute.xlu1 %2900  ;;  %v2903_v12 = vpop.permute.xlu0 %2902 }
 0x3fb   :  { %3048 = vst.msk [vmem:[#allocation3 + $0x168] sm:$0xff] %vm3002_vm9, %v2901_v50  ;;  %3049 = vst.msk [vmem:[#allocation3 + $0x170] sm:$0xff] %vm3002_vm9, %v2903_v12 }
 0x3fc   :  { %3273 = vrot.lane.b32.xlu1 %v3106_v49, %s9813_s1  ;;  %3275 = vrot.lane.b32.xlu0 %v3107_v52, %s9813_s1 }
 0x3fe   :  { %v2905_v55 = vpop.permute.xlu1 %2904  ;;  %v2907_v56 = vpop.permute.xlu0 %2906 }
 0x3ff   :  { %3050 = vst.msk [vmem:[#allocation3 + $0x178] sm:$0xff] %vm3002_vm9, %v2905_v55  ;;  %3051 = vst.msk [vmem:[#allocation3 + $0x180] sm:$0xff] %vm3002_vm9, %v2907_v56 }
 0x400   :  { %3277 = vrot.lane.b32.xlu1 %v3108_v54, %s9813_s1  ;;  %3279 = vrot.lane.b32.xlu0 %v3109_v59, %s9813_s1 }
 0x402   :  { %v2909_v7 = vpop.permute.xlu1 %2908  ;;  %v2911_v62 = vpop.permute.xlu0 %2910 }
 0x403   :  { %3052 = vst.msk [vmem:[#allocation3 + $0x188] sm:$0xff] %vm3002_vm9, %v2909_v7  ;;  %3053 = vst.msk [vmem:[#allocation3 + $0x190] sm:$0xff] %vm3002_vm9, %v2911_v62 }
 0x404   :  { %3281 = vrot.lane.b32.xlu1 %v3110_v57, %s9813_s1  ;;  %3283 = vrot.lane.b32.xlu0 %v3111_v3, %s9813_s1 }
 0x406   :  { %v2913_v2 = vpop.permute.xlu1 %2912  ;;  %v2915_v6 = vpop.permute.xlu0 %2914 }
 0x407   :  { %3054 = vst.msk [vmem:[#allocation3 + $0x198] sm:$0xff] %vm3002_vm9, %v2913_v2  ;;  %3055 = vst.msk [vmem:[#allocation3 + $0x1a0] sm:$0xff] %vm3002_vm9, %v2915_v6 }
 0x408   :  { %3285 = vrot.lane.b32.xlu1 %v3112_v63, %s9813_s1  ;;  %3287 = vrot.lane.b32.xlu0 %v3113_v4, %s9813_s1 }
 0x40a   :  { %v2917_v11 = vpop.permute.xlu1 %2916  ;;  %v2919_v16 = vpop.permute.xlu0 %2918 }
 0x40b   :  { %3056 = vst.msk [vmem:[#allocation3 + $0x1a8] sm:$0xff] %vm3002_vm9, %v2917_v11  ;;  %3057 = vst.msk [vmem:[#allocation3 + $0x1b0] sm:$0xff] %vm3002_vm9, %v2919_v16 }
 0x40c   :  { %3289 = vrot.lane.b32.xlu1 %v3114_v8, %s9813_s1  ;;  %3291 = vrot.lane.b32.xlu0 %v3115_v13, %s9813_s1 }
 0x40e   :  { %v2921_v24 = vpop.permute.xlu1 %2920  ;;  %v2923_v35 = vpop.permute.xlu0 %2922 }
 0x40f   :  { %3058 = vst.msk [vmem:[#allocation3 + $0x1b8] sm:$0xff] %vm3002_vm9, %v2921_v24  ;;  %3059 = vst.msk [vmem:[#allocation3 + $0x1c0] sm:$0xff] %vm3002_vm9, %v2923_v35 }
 0x410   :  { %3293 = vrot.lane.b32.xlu1 %v3116_v20, %s9813_s1  ;;  %3295 = vrot.lane.b32.xlu0 %v3117_v28, %s9813_s1 }
 0x412   :  { %v2925_v51 = vpop.permute.xlu1 %2924  ;;  %v2927_v60 = vpop.permute.xlu0 %2926 }
 0x413   :  { %3060 = vst.msk [vmem:[#allocation3 + $0x1c8] sm:$0xff] %vm3002_vm9, %v2925_v51  ;;  %3061 = vst.msk [vmem:[#allocation3 + $0x1d0] sm:$0xff] %vm3002_vm9, %v2927_v60 }
 0x414   :  { %3297 = vrot.lane.b32.xlu1 %v3118_v43, %s9813_s1  ;;  %3299 = vrot.lane.b32.xlu0 %v3119_v58, %s9813_s1 }
 0x416   :  { %v2929_v5 = vpop.permute.xlu1 %2928  ;;  %v2931_v14 = vpop.permute.xlu0 %2930 }
 0x417   :  { %3062 = vst.msk [vmem:[#allocation3 + $0x1d8] sm:$0xff] %vm3002_vm9, %v2929_v5  ;;  %3063 = vst.msk [vmem:[#allocation3 + $0x1e0] sm:$0xff] %vm3002_vm9, %v2931_v14 }
 0x418   :  { %3301 = vrot.lane.b32.xlu1 %v3120_v1, %s9813_s1  ;;  %3303 = vrot.lane.b32.xlu0 %v3121_v9, %s9813_s1 }
 0x41a   :  { %v2933_v53 = vpop.permute.xlu1 %2932  ;;  %v2935_v45 = vpop.permute.xlu0 %2934 }
 0x41b   :  { %3064 = vst.msk [vmem:[#allocation3 + $0x1e8] sm:$0xff] %vm3002_vm9, %v2933_v53  ;;  %3065 = vst.msk [vmem:[#allocation3 + $0x1f0] sm:$0xff] %vm3002_vm9, %v2935_v45 }
 0x41c   :  { %3305 = vrot.lane.b32.xlu1 %v3122_v21, %s9813_s1  ;;  %3307 = vrot.lane.b32.xlu0 %v3123_v31, %s9813_s1 }
 0x41e   :  { %v2937_v0 = vpop.permute.xlu1 %2936  ;;  %v3196_v25 = vpop.permute.xlu0 %3195 }
 0x41f   :  { %3066 = vst.msk [vmem:[#allocation3 + $0x1f8] sm:$0xff] %vm3002_vm9, %v2937_v0 }
 0x420   :  { %3309 = vrot.lane.b32.xlu1 %v3124_v17, %s9813_s1  ;;  %3388 = vst.msk [vmem:[#allocation3] sm:$0xff] %vm3387_vm11, %v3196_v25  ;;  %3311 = vrot.lane.b32.xlu0 %v3125_v37, %s9813_s1 }
 0x422   :  { %v3198_v10 = vpop.permute.xlu1 %3197  ;;  %v3200_v18 = vpop.permute.xlu0 %3199 }
 0x423   :  { %3389 = vst.msk [vmem:[#allocation3 + $0x8] sm:$0xff] %vm3387_vm11, %v3198_v10  ;;  %3390 = vst.msk [vmem:[#allocation3 + $0x10] sm:$0xff] %vm3387_vm11, %v3200_v18 }
 0x424   :  { %3313 = vrot.lane.b32.xlu1 %v3126_v61, %s9813_s1  ;;  %3315 = vrot.lane.b32.xlu0 %v3127_v15, %s9813_s1 }
 0x426   :  { %v3202_v22 = vpop.permute.xlu1 %3201  ;;  %v3204_v26 = vpop.permute.xlu0 %3203 }
 0x427   :  { %3391 = vst.msk [vmem:[#allocation3 + $0x18] sm:$0xff] %vm3387_vm11, %v3202_v22  ;;  %v3452_v27 = vld [vmem:[#allocation3] sm:$0xff]  ;;  %3392 = vst.msk [vmem:[#allocation3 + $0x20] sm:$0xff] %vm3387_vm11, %v3204_v26 }
 0x428   :  { %3317 = vrot.lane.b32.xlu1 %v3128_v19, %s9813_s1  ;;  %9556 = vmatprep.mubr.msk.f32.mxu0 %vm3521_vm12, %v3452_v27 }
 0x429   :  { %3319 = vrot.lane.b32.xlu0 %v3129_v23, %s9813_s1 }
 0x42a   :  { %v3206_v30 = vpop.permute.xlu1 %3205  ;;  %v3453_v32 = vld [vmem:[#allocation3 + $0x8] sm:$0xff]  ;;  %v3208_v33 = vpop.permute.xlu0 %3207  ;;  %v3454_v34 = vld [vmem:[#allocation3 + $0x10] sm:$0xff] }
 0x42b   :  { %3393 = vst.msk [vmem:[#allocation3 + $0x28] sm:$0xff] %vm3387_vm11, %v3206_v30  ;;  %9557 = vmatmul.mubr.msk.f32.vlgmr.msra.gmra.mxu0 %vm3521_vm12, %v3453_v32  ;;  %3394 = vst.msk [vmem:[#allocation3 + $0x30] sm:$0xff] %vm3387_vm11, %v3208_v33  ;;  %v15924_v33 = vmov 0.0  }
 0x42c   :  { %3321 = vrot.lane.b32.xlu1 %v3130_v29, %s9813_s1  ;;  %9559 = vmatprep.mubr.msk.f32.mxu0 %vm3521_vm12, %v3454_v34  ;;  %4650 = vst.msk [vmem:[#allocation4] sm:$0xff] %vm4103_vm13, %v15924_v33  ;;  %4651 = vst.msk [vmem:[#allocation4 + $0x8] sm:$0xff] %vm4103_vm13, %v15924_v33 }
 0x42d   :  { %4654 = vst.msk [vmem:[#allocation4 + $0x1b0] sm:$0xff] %vm4103_vm13, %v15924_v33  ;;  %4655 = vst.msk [vmem:[#allocation4 + $0x1b8] sm:$0xff] %vm4103_vm13, %v15924_v33 }
 0x42e   :  { %v3210_v36 = vpop.permute.xlu1 %3209  ;;  %v3455_v38 = vld [vmem:[#allocation3 + $0x18] sm:$0xff]  ;;  %v3212_v39 = vpop.permute.xlu0 %3211  ;;  %v3456_v40 = vld [vmem:[#allocation3 + $0x20] sm:$0xff]  ;;  %4658 = vst.msk [vmem:[#allocation4 + $0x198] sm:$0xff] %vm4103_vm13, %v15924_v33  ;;  %4659 = vst.msk [vmem:[#allocation4 + $0x1a0] sm:$0xff] %vm4103_vm13, %v15924_v33 }
 0x42f   :  { %3395 = vst.msk [vmem:[#allocation3 + $0x38] sm:$0xff] %vm3387_vm11, %v3210_v36  ;;  %9560 = vmatmul.mubr.msk.f32.gmra.mxu0 %vm3521_vm12, %v3455_v38  ;;  %3396 = vst.msk [vmem:[#allocation3 + $0x40] sm:$0xff] %vm3387_vm11, %v3212_v39 }
 0x430   :  { %9562 = vmatprep.mubr.msk.f32.mxu0 %vm3521_vm12, %v3456_v40  ;;  %4661 = vst.msk [vmem:[#allocation4 + $0x348] sm:$0xff] %vm4103_vm13, %v15924_v33  ;;  %4662 = vst.msk [vmem:[#allocation4 + $0x350] sm:$0xff] %vm4103_vm13, %v15924_v33 }
 0x431   :  { %4653 = vst.msk [vmem:[#allocation4 + $0x10] sm:$0x3] %vm4652_vm14, %v15924_v33  ;;  %4656 = vst.msk [vmem:[#allocation4 + $0x1c0] sm:$0x3] %vm4652_vm14, %v15924_v33 }
 0x432   :  { %v3214_v41 = vpop.permute.xlu1 %3213  ;;  %v3457_v42 = vld [vmem:[#allocation3 + $0x28] sm:$0xff]  ;;  %v3216_v44 = vpop.permute.xlu0 %3215  ;;  %v3458_v46 = vld [vmem:[#allocation3 + $0x30] sm:$0xff]  ;;  %4660 = vst.msk [vmem:[#allocation4 + $0x1a8] sm:$0x3] %vm4652_vm14, %v15924_v33  ;;  %4663 = vst.msk [vmem:[#allocation4 + $0x358] sm:$0x3] %vm4652_vm14, %v15924_v33 }
 0x433   :  { %3397 = vst.msk [vmem:[#allocation3 + $0x48] sm:$0xff] %vm3387_vm11, %v3214_v41  ;;  %9563 = vmatmul.mubr.msk.f32.gmra.mxu0 %vm3521_vm12, %v3457_v42  ;;  %3398 = vst.msk [vmem:[#allocation3 + $0x50] sm:$0xff] %vm3387_vm11, %v3216_v44 }
 0x434   :  { %9565 = vmatprep.mubr.msk.f32.mxu0 %vm3521_vm12, %v3458_v46  ;;  %4665 = vst.msk [vmem:[#allocation4] sm:$0x1] %vm4664_vm15, %v15924_v33  ;;  %4666 = vst.msk [vmem:[#allocation4 + $0x18] sm:$0x1] %vm4664_vm15, %v15924_v33 }
 0x435   :  { %4667 = vst.msk [vmem:[#allocation4 + $0x30] sm:$0x1] %vm4664_vm15, %v15924_v33  ;;  %4668 = vst.msk [vmem:[#allocation4 + $0x48] sm:$0x1] %vm4664_vm15, %v15924_v33 }
 0x436   :  { %v3218_v47 = vpop.permute.xlu1 %3217  ;;  %v3459_v48 = vld [vmem:[#allocation3 + $0x38] sm:$0xff]  ;;  %v3220_v49 = vpop.permute.xlu0 %3219  ;;  %v3460_v50 = vld [vmem:[#allocation3 + $0x40] sm:$0xff]  ;;  %4669 = vst.msk [vmem:[#allocation4 + $0x60] sm:$0x1] %vm4664_vm15, %v15924_v33  ;;  %4670 = vst.msk [vmem:[#allocation4 + $0x78] sm:$0x1] %vm4664_vm15, %v15924_v33 }
 0x437   :  { %3399 = vst.msk [vmem:[#allocation3 + $0x58] sm:$0xff] %vm3387_vm11, %v3218_v47  ;;  %9566 = vmatmul.mubr.msk.f32.gmra.mxu0 %vm3521_vm12, %v3459_v48  ;;  %3400 = vst.msk [vmem:[#allocation3 + $0x60] sm:$0xff] %vm3387_vm11, %v3220_v49 }
 0x438   :  { %9568 = vmatprep.mubr.msk.f32.mxu0 %vm3521_vm12, %v3460_v50  ;;  %4671 = vst.msk [vmem:[#allocation4 + $0x90] sm:$0x1] %vm4664_vm15, %v15924_v33  ;;  %4672 = vst.msk [vmem:[#allocation4 + $0xa8] sm:$0x1] %vm4664_vm15, %v15924_v33 }
 0x439   :  { %4673 = vst.msk [vmem:[#allocation4 + $0xc0] sm:$0x1] %vm4664_vm15, %v15924_v33  ;;  %4674 = vst.msk [vmem:[#allocation4 + $0xd8] sm:$0x1] %vm4664_vm15, %v15924_v33 }
 0x43a   :  { %v3222_v52 = vpop.permute.xlu1 %3221  ;;  %v3461_v12 = vld [vmem:[#allocation3 + $0x48] sm:$0xff]  ;;  %v3224_v54 = vpop.permute.xlu0 %3223  ;;  %v3462_v55 = vld [vmem:[#allocation3 + $0x50] sm:$0xff]  ;;  %4675 = vst.msk [vmem:[#allocation4 + $0xf0] sm:$0x1] %vm4664_vm15, %v15924_v33  ;;  %4676 = vst.msk [vmem:[#allocation4 + $0x108] sm:$0x1] %vm4664_vm15, %v15924_v33 }
 0x43b   :  { %3401 = vst.msk [vmem:[#allocation3 + $0x68] sm:$0xff] %vm3387_vm11, %v3222_v52  ;;  %9569 = vmatmul.mubr.msk.f32.gmra.mxu0 %vm3521_vm12, %v3461_v12  ;;  %3402 = vst.msk [vmem:[#allocation3 + $0x70] sm:$0xff] %vm3387_vm11, %v3224_v54 }
 0x43c   :  { %9571 = vmatprep.mubr.msk.f32.mxu0 %vm3521_vm12, %v3462_v55  ;;  %4677 = vst.msk [vmem:[#allocation4 + $0x120] sm:$0x1] %vm4664_vm15, %v15924_v33  ;;  %4678 = vst.msk [vmem:[#allocation4 + $0x138] sm:$0x1] %vm4664_vm15, %v15924_v33 }
 0x43d   :  { %4679 = vst.msk [vmem:[#allocation4 + $0x150] sm:$0x1] %vm4664_vm15, %v15924_v33  ;;  %4680 = vst.msk [vmem:[#allocation4 + $0x168] sm:$0x1] %vm4664_vm15, %v15924_v33 }
 0x43e   :  { %v3226_v59 = vpop.permute.xlu1 %3225  ;;  %v3463_v56 = vld [vmem:[#allocation3 + $0x58] sm:$0xff]  ;;  %v3228_v57 = vpop.permute.xlu0 %3227  ;;  %v3464_v7 = vld [vmem:[#allocation3 + $0x60] sm:$0xff]  ;;  %4681 = vst.msk [vmem:[#allocation4 + $0x180] sm:$0x1] %vm4664_vm15, %v15924_v33  ;;  %4682 = vst.msk [vmem:[#allocation4 + $0x198] sm:$0x1] %vm4664_vm15, %v15924_v33 }
 0x43f   :  { %3403 = vst.msk [vmem:[#allocation3 + $0x78] sm:$0xff] %vm3387_vm11, %v3226_v59  ;;  %9572 = vmatmul.mubr.msk.f32.gmra.mxu0 %vm3521_vm12, %v3463_v56  ;;  %3404 = vst.msk [vmem:[#allocation3 + $0x80] sm:$0xff] %vm3387_vm11, %v3228_v57 }
 0x440   :  { %9574 = vmatprep.mubr.msk.f32.mxu0 %vm3521_vm12, %v3464_v7  ;;  %4683 = vst.msk [vmem:[#allocation4 + $0x1b0] sm:$0x1] %vm4664_vm15, %v15924_v33  ;;  %4684 = vst.msk [vmem:[#allocation4 + $0x1c8] sm:$0x1] %vm4664_vm15, %v15924_v33 }
 0x441   :  { %4685 = vst.msk [vmem:[#allocation4 + $0x1e0] sm:$0x1] %vm4664_vm15, %v15924_v33  ;;  %4686 = vst.msk [vmem:[#allocation4 + $0x1f8] sm:$0x1] %vm4664_vm15, %v15924_v33 }
 0x442   :  { %v3230_v3 = vpop.permute.xlu1 %3229  ;;  %v3465_v62 = vld [vmem:[#allocation3 + $0x68] sm:$0xff]  ;;  %v3232_v63 = vpop.permute.xlu0 %3231  ;;  %v3466_v2 = vld [vmem:[#allocation3 + $0x70] sm:$0xff]  ;;  %4687 = vst.msk [vmem:[#allocation4 + $0x210] sm:$0x1] %vm4664_vm15, %v15924_v33  ;;  %4688 = vst.msk [vmem:[#allocation4 + $0x228] sm:$0x1] %vm4664_vm15, %v15924_v33 }
 0x443   :  { %3405 = vst.msk [vmem:[#allocation3 + $0x88] sm:$0xff] %vm3387_vm11, %v3230_v3  ;;  %9575 = vmatmul.mubr.msk.f32.gmra.mxu0 %vm3521_vm12, %v3465_v62  ;;  %3406 = vst.msk [vmem:[#allocation3 + $0x90] sm:$0xff] %vm3387_vm11, %v3232_v63 }
 0x444   :  { %9577 = vmatprep.mubr.msk.f32.mxu0 %vm3521_vm12, %v3466_v2  ;;  %4689 = vst.msk [vmem:[#allocation4 + $0x240] sm:$0x1] %vm4664_vm15, %v15924_v33  ;;  %4690 = vst.msk [vmem:[#allocation4 + $0x258] sm:$0x1] %vm4664_vm15, %v15924_v33 }
 0x445   :  { %4691 = vst.msk [vmem:[#allocation4 + $0x270] sm:$0x1] %vm4664_vm15, %v15924_v33  ;;  %4692 = vst.msk [vmem:[#allocation4 + $0x288] sm:$0x1] %vm4664_vm15, %v15924_v33 }
 0x446   :  { %v3234_v4 = vpop.permute.xlu1 %3233  ;;  %v3467_v6 = vld [vmem:[#allocation3 + $0x78] sm:$0xff]  ;;  %v3236_v8 = vpop.permute.xlu0 %3235  ;;  %v3468_v11 = vld [vmem:[#allocation3 + $0x80] sm:$0xff]  ;;  %4693 = vst.msk [vmem:[#allocation4 + $0x2a0] sm:$0x1] %vm4664_vm15, %v15924_v33  ;;  %4694 = vst.msk [vmem:[#allocation4 + $0x2b8] sm:$0x1] %vm4664_vm15, %v15924_v33 }
 0x447   :  { %3407 = vst.msk [vmem:[#allocation3 + $0x98] sm:$0xff] %vm3387_vm11, %v3234_v4  ;;  %9578 = vmatmul.mubr.msk.f32.gmra.mxu0 %vm3521_vm12, %v3467_v6  ;;  %3408 = vst.msk [vmem:[#allocation3 + $0xa0] sm:$0xff] %vm3387_vm11, %v3236_v8 }
 0x448   :  { %9580 = vmatprep.mubr.msk.f32.mxu0 %vm3521_vm12, %v3468_v11  ;;  %4695 = vst.msk [vmem:[#allocation4 + $0x2d0] sm:$0x1] %vm4664_vm15, %v15924_v33  ;;  %4696 = vst.msk [vmem:[#allocation4 + $0x2e8] sm:$0x1] %vm4664_vm15, %v15924_v33 }
 0x449   :  { %4697 = vst.msk [vmem:[#allocation4 + $0x300] sm:$0x1] %vm4664_vm15, %v15924_v33  ;;  %4698 = vst.msk [vmem:[#allocation4 + $0x318] sm:$0x1] %vm4664_vm15, %v15924_v33 }
 0x44a   :  { %v3238_v13 = vpop.permute.xlu1 %3237  ;;  %v3469_v16 = vld [vmem:[#allocation3 + $0x88] sm:$0xff]  ;;  %v3240_v20 = vpop.permute.xlu0 %3239  ;;  %v3470_v24 = vld [vmem:[#allocation3 + $0x90] sm:$0xff]  ;;  %4699 = vst.msk [vmem:[#allocation4 + $0x330] sm:$0x1] %vm4664_vm15, %v15924_v33  ;;  %4700 = vst.msk [vmem:[#allocation4 + $0x348] sm:$0x1] %vm4664_vm15, %v15924_v33 }
 0x44b   :  { %3409 = vst.msk [vmem:[#allocation3 + $0xa8] sm:$0xff] %vm3387_vm11, %v3238_v13  ;;  %9581 = vmatmul.mubr.msk.f32.gmra.mxu0 %vm3521_vm12, %v3469_v16  ;;  %3410 = vst.msk [vmem:[#allocation3 + $0xb0] sm:$0xff] %vm3387_vm11, %v3240_v20 }
 0x44c   :  { %9583 = vmatprep.mubr.msk.f32.mxu0 %vm3521_vm12, %v3470_v24  ;;  %4701 = vst.msk [vmem:[#allocation4 + $0x11] sm:$0x1] %vm4664_vm15, %v15924_v33  ;;  %4702 = vst.msk [vmem:[#allocation4 + $0x29] sm:$0x1] %vm4664_vm15, %v15924_v33 }
 0x44d   :  { %4703 = vst.msk [vmem:[#allocation4 + $0x41] sm:$0x1] %vm4664_vm15, %v15924_v33  ;;  %4704 = vst.msk [vmem:[#allocation4 + $0x59] sm:$0x1] %vm4664_vm15, %v15924_v33 }
 0x44e   :  { %v3242_v28 = vpop.permute.xlu1 %3241  ;;  %v3471_v35 = vld [vmem:[#allocation3 + $0x98] sm:$0xff]  ;;  %v3244_v43 = vpop.permute.xlu0 %3243  ;;  %v3472_v51 = vld [vmem:[#allocation3 + $0xa0] sm:$0xff]  ;;  %4705 = vst.msk [vmem:[#allocation4 + $0x71] sm:$0x1] %vm4664_vm15, %v15924_v33  ;;  %4706 = vst.msk [vmem:[#allocation4 + $0x89] sm:$0x1] %vm4664_vm15, %v15924_v33 }
 0x44f   :  { %3411 = vst.msk [vmem:[#allocation3 + $0xb8] sm:$0xff] %vm3387_vm11, %v3242_v28  ;;  %9584 = vmatmul.mubr.msk.f32.gmra.mxu0 %vm3521_vm12, %v3471_v35  ;;  %3412 = vst.msk [vmem:[#allocation3 + $0xc0] sm:$0xff] %vm3387_vm11, %v3244_v43 }
 0x450   :  { %9586 = vmatprep.mubr.msk.f32.mxu0 %vm3521_vm12, %v3472_v51  ;;  %4707 = vst.msk [vmem:[#allocation4 + $0xa1] sm:$0x1] %vm4664_vm15, %v15924_v33  ;;  %4708 = vst.msk [vmem:[#allocation4 + $0xb9] sm:$0x1] %vm4664_vm15, %v15924_v33 }
 0x451   :  { %4709 = vst.msk [vmem:[#allocation4 + $0xd1] sm:$0x1] %vm4664_vm15, %v15924_v33  ;;  %4710 = vst.msk [vmem:[#allocation4 + $0xe9] sm:$0x1] %vm4664_vm15, %v15924_v33 }
 0x452   :  { %v3246_v58 = vpop.permute.xlu1 %3245  ;;  %v3473_v60 = vld [vmem:[#allocation3 + $0xa8] sm:$0xff]  ;;  %v3248_v1 = vpop.permute.xlu0 %3247  ;;  %v3474_v5 = vld [vmem:[#allocation3 + $0xb0] sm:$0xff]  ;;  %4711 = vst.msk [vmem:[#allocation4 + $0x101] sm:$0x1] %vm4664_vm15, %v15924_v33  ;;  %4712 = vst.msk [vmem:[#allocation4 + $0x119] sm:$0x1] %vm4664_vm15, %v15924_v33 }
 0x453   :  { %3413 = vst.msk [vmem:[#allocation3 + $0xc8] sm:$0xff] %vm3387_vm11, %v3246_v58  ;;  %9587 = vmatmul.mubr.msk.f32.gmra.mxu0 %vm3521_vm12, %v3473_v60  ;;  %3414 = vst.msk [vmem:[#allocation3 + $0xd0] sm:$0xff] %vm3387_vm11, %v3248_v1 }
 0x454   :  { %9589 = vmatprep.mubr.msk.f32.mxu0 %vm3521_vm12, %v3474_v5  ;;  %4713 = vst.msk [vmem:[#allocation4 + $0x131] sm:$0x1] %vm4664_vm15, %v15924_v33  ;;  %4714 = vst.msk [vmem:[#allocation4 + $0x149] sm:$0x1] %vm4664_vm15, %v15924_v33 }
 0x455   :  { %4715 = vst.msk [vmem:[#allocation4 + $0x161] sm:$0x1] %vm4664_vm15, %v15924_v33  ;;  %4716 = vst.msk [vmem:[#allocation4 + $0x179] sm:$0x1] %vm4664_vm15, %v15924_v33 }
 0x456   :  { %v3250_v9 = vpop.permute.xlu1 %3249  ;;  %v3475_v14 = vld [vmem:[#allocation3 + $0xb8] sm:$0xff]  ;;  %v3252_v21 = vpop.permute.xlu0 %3251  ;;  %v3476_v53 = vld [vmem:[#allocation3 + $0xc0] sm:$0xff]  ;;  %4717 = vst.msk [vmem:[#allocation4 + $0x191] sm:$0x1] %vm4664_vm15, %v15924_v33  ;;  %4718 = vst.msk [vmem:[#allocation4 + $0x1a9] sm:$0x1] %vm4664_vm15, %v15924_v33 }
 0x457   :  { %3415 = vst.msk [vmem:[#allocation3 + $0xd8] sm:$0xff] %vm3387_vm11, %v3250_v9  ;;  %9590 = vmatmul.mubr.msk.f32.gmra.mxu0 %vm3521_vm12, %v3475_v14  ;;  %3416 = vst.msk [vmem:[#allocation3 + $0xe0] sm:$0xff] %vm3387_vm11, %v3252_v21 }
 0x458   :  { %9592 = vmatprep.mubr.msk.f32.mxu0 %vm3521_vm12, %v3476_v53  ;;  %4719 = vst.msk [vmem:[#allocation4 + $0x1c1] sm:$0x1] %vm4664_vm15, %v15924_v33  ;;  %4720 = vst.msk [vmem:[#allocation4 + $0x1d9] sm:$0x1] %vm4664_vm15, %v15924_v33 }
 0x459   :  { %4721 = vst.msk [vmem:[#allocation4 + $0x1f1] sm:$0x1] %vm4664_vm15, %v15924_v33  ;;  %4722 = vst.msk [vmem:[#allocation4 + $0x209] sm:$0x1] %vm4664_vm15, %v15924_v33 }
 0x45a   :  { %v3254_v31 = vpop.permute.xlu1 %3253  ;;  %v3477_v45 = vld [vmem:[#allocation3 + $0xc8] sm:$0xff]  ;;  %v3256_v17 = vpop.permute.xlu0 %3255  ;;  %v3478_v0 = vld [vmem:[#allocation3 + $0xd0] sm:$0xff]  ;;  %4723 = vst.msk [vmem:[#allocation4 + $0x221] sm:$0x1] %vm4664_vm15, %v15924_v33  ;;  %4724 = vst.msk [vmem:[#allocation4 + $0x239] sm:$0x1] %vm4664_vm15, %v15924_v33 }
 0x45b   :  { %3417 = vst.msk [vmem:[#allocation3 + $0xe8] sm:$0xff] %vm3387_vm11, %v3254_v31  ;;  %9593 = vmatmul.mubr.msk.f32.gmra.mxu0 %vm3521_vm12, %v3477_v45  ;;  %3418 = vst.msk [vmem:[#allocation3 + $0xf0] sm:$0xff] %vm3387_vm11, %v3256_v17 }
 0x45c   :  { %9595 = vmatprep.mubr.msk.f32.mxu0 %vm3521_vm12, %v3478_v0  ;;  %4725 = vst.msk [vmem:[#allocation4 + $0x251] sm:$0x1] %vm4664_vm15, %v15924_v33  ;;  %4726 = vst.msk [vmem:[#allocation4 + $0x269] sm:$0x1] %vm4664_vm15, %v15924_v33 }
 0x45d   :  { %4727 = vst.msk [vmem:[#allocation4 + $0x281] sm:$0x1] %vm4664_vm15, %v15924_v33  ;;  %4728 = vst.msk [vmem:[#allocation4 + $0x299] sm:$0x1] %vm4664_vm15, %v15924_v33 }
 0x45e   :  { %v3258_v37 = vpop.permute.xlu1 %3257  ;;  %v3479_v25 = vld [vmem:[#allocation3 + $0xd8] sm:$0xff]  ;;  %v3260_v61 = vpop.permute.xlu0 %3259  ;;  %v3480_v10 = vld [vmem:[#allocation3 + $0xe0] sm:$0xff]  ;;  %4729 = vst.msk [vmem:[#allocation4 + $0x2b1] sm:$0x1] %vm4664_vm15, %v15924_v33  ;;  %4730 = vst.msk [vmem:[#allocation4 + $0x2c9] sm:$0x1] %vm4664_vm15, %v15924_v33 }
 0x45f   :  { %3419 = vst.msk [vmem:[#allocation3 + $0xf8] sm:$0xff] %vm3387_vm11, %v3258_v37  ;;  %9596 = vmatmul.mubr.msk.f32.gmra.mxu0 %vm3521_vm12, %v3479_v25  ;;  %3420 = vst.msk [vmem:[#allocation3 + $0x100] sm:$0xff] %vm3387_vm11, %v3260_v61 }
 0x460   :  { %9598 = vmatprep.mubr.msk.f32.mxu0 %vm3521_vm12, %v3480_v10  ;;  %4731 = vst.msk [vmem:[#allocation4 + $0x2e1] sm:$0x1] %vm4664_vm15, %v15924_v33  ;;  %4732 = vst.msk [vmem:[#allocation4 + $0x2f9] sm:$0x1] %vm4664_vm15, %v15924_v33 }
 0x461   :  { %4733 = vst.msk [vmem:[#allocation4 + $0x311] sm:$0x1] %vm4664_vm15, %v15924_v33  ;;  %4734 = vst.msk [vmem:[#allocation4 + $0x329] sm:$0x1] %vm4664_vm15, %v15924_v33 }
 0x462   :  { %v3262_v15 = vpop.permute.xlu1 %3261  ;;  %v3481_v18 = vld [vmem:[#allocation3 + $0xe8] sm:$0xff]  ;;  %v3264_v19 = vpop.permute.xlu0 %3263  ;;  %v3482_v22 = vld [vmem:[#allocation3 + $0xf0] sm:$0xff]  ;;  %4735 = vst.msk [vmem:[#allocation4 + $0x341] sm:$0x1] %vm4664_vm15, %v15924_v33  ;;  %4736 = vst.msk [vmem:[#allocation4 + $0x359] sm:$0x1] %vm4664_vm15, %v15924_v33 }
 0x463   :  { %3421 = vst.msk [vmem:[#allocation3 + $0x108] sm:$0xff] %vm3387_vm11, %v3262_v15  ;;  %9599 = vmatmul.mubr.msk.f32.gmra.mxu0 %vm3521_vm12, %v3481_v18  ;;  %3422 = vst.msk [vmem:[#allocation3 + $0x110] sm:$0xff] %vm3387_vm11, %v3264_v19 }
 0x464   :  { %9601 = vmatprep.mubr.msk.f32.mxu0 %vm3521_vm12, %v3482_v22 }
 0x466   :  { %v3266_v23 = vpop.permute.xlu1 %3265  ;;  %v3483_v26 = vld [vmem:[#allocation3 + $0xf8] sm:$0xff]  ;;  %v3268_v27 = vpop.permute.xlu0 %3267  ;;  %v3484_v29 = vld [vmem:[#allocation3 + $0x100] sm:$0xff] }
 0x467   :  { %3423 = vst.msk [vmem:[#allocation3 + $0x118] sm:$0xff] %vm3387_vm11, %v3266_v23  ;;  %9602 = vmatmul.mubr.msk.f32.gmra.mxu0 %vm3521_vm12, %v3483_v26  ;;  %3424 = vst.msk [vmem:[#allocation3 + $0x120] sm:$0xff] %vm3387_vm11, %v3268_v27 }
 0x468   :  { %9604 = vmatprep.mubr.msk.f32.mxu0 %vm3521_vm12, %v3484_v29 }
 0x46a   :  { %v3270_v30 = vpop.permute.xlu1 %3269  ;;  %v3485_v32 = vld [vmem:[#allocation3 + $0x108] sm:$0xff]  ;;  %v3272_v34 = vpop.permute.xlu0 %3271  ;;  %v3486_v36 = vld [vmem:[#allocation3 + $0x110] sm:$0xff] }
 0x46b   :  { %3425 = vst.msk [vmem:[#allocation3 + $0x128] sm:$0xff] %vm3387_vm11, %v3270_v30  ;;  %9605 = vmatmul.mubr.msk.f32.gmra.mxu0 %vm3521_vm12, %v3485_v32  ;;  %3426 = vst.msk [vmem:[#allocation3 + $0x130] sm:$0xff] %vm3387_vm11, %v3272_v34 }
 0x46c   :  { %9607 = vmatprep.mubr.msk.f32.mxu0 %vm3521_vm12, %v3486_v36 }
 0x46e   :  { %v3274_v38 = vpop.permute.xlu1 %3273  ;;  %v3487_v39 = vld [vmem:[#allocation3 + $0x118] sm:$0xff]  ;;  %v3276_v40 = vpop.permute.xlu0 %3275  ;;  %v3488_v41 = vld [vmem:[#allocation3 + $0x120] sm:$0xff] }
 0x46f   :  { %3427 = vst.msk [vmem:[#allocation3 + $0x138] sm:$0xff] %vm3387_vm11, %v3274_v38  ;;  %9608 = vmatmul.mubr.msk.f32.gmra.mxu0 %vm3521_vm12, %v3487_v39  ;;  %3428 = vst.msk [vmem:[#allocation3 + $0x140] sm:$0xff] %vm3387_vm11, %v3276_v40 }
 0x470   :  { %9610 = vmatprep.mubr.msk.f32.mxu0 %vm3521_vm12, %v3488_v41 }
 0x472   :  { %v3278_v42 = vpop.permute.xlu1 %3277  ;;  %v3489_v44 = vld [vmem:[#allocation3 + $0x128] sm:$0xff]  ;;  %v3280_v46 = vpop.permute.xlu0 %3279  ;;  %v3490_v47 = vld [vmem:[#allocation3 + $0x130] sm:$0xff] }
 0x473   :  { %3429 = vst.msk [vmem:[#allocation3 + $0x148] sm:$0xff] %vm3387_vm11, %v3278_v42  ;;  %9611 = vmatmul.mubr.msk.f32.gmra.mxu0 %vm3521_vm12, %v3489_v44  ;;  %3430 = vst.msk [vmem:[#allocation3 + $0x150] sm:$0xff] %vm3387_vm11, %v3280_v46 }
 0x474   :  { %9613 = vmatprep.mubr.msk.f32.mxu0 %vm3521_vm12, %v3490_v47 }
 0x476   :  { %v3282_v48 = vpop.permute.xlu1 %3281  ;;  %v3491_v49 = vld [vmem:[#allocation3 + $0x138] sm:$0xff]  ;;  %v3284_v50 = vpop.permute.xlu0 %3283  ;;  %v3492_v52 = vld [vmem:[#allocation3 + $0x140] sm:$0xff] }
 0x477   :  { %3431 = vst.msk [vmem:[#allocation3 + $0x158] sm:$0xff] %vm3387_vm11, %v3282_v48  ;;  %9614 = vmatmul.mubr.msk.f32.gmra.mxu0 %vm3521_vm12, %v3491_v49  ;;  %3432 = vst.msk [vmem:[#allocation3 + $0x160] sm:$0xff] %vm3387_vm11, %v3284_v50 }
 0x478   :  { %9616 = vmatprep.mubr.msk.f32.mxu0 %vm3521_vm12, %v3492_v52 }
 0x47a   :  { %v3286_v12 = vpop.permute.xlu1 %3285  ;;  %v3493_v54 = vld [vmem:[#allocation3 + $0x148] sm:$0xff]  ;;  %v3288_v55 = vpop.permute.xlu0 %3287  ;;  %v3494_v59 = vld [vmem:[#allocation3 + $0x150] sm:$0xff] }
 0x47b   :  { %3433 = vst.msk [vmem:[#allocation3 + $0x168] sm:$0xff] %vm3387_vm11, %v3286_v12  ;;  %9617 = vmatmul.mubr.msk.f32.gmra.mxu0 %vm3521_vm12, %v3493_v54  ;;  %3434 = vst.msk [vmem:[#allocation3 + $0x170] sm:$0xff] %vm3387_vm11, %v3288_v55 }
 0x47c   :  { %9619 = vmatprep.mubr.msk.f32.mxu0 %vm3521_vm12, %v3494_v59 }
 0x47e   :  { %v3290_v56 = vpop.permute.xlu1 %3289  ;;  %v3495_v57 = vld [vmem:[#allocation3 + $0x158] sm:$0xff]  ;;  %v3292_v7 = vpop.permute.xlu0 %3291  ;;  %v3496_v3 = vld [vmem:[#allocation3 + $0x160] sm:$0xff] }
 0x47f   :  { %3435 = vst.msk [vmem:[#allocation3 + $0x178] sm:$0xff] %vm3387_vm11, %v3290_v56  ;;  %9620 = vmatmul.mubr.msk.f32.gmra.mxu0 %vm3521_vm12, %v3495_v57  ;;  %3436 = vst.msk [vmem:[#allocation3 + $0x180] sm:$0xff] %vm3387_vm11, %v3292_v7 }
 0x480   :  { %9622 = vmatprep.mubr.msk.f32.mxu0 %vm3521_vm12, %v3496_v3 }
 0x482   :  { %v3294_v62 = vpop.permute.xlu1 %3293  ;;  %v3497_v63 = vld [vmem:[#allocation3 + $0x168] sm:$0xff]  ;;  %v3296_v2 = vpop.permute.xlu0 %3295  ;;  %v3498_v4 = vld [vmem:[#allocation3 + $0x170] sm:$0xff] }
 0x483   :  { %3437 = vst.msk [vmem:[#allocation3 + $0x188] sm:$0xff] %vm3387_vm11, %v3294_v62  ;;  %9623 = vmatmul.mubr.msk.f32.gmra.mxu0 %vm3521_vm12, %v3497_v63  ;;  %3438 = vst.msk [vmem:[#allocation3 + $0x190] sm:$0xff] %vm3387_vm11, %v3296_v2 }
 0x484   :  { %9625 = vmatprep.mubr.msk.f32.mxu0 %vm3521_vm12, %v3498_v4 }
 0x486   :  { %v3298_v6 = vpop.permute.xlu1 %3297  ;;  %v3499_v8 = vld [vmem:[#allocation3 + $0x178] sm:$0xff]  ;;  %v3300_v11 = vpop.permute.xlu0 %3299  ;;  %v3500_v13 = vld [vmem:[#allocation3 + $0x180] sm:$0xff] }
 0x487   :  { %3439 = vst.msk [vmem:[#allocation3 + $0x198] sm:$0xff] %vm3387_vm11, %v3298_v6  ;;  %9626 = vmatmul.mubr.msk.f32.gmra.mxu0 %vm3521_vm12, %v3499_v8  ;;  %3440 = vst.msk [vmem:[#allocation3 + $0x1a0] sm:$0xff] %vm3387_vm11, %v3300_v11 }
 0x488   :  { %9628 = vmatprep.mubr.msk.f32.mxu0 %vm3521_vm12, %v3500_v13 }
 0x48a   :  { %v3302_v16 = vpop.permute.xlu1 %3301  ;;  %v3501_v20 = vld [vmem:[#allocation3 + $0x188] sm:$0xff]  ;;  %v3304_v24 = vpop.permute.xlu0 %3303  ;;  %v3502_v28 = vld [vmem:[#allocation3 + $0x190] sm:$0xff] }
 0x48b   :  { %3441 = vst.msk [vmem:[#allocation3 + $0x1a8] sm:$0xff] %vm3387_vm11, %v3302_v16  ;;  %9629 = vmatmul.mubr.msk.f32.gmra.mxu0 %vm3521_vm12, %v3501_v20  ;;  %3442 = vst.msk [vmem:[#allocation3 + $0x1b0] sm:$0xff] %vm3387_vm11, %v3304_v24 }
 0x48c   :  { %9631 = vmatprep.mubr.msk.f32.mxu0 %vm3521_vm12, %v3502_v28 }
 0x48e   :  { %v3306_v35 = vpop.permute.xlu1 %3305  ;;  %v3503_v43 = vld [vmem:[#allocation3 + $0x198] sm:$0xff]  ;;  %v3308_v51 = vpop.permute.xlu0 %3307  ;;  %v3504_v58 = vld [vmem:[#allocation3 + $0x1a0] sm:$0xff] }
 0x48f   :  { %3443 = vst.msk [vmem:[#allocation3 + $0x1b8] sm:$0xff] %vm3387_vm11, %v3306_v35  ;;  %9632 = vmatmul.mubr.msk.f32.gmra.mxu0 %vm3521_vm12, %v3503_v43  ;;  %3444 = vst.msk [vmem:[#allocation3 + $0x1c0] sm:$0xff] %vm3387_vm11, %v3308_v51 }
 0x490   :  { %9634 = vmatprep.mubr.msk.f32.mxu0 %vm3521_vm12, %v3504_v58 }
 0x492   :  { %v3310_v60 = vpop.permute.xlu1 %3309  ;;  %v3505_v1 = vld [vmem:[#allocation3 + $0x1a8] sm:$0xff]  ;;  %v3312_v5 = vpop.permute.xlu0 %3311  ;;  %v3506_v9 = vld [vmem:[#allocation3 + $0x1b0] sm:$0xff] }
 0x493   :  { %3445 = vst.msk [vmem:[#allocation3 + $0x1c8] sm:$0xff] %vm3387_vm11, %v3310_v60  ;;  %9635 = vmatmul.mubr.msk.f32.gmra.mxu0 %vm3521_vm12, %v3505_v1  ;;  %3446 = vst.msk [vmem:[#allocation3 + $0x1d0] sm:$0xff] %vm3387_vm11, %v3312_v5 }
 0x494   :  { %9637 = vmatprep.mubr.msk.f32.mxu0 %vm3521_vm12, %v3506_v9 }
 0x496   :  { %v3314_v14 = vpop.permute.xlu1 %3313  ;;  %v3507_v21 = vld [vmem:[#allocation3 + $0x1b8] sm:$0xff]  ;;  %v3316_v53 = vpop.permute.xlu0 %3315  ;;  %v3508_v31 = vld [vmem:[#allocation3 + $0x1c0] sm:$0xff] }
 0x497   :  { %3447 = vst.msk [vmem:[#allocation3 + $0x1d8] sm:$0xff] %vm3387_vm11, %v3314_v14  ;;  %9638 = vmatmul.mubr.msk.f32.gmra.mxu0 %vm3521_vm12, %v3507_v21  ;;  %3448 = vst.msk [vmem:[#allocation3 + $0x1e0] sm:$0xff] %vm3387_vm11, %v3316_v53 }
 0x498   :  { %9640 = vmatprep.mubr.msk.f32.mxu0 %vm3521_vm12, %v3508_v31 }
 0x49a   :  { %v3318_v45 = vpop.permute.xlu1 %3317  ;;  %v3509_v17 = vld [vmem:[#allocation3 + $0x1c8] sm:$0xff]  ;;  %v3510_v37 = vld [vmem:[#allocation3 + $0x1d0] sm:$0xff] }
 0x49b   :  { %3449 = vst.msk [vmem:[#allocation3 + $0x1e8] sm:$0xff] %vm3387_vm11, %v3318_v45  ;;  %9641 = vmatmul.mubr.msk.f32.gmra.mxu0 %vm3521_vm12, %v3509_v17  ;;  %v3320_v0 = vpop.permute.xlu0 %3319 }
 0x49c   :  { %3450 = vst.msk [vmem:[#allocation3 + $0x1f0] sm:$0xff] %vm3387_vm11, %v3320_v0  ;;  %9643 = vmatprep.mubr.msk.f32.mxu0 %vm3521_vm12, %v3510_v37 }
 0x49e   :  { %v3322_v25 = vpop.permute.xlu1 %3321  ;;  %v3511_v61 = vld [vmem:[#allocation3 + $0x1d8] sm:$0xff]  ;;  %v3512_v10 = vld [vmem:[#allocation3 + $0x1e0] sm:$0xff] }
 0x49f   :  { %3451 = vst.msk [vmem:[#allocation3 + $0x1f8] sm:$0xff] %vm3387_vm11, %v3322_v25  ;;  %9644 = vmatmul.mubr.msk.f32.gmra.mxu0 %vm3521_vm12, %v3511_v61 }
 0x4a0   :  { %9646 = vmatprep.mubr.msk.f32.mxu0 %vm3521_vm12, %v3512_v10 }
 0x4a2   :  { %v3513_v15 = vld [vmem:[#allocation3 + $0x1e8] sm:$0xff] }
 0x4a3   :  { %9647 = vmatmul.mubr.msk.f32.gmra.mxu0 %vm3521_vm12, %v3513_v15  ;;  %v3514_v18 = vld [vmem:[#allocation3 + $0x1f0] sm:$0xff] }
 0x4a4   :  { %9649 = vmatprep.mubr.msk.f32.mxu0 %vm3521_vm12, %v3514_v18 }
 0x4a6   :  { %v3515_v19 = vld [vmem:[#allocation3 + $0x1f8] sm:$0xff] }
 0x4a7   :  { %9650 = vmatmul.mubr.msk.f32.gmra.mxu0 %vm3521_vm12, %v3515_v19 }
 0x4eb   :  { %v11705_v22 = vpop.f32.mrf.mxu0 }
 0x4ec   :  { %v4240_v26 = vmul.f32 %v11705_v22, %v11705_v22  ;;  %v4105_v32 = vsel %vm4103_vm13, %v11705_v22, 0.0 }
 0x4ed   :  { %v11707_v23 = vpop.f32.mrf.mxu0 }
 0x4ee   :  { %v4104_v27 = vsel %vm4103_vm13, %v11707_v23, 0.0  ;;  %v4239_v29 = vmul.f32 %v11707_v23, %v11707_v23  ;;  %v4304_v39 = vsel %vm4103_vm13, %v4240_v26, 0.0 }
 0x4ef   :  { %v11715_v30 = vpop.f32.mrf.mxu0  ;;  %v4106_v36 = vadd.f32 %v4105_v32, %v4104_v27 }
 0x4f0   :  { %v4303_v34 = vsel %vm4103_vm13, %v4239_v29, 0.0  ;;  %v4242_v40 = vmul.f32 %v11715_v30, %v11715_v30  ;;  %v4109_v48 = vsel %vm4103_vm13, %v11715_v30, 0.0 }
 0x4f1   :  { %v11720_v38 = vpop.f32.mrf.mxu0  ;;  %v4305_v44 = vadd.f32 %v4304_v39, %v4303_v34 }
 0x4f2   :  { %v4107_v41 = vsel %vm4103_vm13, %v11720_v38, 0.0  ;;  %v4241_v42 = vmul.f32 %v11720_v38, %v11720_v38  ;;  %v4308_v54 = vsel %vm4103_vm13, %v4242_v40, 0.0 }
 0x4f3   :  { %v4108_v46 = vadd.f32 %v4107_v41, %v4106_v36  ;;  %v11729_v47 = vpop.f32.mrf.mxu0 }
 0x4f4   :  { %v4306_v49 = vsel %vm4103_vm13, %v4241_v42, 0.0  ;;  %v4244_v55 = vmul.f32 %v11729_v47, %v11729_v47  ;;  %v4113_v62 = vsel %vm4103_vm13, %v11729_v47, 0.0 }
 0x4f5   :  { %v4110_v50 = vadd.f32 %v4109_v48, %v4108_v46  ;;  %v4307_v52 = vadd.f32 %v4306_v49, %v4305_v44  ;;  %v11734_v12 = vpop.f32.mrf.mxu0 }
 0x4f6   :  { %v4111_v59 = vsel %vm4103_vm13, %v11734_v12, 0.0  ;;  %v4243_v56 = vmul.f32 %v11734_v12, %v11734_v12  ;;  %v4312_v8 = vsel %vm4103_vm13, %v4244_v55, 0.0 }
 0x4f7   :  { %v4309_v57 = vadd.f32 %v4308_v54, %v4307_v52  ;;  %v4112_v7 = vadd.f32 %v4111_v59, %v4110_v50  ;;  %v11743_v3 = vpop.f32.mrf.mxu0 }
 0x4f8   :  { %v4310_v63 = vsel %vm4103_vm13, %v4243_v56, 0.0  ;;  %v4246_v11 = vmul.f32 %v11743_v3, %v11743_v3  ;;  %v4117_v35 = vsel %vm4103_vm13, %v11743_v3, 0.0 }
 0x4f9   :  { %v4311_v2 = vadd.f32 %v4310_v63, %v4309_v57  ;;  %v11748_v4 = vpop.f32.mrf.mxu0  ;;  %v4114_v6 = vadd.f32 %v4113_v62, %v4112_v7 }
 0x4fa   :  { %v4115_v13 = vsel %vm4103_vm13, %v11748_v4, 0.0  ;;  %v4245_v16 = vmul.f32 %v11748_v4, %v11748_v4  ;;  %v4316_v1 = vsel %vm4103_vm13, %v4246_v11, 0.0 }
 0x4fb   :  { %v4116_v20 = vadd.f32 %v4115_v13, %v4114_v6  ;;  %v4313_v24 = vadd.f32 %v4312_v8, %v4311_v2  ;;  %v11757_v28 = vpop.f32.mrf.mxu0 }
 0x4fc   :  { %v4314_v43 = vsel %vm4103_vm13, %v4245_v16, 0.0  ;;  %v4248_v5 = vmul.f32 %v11757_v28, %v11757_v28  ;;  %v4121_v45 = vsel %vm4103_vm13, %v11757_v28, 0.0 }
 0x4fd   :  { %v4315_v51 = vadd.f32 %v4314_v43, %v4313_v24  ;;  %v11762_v58 = vpop.f32.mrf.mxu0  ;;  %v4118_v60 = vadd.f32 %v4117_v35, %v4116_v20 }
 0x4fe   :  { %v4119_v9 = vsel %vm4103_vm13, %v11762_v58, 0.0  ;;  %v4247_v14 = vmul.f32 %v11762_v58, %v11762_v58  ;;  %v4320_v61 = vsel %vm4103_vm13, %v4248_v5, 0.0 }
 0x4ff   :  { %v4120_v21 = vadd.f32 %v4119_v9, %v4118_v60  ;;  %v4317_v53 = vadd.f32 %v4316_v1, %v4315_v51  ;;  %v11771_v31 = vpop.f32.mrf.mxu0 }
 0x500   :  { %v4318_v17 = vsel %vm4103_vm13, %v4247_v14, 0.0  ;;  %v4250_v10 = vmul.f32 %v11771_v31, %v11771_v31  ;;  %v4125_v29 = vsel %vm4103_vm13, %v11771_v31, 0.0 }
 0x501   :  { %v4319_v0 = vadd.f32 %v4318_v17, %v4317_v53  ;;  %v11776_v37 = vpop.f32.mrf.mxu0  ;;  %v4122_v25 = vadd.f32 %v4121_v45, %v4120_v21 }
 0x502   :  { %v4123_v15 = vsel %vm4103_vm13, %v11776_v37, 0.0  ;;  %v4249_v18 = vmul.f32 %v11776_v37, %v11776_v37  ;;  %v4324_v40 = vsel %vm4103_vm13, %v4250_v10, 0.0 }
 0x503   :  { %v4124_v19 = vadd.f32 %v4123_v15, %v4122_v25  ;;  %v4321_v26 = vadd.f32 %v4320_v61, %v4319_v0  ;;  %v11785_v27 = vpop.f32.mrf.mxu0 }
 0x504   :  { %v4322_v32 = vsel %vm4103_vm13, %v4249_v18, 0.0  ;;  %v4252_v41 = vmul.f32 %v11785_v27, %v11785_v27  ;;  %v4129_v50 = vsel %vm4103_vm13, %v11785_v27, 0.0 }
 0x505   :  { %v4323_v34 = vadd.f32 %v4322_v32, %v4321_v26  ;;  %v11790_v36 = vpop.f32.mrf.mxu0  ;;  %v4126_v39 = vadd.f32 %v4125_v29, %v4124_v19 }
 0x506   :  { %v4127_v42 = vsel %vm4103_vm13, %v11790_v36, 0.0  ;;  %v4251_v44 = vmul.f32 %v11790_v36, %v11790_v36  ;;  %v4328_v56 = vsel %vm4103_vm13, %v4252_v41, 0.0 }
 0x507   :  { %v4128_v46 = vadd.f32 %v4127_v42, %v4126_v39  ;;  %v4325_v48 = vadd.f32 %v4324_v40, %v4323_v34  ;;  %v11799_v49 = vpop.f32.mrf.mxu0 }
 0x508   :  { %v4326_v52 = vsel %vm4103_vm13, %v4251_v44, 0.0  ;;  %v4254_v57 = vmul.f32 %v11799_v49, %v11799_v49  ;;  %v4133_v8 = vsel %vm4103_vm13, %v11799_v49, 0.0 }
 0x509   :  { %v4327_v54 = vadd.f32 %v4326_v52, %v4325_v48  ;;  %v11804_v55 = vpop.f32.mrf.mxu0  ;;  %v4130_v59 = vadd.f32 %v4129_v50, %v4128_v46 }
 0x50a   :  { %v4131_v7 = vsel %vm4103_vm13, %v11804_v55, 0.0  ;;  %v4253_v62 = vmul.f32 %v11804_v55, %v11804_v55  ;;  %v4332_v24 = vsel %vm4103_vm13, %v4254_v57, 0.0 }
 0x50b   :  { %v4132_v63 = vadd.f32 %v4131_v7, %v4130_v59  ;;  %v4329_v2 = vadd.f32 %v4328_v56, %v4327_v54  ;;  %v11813_v6 = vpop.f32.mrf.mxu0 }
 0x50c   :  { %v4330_v11 = vsel %vm4103_vm13, %v4253_v62, 0.0  ;;  %v4256_v35 = vmul.f32 %v11813_v6, %v11813_v6  ;;  %v4137_v9 = vsel %vm4103_vm13, %v11813_v6, 0.0 }
 0x50d   :  { %v4331_v13 = vadd.f32 %v4330_v11, %v4329_v2  ;;  %v11818_v16 = vpop.f32.mrf.mxu0  ;;  %v4134_v20 = vadd.f32 %v4133_v8, %v4132_v63 }
 0x50e   :  { %v4135_v43 = vsel %vm4103_vm13, %v11818_v16, 0.0  ;;  %v4255_v51 = vmul.f32 %v11818_v16, %v11818_v16  ;;  %v4336_v17 = vsel %vm4103_vm13, %v4256_v35, 0.0 }
 0x50f   :  { %v4136_v60 = vadd.f32 %v4135_v43, %v4134_v20  ;;  %v4333_v1 = vadd.f32 %v4332_v24, %v4331_v13  ;;  %v11827_v5 = vpop.f32.mrf.mxu0 }
 0x510   :  { %v4334_v14 = vsel %vm4103_vm13, %v4255_v51, 0.0  ;;  %v4258_v0 = vmul.f32 %v11827_v5, %v11827_v5  ;;  %v4141_v19 = vsel %vm4103_vm13, %v11827_v5, 0.0 }
 0x511   :  { %v4335_v21 = vadd.f32 %v4334_v14, %v4333_v1  ;;  %v11832_v53 = vpop.f32.mrf.mxu0  ;;  %v4138_v45 = vadd.f32 %v4137_v9, %v4136_v60 }
 0x512   :  { %v4139_v25 = vsel %vm4103_vm13, %v11832_v53, 0.0  ;;  %v4257_v61 = vmul.f32 %v11832_v53, %v11832_v53  ;;  %v4340_v39 = vsel %vm4103_vm13, %v4258_v0, 0.0 }
 0x513   :  { %v4140_v10 = vadd.f32 %v4139_v25, %v4138_v45  ;;  %v4337_v15 = vadd.f32 %v4336_v17, %v4335_v21  ;;  %v11841_v18 = vpop.f32.mrf.mxu0 }
 0x514   :  { %v4338_v26 = vsel %vm4103_vm13, %v4257_v61, 0.0  ;;  %v4260_v40 = vmul.f32 %v11841_v18, %v11841_v18  ;;  %v4145_v50 = vsel %vm4103_vm13, %v11841_v18, 0.0 }
 0x515   :  { %v4339_v29 = vadd.f32 %v4338_v26, %v4337_v15  ;;  %v11846_v32 = vpop.f32.mrf.mxu0  ;;  %v4142_v34 = vadd.f32 %v4141_v19, %v4140_v10 }
 0x516   :  { %v4143_v41 = vsel %vm4103_vm13, %v11846_v32, 0.0  ;;  %v4259_v42 = vmul.f32 %v11846_v32, %v11846_v32  ;;  %v4344_v57 = vsel %vm4103_vm13, %v4260_v40, 0.0 }
 0x517   :  { %v4144_v44 = vadd.f32 %v4143_v41, %v4142_v34  ;;  %v4341_v46 = vadd.f32 %v4340_v39, %v4339_v29  ;;  %v11855_v48 = vpop.f32.mrf.mxu0 }
 0x518   :  { %v4342_v52 = vsel %vm4103_vm13, %v4259_v42, 0.0  ;;  %v4262_v7 = vmul.f32 %v11855_v48, %v11855_v48  ;;  %v4149_v13 = vsel %vm4103_vm13, %v11855_v48, 0.0 }
 0x519   :  { %v4343_v54 = vadd.f32 %v4342_v52, %v4341_v46  ;;  %v11860_v59 = vpop.f32.mrf.mxu0  ;;  %v4146_v56 = vadd.f32 %v4145_v50, %v4144_v44  ;;  %v4930_v52 = vld [vmem:[#allocation4 + $0x1] sm:$0xff] }
 0x51a   :  { %v4147_v62 = vsel %vm4103_vm13, %v11860_v59, 0.0  ;;  %v4261_v63 = vmul.f32 %v11860_v59, %v11860_v59  ;;  %v4348_v51 = vsel %vm4103_vm13, %v4262_v7, 0.0  ;;  %5058 = vrot.lane.b32.xlu0 %v4930_v52, %s9807_s10 }
 0x51b   :  { %v4148_v2 = vadd.f32 %v4147_v62, %v4146_v56  ;;  %v4345_v8 = vadd.f32 %v4344_v57, %v4343_v54  ;;  %v11869_v11 = vpop.f32.mrf.mxu0 }
 0x51c   :  { %v4346_v20 = vsel %vm4103_vm13, %v4261_v63, 0.0  ;;  %v4264_v60 = vmul.f32 %v11869_v11, %v11869_v11  ;;  %v4153_v17 = vsel %vm4103_vm13, %v11869_v11, 0.0 }
 0x51d   :  { %v4347_v24 = vadd.f32 %v4346_v20, %v4345_v8  ;;  %v11874_v35 = vpop.f32.mrf.mxu0  ;;  %v4150_v43 = vadd.f32 %v4149_v13, %v4148_v2 }
 0x51e   :  { %v4151_v1 = vsel %vm4103_vm13, %v11874_v35, 0.0  ;;  %v4263_v9 = vmul.f32 %v11874_v35, %v11874_v35  ;;  %v4352_v15 = vsel %vm4103_vm13, %v4264_v60, 0.0 }
 0x51f   :  { %v4152_v14 = vadd.f32 %v4151_v1, %v4150_v43  ;;  %v4349_v21 = vadd.f32 %v4348_v51, %v4347_v24  ;;  %v11883_v45 = vpop.f32.mrf.mxu0 }
 0x520   :  { %v4350_v0 = vsel %vm4103_vm13, %v4263_v9, 0.0  ;;  %v4266_v19 = vmul.f32 %v11883_v45, %v11883_v45  ;;  %v4157_v41 = vsel %vm4103_vm13, %v11883_v45, 0.0 }
 0x521   :  { %v4351_v25 = vadd.f32 %v4350_v0, %v4349_v21  ;;  %v11888_v61 = vpop.f32.mrf.mxu0  ;;  %v4154_v10 = vadd.f32 %v4153_v17, %v4152_v14 }
 0x522   :  { %v4155_v26 = vsel %vm4103_vm13, %v11888_v61, 0.0  ;;  %v4265_v29 = vmul.f32 %v11888_v61, %v11888_v61  ;;  %v4356_v54 = vsel %vm4103_vm13, %v4266_v19, 0.0 }
 0x523   :  { %v4156_v34 = vadd.f32 %v4155_v26, %v4154_v10  ;;  %v4353_v39 = vadd.f32 %v4352_v15, %v4351_v25  ;;  %v11897_v40 = vpop.f32.mrf.mxu0 }
 0x524   :  { %v4354_v42 = vsel %vm4103_vm13, %v4265_v29, 0.0  ;;  %v4268_v56 = vmul.f32 %v11897_v40, %v11897_v40  ;;  %v4161_v8 = vsel %vm4103_vm13, %v11897_v40, 0.0 }
 0x525   :  { %v4355_v44 = vadd.f32 %v4354_v42, %v4353_v39  ;;  %v11902_v46 = vpop.f32.mrf.mxu0  ;;  %v4158_v50 = vadd.f32 %v4157_v41, %v4156_v34 }
 0x526   :  { %v4159_v57 = vsel %vm4103_vm13, %v11902_v46, 0.0  ;;  %v4267_v7 = vmul.f32 %v11902_v46, %v11902_v46  ;;  %v4360_v51 = vsel %vm4103_vm13, %v4268_v56, 0.0 }
 0x527   :  { %v4160_v62 = vadd.f32 %v4159_v57, %v4158_v50  ;;  %v4357_v63 = vadd.f32 %v4356_v54, %v4355_v44  ;;  %v11912_v2 = vpop.f32.mrf.mxu0 }
 0x528   :  { %v4358_v13 = vsel %vm4103_vm13, %v4267_v7, 0.0  ;;  %v4270_v60 = vmul.f32 %v11912_v2, %v11912_v2  ;;  %v4165_v0 = vsel %vm4103_vm13, %v11912_v2, 0.0 }
 0x529   :  { %v4359_v20 = vadd.f32 %v4358_v13, %v4357_v63  ;;  %v11917_v24 = vpop.f32.mrf.mxu0  ;;  %v4162_v43 = vadd.f32 %v4161_v8, %v4160_v62 }
 0x52a   :  { %v4163_v1 = vsel %vm4103_vm13, %v11917_v24, 0.0  ;;  %v4269_v9 = vmul.f32 %v11917_v24, %v11917_v24  ;;  %v4364_v26 = vsel %vm4103_vm13, %v4270_v60, 0.0 }
 0x52b   :  { %v4164_v14 = vadd.f32 %v4163_v1, %v4162_v43  ;;  %v4361_v21 = vadd.f32 %v4360_v51, %v4359_v20  ;;  %v11926_v17 = vpop.f32.mrf.mxu0 }
 0x52c   :  { %v4362_v25 = vsel %vm4103_vm13, %v4269_v9, 0.0  ;;  %v4272_v29 = vmul.f32 %v11926_v17, %v11926_v17  ;;  %v4169_v50 = vsel %vm4103_vm13, %v11926_v17, 0.0 }
 0x52d   :  { %v4363_v10 = vadd.f32 %v4362_v25, %v4361_v21  ;;  %v11931_v15 = vpop.f32.mrf.mxu0  ;;  %v4166_v19 = vadd.f32 %v4165_v0, %v4164_v14 }
 0x52e   :  { %v4167_v34 = vsel %vm4103_vm13, %v11931_v15, 0.0  ;;  %v4271_v39 = vmul.f32 %v11931_v15, %v11931_v15  ;;  %v4368_v7 = vsel %vm4103_vm13, %v4272_v29, 0.0 }
 0x52f   :  { %v4168_v41 = vadd.f32 %v4167_v34, %v4166_v19  ;;  %v4365_v42 = vadd.f32 %v4364_v26, %v4363_v10  ;;  %v11940_v44 = vpop.f32.mrf.mxu0 }
 0x530   :  { %v4366_v52 = vsel %vm4103_vm13, %v4271_v39, 0.0  ;;  %v4274_v62 = vmul.f32 %v11940_v44, %v11940_v44  ;;  %v4173_v51 = vsel %vm4103_vm13, %v11940_v44, 0.0 }
 0x531   :  { %v4367_v54 = vadd.f32 %v4366_v52, %v4365_v42  ;;  %v11945_v56 = vpop.f32.mrf.mxu0  ;;  %v4170_v57 = vadd.f32 %v4169_v50, %v4168_v41 }
 0x532   :  { %v4171_v63 = vsel %vm4103_vm13, %v11945_v56, 0.0  ;;  %v4273_v8 = vmul.f32 %v11945_v56, %v11945_v56  ;;  %v4372_v21 = vsel %vm4103_vm13, %v4274_v62, 0.0 }
 0x533   :  { %v4172_v13 = vadd.f32 %v4171_v63, %v4170_v57  ;;  %v4369_v20 = vadd.f32 %v4368_v7, %v4367_v54  ;;  %v11954_v43 = vpop.f32.mrf.mxu0 }
 0x534   :  { %v4370_v60 = vsel %vm4103_vm13, %v4273_v8, 0.0  ;;  %v4276_v0 = vmul.f32 %v11954_v43, %v11954_v43  ;;  %v4177_v34 = vsel %vm4103_vm13, %v11954_v43, 0.0 }
 0x535   :  { %v4371_v1 = vadd.f32 %v4370_v60, %v4369_v20  ;;  %v11959_v9 = vpop.f32.mrf.mxu0  ;;  %v4174_v14 = vadd.f32 %v4173_v51, %v4172_v13  ;;  %v4931_v51 = vld [vmem:[#allocation4 + $0x9] sm:$0xff] }
 0x536   :  { %v4175_v25 = vsel %vm4103_vm13, %v11959_v9, 0.0  ;;  %v4275_v10 = vmul.f32 %v11959_v9, %v11959_v9  ;;  %v4376_v52 = vsel %vm4103_vm13, %v4276_v0, 0.0  ;;  %5060 = vrot.lane.b32.xlu1 %v4931_v51, %s9807_s10 }
 0x537   :  { %v4176_v19 = vadd.f32 %v4175_v25, %v4174_v14  ;;  %v4373_v26 = vadd.f32 %v4372_v21, %v4371_v1  ;;  %v11972_v29 = vpop.f32.mrf.mxu0 }
 0x538   :  { %15925 = vst [vmem:[#allocation6_spill] sm:$0xff] %v11972_v29  ;;  %v4374_v39 = vsel %vm4103_vm13, %v4275_v10, 0.0  ;;  %v4278_v54 = vmul.f32 %v11972_v29, %v11972_v29  ;;  %v4181_v13 = vsel %vm4103_vm13, %v11972_v29, 0.0 }
 0x539   :  { %v4375_v41 = vadd.f32 %v4374_v39, %v4373_v26  ;;  %v11977_v42 = vpop.f32.mrf.mxu0  ;;  %v4178_v50 = vadd.f32 %v4177_v34, %v4176_v19 }
 0x53a   :  { %v4179_v57 = vsel %vm4103_vm13, %v11977_v42, 0.0  ;;  %v4277_v7 = vmul.f32 %v11977_v42, %v11977_v42  ;;  %v4380_v21 = vsel %vm4103_vm13, %v4278_v54, 0.0 }
 0x53b   :  { %v4180_v62 = vadd.f32 %v4179_v57, %v4178_v50  ;;  %v4377_v63 = vadd.f32 %v4376_v52, %v4375_v41  ;;  %v11986_v8 = vpop.f32.mrf.mxu0 }
 0x53c   :  { %15926 = vst [vmem:[#allocation7_spill] sm:$0xff] %v11986_v8  ;;  %v4378_v20 = vsel %vm4103_vm13, %v4277_v7, 0.0  ;;  %v4280_v0 = vmul.f32 %v11986_v8, %v11986_v8  ;;  %v4185_v39 = vsel %vm4103_vm13, %v11986_v8, 0.0 }
 0x53d   :  { %v4379_v60 = vadd.f32 %v4378_v20, %v4377_v63  ;;  %v11991_v1 = vpop.f32.mrf.mxu0  ;;  %v4182_v14 = vadd.f32 %v4181_v13, %v4180_v62 }
 0x53e   :  { %15927 = vst [vmem:[#allocation8_spill] sm:$0xff] %v11991_v1  ;;  %v4183_v25 = vsel %vm4103_vm13, %v11991_v1, 0.0  ;;  %v4279_v10 = vmul.f32 %v11991_v1, %v11991_v1  ;;  %v4384_v57 = vsel %vm4103_vm13, %v4280_v0, 0.0 }
 0x53f   :  { %v4184_v19 = vadd.f32 %v4183_v25, %v4182_v14  ;;  %v4381_v26 = vadd.f32 %v4380_v21, %v4379_v60  ;;  %v12001_v34 = vpop.f32.mrf.mxu0 }
 0x540   :  { %15928 = vst [vmem:[#allocation9_spill] sm:$0xff] %v12001_v34  ;;  %v4382_v41 = vsel %vm4103_vm13, %v4279_v10, 0.0  ;;  %v4282_v7 = vmul.f32 %v12001_v34, %v12001_v34  ;;  %v4189_v60 = vsel %vm4103_vm13, %v12001_v34, 0.0 }
 0x541   :  { %v4383_v50 = vadd.f32 %v4382_v41, %v4381_v26  ;;  %v12006_v52 = vpop.f32.mrf.mxu0  ;;  %v4186_v54 = vadd.f32 %v4185_v39, %v4184_v19 }
 0x542   :  { %15929 = vst [vmem:[#allocation10_spill] sm:$0xff] %v12006_v52  ;;  %v4187_v62 = vsel %vm4103_vm13, %v12006_v52, 0.0  ;;  %v4281_v63 = vmul.f32 %v12006_v52, %v12006_v52  ;;  %v4388_v19 = vsel %vm4103_vm13, %v4282_v7, 0.0 }
 0x543   :  { %v4188_v13 = vadd.f32 %v4187_v62, %v4186_v54  ;;  %v4385_v20 = vadd.f32 %v4384_v57, %v4383_v50  ;;  %v12015_v51 = vpop.f32.mrf.mxu0 }
 0x544   :  { %15930 = vst [vmem:[#allocation11_spill] sm:$0xff] %v12015_v51  ;;  %v4386_v14 = vsel %vm4103_vm13, %v4281_v63, 0.0  ;;  %v4284_v0 = vmul.f32 %v12015_v51, %v12015_v51  ;;  %v4193_v57 = vsel %vm4103_vm13, %v12015_v51, 0.0 }
 0x545   :  { %v4387_v21 = vadd.f32 %v4386_v14, %v4385_v20  ;;  %v12022_v25 = vpop.f32.mrf.mxu0  ;;  %v4190_v10 = vadd.f32 %v4189_v60, %v4188_v13 }
 0x546   :  { %15931 = vst [vmem:[#allocation12_spill] sm:$0xff] %v12022_v25  ;;  %v4191_v26 = vsel %vm4103_vm13, %v12022_v25, 0.0  ;;  %v4283_v39 = vmul.f32 %v12022_v25, %v12022_v25  ;;  %v4392_v63 = vsel %vm4103_vm13, %v4284_v0, 0.0 }
 0x547   :  { %v4192_v41 = vadd.f32 %v4191_v26, %v4190_v10  ;;  %v4389_v50 = vadd.f32 %v4388_v19, %v4387_v21  ;;  %v12029_v54 = vpop.f32.mrf.mxu0 }
 0x548   :  { %15932 = vst [vmem:[#allocation13_spill] sm:$0xff] %v12029_v54  ;;  %v4390_v62 = vsel %vm4103_vm13, %v4283_v39, 0.0  ;;  %v12039_v60 = vmul.f32 %v12029_v54, %v12029_v54  ;;  %v4197_v26 = vsel %vm4103_vm13, %v12029_v54, 0.0 }
 0x549   :  { %v4391_v13 = vadd.f32 %v4390_v62, %v4389_v50  ;;  %v12035_v20 = vpop.f32.mrf.mxu0  ;;  %v4194_v7 = vadd.f32 %v4193_v57, %v4192_v41 }
 0x54a   :  { %15933 = vst [vmem:[#allocation14_spill] sm:$0xff] %v12035_v20  ;;  %v4195_v14 = vsel %vm4103_vm13, %v12035_v20, 0.0  ;;  %v12045_v21 = vmul.f32 %v12035_v20, %v12035_v20  ;;  %v4396_v62 = vsel %vm4103_vm13, %v12039_v60, 0.0 }
 0x54b   :  { %v12047_v10 = vadd.f32 %v4195_v14, %v4194_v7  ;;  %v12049_v19 = vadd.f32 %v4392_v63, %v4391_v13  ;;  %v12051_v0 = vpop.f32.mrf.mxu0 }
 0x54c   :  { %15934 = vst [vmem:[#allocation15_spill] sm:$0xff] %v12051_v0  ;;  %v4394_v39 = vsel %vm4103_vm13, %v12045_v21, 0.0  ;;  %v4288_v63 = vmul.f32 %v12051_v0, %v12051_v0 }
 0x54d   :  { %v4395_v41 = vadd.f32 %v4394_v39, %v12049_v19  ;;  %v12202_v50 = vpop.f32.mrf.mxu0  ;;  %v4198_v57 = vadd.f32 %v4197_v26, %v12047_v10  ;;  %v4201_v19 = vsel %vm4103_vm13, %v12051_v0, 0.0 }
 0x54e   :  { %15935 = vst [vmem:[#allocation16_spill] sm:$0xff] %v12202_v50  ;;  %v4199_v33 = vsel %vm4103_vm13, %v12202_v50, 0.0  ;;  %v4287_v13 = vmul.f32 %v12202_v50, %v12202_v50  ;;  %v4400_v54 = vsel %vm4103_vm13, %v4288_v63, 0.0 }
 0x54f   :  { %v4200_v7 = vadd.f32 %v4199_v33, %v4198_v57  ;;  %v4397_v14 = vadd.f32 %v4396_v62, %v4395_v41  ;;  %v12213_v21 = vpop.f32.mrf.mxu0 }
 0x550   :  { %15936 = vst [vmem:[#allocation17_spill] sm:$0xff] %v12213_v21  ;;  %v4398_v10 = vsel %vm4103_vm13, %v4287_v13, 0.0  ;;  %v4290_v20 = vmul.f32 %v12213_v21, %v12213_v21  ;;  %v4205_v13 = vsel %vm4103_vm13, %v12213_v21, 0.0 }
 0x551   :  { %v4399_v26 = vadd.f32 %v4398_v10, %v4397_v14  ;;  %v12218_v60 = vpop.f32.mrf.mxu0  ;;  %v4202_v39 = vadd.f32 %v4201_v19, %v4200_v7 }
 0x552   :  { %15937 = vst [vmem:[#allocation18_spill] sm:$0xff] %v12218_v60  ;;  %v4203_v57 = vsel %vm4103_vm13, %v12218_v60, 0.0  ;;  %v4289_v41 = vmul.f32 %v12218_v60, %v12218_v60  ;;  %v4404_v10 = vsel %vm4103_vm13, %v4290_v20, 0.0 }
 0x553   :  { %v4204_v62 = vadd.f32 %v4203_v57, %v4202_v39  ;;  %v4401_v33 = vadd.f32 %v4400_v54, %v4399_v26  ;;  %v12227_v0 = vpop.f32.mrf.mxu0 }
 0x554   :  { %15938 = vst [vmem:[#allocation19_spill] sm:$0xff] %v12227_v0  ;;  %v4402_v7 = vsel %vm4103_vm13, %v4289_v41, 0.0  ;;  %v4292_v50 = vmul.f32 %v12227_v0, %v12227_v0  ;;  %v4209_v41 = vsel %vm4103_vm13, %v12227_v0, 0.0 }
 0x555   :  { %v4403_v14 = vadd.f32 %v4402_v7, %v4401_v33  ;;  %v12232_v63 = vpop.f32.mrf.mxu0  ;;  %v4206_v19 = vadd.f32 %v4205_v13, %v4204_v62 }
 0x556   :  { %15939 = vst [vmem:[#allocation20_spill] sm:$0xff] %v12232_v63  ;;  %v4207_v39 = vsel %vm4103_vm13, %v12232_v63, 0.0  ;;  %v4291_v54 = vmul.f32 %v12232_v63, %v12232_v63  ;;  %v4408_v7 = vsel %vm4103_vm13, %v4292_v50, 0.0 }
 0x557   :  { %v4208_v26 = vadd.f32 %v4207_v39, %v4206_v19  ;;  %v4405_v57 = vadd.f32 %v4404_v10, %v4403_v14  ;;  %v12241_v21 = vpop.f32.mrf.mxu0 }
 0x558   :  { %15940 = vst [vmem:[#allocation21_spill] sm:$0xff] %v12241_v21  ;;  %v4406_v62 = vsel %vm4103_vm13, %v4291_v54, 0.0  ;;  %v4294_v60 = vmul.f32 %v12241_v21, %v12241_v21  ;;  %v4213_v54 = vsel %vm4103_vm13, %v12241_v21, 0.0 }
 0x559   :  { %v4407_v33 = vadd.f32 %v4406_v62, %v4405_v57  ;;  %v12246_v20 = vpop.f32.mrf.mxu0  ;;  %v4210_v13 = vadd.f32 %v4209_v41, %v4208_v26 }
 0x55a   :  { %15941 = vst [vmem:[#allocation22_spill] sm:$0xff] %v12246_v20  ;;  %v4211_v19 = vsel %vm4103_vm13, %v12246_v20, 0.0  ;;  %v4293_v14 = vmul.f32 %v12246_v20, %v12246_v20  ;;  %v4412_v62 = vsel %vm4103_vm13, %v4294_v60, 0.0 }
 0x55b   :  { %v4212_v10 = vadd.f32 %v4211_v19, %v4210_v13  ;;  %v4409_v39 = vadd.f32 %v4408_v7, %v4407_v33  ;;  %v12255_v0 = vpop.f32.mrf.mxu0 }
 0x55c   :  { %15942 = vst [vmem:[#allocation23_spill] sm:$0xff] %v12255_v0  ;;  %v4410_v26 = vsel %vm4103_vm13, %v4293_v14, 0.0  ;;  %v4296_v63 = vmul.f32 %v12255_v0, %v12255_v0  ;;  %v4217_v14 = vsel %vm4103_vm13, %v12255_v0, 0.0 }
 0x55d   :  { %v4411_v57 = vadd.f32 %v4410_v26, %v4409_v39  ;;  %v12260_v50 = vpop.f32.mrf.mxu0  ;;  %v4214_v41 = vadd.f32 %v4213_v54, %v4212_v10 }
 0x55e   :  { %15943 = vst [vmem:[#allocation24_spill] sm:$0xff] %v12260_v50  ;;  %v4215_v13 = vsel %vm4103_vm13, %v12260_v50, 0.0  ;;  %v4295_v33 = vmul.f32 %v12260_v50, %v12260_v50  ;;  %v4416_v26 = vsel %vm4103_vm13, %v4296_v63, 0.0 }
 0x55f   :  { %v4216_v7 = vadd.f32 %v4215_v13, %v4214_v41  ;;  %v4413_v19 = vadd.f32 %v4412_v62, %v4411_v57  ;;  %v12269_v21 = vpop.f32.mrf.mxu0 }
 0x560   :  { %15944 = vst [vmem:[#allocation25_spill] sm:$0xff] %v12269_v21  ;;  %v4414_v10 = vsel %vm4103_vm13, %v4295_v33, 0.0  ;;  %v4298_v20 = vmul.f32 %v12269_v21, %v12269_v21  ;;  %v4221_v33 = vsel %vm4103_vm13, %v12269_v21, 0.0 }
 0x561   :  { %v4415_v39 = vadd.f32 %v4414_v10, %v4413_v19  ;;  %v12274_v60 = vpop.f32.mrf.mxu0  ;;  %v4218_v54 = vadd.f32 %v4217_v14, %v4216_v7 }
 0x562   :  { %15945 = vst [vmem:[#allocation26_spill] sm:$0xff] %v12274_v60  ;;  %v4219_v41 = vsel %vm4103_vm13, %v12274_v60, 0.0  ;;  %v4297_v57 = vmul.f32 %v12274_v60, %v12274_v60  ;;  %v4420_v10 = vsel %vm4103_vm13, %v4298_v20, 0.0 }
 0x563   :  { %v4220_v62 = vadd.f32 %v4219_v41, %v4218_v54  ;;  %v4417_v13 = vadd.f32 %v4416_v26, %v4415_v39  ;;  %v12283_v0 = vpop.f32.mrf.mxu0 }
 0x564   :  { %15946 = vst [vmem:[#allocation27_spill] sm:$0xff] %v12283_v0  ;;  %v4418_v7 = vsel %vm4103_vm13, %v4297_v57, 0.0  ;;  %v4300_v50 = vmul.f32 %v12283_v0, %v12283_v0  ;;  %v4225_v57 = vsel %vm4103_vm13, %v12283_v0, 0.0 }
 0x565   :  { %v4419_v19 = vadd.f32 %v4418_v7, %v4417_v13  ;;  %v12288_v63 = vpop.f32.mrf.mxu0  ;;  %v4222_v14 = vadd.f32 %v4221_v33, %v4220_v62 }
 0x566   :  { %15947 = vst [vmem:[#allocation28_spill] sm:$0xff] %v12288_v63  ;;  %v4223_v54 = vsel %vm4103_vm13, %v12288_v63, 0.0  ;;  %v4299_v39 = vmul.f32 %v12288_v63, %v12288_v63  ;;  %v4424_v7 = vsel %vm4103_vm13, %v4300_v50, 0.0 }
 0x567   :  { %v4224_v26 = vadd.f32 %v4223_v54, %v4222_v14  ;;  %v4421_v41 = vadd.f32 %v4420_v10, %v4419_v19  ;;  %v12297_v21 = vpop.f32.mrf.mxu0 }
 0x568   :  { %15948 = vst [vmem:[#allocation29_spill] sm:$0xff] %v12297_v21  ;;  %v4422_v62 = vsel %vm4103_vm13, %v4299_v39, 0.0  ;;  %v4302_v60 = vmul.f32 %v12297_v21, %v12297_v21  ;;  %v4229_v10 = vsel %vm4103_vm13, %v12297_v21, 0.0 }
 0x569   :  { %v4423_v13 = vadd.f32 %v4422_v62, %v4421_v41  ;;  %v4094_v20 = vpop.f32.mrf.mxu0  ;;  %v4226_v33 = vadd.f32 %v4225_v57, %v4224_v26 }
 0x56a   :  { %v4227_v51 = vsel %vm4103_vm13, %v4094_v20, 0.0  ;;  %v4301_v63 = vmul.f32 %v4094_v20, %v4094_v20  ;;  %v4428_v41 = vsel %vm4103_vm13, %v4302_v60, 0.0  ;;  %v4447_v60 = vlaneseq }
 0x56b   :  { %v4228_v14 = vadd.f32 %v4227_v51, %v4226_v33  ;;  %v4425_v19 = vadd.f32 %v4424_v7, %v4423_v13 }
 0x56c   :  { %v4426_v54 = vsel %vm4103_vm13, %v4301_v63, 0.0 }
 0x56d   :  { %v4230_v0 = vadd.f32 %v4229_v10, %v4228_v14  ;;  %v4427_v39 = vadd.f32 %v4426_v54, %v4425_v19  ;;  %v4448_v10 = vshrl.u32 %v4447_v60, 7 }
 0x56f   :  { %v4231_v26 = vrot.slane %v4230_v0, 4  ;;  %v4429_v57 = vadd.f32 %v4428_v41, %v4427_v39  ;;  %v12313_v54 = vsub.s32 0, %v4448_v10  ;;  %v15956_v10 = vld [vmem:[#allocation11_spill] sm:$0xff] }
 0x571   :  { %v4232_v50 = vadd.f32 %v4231_v26, %v4230_v0  ;;  %v4430_v62 = vrot.slane %v4429_v57, 4  ;;  %v4439_v0 = vld [vmem:[%s15842_s2] sm:$0x1]  ;;  %15949 = vst [vmem:[#allocation30_spill] sm:$0xff] %v12313_v54  ;;  %s9814_s2 = smov 40  }
 0x573   :  { %v4233_v25 = vrot.slane %v4232_v50, 2  ;;  %v4431_v34 = vadd.f32 %v4430_v62, %v4429_v57 }
 0x575   :  { %v4234_v52 = vadd.f32 %v4233_v25, %v4232_v50  ;;  %v4432_v8 = vrot.slane %v4431_v34, 2 }
 0x577   :  { %v4235_v1 = vrot.slane %v4234_v52, 1  ;;  %v4433_v51 = vadd.f32 %v4432_v8, %v4431_v34  ;;  %v4443_v8 = vld [vmem:[%s15843_s3] sm:$0x1] }
 0x579   :  { %v4236_v13 = vadd.f32 %v4235_v1, %v4234_v52  ;;  %v4434_v33 = vrot.slane %v4433_v51, 1 }
 0x57b   :  { %v4238_v7 = vmul.f32 0.001953125, %v4236_v13  ;;  %v4435_v21 = vadd.f32 %v4434_v33, %v4433_v51  ;;  %v15950_v13 = vld [vmem:[#allocation6_spill] sm:$0xff]  ;;  %v15951_v33 = vld [vmem:[#allocation8_spill] sm:$0xff] }
 0x57d   :  { %v4436_v29 = vmul.f32 0.001953125, %v4435_v21  ;;  %v4437_v63 = vmul.f32 %v4238_v7, %v4238_v7 }
 0x57f   :  { %v4438_v14 = vsub.f32 %v4436_v29, %v4437_v63  ;;  %v15953_v63 = vld [vmem:[#allocation10_spill] sm:$0xff] }
 0x581   :  { %v4440_v19 = vadd.f32 1e-05, %v4438_v14  ;;  %v15954_v14 = vld [vmem:[#allocation9_spill] sm:$0xff] }
 0x583   :  { %9797 = vrsqrt.f32 %v4440_v19  ;;  %v15955_v19 = vld [vmem:[#allocation12_spill] sm:$0xff] }
 0x590   :  { %v9798_v25 = vpop.eup %9797 }
 0x591   :  { %v4442_v39 = vmul.f32 %v9798_v25, %v4439_v0  ;;  %v15957_v25 = vld [vmem:[#allocation14_spill] sm:$0xff] }
 0x593   :  { %v4444_v1 = vmul.f32 %v4442_v39, %v4238_v7  ;;  %v12319_v34 = vrot.slane %v4442_v39, %v12313_v54  ;;  %v15952_v7 = vld [vmem:[#allocation7_spill] sm:$0xff] }
 0x595   :  { %v4445_v29 = vsub.f32 %v4443_v8, %v4444_v1  ;;  %v4514_v52 = vmul.f32 %v12319_v34, %v4094_v20  ;;  %v12324_v21 = vmul.f32 %v12319_v34, %v11707_v23  ;;  %v12328_v41 = vmul.f32 %v11705_v22, %v12319_v34  ;;  %v15958_v8 = vld [vmem:[#allocation13_spill] sm:$0xff] }
 0x596   :  { %v12332_v26 = vmul.f32 %v12319_v34, %v11720_v38  ;;  %v12336_v57 = vmul.f32 %v11715_v30, %v12319_v34  ;;  %v12340_v50 = vmul.f32 %v12319_v34, %v11734_v12  ;;  %v12344_v23 = vmul.f32 %v11729_v47, %v12319_v34 }
 0x597   :  { %v12347_v20 = vrot.slane %v4445_v29, %v12313_v54  ;;  %v12351_v22 = vmul.f32 %v12319_v34, %v11748_v4  ;;  %v12355_v38 = vmul.f32 %v11743_v3, %v12319_v34  ;;  %v12359_v30 = vmul.f32 %v12319_v34, %v11762_v58  ;;  %v15959_v29 = vld [vmem:[#allocation16_spill] sm:$0xff] }
 0x598   :  { %v12363_v12 = vmul.f32 %v11757_v28, %v12319_v34  ;;  %v12367_v47 = vmul.f32 %v12319_v34, %v11776_v37  ;;  %v12371_v4 = vmul.f32 %v11771_v31, %v12319_v34  ;;  %v12375_v3 = vmul.f32 %v12319_v34, %v11790_v36  ;;  %v15972_v54 = vld [vmem:[#allocation24_spill] sm:$0xff] }
 0x599   :  { %v4584_v62 = vadd.f32 %v12347_v20, %v4514_v52  ;;  %v12380_v58 = vmul.f32 %v11785_v27, %v12319_v34  ;;  %v12384_v28 = vmul.f32 %v12319_v34, %v11804_v55  ;;  %v12388_v37 = vmul.f32 %v11799_v49, %v12319_v34 }
 0x59a   :  { %v12392_v31 = vmul.f32 %v12319_v34, %v11818_v16  ;;  %v12396_v36 = vmul.f32 %v11813_v6, %v12319_v34  ;;  %v12400_v27 = vmul.f32 %v12319_v34, %v11832_v53  ;;  %v12404_v55 = vmul.f32 %v11827_v5, %v12319_v34 }
 0x59b   :  { %v4648_v51 = vmax.f32 %v4584_v62, 0.0  ;;  %v12408_v49 = vmul.f32 %v12319_v34, %v11846_v32  ;;  %v12412_v16 = vmul.f32 %v11841_v18, %v12319_v34  ;;  %v12416_v6 = vmul.f32 %v12319_v34, %v11860_v59  ;;  %v15960_v62 = vld [vmem:[#allocation15_spill] sm:$0xff] }
 0x59c   :  { %v12420_v53 = vmul.f32 %v11855_v48, %v12319_v34  ;;  %v12424_v5 = vmul.f32 %v12319_v34, %v11874_v35  ;;  %v12428_v32 = vmul.f32 %v11869_v11, %v12319_v34  ;;  %v12432_v18 = vmul.f32 %v12319_v34, %v11888_v61 }
 0x59d   :  { %4800 = vst.msk [vmem:[#allocation4 + $0x331] sm:$0xff] %vm4103_vm13, %v4648_v51  ;;  %v12437_v59 = vmul.f32 %v11883_v45, %v12319_v34  ;;  %v12441_v48 = vmul.f32 %v12319_v34, %v11902_v46  ;;  %v12445_v35 = vmul.f32 %v11897_v40, %v12319_v34  ;;  %v12449_v11 = vmul.f32 %v12319_v34, %v11917_v24 }
 0x59e   :  { %v12453_v61 = vmul.f32 %v11912_v2, %v12319_v34  ;;  %v12457_v45 = vmul.f32 %v12319_v34, %v11931_v15  ;;  %v12461_v46 = vmul.f32 %v11926_v17, %v12319_v34  ;;  %v12465_v40 = vmul.f32 %v12319_v34, %v11945_v56 }
 0x59f   :  { %v12469_v24 = vmul.f32 %v11940_v44, %v12319_v34  ;;  %v12473_v2 = vmul.f32 %v12319_v34, %v11959_v9  ;;  %v12477_v15 = vmul.f32 %v11954_v43, %v12319_v34  ;;  %v12481_v17 = vmul.f32 %v12319_v34, %v11977_v42 }
 0x5a0   :  { %v12485_v56 = vmul.f32 %v15950_v13, %v12319_v34  ;;  %v12489_v44 = vmul.f32 %v12319_v34, %v15951_v33  ;;  %v12493_v9 = vmul.f32 %v15952_v7, %v12319_v34  ;;  %v12497_v43 = vmul.f32 %v12319_v34, %v15953_v63  ;;  %v15961_v13 = vld [vmem:[#allocation18_spill] sm:$0xff]  ;;  %v15962_v7 = vld [vmem:[#allocation17_spill] sm:$0xff] }
 0x5a1   :  { %v12501_v42 = vmul.f32 %v15954_v14, %v12319_v34  ;;  %v12505_v60 = vmul.f32 %v12319_v34, %v15955_v19  ;;  %v12509_v0 = vmul.f32 %v15956_v10, %v12319_v34  ;;  %v12513_v39 = vmul.f32 %v12319_v34, %v15957_v25  ;;  %v15964_v14 = vld [vmem:[#allocation20_spill] sm:$0xff]  ;;  %v15966_v10 = vld [vmem:[#allocation19_spill] sm:$0xff] }
 0x5a2   :  { %v12517_v1 = vmul.f32 %v15958_v8, %v12319_v34  ;;  %v12521_v52 = vmul.f32 %v12319_v34, %v15959_v29  ;;  %v12525_v51 = vmul.f32 %v15960_v62, %v12319_v34  ;;  %v12529_v33 = vmul.f32 %v12319_v34, %v15961_v13  ;;  %v15968_v8 = vld [vmem:[#allocation22_spill] sm:$0xff]  ;;  %v15970_v62 = vld [vmem:[#allocation21_spill] sm:$0xff] }
 0x5a3   :  { %v12533_v63 = vmul.f32 %v15962_v7, %v12319_v34  ;;  %v12537_v19 = vmul.f32 %v12319_v34, %v15964_v14  ;;  %v12541_v25 = vmul.f32 %v15966_v10, %v12319_v34  ;;  %v12545_v29 = vmul.f32 %v12319_v34, %v15968_v8 }
 0x5a4   :  { %v12549_v13 = vmul.f32 %v15970_v62, %v12319_v34  ;;  %v12553_v7 = vmul.f32 %v12319_v34, %v15972_v54 }
 0x5a5   :  { %15963 = vst [vmem:[#allocation6_spill] sm:$0xff] %v12533_v63  ;;  %15965 = vst [vmem:[#allocation8_spill] sm:$0xff] %v12537_v19  ;;  %v15974_v63 = vld [vmem:[#allocation23_spill] sm:$0xff]  ;;  %v15975_v19 = vld [vmem:[#allocation26_spill] sm:$0xff] }
 0x5a6   :  { %15967 = vst [vmem:[#allocation7_spill] sm:$0xff] %v12541_v25  ;;  %15969 = vst [vmem:[#allocation10_spill] sm:$0xff] %v12545_v29  ;;  %v12557_v14 = vmul.f32 %v15974_v63, %v12319_v34  ;;  %v12561_v10 = vmul.f32 %v12319_v34, %v15975_v19  ;;  %v15976_v25 = vld [vmem:[#allocation25_spill] sm:$0xff]  ;;  %v15977_v29 = vld [vmem:[#allocation28_spill] sm:$0xff]  ;;  %v12581_v19 = vadd.f32 %v12347_v20, %v12324_v21 }
 0x5a7   :  { %15971 = vst [vmem:[#allocation9_spill] sm:$0xff] %v12549_v13  ;;  %15973 = vst [vmem:[#allocation12_spill] sm:$0xff] %v12553_v7  ;;  %v12565_v8 = vmul.f32 %v15976_v25, %v12319_v34  ;;  %v12569_v62 = vmul.f32 %v12319_v34, %v15977_v29  ;;  %v15978_v13 = vld [vmem:[#allocation27_spill] sm:$0xff]  ;;  %v15979_v7 = vld [vmem:[#allocation29_spill] sm:$0xff]  ;;  %v12585_v25 = vadd.f32 %v12347_v20, %v12328_v41 }
 0x5a8   :  { %v12573_v54 = vmul.f32 %v15978_v13, %v12319_v34  ;;  %v12577_v63 = vmul.f32 %v15979_v7, %v12319_v34  ;;  %v12589_v29 = vadd.f32 %v12347_v20, %v12332_v26  ;;  %v12593_v13 = vadd.f32 %v12347_v20, %v12336_v57  ;;  %v4802_v7 = vld [vmem:[#allocation4] sm:$0xff] }
 0x5a9   :  { %v12597_v34 = vadd.f32 %v12347_v20, %v12340_v50  ;;  %v12601_v21 = vadd.f32 %v12347_v20, %v12344_v23  ;;  %v12605_v41 = vadd.f32 %v12347_v20, %v12351_v22  ;;  %v12609_v26 = vadd.f32 %v12347_v20, %v12355_v38  ;;  %4866 = vst.msk [vmem:[#allocation5] sm:$0xff] %vm4103_vm13, %v4802_v7 }
 0x5aa   :  { %v12613_v57 = vadd.f32 %v12347_v20, %v12359_v30  ;;  %v12617_v50 = vadd.f32 %v12347_v20, %v12363_v12  ;;  %v12621_v23 = vadd.f32 %v12347_v20, %v12367_v47  ;;  %v12625_v22 = vadd.f32 %v12347_v20, %v12371_v4 }
 0x5ab   :  { %v12629_v38 = vadd.f32 %v12347_v20, %v12375_v3  ;;  %v12633_v30 = vadd.f32 %v12347_v20, %v12380_v58  ;;  %v12637_v12 = vadd.f32 %v12347_v20, %v12384_v28  ;;  %v12641_v47 = vadd.f32 %v12347_v20, %v12388_v37 }
 0x5ac   :  { %v12645_v4 = vadd.f32 %v12347_v20, %v12392_v31  ;;  %v12649_v3 = vadd.f32 %v12347_v20, %v12396_v36  ;;  %v12653_v58 = vadd.f32 %v12347_v20, %v12400_v27  ;;  %v12657_v28 = vadd.f32 %v12347_v20, %v12404_v55  ;;  %v15986_v7 = vld [vmem:[#allocation8_spill] sm:$0xff] }
 0x5ad   :  { %v12661_v37 = vadd.f32 %v12347_v20, %v12408_v49  ;;  %v12665_v31 = vadd.f32 %v12347_v20, %v12412_v16  ;;  %v12669_v36 = vadd.f32 %v12347_v20, %v12416_v6  ;;  %v12673_v27 = vadd.f32 %v12347_v20, %v12420_v53 }
 0x5ae   :  { %v12677_v55 = vadd.f32 %v12347_v20, %v12424_v5  ;;  %v12681_v49 = vadd.f32 %v12347_v20, %v12428_v32  ;;  %v12685_v16 = vadd.f32 %v12347_v20, %v12432_v18  ;;  %v12689_v6 = vadd.f32 %v12347_v20, %v12437_v59 }
 0x5af   :  { %15980 = vst [vmem:[#allocation11_spill] sm:$0xff] %v12669_v36  ;;  %v4803_v36 = vld [vmem:[#allocation4 + $0x8] sm:$0xff]  ;;  %v12693_v53 = vadd.f32 %v12347_v20, %v12441_v48  ;;  %v12697_v5 = vadd.f32 %v12347_v20, %v12445_v35  ;;  %v12701_v32 = vadd.f32 %v12347_v20, %v12449_v11  ;;  %v12705_v18 = vadd.f32 %v12347_v20, %v12453_v61 }
 0x5b0   :  { %4867 = vst.msk [vmem:[#allocation5 + $0x8] sm:$0xff] %vm4103_vm13, %v4803_v36  ;;  %v12711_v59 = vadd.f32 %v12347_v20, %v12457_v45  ;;  %v12715_v48 = vadd.f32 %v12347_v20, %v12461_v46  ;;  %v12719_v35 = vadd.f32 %v12347_v20, %v12465_v40  ;;  %v12723_v11 = vadd.f32 %v12347_v20, %v12469_v24  ;;  %v15985_v36 = vld [vmem:[#allocation6_spill] sm:$0xff] }
 0x5b1   :  { %v12727_v61 = vadd.f32 %v12347_v20, %v12473_v2  ;;  %v12731_v45 = vadd.f32 %v12347_v20, %v12477_v15  ;;  %v12735_v46 = vadd.f32 %v12347_v20, %v12481_v17  ;;  %v12739_v40 = vadd.f32 %v12347_v20, %v12485_v56 }
 0x5b2   :  { %v12743_v24 = vadd.f32 %v12347_v20, %v12489_v44  ;;  %v12747_v2 = vadd.f32 %v12347_v20, %v12493_v9  ;;  %v12751_v15 = vadd.f32 %v12347_v20, %v12497_v43  ;;  %v12755_v17 = vadd.f32 %v12347_v20, %v12501_v42 }
 0x5b3   :  { %v12759_v56 = vadd.f32 %v12347_v20, %v12505_v60  ;;  %v12763_v44 = vadd.f32 %v12347_v20, %v12509_v0  ;;  %v12767_v9 = vadd.f32 %v12347_v20, %v12513_v39  ;;  %v12771_v43 = vadd.f32 %v12347_v20, %v12517_v1 }
 0x5b4   :  { %v12775_v42 = vadd.f32 %v12347_v20, %v12521_v52  ;;  %v12779_v60 = vadd.f32 %v12347_v20, %v12525_v51  ;;  %v12783_v0 = vadd.f32 %v12347_v20, %v12529_v33  ;;  %v12787_v39 = vadd.f32 %v12347_v20, %v15985_v36 }
 0x5b5   :  { %15981 = vst [vmem:[#allocation14_spill] sm:$0xff] %v12771_v43  ;;  %v12791_v1 = vadd.f32 %v12347_v20, %v15986_v7  ;;  %v15987_v43 = vld [vmem:[#allocation7_spill] sm:$0xff]  ;;  %v12811_v7 = vadd.f32 %v12347_v20, %v12557_v14  ;;  %v12831_v14 = vadd.f32 %v12347_v20, %v12577_v63  ;;  %v4596_v63 = vmax.f32 %v12621_v23, 0.0 }
 0x5b6   :  { %15982 = vst [vmem:[#allocation13_spill] sm:$0xff] %v12775_v42  ;;  %15983 = vst [vmem:[#allocation16_spill] sm:$0xff] %v12779_v60  ;;  %v12795_v52 = vadd.f32 %v12347_v20, %v15987_v43  ;;  %v15988_v42 = vld [vmem:[#allocation10_spill] sm:$0xff]  ;;  %v15989_v60 = vld [vmem:[#allocation9_spill] sm:$0xff]  ;;  %v12815_v43 = vadd.f32 %v12347_v20, %v12561_v10  ;;  %v4587_v10 = vmax.f32 %v12585_v25, 0.0  ;;  %v4598_v25 = vmax.f32 %v12629_v38, 0.0 }
 0x5b7   :  { %15984 = vst [vmem:[#allocation15_spill] sm:$0xff] %v12783_v0  ;;  %v12799_v51 = vadd.f32 %v12347_v20, %v15988_v42  ;;  %v12803_v33 = vadd.f32 %v12347_v20, %v15989_v60  ;;  %v15990_v0 = vld [vmem:[#allocation12_spill] sm:$0xff]  ;;  %15991 = vst [vmem:[#allocation18_spill] sm:$0xff] %v12811_v7  ;;  %v12819_v42 = vadd.f32 %v12347_v20, %v12565_v8  ;;  %v4586_v7 = vmax.f32 %v12581_v19, 0.0 }
 0x5b8   :  { %v12807_v36 = vadd.f32 %v12347_v20, %v15990_v0  ;;  %15992 = vst [vmem:[#allocation17_spill] sm:$0xff] %v12815_v43  ;;  %v12823_v60 = vadd.f32 %v12347_v20, %v12569_v62  ;;  %v12827_v0 = vadd.f32 %v12347_v20, %v12573_v54  ;;  %v4588_v43 = vmax.f32 %v12589_v29, 0.0  ;;  %4739 = vst.msk [vmem:[#allocation4 + $0x21] sm:$0xff] %vm4103_vm13, %v4587_v10 }
 0x5b9   :  { %15993 = vst [vmem:[#allocation20_spill] sm:$0xff] %v12819_v42  ;;  %v4589_v8 = vmax.f32 %v12593_v13, 0.0  ;;  %v4590_v42 = vmax.f32 %v12597_v34, 0.0  ;;  %v4591_v62 = vmax.f32 %v12601_v21, 0.0  ;;  %v4593_v54 = vmax.f32 %v12609_v26, 0.0  ;;  %4738 = vst.msk [vmem:[#allocation4 + $0x19] sm:$0xff] %vm4103_vm13, %v4586_v7 }
 0x5ba   :  { %15994 = vst [vmem:[#allocation19_spill] sm:$0xff] %v12823_v60  ;;  %15995 = vst [vmem:[#allocation22_spill] sm:$0xff] %v12827_v0  ;;  %v4592_v60 = vmax.f32 %v12605_v41, 0.0  ;;  %v4594_v0 = vmax.f32 %v12613_v57, 0.0  ;;  %v4595_v20 = vmax.f32 %v12617_v50, 0.0  ;;  %v4597_v19 = vmax.f32 %v12625_v22, 0.0 }
 0x5bb   :  { %4740 = vst.msk [vmem:[#allocation4 + $0x31] sm:$0xff] %vm4103_vm13, %v4588_v43  ;;  %4741 = vst.msk [vmem:[#allocation4 + $0x39] sm:$0xff] %vm4103_vm13, %v4589_v8  ;;  %v4599_v29 = vmax.f32 %v12633_v30, 0.0  ;;  %v4600_v13 = vmax.f32 %v12637_v12, 0.0  ;;  %v4601_v34 = vmax.f32 %v12641_v47, 0.0  ;;  %v4602_v21 = vmax.f32 %v12645_v4, 0.0 }
 0x5bc   :  { %4742 = vst.msk [vmem:[#allocation4 + $0x49] sm:$0xff] %vm4103_vm13, %v4590_v42  ;;  %4743 = vst.msk [vmem:[#allocation4 + $0x51] sm:$0xff] %vm4103_vm13, %v4591_v62  ;;  %v4603_v41 = vmax.f32 %v12649_v3, 0.0  ;;  %v4604_v26 = vmax.f32 %v12653_v58, 0.0  ;;  %v4605_v57 = vmax.f32 %v12657_v28, 0.0  ;;  %v4606_v50 = vmax.f32 %v12661_v37, 0.0 }
 0x5bd   :  { %4744 = vst.msk [vmem:[#allocation4 + $0x61] sm:$0xff] %vm4103_vm13, %v4592_v60  ;;  %4745 = vst.msk [vmem:[#allocation4 + $0x69] sm:$0xff] %vm4103_vm13, %v4593_v54  ;;  %v4607_v23 = vmax.f32 %v12665_v31, 0.0  ;;  %v15996_v22 = vld [vmem:[#allocation11_spill] sm:$0xff]  ;;  %v4609_v30 = vmax.f32 %v12673_v27, 0.0  ;;  %v4610_v12 = vmax.f32 %v12677_v55, 0.0 }
 0x5be   :  { %4746 = vst.msk [vmem:[#allocation4 + $0x79] sm:$0xff] %vm4103_vm13, %v4594_v0  ;;  %4747 = vst.msk [vmem:[#allocation4 + $0x81] sm:$0xff] %vm4103_vm13, %v4595_v20  ;;  %v4608_v38 = vmax.f32 %v15996_v22, 0.0  ;;  %v4611_v47 = vmax.f32 %v12681_v49, 0.0  ;;  %v4612_v4 = vmax.f32 %v12685_v16, 0.0  ;;  %v4613_v3 = vmax.f32 %v12689_v6, 0.0  ;;  %v5061_v20 = vpop.permute.xlu1 %5060 }
 0x5bf   :  { %4748 = vst.msk [vmem:[#allocation4 + $0x91] sm:$0xff] %vm4103_vm13, %v4596_v63  ;;  %4749 = vst.msk [vmem:[#allocation4 + $0x99] sm:$0xff] %vm4103_vm13, %v4597_v19  ;;  %v4614_v58 = vmax.f32 %v12693_v53, 0.0  ;;  %v4615_v28 = vmax.f32 %v12697_v5, 0.0  ;;  %v4616_v37 = vmax.f32 %v12701_v32, 0.0  ;;  %v4617_v31 = vmax.f32 %v12705_v18, 0.0 }
 0x5c0   :  { %4750 = vst.msk [vmem:[#allocation4 + $0xa9] sm:$0xff] %vm4103_vm13, %v4598_v25  ;;  %4751 = vst.msk [vmem:[#allocation4 + $0xb1] sm:$0xff] %vm4103_vm13, %v4599_v29  ;;  %v4618_v27 = vmax.f32 %v12711_v59, 0.0  ;;  %v4619_v55 = vmax.f32 %v12715_v48, 0.0  ;;  %v4620_v49 = vmax.f32 %v12719_v35, 0.0  ;;  %v4621_v16 = vmax.f32 %v12723_v11, 0.0 }
 0x5c1   :  { %4752 = vst.msk [vmem:[#allocation4 + $0xc1] sm:$0xff] %vm4103_vm13, %v4600_v13  ;;  %4753 = vst.msk [vmem:[#allocation4 + $0xc9] sm:$0xff] %vm4103_vm13, %v4601_v34  ;;  %v4622_v6 = vmax.f32 %v12727_v61, 0.0  ;;  %v4932_v53 = vld [vmem:[#allocation4 + $0x19] sm:$0xff]  ;;  %v4623_v32 = vmax.f32 %v12731_v45, 0.0  ;;  %v4624_v18 = vmax.f32 %v12735_v46, 0.0 }
 0x5c2   :  { %4754 = vst.msk [vmem:[#allocation4 + $0xd9] sm:$0xff] %vm4103_vm13, %v4602_v21  ;;  %4755 = vst.msk [vmem:[#allocation4 + $0xe1] sm:$0xff] %vm4103_vm13, %v4603_v41  ;;  %v12899_v5 = vld [vmem:[#allocation4 + $0x18] sm:$0xff]  ;;  %v4625_v59 = vmax.f32 %v12739_v40, 0.0  ;;  %v4626_v48 = vmax.f32 %v12743_v24, 0.0  ;;  %v4933_v35 = vld [vmem:[#allocation4 + $0x21] sm:$0xff]  ;;  %5062 = vrot.lane.b32.xlu0 %v4932_v53, %s9807_s10 }
 0x5c3   :  { %4756 = vst.msk [vmem:[#allocation4 + $0xf1] sm:$0xff] %vm4103_vm13, %v4604_v26  ;;  %4757 = vst.msk [vmem:[#allocation4 + $0xf9] sm:$0xff] %vm4103_vm13, %v4605_v57  ;;  %v4627_v11 = vmax.f32 %v12747_v2, 0.0  ;;  %v4628_v61 = vmax.f32 %v12751_v15, 0.0  ;;  %v4629_v45 = vmax.f32 %v12755_v17, 0.0  ;;  %v4630_v46 = vmax.f32 %v12759_v56, 0.0  ;;  %5064 = vrot.lane.b32.xlu1 %v4933_v35, %s9807_s10 }
 0x5c4   :  { %4758 = vst.msk [vmem:[#allocation4 + $0x109] sm:$0xff] %vm4103_vm13, %v4606_v50  ;;  %4759 = vst.msk [vmem:[#allocation4 + $0x111] sm:$0xff] %vm4103_vm13, %v4607_v23  ;;  %v4631_v40 = vmax.f32 %v12763_v44, 0.0  ;;  %v4632_v24 = vmax.f32 %v12767_v9, 0.0  ;;  %v15997_v2 = vld [vmem:[#allocation14_spill] sm:$0xff]  ;;  %v15998_v7 = vld [vmem:[#allocation13_spill] sm:$0xff] }
 0x5c5   :  { %4760 = vst.msk [vmem:[#allocation4 + $0x121] sm:$0xff] %vm4103_vm13, %v4608_v38  ;;  %4761 = vst.msk [vmem:[#allocation4 + $0x129] sm:$0xff] %vm4103_vm13, %v4609_v30  ;;  %v4633_v15 = vmax.f32 %v15997_v2, 0.0  ;;  %v4634_v17 = vmax.f32 %v15998_v7, 0.0  ;;  %v15999_v56 = vld [vmem:[#allocation16_spill] sm:$0xff]  ;;  %v16000_v42 = vld [vmem:[#allocation15_spill] sm:$0xff] }
 0x5c6   :  { %4762 = vst.msk [vmem:[#allocation4 + $0x139] sm:$0xff] %vm4103_vm13, %v4610_v12  ;;  %4763 = vst.msk [vmem:[#allocation4 + $0x141] sm:$0xff] %vm4103_vm13, %v4611_v47  ;;  %v4635_v43 = vmax.f32 %v15999_v56, 0.0  ;;  %v4636_v60 = vmax.f32 %v16000_v42, 0.0  ;;  %v4637_v44 = vmax.f32 %v12787_v39, 0.0  ;;  %v4638_v9 = vmax.f32 %v12791_v1, 0.0  ;;  %v5059_v1 = vpop.permute.xlu0 %5058 }
 0x5c7   :  { %4764 = vst.msk [vmem:[#allocation4 + $0x151] sm:$0xff] %vm4103_vm13, %v4612_v4  ;;  %4765 = vst.msk [vmem:[#allocation4 + $0x159] sm:$0xff] %vm4103_vm13, %v4613_v3  ;;  %v4934_v0 = vld [vmem:[#allocation4 + $0x31] sm:$0xff]  ;;  %v4639_v10 = vmax.f32 %v12795_v52, 0.0  ;;  %v4640_v8 = vmax.f32 %v12799_v51, 0.0  ;;  %v4641_v62 = vmax.f32 %v12803_v33, 0.0 }
 0x5c8   :  { %4766 = vst.msk [vmem:[#allocation4 + $0x169] sm:$0xff] %vm4103_vm13, %v4614_v58  ;;  %4767 = vst.msk [vmem:[#allocation4 + $0x171] sm:$0xff] %vm4103_vm13, %v4615_v28  ;;  %v4642_v54 = vmax.f32 %v12807_v36, 0.0  ;;  %v4935_v39 = vld [vmem:[#allocation4 + $0x39] sm:$0xff]  ;;  %5066 = vrot.lane.b32.xlu0 %v4934_v0, %s9807_s10  ;;  %v16003_v33 = vld [vmem:[#allocation20_spill] sm:$0xff]  ;;  %v4649_v21 = vmax.f32 %v12831_v14, 0.0 }
 0x5c9   :  { %4768 = vst.msk [vmem:[#allocation4 + $0x181] sm:$0xff] %vm4103_vm13, %v4616_v37  ;;  %4769 = vst.msk [vmem:[#allocation4 + $0x189] sm:$0xff] %vm4103_vm13, %v4617_v31  ;;  %v16001_v52 = vld [vmem:[#allocation18_spill] sm:$0xff]  ;;  %v16002_v51 = vld [vmem:[#allocation17_spill] sm:$0xff]  ;;  %v4645_v25 = vmax.f32 %v16003_v33, 0.0  ;;  %5068 = vrot.lane.b32.xlu1 %v4935_v39, %s9807_s10 }
 0x5ca   :  { %4770 = vst.msk [vmem:[#allocation4 + $0x1c9] sm:$0xff] %vm4103_vm13, %v4618_v27  ;;  %4868 = vst.msk [vmem:[#allocation5 + $0x10] sm:$0xff] %vm4103_vm13, %v12899_v5  ;;  %v4643_v63 = vmax.f32 %v16001_v52, 0.0  ;;  %v4644_v19 = vmax.f32 %v16002_v51, 0.0  ;;  %v16004_v36 = vld [vmem:[#allocation19_spill] sm:$0xff]  ;;  %v16005_v13 = vld [vmem:[#allocation22_spill] sm:$0xff] }
 0x5cb   :  { %4771 = vst.msk [vmem:[#allocation4 + $0x1d1] sm:$0xff] %vm4103_vm13, %v4619_v55  ;;  %4772 = vst.msk [vmem:[#allocation4 + $0x1e1] sm:$0xff] %vm4103_vm13, %v4620_v49  ;;  %v4646_v29 = vmax.f32 %v16004_v36, 0.0  ;;  %v4647_v34 = vmax.f32 %v16005_v13, 0.0  ;;  %v4936_v41 = vld [vmem:[#allocation4 + $0x49] sm:$0xff]  ;;  %v4937_v14 = vld [vmem:[#allocation4 + $0x51] sm:$0xff] }
 0x5cc   :  { %4773 = vst.msk [vmem:[#allocation4 + $0x1e9] sm:$0xff] %vm4103_vm13, %v4621_v16  ;;  %4774 = vst.msk [vmem:[#allocation4 + $0x1f9] sm:$0xff] %vm4103_vm13, %v4622_v6  ;;  %5070 = vrot.lane.b32.xlu0 %v4936_v41, %s9807_s10  ;;  %v4938_v26 = vld [vmem:[#allocation4 + $0x61] sm:$0xff]  ;;  %v4939_v57 = vld [vmem:[#allocation4 + $0x69] sm:$0xff] }
 0x5cd   :  { %4775 = vst.msk [vmem:[#allocation4 + $0x201] sm:$0xff] %vm4103_vm13, %v4623_v32  ;;  %4776 = vst.msk [vmem:[#allocation4 + $0x211] sm:$0xff] %vm4103_vm13, %v4624_v18  ;;  %5072 = vrot.lane.b32.xlu1 %v4937_v14, %s9807_s10  ;;  %v4940_v50 = vld [vmem:[#allocation4 + $0x79] sm:$0xff]  ;;  %v4941_v23 = vld [vmem:[#allocation4 + $0x81] sm:$0xff] }
 0x5ce   :  { %4777 = vst.msk [vmem:[#allocation4 + $0x219] sm:$0xff] %vm4103_vm13, %v4625_v59  ;;  %4778 = vst.msk [vmem:[#allocation4 + $0x229] sm:$0xff] %vm4103_vm13, %v4626_v48  ;;  %v4942_v22 = vld [vmem:[#allocation4 + $0x91] sm:$0xff]  ;;  %v4943_v38 = vld [vmem:[#allocation4 + $0x99] sm:$0xff] }
 0x5cf   :  { %4779 = vst.msk [vmem:[#allocation4 + $0x231] sm:$0xff] %vm4103_vm13, %v4627_v11  ;;  %4780 = vst.msk [vmem:[#allocation4 + $0x241] sm:$0xff] %vm4103_vm13, %v4628_v61  ;;  %v12976_v30 = vld [vmem:[#allocation4 + $0x20] sm:$0xff]  ;;  %v12981_v12 = vld [vmem:[#allocation4 + $0x38] sm:$0xff] }
 0x5d0   :  { %4781 = vst.msk [vmem:[#allocation4 + $0x249] sm:$0xff] %vm4103_vm13, %v4629_v45  ;;  %4782 = vst.msk [vmem:[#allocation4 + $0x259] sm:$0xff] %vm4103_vm13, %v4630_v46  ;;  %5074 = vrot.lane.b32.xlu0 %v4938_v26, %s9807_s10  ;;  %v12983_v47 = vld [vmem:[#allocation4 + $0x30] sm:$0xff]  ;;  %v12993_v58 = vld [vmem:[#allocation4 + $0x48] sm:$0xff] }
 0x5d1   :  { %4783 = vst.msk [vmem:[#allocation4 + $0x261] sm:$0xff] %vm4103_vm13, %v4631_v40  ;;  %4784 = vst.msk [vmem:[#allocation4 + $0x271] sm:$0xff] %vm4103_vm13, %v4632_v24  ;;  %5076 = vrot.lane.b32.xlu1 %v4939_v57, %s9807_s10  ;;  %v4944_v4 = vld [vmem:[#allocation4 + $0xa9] sm:$0xff]  ;;  %v12997_v37 = vld [vmem:[#allocation4 + $0x60] sm:$0xff] }
 0x5d2   :  { %4785 = vst.msk [vmem:[#allocation4 + $0x279] sm:$0xff] %vm4103_vm13, %v4633_v15  ;;  %4786 = vst.msk [vmem:[#allocation4 + $0x289] sm:$0xff] %vm4103_vm13, %v4634_v17  ;;  %v12989_v3 = vld [vmem:[#allocation4 + $0x50] sm:$0xff]  ;;  %v12995_v28 = vld [vmem:[#allocation4 + $0x68] sm:$0xff] }
 0x5d3   :  { %4787 = vst.msk [vmem:[#allocation4 + $0x291] sm:$0xff] %vm4103_vm13, %v4635_v43  ;;  %4788 = vst.msk [vmem:[#allocation4 + $0x2a1] sm:$0xff] %vm4103_vm13, %v4636_v60  ;;  %v4945_v31 = vld [vmem:[#allocation4 + $0xb1] sm:$0xff]  ;;  %v13006_v27 = vld [vmem:[#allocation4 + $0x80] sm:$0xff] }
 0x5d4   :  { %4789 = vst.msk [vmem:[#allocation4 + $0x2a9] sm:$0xff] %vm4103_vm13, %v4637_v44  ;;  %4790 = vst.msk [vmem:[#allocation4 + $0x2b9] sm:$0xff] %vm4103_vm13, %v4638_v9  ;;  %5078 = vrot.lane.b32.xlu0 %v4940_v50, %s9807_s10  ;;  %v13011_v55 = vld [vmem:[#allocation4 + $0x78] sm:$0xff]  ;;  %v13017_v16 = vld [vmem:[#allocation4 + $0x90] sm:$0xff] }
 0x5d5   :  { %4791 = vst.msk [vmem:[#allocation4 + $0x2c1] sm:$0xff] %vm4103_vm13, %v4639_v10  ;;  %4792 = vst.msk [vmem:[#allocation4 + $0x2d1] sm:$0xff] %vm4103_vm13, %v4640_v8  ;;  %5080 = vrot.lane.b32.xlu1 %v4941_v23, %s9807_s10  ;;  %v13015_v49 = vld [vmem:[#allocation4 + $0x98] sm:$0xff]  ;;  %v4946_v6 = vld [vmem:[#allocation4 + $0xc1] sm:$0xff] }
 0x5d6   :  { %4793 = vst.msk [vmem:[#allocation4 + $0x2d9] sm:$0xff] %vm4103_vm13, %v4641_v62  ;;  %4794 = vst.msk [vmem:[#allocation4 + $0x2e9] sm:$0xff] %vm4103_vm13, %v4642_v54  ;;  %v13023_v53 = vld [vmem:[#allocation4 + $0xb0] sm:$0xff]  ;;  %v13025_v32 = vld [vmem:[#allocation4 + $0xa8] sm:$0xff] }
 0x5d7   :  { %4795 = vst.msk [vmem:[#allocation4 + $0x2f1] sm:$0xff] %vm4103_vm13, %v4643_v63  ;;  %4796 = vst.msk [vmem:[#allocation4 + $0x301] sm:$0xff] %vm4103_vm13, %v4644_v19  ;;  %v4947_v18 = vld [vmem:[#allocation4 + $0xc9] sm:$0xff]  ;;  %v13037_v48 = vld [vmem:[#allocation4 + $0xc0] sm:$0xff] }
 0x5d8   :  { %4797 = vst.msk [vmem:[#allocation4 + $0x309] sm:$0xff] %vm4103_vm13, %v4645_v25  ;;  %4798 = vst.msk [vmem:[#allocation4 + $0x319] sm:$0xff] %vm4103_vm13, %v4646_v29  ;;  %5082 = vrot.lane.b32.xlu0 %v4942_v22, %s9807_s10  ;;  %v13032_v59 = vld [vmem:[#allocation4 + $0xc8] sm:$0xff]  ;;  %v13041_v35 = vld [vmem:[#allocation4 + $0xe0] sm:$0xff] }
 0x5d9   :  { %5251 = vst.msk [vmem:[#allocation5] sm:$0xff] %vm5250_vm0, %v5059_v1  ;;  %5252 = vst.msk [vmem:[#allocation5 + $0x8] sm:$0xff] %vm5250_vm0, %v5061_v20  ;;  %5084 = vrot.lane.b32.xlu1 %v4943_v38, %s9807_s10  ;;  %v13043_v11 = vld [vmem:[#allocation4 + $0xd8] sm:$0xff]  ;;  %v13051_v46 = vld [vmem:[#allocation4 + $0xf0] sm:$0xff] }
 0x5da   :  { %4799 = vst.msk [vmem:[#allocation4 + $0x321] sm:$0xff] %vm4103_vm13, %v4647_v34  ;;  %4801 = vst.msk [vmem:[#allocation4 + $0x339] sm:$0xff] %vm4103_vm13, %v4649_v21  ;;  %v4948_v61 = vld [vmem:[#allocation4 + $0xd9] sm:$0xff]  ;;  %v4949_v40 = vld [vmem:[#allocation4 + $0xe1] sm:$0xff] }
 0x5db   :  { %4869 = vst.msk [vmem:[#allocation5 + $0x18] sm:$0xff] %vm4103_vm13, %v12976_v30  ;;  %4871 = vst.msk [vmem:[#allocation5 + $0x28] sm:$0xff] %vm4103_vm13, %v12981_v12  ;;  %v13049_v45 = vld [vmem:[#allocation4 + $0xf8] sm:$0xff]  ;;  %v13058_v24 = vld [vmem:[#allocation4 + $0x110] sm:$0xff] }
 0x5dc   :  { %4870 = vst.msk [vmem:[#allocation5 + $0x20] sm:$0xff] %vm4103_vm13, %v12983_v47  ;;  %4873 = vst.msk [vmem:[#allocation5 + $0x38] sm:$0xff] %vm4103_vm13, %v12989_v3  ;;  %5086 = vrot.lane.b32.xlu0 %v4944_v4, %s9807_s10  ;;  %v13063_v2 = vld [vmem:[#allocation4 + $0x108] sm:$0xff]  ;;  %v13069_v7 = vld [vmem:[#allocation4 + $0x120] sm:$0xff] }
 0x5dd   :  { %4872 = vst.msk [vmem:[#allocation5 + $0x30] sm:$0xff] %vm4103_vm13, %v12993_v58  ;;  %4875 = vst.msk [vmem:[#allocation5 + $0x48] sm:$0xff] %vm4103_vm13, %v12995_v28  ;;  %5088 = vrot.lane.b32.xlu1 %v4945_v31, %s9807_s10  ;;  %v13067_v15 = vld [vmem:[#allocation4 + $0x128] sm:$0xff]  ;;  %v4950_v17 = vld [vmem:[#allocation4 + $0xf1] sm:$0xff] }
 0x5de   :  { %4874 = vst.msk [vmem:[#allocation5 + $0x40] sm:$0xff] %vm4103_vm13, %v12997_v37  ;;  %4877 = vst.msk [vmem:[#allocation5 + $0x58] sm:$0xff] %vm4103_vm13, %v13006_v27  ;;  %v13075_v56 = vld [vmem:[#allocation4 + $0x140] sm:$0xff]  ;;  %v13077_v43 = vld [vmem:[#allocation4 + $0x138] sm:$0xff] }
 0x5df   :  { %4876 = vst.msk [vmem:[#allocation5 + $0x50] sm:$0xff] %vm4103_vm13, %v13011_v55  ;;  %4879 = vst.msk [vmem:[#allocation5 + $0x68] sm:$0xff] %vm4103_vm13, %v13015_v49  ;;  %v4951_v42 = vld [vmem:[#allocation4 + $0xf9] sm:$0xff]  ;;  %v13089_v44 = vld [vmem:[#allocation4 + $0x150] sm:$0xff] }
 0x5e0   :  { %4878 = vst.msk [vmem:[#allocation5 + $0x60] sm:$0xff] %vm4103_vm13, %v13017_v16  ;;  %5090 = vrot.lane.b32.xlu0 %v4946_v6, %s9807_s10  ;;  %4881 = vst.msk [vmem:[#allocation5 + $0x78] sm:$0xff] %vm4103_vm13, %v13023_v53  ;;  %v13084_v60 = vld [vmem:[#allocation4 + $0x158] sm:$0xff]  ;;  %v13093_v9 = vld [vmem:[#allocation4 + $0x170] sm:$0xff] }
 0x5e1   :  { %4880 = vst.msk [vmem:[#allocation5 + $0x70] sm:$0xff] %vm4103_vm13, %v13025_v32  ;;  %5092 = vrot.lane.b32.xlu1 %v4947_v18, %s9807_s10  ;;  %4883 = vst.msk [vmem:[#allocation5 + $0x88] sm:$0xff] %vm4103_vm13, %v13032_v59  ;;  %v13095_v0 = vld [vmem:[#allocation4 + $0x168] sm:$0xff]  ;;  %v4953_v8 = vld [vmem:[#allocation4 + $0x111] sm:$0xff] }
 0x5e2   :  { %4882 = vst.msk [vmem:[#allocation5 + $0x80] sm:$0xff] %vm4103_vm13, %v13037_v48  ;;  %4885 = vst.msk [vmem:[#allocation5 + $0x98] sm:$0xff] %vm4103_vm13, %v13041_v35  ;;  %v4952_v10 = vld [vmem:[#allocation4 + $0x109] sm:$0xff]  ;;  %v13113_v1 = vld [vmem:[#allocation4 + $0x1e0] sm:$0xff] }
 0x5e3   :  { %4884 = vst.msk [vmem:[#allocation5 + $0x90] sm:$0xff] %vm4103_vm13, %v13043_v11  ;;  %4887 = vst.msk [vmem:[#allocation5 + $0xa8] sm:$0xff] %vm4103_vm13, %v13049_v45  ;;  %v13102_v62 = vld [vmem:[#allocation4 + $0x1d0] sm:$0xff]  ;;  %v13104_v54 = vld [vmem:[#allocation4 + $0x1c8] sm:$0xff] }
 0x5e4   :  { %5094 = vrot.lane.b32.xlu0 %v4948_v61, %s9807_s10  ;;  %4886 = vst.msk [vmem:[#allocation5 + $0xa0] sm:$0xff] %vm4103_vm13, %v13051_v46  ;;  %4889 = vst.msk [vmem:[#allocation5 + $0xb8] sm:$0xff] %vm4103_vm13, %v13058_v24  ;;  %v13111_v39 = vld [vmem:[#allocation4 + $0x1e8] sm:$0xff]  ;;  %v13119_v52 = vld [vmem:[#allocation4 + $0x200] sm:$0xff] }
 0x5e5   :  { %5096 = vrot.lane.b32.xlu1 %v4949_v40, %s9807_s10  ;;  %4888 = vst.msk [vmem:[#allocation5 + $0xb0] sm:$0xff] %vm4103_vm13, %v13063_v2  ;;  %4891 = vst.msk [vmem:[#allocation5 + $0xc8] sm:$0xff] %vm4103_vm13, %v13067_v15  ;;  %v4954_v20 = vld [vmem:[#allocation4 + $0x121] sm:$0xff]  ;;  %v13123_v63 = vld [vmem:[#allocation4 + $0x1f8] sm:$0xff] }
 0x5e6   :  { %4890 = vst.msk [vmem:[#allocation5 + $0xc0] sm:$0xff] %vm4103_vm13, %v13069_v7  ;;  %4893 = vst.msk [vmem:[#allocation5 + $0xd8] sm:$0xff] %vm4103_vm13, %v13075_v56  ;;  %v13125_v51 = vld [vmem:[#allocation4 + $0x218] sm:$0xff]  ;;  %v13127_v19 = vld [vmem:[#allocation4 + $0x210] sm:$0xff] }
 0x5e7   :  { %4892 = vst.msk [vmem:[#allocation5 + $0xd0] sm:$0xff] %vm4103_vm13, %v13077_v43  ;;  %4895 = vst.msk [vmem:[#allocation5 + $0xe8] sm:$0xff] %vm4103_vm13, %v13084_v60  ;;  %v4955_v33 = vld [vmem:[#allocation4 + $0x129] sm:$0xff]  ;;  %v4835_v36 = vld [vmem:[#allocation4 + $0x1b8] sm:$0xff] }
 0x5e8   :  { %5098 = vrot.lane.b32.xlu0 %v4950_v17, %s9807_s10  ;;  %4894 = vst.msk [vmem:[#allocation5 + $0xe0] sm:$0xff] %vm4103_vm13, %v13089_v44  ;;  %4897 = vst.msk [vmem:[#allocation5 + $0xf8] sm:$0xff] %vm4103_vm13, %v13093_v9  ;;  %v13136_v25 = vld [vmem:[#allocation4 + $0x230] sm:$0xff]  ;;  %v13141_v29 = vld [vmem:[#allocation4 + $0x228] sm:$0xff] }
 0x5e9   :  { %5100 = vrot.lane.b32.xlu1 %v4951_v42, %s9807_s10  ;;  %4896 = vst.msk [vmem:[#allocation5 + $0xf0] sm:$0xff] %vm4103_vm13, %v13095_v0  ;;  %4901 = vst.msk [vmem:[#allocation5 + $0x118] sm:$0xff] %vm4103_vm13, %v13102_v62  ;;  %v13146_v13 = vld [vmem:[#allocation4 + $0x248] sm:$0xff]  ;;  %v13148_v34 = vld [vmem:[#allocation4 + $0x240] sm:$0xff] }
 0x5ea   :  { %4900 = vst.msk [vmem:[#allocation5 + $0x110] sm:$0xff] %vm4103_vm13, %v13104_v54  ;;  %4903 = vst.msk [vmem:[#allocation5 + $0x128] sm:$0xff] %vm4103_vm13, %v13111_v39  ;;  %v4956_v21 = vld [vmem:[#allocation4 + $0x139] sm:$0xff]  ;;  %v4957_v14 = vld [vmem:[#allocation4 + $0x141] sm:$0xff] }
 0x5eb   :  { %4902 = vst.msk [vmem:[#allocation5 + $0x120] sm:$0xff] %vm4103_vm13, %v13113_v1  ;;  %4905 = vst.msk [vmem:[#allocation5 + $0x138] sm:$0xff] %vm4103_vm13, %v13119_v52  ;;  %v13154_v41 = vld [vmem:[#allocation4 + $0x260] sm:$0xff]  ;;  %v4834_v26 = vld [vmem:[#allocation4 + $0x1b0] sm:$0xff] }
 0x5ec   :  { %5102 = vrot.lane.b32.xlu0 %v4952_v10, %s9807_s10  ;;  %4904 = vst.msk [vmem:[#allocation5 + $0x130] sm:$0xff] %vm4103_vm13, %v13123_v63  ;;  %4907 = vst.msk [vmem:[#allocation5 + $0x148] sm:$0xff] %vm4103_vm13, %v13125_v51  ;;  %v13159_v57 = vld [vmem:[#allocation4 + $0x258] sm:$0xff]  ;;  %v13167_v23 = vld [vmem:[#allocation4 + $0x270] sm:$0xff] }
 0x5ed   :  { %5104 = vrot.lane.b32.xlu1 %v4953_v8, %s9807_s10  ;;  %4906 = vst.msk [vmem:[#allocation5 + $0x140] sm:$0xff] %vm4103_vm13, %v13127_v19  ;;  %4909 = vst.msk [vmem:[#allocation5 + $0x158] sm:$0xff] %vm4103_vm13, %v13136_v25  ;;  %v13165_v50 = vld [vmem:[#allocation4 + $0x278] sm:$0xff]  ;;  %v13173_v22 = vld [vmem:[#allocation4 + $0x290] sm:$0xff] }
 0x5ee   :  { %4899 = vst.msk [vmem:[#allocation5 + $0x108] sm:$0xff] %vm4103_vm13, %v4835_v36  ;;  %4908 = vst.msk [vmem:[#allocation5 + $0x150] sm:$0xff] %vm4103_vm13, %v13141_v29  ;;  %v4958_v38 = vld [vmem:[#allocation4 + $0x151] sm:$0xff]  ;;  %v13177_v4 = vld [vmem:[#allocation4 + $0x288] sm:$0xff] }
 0x5ef   :  { %4911 = vst.msk [vmem:[#allocation5 + $0x168] sm:$0xff] %vm4103_vm13, %v13146_v13  ;;  %4910 = vst.msk [vmem:[#allocation5 + $0x160] sm:$0xff] %vm4103_vm13, %v13148_v34  ;;  %v4959_v31 = vld [vmem:[#allocation4 + $0x159] sm:$0xff]  ;;  %v13182_v6 = vld [vmem:[#allocation4 + $0x2a8] sm:$0xff] }
 0x5f0   :  { %5106 = vrot.lane.b32.xlu0 %v4954_v20, %s9807_s10  ;;  %4913 = vst.msk [vmem:[#allocation5 + $0x178] sm:$0xff] %vm4103_vm13, %v13154_v41  ;;  %4898 = vst.msk [vmem:[#allocation5 + $0x100] sm:$0xff] %vm4103_vm13, %v4834_v26  ;;  %v13184_v18 = vld [vmem:[#allocation4 + $0x2a0] sm:$0xff]  ;;  %v13193_v40 = vld [vmem:[#allocation4 + $0x2b8] sm:$0xff] }
 0x5f1   :  { %5108 = vrot.lane.b32.xlu1 %v4955_v33, %s9807_s10  ;;  %4912 = vst.msk [vmem:[#allocation5 + $0x170] sm:$0xff] %vm4103_vm13, %v13159_v57  ;;  %4915 = vst.msk [vmem:[#allocation5 + $0x188] sm:$0xff] %vm4103_vm13, %v13165_v50  ;;  %v13191_v61 = vld [vmem:[#allocation4 + $0x2c0] sm:$0xff]  ;;  %v13199_v17 = vld [vmem:[#allocation4 + $0x2d8] sm:$0xff] }
 0x5f2   :  { %4914 = vst.msk [vmem:[#allocation5 + $0x180] sm:$0xff] %vm4103_vm13, %v13167_v23  ;;  %4917 = vst.msk [vmem:[#allocation5 + $0x198] sm:$0xff] %vm4103_vm13, %v13173_v22  ;;  %v4960_v42 = vld [vmem:[#allocation4 + $0x169] sm:$0xff]  ;;  %v4961_v8 = vld [vmem:[#allocation4 + $0x171] sm:$0xff] }
 0x5f3   :  { %4916 = vst.msk [vmem:[#allocation5 + $0x190] sm:$0xff] %vm4103_vm13, %v13177_v4  ;;  %4919 = vst.msk [vmem:[#allocation5 + $0x1a8] sm:$0xff] %vm4103_vm13, %v13182_v6  ;;  %v13203_v10 = vld [vmem:[#allocation4 + $0x2d0] sm:$0xff]  ;;  %v13210_v33 = vld [vmem:[#allocation4 + $0x2e8] sm:$0xff] }
 0x5f4   :  { %5110 = vrot.lane.b32.xlu0 %v4956_v21, %s9807_s10  ;;  %4918 = vst.msk [vmem:[#allocation5 + $0x1a0] sm:$0xff] %vm4103_vm13, %v13184_v18  ;;  %4921 = vst.msk [vmem:[#allocation5 + $0x1b8] sm:$0xff] %vm4103_vm13, %v13191_v61  ;;  %v13208_v20 = vld [vmem:[#allocation4 + $0x2f0] sm:$0xff]  ;;  %v13217_v21 = vld [vmem:[#allocation4 + $0x308] sm:$0xff] }
 0x5f5   :  { %5112 = vrot.lane.b32.xlu1 %v4957_v14, %s9807_s10  ;;  %4920 = vst.msk [vmem:[#allocation5 + $0x1b0] sm:$0xff] %vm4103_vm13, %v13193_v40  ;;  %4923 = vst.msk [vmem:[#allocation5 + $0x1c8] sm:$0xff] %vm4103_vm13, %v13199_v17  ;;  %v4962_v36 = vld [vmem:[#allocation4 + $0x1b1] sm:$0xff]  ;;  %v13219_v14 = vld [vmem:[#allocation4 + $0x300] sm:$0xff] }
 0x5f6   :  { %4922 = vst.msk [vmem:[#allocation5 + $0x1c0] sm:$0xff] %vm4103_vm13, %v13203_v10  ;;  %16006 = vst [vmem:[#allocation21_spill] sm:$0xff] %v13208_v20  ;;  %v4963_v26 = vld [vmem:[#allocation4 + $0x1b9] sm:$0xff] }
 0x5f7   :  { %16007 = vst [vmem:[#allocation24_spill] sm:$0xff] %v13210_v33  ;;  %4925 = vst.msk [vmem:[#allocation5 + $0x1d8] sm:$0xff] %vm4103_vm13, %v13208_v20  ;;  %v4969_v20 = vld [vmem:[#allocation4 + $0x201] sm:$0xff] }
 0x5f8   :  { %5114 = vrot.lane.b32.xlu0 %v4958_v38, %s9807_s10  ;;  %4924 = vst.msk [vmem:[#allocation5 + $0x1d0] sm:$0xff] %vm4103_vm13, %v13210_v33  ;;  %16008 = vst [vmem:[#allocation23_spill] sm:$0xff] %v13217_v21  ;;  %v13225_v38 = vld [vmem:[#allocation4 + $0x320] sm:$0xff] }
 0x5f9   :  { %5116 = vrot.lane.b32.xlu1 %v4959_v31, %s9807_s10  ;;  %16009 = vst [vmem:[#allocation26_spill] sm:$0xff] %v13219_v14  ;;  %4927 = vst.msk [vmem:[#allocation5 + $0x1e8] sm:$0xff] %vm4103_vm13, %v13217_v21  ;;  %v13229_v31 = vld [vmem:[#allocation4 + $0x318] sm:$0xff]  ;;  %v4966_v21 = vld [vmem:[#allocation4 + $0x1e1] sm:$0xff] }
 0x5fa   :  { %4926 = vst.msk [vmem:[#allocation5 + $0x1e0] sm:$0xff] %vm4103_vm13, %v13219_v14  ;;  %16010 = vst [vmem:[#allocation25_spill] sm:$0xff] %v13225_v38  ;;  %v4967_v14 = vld [vmem:[#allocation4 + $0x1e9] sm:$0xff] }
 0x5fb   :  { %4929 = vst.msk [vmem:[#allocation5 + $0x1f8] sm:$0xff] %vm4103_vm13, %v13225_v38  ;;  %16011 = vst [vmem:[#allocation28_spill] sm:$0xff] %v13229_v31  ;;  %v4968_v38 = vld [vmem:[#allocation4 + $0x1f9] sm:$0xff] }
 0x5fc   :  { %5118 = vrot.lane.b32.xlu0 %v4960_v42, %s9807_s10  ;;  %4928 = vst.msk [vmem:[#allocation5 + $0x1f0] sm:$0xff] %vm4103_vm13, %v13229_v31  ;;  %v4964_v42 = vld [vmem:[#allocation4 + $0x1c9] sm:$0xff]  ;;  %v4990_v31 = vld [vmem:[#allocation4 + $0x301] sm:$0xff] }
 0x5fd   :  { %5120 = vrot.lane.b32.xlu1 %v4961_v8, %s9807_s10  ;;  %v4965_v8 = vld [vmem:[#allocation4 + $0x1d1] sm:$0xff] }
 0x600   :  { %5122 = vrot.lane.b32.xlu0 %v4962_v36, %s9807_s10  ;;  %v4970_v36 = vld [vmem:[#allocation4 + $0x211] sm:$0xff] }
 0x601   :  { %5124 = vrot.lane.b32.xlu1 %v4963_v26, %s9807_s10  ;;  %v4971_v26 = vld [vmem:[#allocation4 + $0x219] sm:$0xff] }
 0x604   :  { %5126 = vrot.lane.b32.xlu0 %v4964_v42, %s9807_s10  ;;  %v4972_v42 = vld [vmem:[#allocation4 + $0x229] sm:$0xff] }
 0x605   :  { %5128 = vrot.lane.b32.xlu1 %v4965_v8, %s9807_s10  ;;  %v4973_v8 = vld [vmem:[#allocation4 + $0x231] sm:$0xff] }
 0x608   :  { %5130 = vrot.lane.b32.xlu0 %v4966_v21, %s9807_s10  ;;  %v4974_v21 = vld [vmem:[#allocation4 + $0x241] sm:$0xff] }
 0x609   :  { %5132 = vrot.lane.b32.xlu1 %v4967_v14, %s9807_s10  ;;  %v4975_v14 = vld [vmem:[#allocation4 + $0x249] sm:$0xff] }
 0x60c   :  { %5134 = vrot.lane.b32.xlu0 %v4968_v38, %s9807_s10  ;;  %v4976_v38 = vld [vmem:[#allocation4 + $0x259] sm:$0xff] }
 0x60d   :  { %5136 = vrot.lane.b32.xlu1 %v4969_v20, %s9807_s10  ;;  %v4977_v20 = vld [vmem:[#allocation4 + $0x261] sm:$0xff] }
 0x610   :  { %5138 = vrot.lane.b32.xlu0 %v4970_v36, %s9807_s10  ;;  %v4978_v36 = vld [vmem:[#allocation4 + $0x271] sm:$0xff] }
 0x611   :  { %5140 = vrot.lane.b32.xlu1 %v4971_v26, %s9807_s10  ;;  %v4979_v26 = vld [vmem:[#allocation4 + $0x279] sm:$0xff] }
 0x614   :  { %5142 = vrot.lane.b32.xlu0 %v4972_v42, %s9807_s10  ;;  %v4980_v42 = vld [vmem:[#allocation4 + $0x289] sm:$0xff] }
 0x615   :  { %5144 = vrot.lane.b32.xlu1 %v4973_v8, %s9807_s10  ;;  %v4981_v8 = vld [vmem:[#allocation4 + $0x291] sm:$0xff] }
 0x618   :  { %5146 = vrot.lane.b32.xlu0 %v4974_v21, %s9807_s10  ;;  %v4982_v21 = vld [vmem:[#allocation4 + $0x2a1] sm:$0xff] }
 0x619   :  { %5148 = vrot.lane.b32.xlu1 %v4975_v14, %s9807_s10  ;;  %v4983_v14 = vld [vmem:[#allocation4 + $0x2a9] sm:$0xff] }
 0x61c   :  { %5150 = vrot.lane.b32.xlu0 %v4976_v38, %s9807_s10  ;;  %v4984_v38 = vld [vmem:[#allocation4 + $0x2b9] sm:$0xff] }
 0x61d   :  { %5152 = vrot.lane.b32.xlu1 %v4977_v20, %s9807_s10  ;;  %v4985_v20 = vld [vmem:[#allocation4 + $0x2c1] sm:$0xff] }
 0x620   :  { %5154 = vrot.lane.b32.xlu0 %v4978_v36, %s9807_s10  ;;  %v4986_v36 = vld [vmem:[#allocation4 + $0x2d1] sm:$0xff] }
 0x621   :  { %5156 = vrot.lane.b32.xlu1 %v4979_v26, %s9807_s10  ;;  %v4987_v26 = vld [vmem:[#allocation4 + $0x2d9] sm:$0xff] }
 0x624   :  { %5158 = vrot.lane.b32.xlu0 %v4980_v42, %s9807_s10  ;;  %v4988_v42 = vld [vmem:[#allocation4 + $0x2e9] sm:$0xff] }
 0x625   :  { %5160 = vrot.lane.b32.xlu1 %v4981_v8, %s9807_s10  ;;  %v4989_v8 = vld [vmem:[#allocation4 + $0x2f1] sm:$0xff] }
 0x628   :  { %5162 = vrot.lane.b32.xlu0 %v4982_v21, %s9807_s10 }
 0x629   :  { %5164 = vrot.lane.b32.xlu1 %v4983_v14, %s9807_s10 }
 0x62c   :  { %5166 = vrot.lane.b32.xlu0 %v4984_v38, %s9807_s10  ;;  %v4991_v38 = vld [vmem:[#allocation4 + $0x309] sm:$0xff] }
 0x62d   :  { %5168 = vrot.lane.b32.xlu1 %v4985_v20, %s9807_s10 }
 0x630   :  { %5170 = vrot.lane.b32.xlu0 %v4986_v36, %s9807_s10 }
 0x631   :  { %5172 = vrot.lane.b32.xlu1 %v4987_v26, %s9807_s10  ;;  %v4992_v26 = vld [vmem:[#allocation4 + $0x319] sm:$0xff] }
 0x634   :  { %5174 = vrot.lane.b32.xlu0 %v4988_v42, %s9807_s10  ;;  %v5063_v21 = vpop.permute.xlu0 %5062  ;;  %v4993_v42 = vld [vmem:[#allocation4 + $0x321] sm:$0xff] }
 0x635   :  { %5176 = vrot.lane.b32.xlu1 %v4989_v8, %s9807_s10  ;;  %v5065_v14 = vpop.permute.xlu1 %5064  ;;  %5253 = vst.msk [vmem:[#allocation5 + $0x10] sm:$0xff] %vm5250_vm0, %v5063_v21  ;;  %v5315_v8 = vld [vmem:[#allocation4 + $0x2] sm:$0xff] }
 0x636   :  { %5254 = vst.msk [vmem:[#allocation5 + $0x18] sm:$0xff] %vm5250_vm0, %v5065_v14  ;;  %v5316_v14 = vld [vmem:[#allocation4 + $0xa] sm:$0xff] }
 0x638   :  { %5178 = vrot.lane.b32.xlu0 %v4990_v31, %s9807_s10 }
 0x639   :  { %5180 = vrot.lane.b32.xlu1 %v4991_v38, %s9807_s10 }
 0x63a   :  { %v5067_v20 = vpop.permute.xlu0 %5066 }
 0x63b   :  { %v5069_v36 = vpop.permute.xlu1 %5068  ;;  %5255 = vst.msk [vmem:[#allocation5 + $0x20] sm:$0xff] %vm5250_vm0, %v5067_v20  ;;  %v5317_v20 = vld [vmem:[#allocation4 + $0x1a] sm:$0xff] }
 0x63c   :  { %5256 = vst.msk [vmem:[#allocation5 + $0x28] sm:$0xff] %vm5250_vm0, %v5069_v36  ;;  %5182 = vrot.lane.b32.xlu0 %v4992_v26, %s9807_s10  ;;  %v5318_v36 = vld [vmem:[#allocation4 + $0x22] sm:$0xff] }
 0x63d   :  { %5184 = vrot.lane.b32.xlu1 %v4993_v42, %s9807_s10 }
 0x63e   :  { %v5071_v21 = vpop.permute.xlu0 %5070 }
 0x63f   :  { %v5073_v33 = vpop.permute.xlu1 %5072  ;;  %5257 = vst.msk [vmem:[#allocation5 + $0x30] sm:$0xff] %vm5250_vm0, %v5071_v21 }
 0x640   :  { %5258 = vst.msk [vmem:[#allocation5 + $0x38] sm:$0xff] %vm5250_vm0, %v5073_v33  ;;  %5443 = vrot.lane.b32.xlu0 %v5315_v8, %s9809_s18  ;;  %v5319_v33 = vld [vmem:[#allocation4 + $0x32] sm:$0xff]  ;;  %v5320_v8 = vld [vmem:[#allocation4 + $0x3a] sm:$0xff] }
 0x641   :  { %5445 = vrot.lane.b32.xlu1 %v5316_v14, %s9809_s18 }
 0x642   :  { %v5075_v31 = vpop.permute.xlu0 %5074 }
 0x643   :  { %v5077_v38 = vpop.permute.xlu1 %5076  ;;  %5259 = vst.msk [vmem:[#allocation5 + $0x40] sm:$0xff] %vm5250_vm0, %v5075_v31  ;;  %v5321_v31 = vld [vmem:[#allocation4 + $0x4a] sm:$0xff] }
 0x644   :  { %5260 = vst.msk [vmem:[#allocation5 + $0x48] sm:$0xff] %vm5250_vm0, %v5077_v38  ;;  %5447 = vrot.lane.b32.xlu0 %v5317_v20, %s9809_s18  ;;  %v5322_v38 = vld [vmem:[#allocation4 + $0x52] sm:$0xff] }
 0x645   :  { %5449 = vrot.lane.b32.xlu1 %v5318_v36, %s9809_s18 }
 0x646   :  { %v5079_v26 = vpop.permute.xlu0 %5078 }
 0x647   :  { %v5081_v42 = vpop.permute.xlu1 %5080  ;;  %5261 = vst.msk [vmem:[#allocation5 + $0x50] sm:$0xff] %vm5250_vm0, %v5079_v26  ;;  %v5323_v26 = vld [vmem:[#allocation4 + $0x62] sm:$0xff] }
 0x648   :  { %5262 = vst.msk [vmem:[#allocation5 + $0x58] sm:$0xff] %vm5250_vm0, %v5081_v42  ;;  %5451 = vrot.lane.b32.xlu0 %v5319_v33, %s9809_s18  ;;  %v5324_v42 = vld [vmem:[#allocation4 + $0x6a] sm:$0xff] }
 0x649   :  { %5453 = vrot.lane.b32.xlu1 %v5320_v8, %s9809_s18 }
 0x64a   :  { %v5083_v21 = vpop.permute.xlu0 %5082 }
 0x64b   :  { %v5085_v14 = vpop.permute.xlu1 %5084  ;;  %5263 = vst.msk [vmem:[#allocation5 + $0x60] sm:$0xff] %vm5250_vm0, %v5083_v21  ;;  %v5325_v21 = vld [vmem:[#allocation4 + $0x7a] sm:$0xff] }
 0x64c   :  { %5264 = vst.msk [vmem:[#allocation5 + $0x68] sm:$0xff] %vm5250_vm0, %v5085_v14  ;;  %5455 = vrot.lane.b32.xlu0 %v5321_v31, %s9809_s18  ;;  %v5326_v14 = vld [vmem:[#allocation4 + $0x82] sm:$0xff] }
 0x64d   :  { %5457 = vrot.lane.b32.xlu1 %v5322_v38, %s9809_s18 }
 0x64e   :  { %v5087_v20 = vpop.permute.xlu0 %5086 }
 0x64f   :  { %v5089_v36 = vpop.permute.xlu1 %5088  ;;  %5265 = vst.msk [vmem:[#allocation5 + $0x70] sm:$0xff] %vm5250_vm0, %v5087_v20  ;;  %v5327_v20 = vld [vmem:[#allocation4 + $0x92] sm:$0xff] }
 0x650   :  { %5266 = vst.msk [vmem:[#allocation5 + $0x78] sm:$0xff] %vm5250_vm0, %v5089_v36  ;;  %5459 = vrot.lane.b32.xlu0 %v5323_v26, %s9809_s18  ;;  %v5328_v36 = vld [vmem:[#allocation4 + $0x9a] sm:$0xff] }
 0x651   :  { %5461 = vrot.lane.b32.xlu1 %v5324_v42, %s9809_s18 }
 0x652   :  { %v5091_v33 = vpop.permute.xlu0 %5090 }
 0x653   :  { %v5093_v8 = vpop.permute.xlu1 %5092  ;;  %5267 = vst.msk [vmem:[#allocation5 + $0x80] sm:$0xff] %vm5250_vm0, %v5091_v33  ;;  %v5329_v33 = vld [vmem:[#allocation4 + $0xaa] sm:$0xff] }
 0x654   :  { %5268 = vst.msk [vmem:[#allocation5 + $0x88] sm:$0xff] %vm5250_vm0, %v5093_v8  ;;  %5463 = vrot.lane.b32.xlu0 %v5325_v21, %s9809_s18  ;;  %v5330_v8 = vld [vmem:[#allocation4 + $0xb2] sm:$0xff] }
 0x655   :  { %5465 = vrot.lane.b32.xlu1 %v5326_v14, %s9809_s18 }
 0x656   :  { %v5095_v31 = vpop.permute.xlu0 %5094 }
 0x657   :  { %v5097_v38 = vpop.permute.xlu1 %5096  ;;  %5269 = vst.msk [vmem:[#allocation5 + $0x90] sm:$0xff] %vm5250_vm0, %v5095_v31  ;;  %v5331_v31 = vld [vmem:[#allocation4 + $0xc2] sm:$0xff] }
 0x658   :  { %5270 = vst.msk [vmem:[#allocation5 + $0x98] sm:$0xff] %vm5250_vm0, %v5097_v38  ;;  %5467 = vrot.lane.b32.xlu0 %v5327_v20, %s9809_s18  ;;  %v5332_v38 = vld [vmem:[#allocation4 + $0xca] sm:$0xff] }
 0x659   :  { %5469 = vrot.lane.b32.xlu1 %v5328_v36, %s9809_s18 }
 0x65a   :  { %v5099_v26 = vpop.permute.xlu0 %5098 }
 0x65b   :  { %v5101_v42 = vpop.permute.xlu1 %5100  ;;  %5271 = vst.msk [vmem:[#allocation5 + $0xa0] sm:$0xff] %vm5250_vm0, %v5099_v26  ;;  %v5333_v26 = vld [vmem:[#allocation4 + $0xda] sm:$0xff] }
 0x65c   :  { %5272 = vst.msk [vmem:[#allocation5 + $0xa8] sm:$0xff] %vm5250_vm0, %v5101_v42  ;;  %5471 = vrot.lane.b32.xlu0 %v5329_v33, %s9809_s18  ;;  %v5334_v42 = vld [vmem:[#allocation4 + $0xe2] sm:$0xff] }
 0x65d   :  { %5473 = vrot.lane.b32.xlu1 %v5330_v8, %s9809_s18 }
 0x65e   :  { %v5103_v21 = vpop.permute.xlu0 %5102 }
 0x65f   :  { %v5105_v14 = vpop.permute.xlu1 %5104  ;;  %5273 = vst.msk [vmem:[#allocation5 + $0xb0] sm:$0xff] %vm5250_vm0, %v5103_v21  ;;  %v5335_v21 = vld [vmem:[#allocation4 + $0xf2] sm:$0xff] }
 0x660   :  { %5274 = vst.msk [vmem:[#allocation5 + $0xb8] sm:$0xff] %vm5250_vm0, %v5105_v14  ;;  %5475 = vrot.lane.b32.xlu0 %v5331_v31, %s9809_s18  ;;  %v5336_v14 = vld [vmem:[#allocation4 + $0xfa] sm:$0xff] }
 0x661   :  { %5477 = vrot.lane.b32.xlu1 %v5332_v38, %s9809_s18 }
 0x662   :  { %v5107_v20 = vpop.permute.xlu0 %5106 }
 0x663   :  { %v5109_v36 = vpop.permute.xlu1 %5108  ;;  %5275 = vst.msk [vmem:[#allocation5 + $0xc0] sm:$0xff] %vm5250_vm0, %v5107_v20  ;;  %v5337_v20 = vld [vmem:[#allocation4 + $0x10a] sm:$0xff] }
 0x664   :  { %5276 = vst.msk [vmem:[#allocation5 + $0xc8] sm:$0xff] %vm5250_vm0, %v5109_v36  ;;  %5479 = vrot.lane.b32.xlu0 %v5333_v26, %s9809_s18  ;;  %v5338_v36 = vld [vmem:[#allocation4 + $0x112] sm:$0xff] }
 0x665   :  { %5481 = vrot.lane.b32.xlu1 %v5334_v42, %s9809_s18 }
 0x666   :  { %v5111_v33 = vpop.permute.xlu0 %5110 }
 0x667   :  { %v5113_v8 = vpop.permute.xlu1 %5112  ;;  %5277 = vst.msk [vmem:[#allocation5 + $0xd0] sm:$0xff] %vm5250_vm0, %v5111_v33  ;;  %v5339_v33 = vld [vmem:[#allocation4 + $0x122] sm:$0xff] }
 0x668   :  { %5278 = vst.msk [vmem:[#allocation5 + $0xd8] sm:$0xff] %vm5250_vm0, %v5113_v8  ;;  %5483 = vrot.lane.b32.xlu0 %v5335_v21, %s9809_s18  ;;  %v5340_v8 = vld [vmem:[#allocation4 + $0x12a] sm:$0xff] }
 0x669   :  { %5485 = vrot.lane.b32.xlu1 %v5336_v14, %s9809_s18 }
 0x66a   :  { %v5115_v31 = vpop.permute.xlu0 %5114 }
 0x66b   :  { %v5117_v38 = vpop.permute.xlu1 %5116  ;;  %5279 = vst.msk [vmem:[#allocation5 + $0xe0] sm:$0xff] %vm5250_vm0, %v5115_v31  ;;  %v5341_v31 = vld [vmem:[#allocation4 + $0x13a] sm:$0xff] }
 0x66c   :  { %5280 = vst.msk [vmem:[#allocation5 + $0xe8] sm:$0xff] %vm5250_vm0, %v5117_v38  ;;  %5487 = vrot.lane.b32.xlu0 %v5337_v20, %s9809_s18  ;;  %v5342_v38 = vld [vmem:[#allocation4 + $0x142] sm:$0xff] }
 0x66d   :  { %5489 = vrot.lane.b32.xlu1 %v5338_v36, %s9809_s18 }
 0x66e   :  { %v5119_v26 = vpop.permute.xlu0 %5118 }
 0x66f   :  { %v5121_v42 = vpop.permute.xlu1 %5120  ;;  %5281 = vst.msk [vmem:[#allocation5 + $0xf0] sm:$0xff] %vm5250_vm0, %v5119_v26  ;;  %v5343_v26 = vld [vmem:[#allocation4 + $0x152] sm:$0xff] }
 0x670   :  { %5282 = vst.msk [vmem:[#allocation5 + $0xf8] sm:$0xff] %vm5250_vm0, %v5121_v42  ;;  %5491 = vrot.lane.b32.xlu0 %v5339_v33, %s9809_s18  ;;  %v5344_v42 = vld [vmem:[#allocation4 + $0x15a] sm:$0xff] }
 0x671   :  { %5493 = vrot.lane.b32.xlu1 %v5340_v8, %s9809_s18 }
 0x672   :  { %v5123_v21 = vpop.permute.xlu0 %5122 }
 0x673   :  { %v5125_v14 = vpop.permute.xlu1 %5124  ;;  %5283 = vst.msk [vmem:[#allocation5 + $0x100] sm:$0xff] %vm5250_vm0, %v5123_v21  ;;  %v5345_v21 = vld [vmem:[#allocation4 + $0x16a] sm:$0xff] }
 0x674   :  { %5284 = vst.msk [vmem:[#allocation5 + $0x108] sm:$0xff] %vm5250_vm0, %v5125_v14  ;;  %5495 = vrot.lane.b32.xlu0 %v5341_v31, %s9809_s18  ;;  %v5346_v14 = vld [vmem:[#allocation4 + $0x172] sm:$0xff] }
 0x675   :  { %5497 = vrot.lane.b32.xlu1 %v5342_v38, %s9809_s18  ;;  %v5347_v31 = vld [vmem:[#allocation4 + $0x1b2] sm:$0xff] }
 0x676   :  { %v5127_v20 = vpop.permute.xlu0 %5126 }
 0x677   :  { %v5129_v36 = vpop.permute.xlu1 %5128  ;;  %5285 = vst.msk [vmem:[#allocation5 + $0x110] sm:$0xff] %vm5250_vm0, %v5127_v20  ;;  %v5348_v20 = vld [vmem:[#allocation4 + $0x1ba] sm:$0xff] }
 0x678   :  { %5286 = vst.msk [vmem:[#allocation5 + $0x118] sm:$0xff] %vm5250_vm0, %v5129_v36  ;;  %5499 = vrot.lane.b32.xlu0 %v5343_v26, %s9809_s18 }
 0x679   :  { %5501 = vrot.lane.b32.xlu1 %v5344_v42, %s9809_s18 }
 0x67a   :  { %v5131_v33 = vpop.permute.xlu0 %5130 }
 0x67b   :  { %v5133_v8 = vpop.permute.xlu1 %5132  ;;  %5287 = vst.msk [vmem:[#allocation5 + $0x120] sm:$0xff] %vm5250_vm0, %v5131_v33  ;;  %v5349_v33 = vld [vmem:[#allocation4 + $0x1ca] sm:$0xff] }
 0x67c   :  { %5288 = vst.msk [vmem:[#allocation5 + $0x128] sm:$0xff] %vm5250_vm0, %v5133_v8  ;;  %5503 = vrot.lane.b32.xlu0 %v5345_v21, %s9809_s18  ;;  %v5350_v8 = vld [vmem:[#allocation4 + $0x1d2] sm:$0xff] }
 0x67d   :  { %5505 = vrot.lane.b32.xlu1 %v5346_v14, %s9809_s18 }
 0x67e   :  { %v5135_v38 = vpop.permute.xlu0 %5134 }
 0x67f   :  { %v5137_v36 = vpop.permute.xlu1 %5136  ;;  %5289 = vst.msk [vmem:[#allocation5 + $0x130] sm:$0xff] %vm5250_vm0, %v5135_v38  ;;  %v5351_v38 = vld [vmem:[#allocation4 + $0x1e2] sm:$0xff] }
 0x680   :  { %5290 = vst.msk [vmem:[#allocation5 + $0x138] sm:$0xff] %vm5250_vm0, %v5137_v36  ;;  %5507 = vrot.lane.b32.xlu0 %v5347_v31, %s9809_s18  ;;  %v5352_v31 = vld [vmem:[#allocation4 + $0x1ea] sm:$0xff] }
 0x681   :  { %5509 = vrot.lane.b32.xlu1 %v5348_v20, %s9809_s18 }
 0x682   :  { %v5139_v26 = vpop.permute.xlu0 %5138 }
 0x683   :  { %v5141_v42 = vpop.permute.xlu1 %5140  ;;  %5291 = vst.msk [vmem:[#allocation5 + $0x140] sm:$0xff] %vm5250_vm0, %v5139_v26  ;;  %v5353_v26 = vld [vmem:[#allocation4 + $0x1fa] sm:$0xff] }
 0x684   :  { %5292 = vst.msk [vmem:[#allocation5 + $0x148] sm:$0xff] %vm5250_vm0, %v5141_v42  ;;  %5511 = vrot.lane.b32.xlu0 %v5349_v33, %s9809_s18  ;;  %v5354_v42 = vld [vmem:[#allocation4 + $0x202] sm:$0xff] }
 0x685   :  { %5513 = vrot.lane.b32.xlu1 %v5350_v8, %s9809_s18 }
 0x686   :  { %v5143_v21 = vpop.permute.xlu0 %5142 }
 0x687   :  { %v5145_v14 = vpop.permute.xlu1 %5144  ;;  %5293 = vst.msk [vmem:[#allocation5 + $0x150] sm:$0xff] %vm5250_vm0, %v5143_v21  ;;  %v5355_v21 = vld [vmem:[#allocation4 + $0x212] sm:$0xff] }
 0x688   :  { %5294 = vst.msk [vmem:[#allocation5 + $0x158] sm:$0xff] %vm5250_vm0, %v5145_v14  ;;  %5515 = vrot.lane.b32.xlu0 %v5351_v38, %s9809_s18  ;;  %v5356_v14 = vld [vmem:[#allocation4 + $0x21a] sm:$0xff] }
 0x689   :  { %5517 = vrot.lane.b32.xlu1 %v5352_v31, %s9809_s18 }
 0x68a   :  { %v5147_v20 = vpop.permute.xlu0 %5146 }
 0x68b   :  { %v5149_v36 = vpop.permute.xlu1 %5148  ;;  %5295 = vst.msk [vmem:[#allocation5 + $0x160] sm:$0xff] %vm5250_vm0, %v5147_v20  ;;  %v5357_v20 = vld [vmem:[#allocation4 + $0x22a] sm:$0xff] }
 0x68c   :  { %5296 = vst.msk [vmem:[#allocation5 + $0x168] sm:$0xff] %vm5250_vm0, %v5149_v36  ;;  %5519 = vrot.lane.b32.xlu0 %v5353_v26, %s9809_s18  ;;  %v5358_v36 = vld [vmem:[#allocation4 + $0x232] sm:$0xff] }
 0x68d   :  { %5521 = vrot.lane.b32.xlu1 %v5354_v42, %s9809_s18 }
 0x68e   :  { %v5151_v33 = vpop.permute.xlu0 %5150 }
 0x68f   :  { %v5153_v8 = vpop.permute.xlu1 %5152  ;;  %5297 = vst.msk [vmem:[#allocation5 + $0x170] sm:$0xff] %vm5250_vm0, %v5151_v33  ;;  %v5359_v33 = vld [vmem:[#allocation4 + $0x242] sm:$0xff] }
 0x690   :  { %5298 = vst.msk [vmem:[#allocation5 + $0x178] sm:$0xff] %vm5250_vm0, %v5153_v8  ;;  %5523 = vrot.lane.b32.xlu0 %v5355_v21, %s9809_s18  ;;  %v5360_v8 = vld [vmem:[#allocation4 + $0x24a] sm:$0xff] }
 0x691   :  { %5525 = vrot.lane.b32.xlu1 %v5356_v14, %s9809_s18 }
 0x692   :  { %v5155_v38 = vpop.permute.xlu0 %5154 }
 0x693   :  { %v5157_v31 = vpop.permute.xlu1 %5156  ;;  %5299 = vst.msk [vmem:[#allocation5 + $0x180] sm:$0xff] %vm5250_vm0, %v5155_v38  ;;  %v5361_v38 = vld [vmem:[#allocation4 + $0x25a] sm:$0xff] }
 0x694   :  { %5300 = vst.msk [vmem:[#allocation5 + $0x188] sm:$0xff] %vm5250_vm0, %v5157_v31  ;;  %5527 = vrot.lane.b32.xlu0 %v5357_v20, %s9809_s18  ;;  %v5362_v31 = vld [vmem:[#allocation4 + $0x262] sm:$0xff] }
 0x695   :  { %5529 = vrot.lane.b32.xlu1 %v5358_v36, %s9809_s18 }
 0x696   :  { %v5159_v26 = vpop.permute.xlu0 %5158 }
 0x697   :  { %v5161_v42 = vpop.permute.xlu1 %5160  ;;  %5301 = vst.msk [vmem:[#allocation5 + $0x190] sm:$0xff] %vm5250_vm0, %v5159_v26  ;;  %v5363_v26 = vld [vmem:[#allocation4 + $0x272] sm:$0xff] }
 0x698   :  { %5302 = vst.msk [vmem:[#allocation5 + $0x198] sm:$0xff] %vm5250_vm0, %v5161_v42  ;;  %5531 = vrot.lane.b32.xlu0 %v5359_v33, %s9809_s18  ;;  %v5364_v42 = vld [vmem:[#allocation4 + $0x27a] sm:$0xff] }
 0x699   :  { %5533 = vrot.lane.b32.xlu1 %v5360_v8, %s9809_s18 }
 0x69a   :  { %v5163_v21 = vpop.permute.xlu0 %5162 }
 0x69b   :  { %v5165_v14 = vpop.permute.xlu1 %5164  ;;  %5303 = vst.msk [vmem:[#allocation5 + $0x1a0] sm:$0xff] %vm5250_vm0, %v5163_v21  ;;  %v5365_v21 = vld [vmem:[#allocation4 + $0x28a] sm:$0xff] }
 0x69c   :  { %5304 = vst.msk [vmem:[#allocation5 + $0x1a8] sm:$0xff] %vm5250_vm0, %v5165_v14  ;;  %5535 = vrot.lane.b32.xlu0 %v5361_v38, %s9809_s18  ;;  %v5366_v14 = vld [vmem:[#allocation4 + $0x292] sm:$0xff] }
 0x69d   :  { %5537 = vrot.lane.b32.xlu1 %v5362_v31, %s9809_s18 }
 0x69e   :  { %v5167_v20 = vpop.permute.xlu0 %5166 }
 0x69f   :  { %v5169_v36 = vpop.permute.xlu1 %5168  ;;  %5305 = vst.msk [vmem:[#allocation5 + $0x1b0] sm:$0xff] %vm5250_vm0, %v5167_v20  ;;  %v5367_v20 = vld [vmem:[#allocation4 + $0x2a2] sm:$0xff] }
 0x6a0   :  { %5306 = vst.msk [vmem:[#allocation5 + $0x1b8] sm:$0xff] %vm5250_vm0, %v5169_v36  ;;  %5539 = vrot.lane.b32.xlu0 %v5363_v26, %s9809_s18  ;;  %v5368_v36 = vld [vmem:[#allocation4 + $0x2aa] sm:$0xff] }
 0x6a1   :  { %5541 = vrot.lane.b32.xlu1 %v5364_v42, %s9809_s18 }
 0x6a2   :  { %v5171_v33 = vpop.permute.xlu0 %5170 }
 0x6a3   :  { %v5173_v8 = vpop.permute.xlu1 %5172  ;;  %5307 = vst.msk [vmem:[#allocation5 + $0x1c0] sm:$0xff] %vm5250_vm0, %v5171_v33  ;;  %v5369_v33 = vld [vmem:[#allocation4 + $0x2ba] sm:$0xff] }
 0x6a4   :  { %5308 = vst.msk [vmem:[#allocation5 + $0x1c8] sm:$0xff] %vm5250_vm0, %v5173_v8  ;;  %5543 = vrot.lane.b32.xlu0 %v5365_v21, %s9809_s18  ;;  %v5370_v8 = vld [vmem:[#allocation4 + $0x2c2] sm:$0xff] }
 0x6a5   :  { %5545 = vrot.lane.b32.xlu1 %v5366_v14, %s9809_s18 }
 0x6a6   :  { %v5175_v38 = vpop.permute.xlu0 %5174 }
 0x6a7   :  { %v5177_v31 = vpop.permute.xlu1 %5176  ;;  %5309 = vst.msk [vmem:[#allocation5 + $0x1d0] sm:$0xff] %vm5250_vm0, %v5175_v38  ;;  %v5371_v38 = vld [vmem:[#allocation4 + $0x2d2] sm:$0xff] }
 0x6a8   :  { %5310 = vst.msk [vmem:[#allocation5 + $0x1d8] sm:$0xff] %vm5250_vm0, %v5177_v31  ;;  %5547 = vrot.lane.b32.xlu0 %v5367_v20, %s9809_s18  ;;  %v5372_v31 = vld [vmem:[#allocation4 + $0x2da] sm:$0xff] }
 0x6a9   :  { %5549 = vrot.lane.b32.xlu1 %v5368_v36, %s9809_s18 }
 0x6aa   :  { %v5179_v26 = vpop.permute.xlu0 %5178 }
 0x6ab   :  { %v5181_v42 = vpop.permute.xlu1 %5180  ;;  %5311 = vst.msk [vmem:[#allocation5 + $0x1e0] sm:$0xff] %vm5250_vm0, %v5179_v26  ;;  %v5373_v26 = vld [vmem:[#allocation4 + $0x2ea] sm:$0xff] }
 0x6ac   :  { %5312 = vst.msk [vmem:[#allocation5 + $0x1e8] sm:$0xff] %vm5250_vm0, %v5181_v42  ;;  %5551 = vrot.lane.b32.xlu0 %v5369_v33, %s9809_s18  ;;  %v5374_v42 = vld [vmem:[#allocation4 + $0x2f2] sm:$0xff] }
 0x6ad   :  { %5553 = vrot.lane.b32.xlu1 %v5370_v8, %s9809_s18 }
 0x6ae   :  { %v5183_v21 = vpop.permute.xlu0 %5182 }
 0x6af   :  { %v5185_v14 = vpop.permute.xlu1 %5184  ;;  %5313 = vst.msk [vmem:[#allocation5 + $0x1f0] sm:$0xff] %vm5250_vm0, %v5183_v21  ;;  %v5375_v21 = vld [vmem:[#allocation4 + $0x302] sm:$0xff] }
 0x6b0   :  { %5314 = vst.msk [vmem:[#allocation5 + $0x1f8] sm:$0xff] %vm5250_vm0, %v5185_v14  ;;  %5555 = vrot.lane.b32.xlu0 %v5371_v38, %s9809_s18  ;;  %v5376_v14 = vld [vmem:[#allocation4 + $0x30a] sm:$0xff] }
 0x6b1   :  { %5557 = vrot.lane.b32.xlu1 %v5372_v31, %s9809_s18 }
 0x6b2   :  { %v5444_v20 = vpop.permute.xlu0 %5443 }
 0x6b3   :  { %v5446_v36 = vpop.permute.xlu1 %5445  ;;  %5636 = vst.msk [vmem:[#allocation5] sm:$0xff] %vm5635_vm1, %v5444_v20  ;;  %v5377_v20 = vld [vmem:[#allocation4 + $0x31a] sm:$0xff] }
 0x6b4   :  { %5637 = vst.msk [vmem:[#allocation5 + $0x8] sm:$0xff] %vm5635_vm1, %v5446_v36  ;;  %5559 = vrot.lane.b32.xlu0 %v5373_v26, %s9809_s18  ;;  %v5378_v36 = vld [vmem:[#allocation4 + $0x322] sm:$0xff] }
 0x6b5   :  { %5561 = vrot.lane.b32.xlu1 %v5374_v42, %s9809_s18 }
 0x6b6   :  { %v5448_v33 = vpop.permute.xlu0 %5447 }
 0x6b7   :  { %v5450_v8 = vpop.permute.xlu1 %5449  ;;  %5638 = vst.msk [vmem:[#allocation5 + $0x10] sm:$0xff] %vm5635_vm1, %v5448_v33 }
 0x6b8   :  { %5639 = vst.msk [vmem:[#allocation5 + $0x18] sm:$0xff] %vm5635_vm1, %v5450_v8  ;;  %5563 = vrot.lane.b32.xlu0 %v5375_v21, %s9809_s18 }
 0x6b9   :  { %5565 = vrot.lane.b32.xlu1 %v5376_v14, %s9809_s18 }
 0x6ba   :  { %v5452_v38 = vpop.permute.xlu0 %5451 }
 0x6bb   :  { %v5454_v31 = vpop.permute.xlu1 %5453  ;;  %5640 = vst.msk [vmem:[#allocation5 + $0x20] sm:$0xff] %vm5635_vm1, %v5452_v38 }
 0x6bc   :  { %5641 = vst.msk [vmem:[#allocation5 + $0x28] sm:$0xff] %vm5635_vm1, %v5454_v31  ;;  %5567 = vrot.lane.b32.xlu0 %v5377_v20, %s9809_s18 }
 0x6bd   :  { %5569 = vrot.lane.b32.xlu1 %v5378_v36, %s9809_s18 }
 0x6be   :  { %v5456_v26 = vpop.permute.xlu0 %5455 }
 0x6bf   :  { %v5458_v42 = vpop.permute.xlu1 %5457  ;;  %5642 = vst.msk [vmem:[#allocation5 + $0x30] sm:$0xff] %vm5635_vm1, %v5456_v26 }
 0x6c0   :  { %5643 = vst.msk [vmem:[#allocation5 + $0x38] sm:$0xff] %vm5635_vm1, %v5458_v42  ;;  %5828 = vrot.lane.b32.xlu0 %v12899_v5, %s9811_s20 }
 0x6c1   :  { %5830 = vrot.lane.b32.xlu1 %v12976_v30, %s9811_s20 }
 0x6c2   :  { %v5460_v33 = vpop.permute.xlu0 %5459 }
 0x6c3   :  { %v5462_v8 = vpop.permute.xlu1 %5461  ;;  %5644 = vst.msk [vmem:[#allocation5 + $0x40] sm:$0xff] %vm5635_vm1, %v5460_v33 }
 0x6c4   :  { %5645 = vst.msk [vmem:[#allocation5 + $0x48] sm:$0xff] %vm5635_vm1, %v5462_v8  ;;  %5832 = vrot.lane.b32.xlu0 %v12983_v47, %s9811_s20 }
 0x6c5   :  { %5834 = vrot.lane.b32.xlu1 %v12981_v12, %s9811_s20 }
 0x6c6   :  { %v5464_v21 = vpop.permute.xlu0 %5463 }
 0x6c7   :  { %v5466_v14 = vpop.permute.xlu1 %5465  ;;  %5646 = vst.msk [vmem:[#allocation5 + $0x50] sm:$0xff] %vm5635_vm1, %v5464_v21  ;;  %v16016_v21 = vld [vmem:[#allocation28_spill] sm:$0xff] }
 0x6c8   :  { %5647 = vst.msk [vmem:[#allocation5 + $0x58] sm:$0xff] %vm5635_vm1, %v5466_v14  ;;  %5836 = vrot.lane.b32.xlu0 %v12993_v58, %s9811_s20  ;;  %v16017_v14 = vld [vmem:[#allocation25_spill] sm:$0xff] }
 0x6c9   :  { %5838 = vrot.lane.b32.xlu1 %v12989_v3, %s9811_s20 }
 0x6ca   :  { %v5468_v5 = vpop.permute.xlu0 %5467 }
 0x6cb   :  { %v5470_v30 = vpop.permute.xlu1 %5469  ;;  %5648 = vst.msk [vmem:[#allocation5 + $0x60] sm:$0xff] %vm5635_vm1, %v5468_v5 }
 0x6cc   :  { %5649 = vst.msk [vmem:[#allocation5 + $0x68] sm:$0xff] %vm5635_vm1, %v5470_v30  ;;  %5840 = vrot.lane.b32.xlu0 %v12997_v37, %s9811_s20 }
 0x6cd   :  { %5842 = vrot.lane.b32.xlu1 %v12995_v28, %s9811_s20 }
 0x6ce   :  { %v5472_v12 = vpop.permute.xlu0 %5471 }
 0x6cf   :  { %v5474_v47 = vpop.permute.xlu1 %5473  ;;  %5650 = vst.msk [vmem:[#allocation5 + $0x70] sm:$0xff] %vm5635_vm1, %v5472_v12  ;;  %v5762_v12 = vld [vmem:[#allocation4 + $0x330] sm:$0xff] }
 0x6d0   :  { %5651 = vst.msk [vmem:[#allocation5 + $0x78] sm:$0xff] %vm5635_vm1, %v5474_v47  ;;  %5844 = vrot.lane.b32.xlu0 %v13011_v55, %s9811_s20  ;;  %v5763_v47 = vld [vmem:[#allocation4 + $0x338] sm:$0xff] }
 0x6d1   :  { %5846 = vrot.lane.b32.xlu1 %v13006_v27, %s9811_s20 }
 0x6d2   :  { %v5476_v3 = vpop.permute.xlu0 %5475 }
 0x6d3   :  { %v5478_v58 = vpop.permute.xlu1 %5477  ;;  %5652 = vst.msk [vmem:[#allocation5 + $0x80] sm:$0xff] %vm5635_vm1, %v5476_v3 }
 0x6d4   :  { %5653 = vst.msk [vmem:[#allocation5 + $0x88] sm:$0xff] %vm5635_vm1, %v5478_v58  ;;  %5848 = vrot.lane.b32.xlu0 %v13017_v16, %s9811_s20 }
 0x6d5   :  { %5850 = vrot.lane.b32.xlu1 %v13015_v49, %s9811_s20 }
 0x6d6   :  { %v5480_v28 = vpop.permute.xlu0 %5479 }
 0x6d7   :  { %v5482_v37 = vpop.permute.xlu1 %5481  ;;  %5654 = vst.msk [vmem:[#allocation5 + $0x90] sm:$0xff] %vm5635_vm1, %v5480_v28  ;;  %v6085_v28 = vld [vmem:[#allocation4 + $0x19] sm:$0xff] }
 0x6d8   :  { %5655 = vst.msk [vmem:[#allocation5 + $0x98] sm:$0xff] %vm5635_vm1, %v5482_v37  ;;  %5852 = vrot.lane.b32.xlu0 %v13025_v32, %s9811_s20  ;;  %v6086_v37 = vld [vmem:[#allocation4 + $0x21] sm:$0xff] }
 0x6d9   :  { %5854 = vrot.lane.b32.xlu1 %v13023_v53, %s9811_s20 }
 0x6da   :  { %v5484_v27 = vpop.permute.xlu0 %5483 }
 0x6db   :  { %v5486_v55 = vpop.permute.xlu1 %5485  ;;  %5656 = vst.msk [vmem:[#allocation5 + $0xa0] sm:$0xff] %vm5635_vm1, %v5484_v27 }
 0x6dc   :  { %5657 = vst.msk [vmem:[#allocation5 + $0xa8] sm:$0xff] %vm5635_vm1, %v5486_v55  ;;  %5856 = vrot.lane.b32.xlu0 %v13037_v48, %s9811_s20 }
 0x6dd   :  { %5858 = vrot.lane.b32.xlu1 %v13032_v59, %s9811_s20 }
 0x6de   :  { %v5488_v49 = vpop.permute.xlu0 %5487 }
 0x6df   :  { %v5490_v16 = vpop.permute.xlu1 %5489  ;;  %5658 = vst.msk [vmem:[#allocation5 + $0xb0] sm:$0xff] %vm5635_vm1, %v5488_v49  ;;  %v13590_v49 = vld [vmem:[#allocation4 + $0x31] sm:$0xff] }
 0x6e0   :  { %5659 = vst.msk [vmem:[#allocation5 + $0xb8] sm:$0xff] %vm5635_vm1, %v5490_v16  ;;  %5860 = vrot.lane.b32.xlu0 %v13043_v11, %s9811_s20  ;;  %v13593_v16 = vld [vmem:[#allocation4 + $0x39] sm:$0xff] }
 0x6e1   :  { %5862 = vrot.lane.b32.xlu1 %v13041_v35, %s9811_s20 }
 0x6e2   :  { %v5492_v53 = vpop.permute.xlu0 %5491 }
 0x6e3   :  { %v5494_v32 = vpop.permute.xlu1 %5493  ;;  %5660 = vst.msk [vmem:[#allocation5 + $0xc0] sm:$0xff] %vm5635_vm1, %v5492_v53 }
 0x6e4   :  { %5661 = vst.msk [vmem:[#allocation5 + $0xc8] sm:$0xff] %vm5635_vm1, %v5494_v32  ;;  %5864 = vrot.lane.b32.xlu0 %v13051_v46, %s9811_s20 }
 0x6e5   :  { %5866 = vrot.lane.b32.xlu1 %v13049_v45, %s9811_s20 }
 0x6e6   :  { %v5496_v59 = vpop.permute.xlu0 %5495 }
 0x6e7   :  { %v5498_v48 = vpop.permute.xlu1 %5497  ;;  %5662 = vst.msk [vmem:[#allocation5 + $0xd0] sm:$0xff] %vm5635_vm1, %v5496_v59  ;;  %v13600_v59 = vld [vmem:[#allocation4 + $0x49] sm:$0xff] }
 0x6e8   :  { %5663 = vst.msk [vmem:[#allocation5 + $0xd8] sm:$0xff] %vm5635_vm1, %v5498_v48  ;;  %5868 = vrot.lane.b32.xlu0 %v13063_v2, %s9811_s20  ;;  %v13603_v48 = vld [vmem:[#allocation4 + $0x51] sm:$0xff] }
 0x6e9   :  { %5870 = vrot.lane.b32.xlu1 %v13058_v24, %s9811_s20 }
 0x6ea   :  { %v5500_v35 = vpop.permute.xlu0 %5499 }
 0x6eb   :  { %v5502_v11 = vpop.permute.xlu1 %5501  ;;  %5664 = vst.msk [vmem:[#allocation5 + $0xe0] sm:$0xff] %vm5635_vm1, %v5500_v35 }
 0x6ec   :  { %5665 = vst.msk [vmem:[#allocation5 + $0xe8] sm:$0xff] %vm5635_vm1, %v5502_v11  ;;  %5872 = vrot.lane.b32.xlu0 %v13069_v7, %s9811_s20 }
 0x6ed   :  { %5874 = vrot.lane.b32.xlu1 %v13067_v15, %s9811_s20 }
 0x6ee   :  { %v5504_v45 = vpop.permute.xlu0 %5503 }
 0x6ef   :  { %v5506_v46 = vpop.permute.xlu1 %5505  ;;  %5666 = vst.msk [vmem:[#allocation5 + $0xf0] sm:$0xff] %vm5635_vm1, %v5504_v45  ;;  %v13610_v45 = vld [vmem:[#allocation4 + $0x61] sm:$0xff] }
 0x6f0   :  { %5667 = vst.msk [vmem:[#allocation5 + $0xf8] sm:$0xff] %vm5635_vm1, %v5506_v46  ;;  %5876 = vrot.lane.b32.xlu0 %v13077_v43, %s9811_s20  ;;  %v13613_v46 = vld [vmem:[#allocation4 + $0x69] sm:$0xff] }
 0x6f1   :  { %5878 = vrot.lane.b32.xlu1 %v13075_v56, %s9811_s20 }
 0x6f2   :  { %v5508_v24 = vpop.permute.xlu0 %5507 }
 0x6f3   :  { %v5510_v2 = vpop.permute.xlu1 %5509  ;;  %5668 = vst.msk [vmem:[#allocation5 + $0x100] sm:$0xff] %vm5635_vm1, %v5508_v24 }
 0x6f4   :  { %5669 = vst.msk [vmem:[#allocation5 + $0x108] sm:$0xff] %vm5635_vm1, %v5510_v2  ;;  %5880 = vrot.lane.b32.xlu0 %v13089_v44, %s9811_s20  ;;  %v5730_v44 = vld [vmem:[#allocation4 + $0x180] sm:$0xff] }
 0x6f5   :  { %5882 = vrot.lane.b32.xlu1 %v13084_v60, %s9811_s20  ;;  %v5731_v60 = vld [vmem:[#allocation4 + $0x188] sm:$0xff] }
 0x6f6   :  { %v5512_v15 = vpop.permute.xlu0 %5511 }
 0x6f7   :  { %v5514_v7 = vpop.permute.xlu1 %5513  ;;  %5670 = vst.msk [vmem:[#allocation5 + $0x110] sm:$0xff] %vm5635_vm1, %v5512_v15  ;;  %v13620_v15 = vld [vmem:[#allocation4 + $0x79] sm:$0xff] }
 0x6f8   :  { %5671 = vst.msk [vmem:[#allocation5 + $0x118] sm:$0xff] %vm5635_vm1, %v5514_v7  ;;  %5884 = vrot.lane.b32.xlu0 %v13095_v0, %s9811_s20  ;;  %v13623_v7 = vld [vmem:[#allocation4 + $0x81] sm:$0xff] }
 0x6f9   :  { %5886 = vrot.lane.b32.xlu1 %v13093_v9, %s9811_s20 }
 0x6fa   :  { %v5516_v56 = vpop.permute.xlu0 %5515 }
 0x6fb   :  { %v5518_v43 = vpop.permute.xlu1 %5517  ;;  %5672 = vst.msk [vmem:[#allocation5 + $0x120] sm:$0xff] %vm5635_vm1, %v5516_v56 }
 0x6fc   :  { %5673 = vst.msk [vmem:[#allocation5 + $0x128] sm:$0xff] %vm5635_vm1, %v5518_v43  ;;  %5888 = vrot.lane.b32.xlu0 %v5730_v44, %s9811_s20  ;;  %v13630_v44 = vld [vmem:[#allocation4 + $0x91] sm:$0xff] }
 0x6fd   :  { %5890 = vrot.lane.b32.xlu1 %v5731_v60, %s9811_s20  ;;  %v13633_v60 = vld [vmem:[#allocation4 + $0x99] sm:$0xff] }
 0x6fe   :  { %v5520_v38 = vpop.permute.xlu0 %5519 }
 0x6ff   :  { %v5522_v31 = vpop.permute.xlu1 %5521  ;;  %5674 = vst.msk [vmem:[#allocation5 + $0x130] sm:$0xff] %vm5635_vm1, %v5520_v38 }
 0x700   :  { %5675 = vst.msk [vmem:[#allocation5 + $0x138] sm:$0xff] %vm5635_vm1, %v5522_v31  ;;  %5892 = vrot.lane.b32.xlu0 %v13104_v54, %s9811_s20 }
 0x701   :  { %5894 = vrot.lane.b32.xlu1 %v13102_v62, %s9811_s20 }
 0x702   :  { %v5524_v9 = vpop.permute.xlu0 %5523 }
 0x703   :  { %v5526_v0 = vpop.permute.xlu1 %5525  ;;  %5676 = vst.msk [vmem:[#allocation5 + $0x140] sm:$0xff] %vm5635_vm1, %v5524_v9  ;;  %v6097_v9 = vld [vmem:[#allocation4 + $0xa9] sm:$0xff] }
 0x704   :  { %5677 = vst.msk [vmem:[#allocation5 + $0x148] sm:$0xff] %vm5635_vm1, %v5526_v0  ;;  %5896 = vrot.lane.b32.xlu0 %v13113_v1, %s9811_s20  ;;  %v6098_v0 = vld [vmem:[#allocation4 + $0xb1] sm:$0xff] }
 0x705   :  { %5898 = vrot.lane.b32.xlu1 %v13111_v39, %s9811_s20 }
 0x706   :  { %v5528_v20 = vpop.permute.xlu0 %5527 }
 0x707   :  { %v5530_v36 = vpop.permute.xlu1 %5529  ;;  %5678 = vst.msk [vmem:[#allocation5 + $0x150] sm:$0xff] %vm5635_vm1, %v5528_v20 }
 0x708   :  { %5679 = vst.msk [vmem:[#allocation5 + $0x158] sm:$0xff] %vm5635_vm1, %v5530_v36  ;;  %5900 = vrot.lane.b32.xlu0 %v13123_v63, %s9811_s20 }
 0x709   :  { %5902 = vrot.lane.b32.xlu1 %v13119_v52, %s9811_s20 }
 0x70a   :  { %v5532_v62 = vpop.permute.xlu0 %5531 }
 0x70b   :  { %v5534_v54 = vpop.permute.xlu1 %5533  ;;  %5680 = vst.msk [vmem:[#allocation5 + $0x160] sm:$0xff] %vm5635_vm1, %v5532_v62  ;;  %v6099_v62 = vld [vmem:[#allocation4 + $0xc1] sm:$0xff] }
 0x70c   :  { %5681 = vst.msk [vmem:[#allocation5 + $0x168] sm:$0xff] %vm5635_vm1, %v5534_v54  ;;  %5904 = vrot.lane.b32.xlu0 %v13127_v19, %s9811_s20  ;;  %v6100_v54 = vld [vmem:[#allocation4 + $0xc9] sm:$0xff] }
 0x70d   :  { %5906 = vrot.lane.b32.xlu1 %v13125_v51, %s9811_s20 }
 0x70e   :  { %v5536_v39 = vpop.permute.xlu0 %5535 }
 0x70f   :  { %v5538_v1 = vpop.permute.xlu1 %5537  ;;  %5682 = vst.msk [vmem:[#allocation5 + $0x170] sm:$0xff] %vm5635_vm1, %v5536_v39 }
 0x710   :  { %5683 = vst.msk [vmem:[#allocation5 + $0x178] sm:$0xff] %vm5635_vm1, %v5538_v1  ;;  %5908 = vrot.lane.b32.xlu0 %v13141_v29, %s9811_s20 }
 0x711   :  { %5910 = vrot.lane.b32.xlu1 %v13136_v25, %s9811_s20 }
 0x712   :  { %v5540_v52 = vpop.permute.xlu0 %5539 }
 0x713   :  { %v5542_v63 = vpop.permute.xlu1 %5541  ;;  %5684 = vst.msk [vmem:[#allocation5 + $0x180] sm:$0xff] %vm5635_vm1, %v5540_v52  ;;  %v6101_v52 = vld [vmem:[#allocation4 + $0xd9] sm:$0xff] }
 0x714   :  { %5685 = vst.msk [vmem:[#allocation5 + $0x188] sm:$0xff] %vm5635_vm1, %v5542_v63  ;;  %5912 = vrot.lane.b32.xlu0 %v13148_v34, %s9811_s20  ;;  %v6102_v63 = vld [vmem:[#allocation4 + $0xe1] sm:$0xff] }
 0x715   :  { %5914 = vrot.lane.b32.xlu1 %v13146_v13, %s9811_s20 }
 0x716   :  { %v5544_v51 = vpop.permute.xlu0 %5543 }
 0x717   :  { %v5546_v19 = vpop.permute.xlu1 %5545  ;;  %5686 = vst.msk [vmem:[#allocation5 + $0x190] sm:$0xff] %vm5635_vm1, %v5544_v51 }
 0x718   :  { %5687 = vst.msk [vmem:[#allocation5 + $0x198] sm:$0xff] %vm5635_vm1, %v5546_v19  ;;  %5916 = vrot.lane.b32.xlu0 %v13159_v57, %s9811_s20 }
 0x719   :  { %5918 = vrot.lane.b32.xlu1 %v13154_v41, %s9811_s20 }
 0x71a   :  { %v5548_v25 = vpop.permute.xlu0 %5547 }
 0x71b   :  { %v5550_v29 = vpop.permute.xlu1 %5549  ;;  %5688 = vst.msk [vmem:[#allocation5 + $0x1a0] sm:$0xff] %vm5635_vm1, %v5548_v25  ;;  %v6103_v25 = vld [vmem:[#allocation4 + $0xf1] sm:$0xff] }
 0x71c   :  { %5689 = vst.msk [vmem:[#allocation5 + $0x1a8] sm:$0xff] %vm5635_vm1, %v5550_v29  ;;  %5920 = vrot.lane.b32.xlu0 %v13167_v23, %s9811_s20  ;;  %v6104_v29 = vld [vmem:[#allocation4 + $0xf9] sm:$0xff] }
 0x71d   :  { %5922 = vrot.lane.b32.xlu1 %v13165_v50, %s9811_s20 }
 0x71e   :  { %v5552_v13 = vpop.permute.xlu0 %5551 }
 0x71f   :  { %v5554_v34 = vpop.permute.xlu1 %5553  ;;  %5690 = vst.msk [vmem:[#allocation5 + $0x1b0] sm:$0xff] %vm5635_vm1, %v5552_v13 }
 0x720   :  { %5691 = vst.msk [vmem:[#allocation5 + $0x1b8] sm:$0xff] %vm5635_vm1, %v5554_v34  ;;  %5924 = vrot.lane.b32.xlu0 %v13177_v4, %s9811_s20 }
 0x721   :  { %5926 = vrot.lane.b32.xlu1 %v13173_v22, %s9811_s20 }
 0x722   :  { %v5556_v41 = vpop.permute.xlu0 %5555 }
 0x723   :  { %v5558_v57 = vpop.permute.xlu1 %5557  ;;  %5692 = vst.msk [vmem:[#allocation5 + $0x1c0] sm:$0xff] %vm5635_vm1, %v5556_v41  ;;  %v6105_v41 = vld [vmem:[#allocation4 + $0x109] sm:$0xff] }
 0x724   :  { %5693 = vst.msk [vmem:[#allocation5 + $0x1c8] sm:$0xff] %vm5635_vm1, %v5558_v57  ;;  %5928 = vrot.lane.b32.xlu0 %v13184_v18, %s9811_s20  ;;  %v6106_v57 = vld [vmem:[#allocation4 + $0x111] sm:$0xff] }
 0x725   :  { %5930 = vrot.lane.b32.xlu1 %v13182_v6, %s9811_s20 }
 0x726   :  { %v5560_v50 = vpop.permute.xlu0 %5559 }
 0x727   :  { %v5562_v23 = vpop.permute.xlu1 %5561  ;;  %5694 = vst.msk [vmem:[#allocation5 + $0x1d0] sm:$0xff] %vm5635_vm1, %v5560_v50 }
 0x728   :  { %5695 = vst.msk [vmem:[#allocation5 + $0x1d8] sm:$0xff] %vm5635_vm1, %v5562_v23  ;;  %5932 = vrot.lane.b32.xlu0 %v13193_v40, %s9811_s20  ;;  %v16013_v40 = vld [vmem:[#allocation21_spill] sm:$0xff] }
 0x729   :  { %5934 = vrot.lane.b32.xlu1 %v13191_v61, %s9811_s20  ;;  %v16012_v61 = vld [vmem:[#allocation24_spill] sm:$0xff] }
 0x72a   :  { %v5564_v22 = vpop.permute.xlu0 %5563 }
 0x72b   :  { %v5566_v4 = vpop.permute.xlu1 %5565  ;;  %5696 = vst.msk [vmem:[#allocation5 + $0x1e0] sm:$0xff] %vm5635_vm1, %v5564_v22  ;;  %v6107_v22 = vld [vmem:[#allocation4 + $0x121] sm:$0xff] }
 0x72c   :  { %5697 = vst.msk [vmem:[#allocation5 + $0x1e8] sm:$0xff] %vm5635_vm1, %v5566_v4  ;;  %5936 = vrot.lane.b32.xlu0 %v13203_v10, %s9811_s20  ;;  %v16015_v10 = vld [vmem:[#allocation23_spill] sm:$0xff] }
 0x72d   :  { %5938 = vrot.lane.b32.xlu1 %v13199_v17, %s9811_s20  ;;  %v16014_v17 = vld [vmem:[#allocation26_spill] sm:$0xff]  ;;  %v6108_v4 = vld [vmem:[#allocation4 + $0x129] sm:$0xff] }
 0x72e   :  { %v5568_v6 = vpop.permute.xlu0 %5567 }
 0x72f   :  { %v5570_v18 = vpop.permute.xlu1 %5569  ;;  %5698 = vst.msk [vmem:[#allocation5 + $0x1f0] sm:$0xff] %vm5635_vm1, %v5568_v6 }
 0x730   :  { %5699 = vst.msk [vmem:[#allocation5 + $0x1f8] sm:$0xff] %vm5635_vm1, %v5570_v18  ;;  %5940 = vrot.lane.b32.xlu0 %v16012_v61, %s9811_s20  ;;  %v6109_v61 = vld [vmem:[#allocation4 + $0x139] sm:$0xff] }
 0x731   :  { %5942 = vrot.lane.b32.xlu1 %v16013_v40, %s9811_s20  ;;  %v6110_v40 = vld [vmem:[#allocation4 + $0x141] sm:$0xff] }
 0x732   :  { %v5829_v26 = vpop.permute.xlu0 %5828 }
 0x733   :  { %v5831_v42 = vpop.permute.xlu1 %5830  ;;  %6021 = vst.msk [vmem:[#allocation5] sm:$0xff] %vm6020_vm2, %v5829_v26 }
 0x734   :  { %6022 = vst.msk [vmem:[#allocation5 + $0x8] sm:$0xff] %vm6020_vm2, %v5831_v42  ;;  %5944 = vrot.lane.b32.xlu0 %v16014_v17, %s9811_s20  ;;  %v6111_v17 = vld [vmem:[#allocation4 + $0x151] sm:$0xff] }
 0x735   :  { %5946 = vrot.lane.b32.xlu1 %v16015_v10, %s9811_s20  ;;  %v6112_v10 = vld [vmem:[#allocation4 + $0x159] sm:$0xff] }
 0x736   :  { %v5833_v33 = vpop.permute.xlu0 %5832 }
 0x737   :  { %v5835_v8 = vpop.permute.xlu1 %5834  ;;  %6023 = vst.msk [vmem:[#allocation5 + $0x10] sm:$0xff] %vm6020_vm2, %v5833_v33 }
 0x738   :  { %6024 = vst.msk [vmem:[#allocation5 + $0x18] sm:$0xff] %vm6020_vm2, %v5835_v8  ;;  %5948 = vrot.lane.b32.xlu0 %v16016_v21, %s9811_s20  ;;  %v6113_v21 = vld [vmem:[#allocation4 + $0x169] sm:$0xff] }
 0x739   :  { %5950 = vrot.lane.b32.xlu1 %v16017_v14, %s9811_s20  ;;  %v6114_v14 = vld [vmem:[#allocation4 + $0x171] sm:$0xff] }
 0x73a   :  { %v5837_v5 = vpop.permute.xlu0 %5836 }
 0x73b   :  { %v5839_v30 = vpop.permute.xlu1 %5838  ;;  %6025 = vst.msk [vmem:[#allocation5 + $0x20] sm:$0xff] %vm6020_vm2, %v5837_v5 }
 0x73c   :  { %6026 = vst.msk [vmem:[#allocation5 + $0x28] sm:$0xff] %vm6020_vm2, %v5839_v30  ;;  %5952 = vrot.lane.b32.xlu0 %v5762_v12, %s9811_s20  ;;  %v6115_v12 = vld [vmem:[#allocation4 + $0x181] sm:$0xff] }
 0x73d   :  { %5954 = vrot.lane.b32.xlu1 %v5763_v47, %s9811_s20  ;;  %v6116_v47 = vld [vmem:[#allocation4 + $0x189] sm:$0xff] }
 0x73e   :  { %v5841_v3 = vpop.permute.xlu0 %5840 }
 0x73f   :  { %v5843_v58 = vpop.permute.xlu1 %5842  ;;  %6027 = vst.msk [vmem:[#allocation5 + $0x30] sm:$0xff] %vm6020_vm2, %v5841_v3 }
 0x740   :  { %6028 = vst.msk [vmem:[#allocation5 + $0x38] sm:$0xff] %vm6020_vm2, %v5843_v58  ;;  %6213 = vrot.lane.b32.xlu0 %v6085_v28, %s9813_s1  ;;  %v6117_v28 = vld [vmem:[#allocation4 + $0x1c9] sm:$0xff] }
 0x741   :  { %6215 = vrot.lane.b32.xlu1 %v6086_v37, %s9813_s1  ;;  %v6118_v37 = vld [vmem:[#allocation4 + $0x1d1] sm:$0xff] }
 0x742   :  { %v5845_v27 = vpop.permute.xlu0 %5844 }
 0x743   :  { %v5847_v55 = vpop.permute.xlu1 %5846  ;;  %6029 = vst.msk [vmem:[#allocation5 + $0x40] sm:$0xff] %vm6020_vm2, %v5845_v27 }
 0x744   :  { %6030 = vst.msk [vmem:[#allocation5 + $0x48] sm:$0xff] %vm6020_vm2, %v5847_v55  ;;  %6217 = vrot.lane.b32.xlu0 %v13590_v49, %s9813_s1 }
 0x745   :  { %6219 = vrot.lane.b32.xlu1 %v13593_v16, %s9813_s1 }
 0x746   :  { %v5849_v53 = vpop.permute.xlu0 %5848 }
 0x747   :  { %v5851_v32 = vpop.permute.xlu1 %5850  ;;  %6031 = vst.msk [vmem:[#allocation5 + $0x50] sm:$0xff] %vm6020_vm2, %v5849_v53  ;;  %v6119_v53 = vld [vmem:[#allocation4 + $0x1e1] sm:$0xff] }
 0x748   :  { %6032 = vst.msk [vmem:[#allocation5 + $0x58] sm:$0xff] %vm6020_vm2, %v5851_v32  ;;  %6221 = vrot.lane.b32.xlu0 %v13600_v59, %s9813_s1  ;;  %v6120_v32 = vld [vmem:[#allocation4 + $0x1e9] sm:$0xff] }
 0x749   :  { %6223 = vrot.lane.b32.xlu1 %v13603_v48, %s9813_s1 }
 0x74a   :  { %v5853_v35 = vpop.permute.xlu0 %5852 }
 0x74b   :  { %v5855_v11 = vpop.permute.xlu1 %5854  ;;  %6033 = vst.msk [vmem:[#allocation5 + $0x60] sm:$0xff] %vm6020_vm2, %v5853_v35 }
 0x74c   :  { %6034 = vst.msk [vmem:[#allocation5 + $0x68] sm:$0xff] %vm6020_vm2, %v5855_v11  ;;  %6225 = vrot.lane.b32.xlu0 %v13610_v45, %s9813_s1 }
 0x74d   :  { %6227 = vrot.lane.b32.xlu1 %v13613_v46, %s9813_s1 }
 0x74e   :  { %v5857_v24 = vpop.permute.xlu0 %5856 }
 0x74f   :  { %v5859_v2 = vpop.permute.xlu1 %5858  ;;  %6035 = vst.msk [vmem:[#allocation5 + $0x70] sm:$0xff] %vm6020_vm2, %v5857_v24  ;;  %v6121_v24 = vld [vmem:[#allocation4 + $0x1f9] sm:$0xff] }
 0x750   :  { %6036 = vst.msk [vmem:[#allocation5 + $0x78] sm:$0xff] %vm6020_vm2, %v5859_v2  ;;  %6229 = vrot.lane.b32.xlu0 %v13620_v15, %s9813_s1  ;;  %v6122_v2 = vld [vmem:[#allocation4 + $0x201] sm:$0xff] }
 0x751   :  { %6231 = vrot.lane.b32.xlu1 %v13623_v7, %s9813_s1 }
 0x752   :  { %v5861_v56 = vpop.permute.xlu0 %5860 }
 0x753   :  { %v5863_v43 = vpop.permute.xlu1 %5862  ;;  %6037 = vst.msk [vmem:[#allocation5 + $0x80] sm:$0xff] %vm6020_vm2, %v5861_v56 }
 0x754   :  { %6038 = vst.msk [vmem:[#allocation5 + $0x88] sm:$0xff] %vm6020_vm2, %v5863_v43  ;;  %6233 = vrot.lane.b32.xlu0 %v13630_v44, %s9813_s1 }
 0x755   :  { %6235 = vrot.lane.b32.xlu1 %v13633_v60, %s9813_s1 }
 0x756   :  { %v5865_v38 = vpop.permute.xlu0 %5864 }
 0x757   :  { %v5867_v31 = vpop.permute.xlu1 %5866  ;;  %6039 = vst.msk [vmem:[#allocation5 + $0x90] sm:$0xff] %vm6020_vm2, %v5865_v38  ;;  %v6123_v38 = vld [vmem:[#allocation4 + $0x211] sm:$0xff] }
 0x758   :  { %6040 = vst.msk [vmem:[#allocation5 + $0x98] sm:$0xff] %vm6020_vm2, %v5867_v31  ;;  %6237 = vrot.lane.b32.xlu0 %v6097_v9, %s9813_s1  ;;  %v6124_v31 = vld [vmem:[#allocation4 + $0x219] sm:$0xff] }
 0x759   :  { %6239 = vrot.lane.b32.xlu1 %v6098_v0, %s9813_s1 }
 0x75a   :  { %v5869_v20 = vpop.permute.xlu0 %5868 }
 0x75b   :  { %v5871_v36 = vpop.permute.xlu1 %5870  ;;  %6041 = vst.msk [vmem:[#allocation5 + $0xa0] sm:$0xff] %vm6020_vm2, %v5869_v20  ;;  %v6125_v20 = vld [vmem:[#allocation4 + $0x229] sm:$0xff] }
 0x75c   :  { %6042 = vst.msk [vmem:[#allocation5 + $0xa8] sm:$0xff] %vm6020_vm2, %v5871_v36  ;;  %6241 = vrot.lane.b32.xlu0 %v6099_v62, %s9813_s1  ;;  %v6126_v36 = vld [vmem:[#allocation4 + $0x231] sm:$0xff] }
 0x75d   :  { %6243 = vrot.lane.b32.xlu1 %v6100_v54, %s9813_s1 }
 0x75e   :  { %v5873_v39 = vpop.permute.xlu0 %5872 }
 0x75f   :  { %v5875_v1 = vpop.permute.xlu1 %5874  ;;  %6043 = vst.msk [vmem:[#allocation5 + $0xb0] sm:$0xff] %vm6020_vm2, %v5873_v39  ;;  %v6127_v39 = vld [vmem:[#allocation4 + $0x241] sm:$0xff] }
 0x760   :  { %6044 = vst.msk [vmem:[#allocation5 + $0xb8] sm:$0xff] %vm6020_vm2, %v5875_v1  ;;  %6245 = vrot.lane.b32.xlu0 %v6101_v52, %s9813_s1  ;;  %v6128_v1 = vld [vmem:[#allocation4 + $0x249] sm:$0xff] }
 0x761   :  { %6247 = vrot.lane.b32.xlu1 %v6102_v63, %s9813_s1 }
 0x762   :  { %v5877_v51 = vpop.permute.xlu0 %5876 }
 0x763   :  { %v5879_v19 = vpop.permute.xlu1 %5878  ;;  %6045 = vst.msk [vmem:[#allocation5 + $0xc0] sm:$0xff] %vm6020_vm2, %v5877_v51  ;;  %v6129_v51 = vld [vmem:[#allocation4 + $0x259] sm:$0xff] }
 0x764   :  { %6046 = vst.msk [vmem:[#allocation5 + $0xc8] sm:$0xff] %vm6020_vm2, %v5879_v19  ;;  %6249 = vrot.lane.b32.xlu0 %v6103_v25, %s9813_s1  ;;  %v6130_v19 = vld [vmem:[#allocation4 + $0x261] sm:$0xff] }
 0x765   :  { %6251 = vrot.lane.b32.xlu1 %v6104_v29, %s9813_s1 }
 0x766   :  { %v5881_v13 = vpop.permute.xlu0 %5880 }
 0x767   :  { %v5883_v34 = vpop.permute.xlu1 %5882  ;;  %6047 = vst.msk [vmem:[#allocation5 + $0xd0] sm:$0xff] %vm6020_vm2, %v5881_v13  ;;  %v6131_v13 = vld [vmem:[#allocation4 + $0x271] sm:$0xff] }
 0x768   :  { %6048 = vst.msk [vmem:[#allocation5 + $0xd8] sm:$0xff] %vm6020_vm2, %v5883_v34  ;;  %6253 = vrot.lane.b32.xlu0 %v6105_v41, %s9813_s1  ;;  %v6132_v34 = vld [vmem:[#allocation4 + $0x279] sm:$0xff] }
 0x769   :  { %6255 = vrot.lane.b32.xlu1 %v6106_v57, %s9813_s1 }
 0x76a   :  { %v5885_v50 = vpop.permute.xlu0 %5884 }
 0x76b   :  { %v5887_v23 = vpop.permute.xlu1 %5886  ;;  %6049 = vst.msk [vmem:[#allocation5 + $0xe0] sm:$0xff] %vm6020_vm2, %v5885_v50  ;;  %v6133_v50 = vld [vmem:[#allocation4 + $0x289] sm:$0xff] }
 0x76c   :  { %6050 = vst.msk [vmem:[#allocation5 + $0xe8] sm:$0xff] %vm6020_vm2, %v5887_v23  ;;  %6257 = vrot.lane.b32.xlu0 %v6107_v22, %s9813_s1  ;;  %v6134_v23 = vld [vmem:[#allocation4 + $0x291] sm:$0xff] }
 0x76d   :  { %6259 = vrot.lane.b32.xlu1 %v6108_v4, %s9813_s1 }
 0x76e   :  { %v5889_v6 = vpop.permute.xlu0 %5888 }
 0x76f   :  { %v5891_v18 = vpop.permute.xlu1 %5890  ;;  %6051 = vst.msk [vmem:[#allocation5 + $0xf0] sm:$0xff] %vm6020_vm2, %v5889_v6  ;;  %v6135_v6 = vld [vmem:[#allocation4 + $0x2a1] sm:$0xff] }
 0x770   :  { %6052 = vst.msk [vmem:[#allocation5 + $0xf8] sm:$0xff] %vm6020_vm2, %v5891_v18  ;;  %6261 = vrot.lane.b32.xlu0 %v6109_v61, %s9813_s1  ;;  %v6136_v18 = vld [vmem:[#allocation4 + $0x2a9] sm:$0xff] }
 0x771   :  { %6263 = vrot.lane.b32.xlu1 %v6110_v40, %s9813_s1 }
 0x772   :  { %v5893_v26 = vpop.permute.xlu0 %5892 }
 0x773   :  { %v5895_v42 = vpop.permute.xlu1 %5894  ;;  %6053 = vst.msk [vmem:[#allocation5 + $0x100] sm:$0xff] %vm6020_vm2, %v5893_v26  ;;  %v6137_v26 = vld [vmem:[#allocation4 + $0x2b9] sm:$0xff] }
 0x774   :  { %6054 = vst.msk [vmem:[#allocation5 + $0x108] sm:$0xff] %vm6020_vm2, %v5895_v42  ;;  %6265 = vrot.lane.b32.xlu0 %v6111_v17, %s9813_s1  ;;  %v6138_v42 = vld [vmem:[#allocation4 + $0x2c1] sm:$0xff] }
 0x775   :  { %6267 = vrot.lane.b32.xlu1 %v6112_v10, %s9813_s1 }
 0x776   :  { %v5897_v33 = vpop.permute.xlu0 %5896 }
 0x777   :  { %v5899_v8 = vpop.permute.xlu1 %5898  ;;  %6055 = vst.msk [vmem:[#allocation5 + $0x110] sm:$0xff] %vm6020_vm2, %v5897_v33  ;;  %v6139_v33 = vld [vmem:[#allocation4 + $0x2d1] sm:$0xff] }
 0x778   :  { %6056 = vst.msk [vmem:[#allocation5 + $0x118] sm:$0xff] %vm6020_vm2, %v5899_v8  ;;  %6269 = vrot.lane.b32.xlu0 %v6113_v21, %s9813_s1  ;;  %v6140_v8 = vld [vmem:[#allocation4 + $0x2d9] sm:$0xff] }
 0x779   :  { %6271 = vrot.lane.b32.xlu1 %v6114_v14, %s9813_s1 }
 0x77a   :  { %v5901_v5 = vpop.permute.xlu0 %5900 }
 0x77b   :  { %v5903_v30 = vpop.permute.xlu1 %5902  ;;  %6057 = vst.msk [vmem:[#allocation5 + $0x120] sm:$0xff] %vm6020_vm2, %v5901_v5  ;;  %v6141_v5 = vld [vmem:[#allocation4 + $0x2e9] sm:$0xff] }
 0x77c   :  { %6058 = vst.msk [vmem:[#allocation5 + $0x128] sm:$0xff] %vm6020_vm2, %v5903_v30  ;;  %6273 = vrot.lane.b32.xlu0 %v6115_v12, %s9813_s1  ;;  %v6142_v30 = vld [vmem:[#allocation4 + $0x2f1] sm:$0xff] }
 0x77d   :  { %6275 = vrot.lane.b32.xlu1 %v6116_v47, %s9813_s1 }
 0x77e   :  { %v5905_v3 = vpop.permute.xlu0 %5904 }
 0x77f   :  { %v5907_v58 = vpop.permute.xlu1 %5906  ;;  %6059 = vst.msk [vmem:[#allocation5 + $0x130] sm:$0xff] %vm6020_vm2, %v5905_v3  ;;  %v6143_v3 = vld [vmem:[#allocation4 + $0x301] sm:$0xff] }
 0x780   :  { %6060 = vst.msk [vmem:[#allocation5 + $0x138] sm:$0xff] %vm6020_vm2, %v5907_v58  ;;  %6277 = vrot.lane.b32.xlu0 %v6117_v28, %s9813_s1  ;;  %v6144_v58 = vld [vmem:[#allocation4 + $0x309] sm:$0xff] }
 0x781   :  { %6279 = vrot.lane.b32.xlu1 %v6118_v37, %s9813_s1 }
 0x782   :  { %v5909_v27 = vpop.permute.xlu0 %5908 }
 0x783   :  { %v5911_v55 = vpop.permute.xlu1 %5910  ;;  %6061 = vst.msk [vmem:[#allocation5 + $0x140] sm:$0xff] %vm6020_vm2, %v5909_v27  ;;  %v6145_v27 = vld [vmem:[#allocation4 + $0x319] sm:$0xff] }
 0x784   :  { %6062 = vst.msk [vmem:[#allocation5 + $0x148] sm:$0xff] %vm6020_vm2, %v5911_v55  ;;  %6281 = vrot.lane.b32.xlu0 %v6119_v53, %s9813_s1  ;;  %v6146_v55 = vld [vmem:[#allocation4 + $0x321] sm:$0xff] }
 0x785   :  { %6283 = vrot.lane.b32.xlu1 %v6120_v32, %s9813_s1 }
 0x786   :  { %v5913_v35 = vpop.permute.xlu0 %5912 }
 0x787   :  { %v5915_v11 = vpop.permute.xlu1 %5914  ;;  %6063 = vst.msk [vmem:[#allocation5 + $0x150] sm:$0xff] %vm6020_vm2, %v5913_v35  ;;  %v6147_v35 = vld [vmem:[#allocation4 + $0x331] sm:$0xff] }
 0x788   :  { %6064 = vst.msk [vmem:[#allocation5 + $0x158] sm:$0xff] %vm6020_vm2, %v5915_v11  ;;  %6285 = vrot.lane.b32.xlu0 %v6121_v24, %s9813_s1  ;;  %v6148_v11 = vld [vmem:[#allocation4 + $0x339] sm:$0xff] }
 0x789   :  { %6287 = vrot.lane.b32.xlu1 %v6122_v2, %s9813_s1 }
 0x78a   :  { %v5917_v56 = vpop.permute.xlu0 %5916 }
 0x78b   :  { %v5919_v43 = vpop.permute.xlu1 %5918  ;;  %6065 = vst.msk [vmem:[#allocation5 + $0x160] sm:$0xff] %vm6020_vm2, %v5917_v56  ;;  %v6470_v56 = vld [vmem:[#allocation4 + $0x1a] sm:$0xff] }
 0x78c   :  { %6066 = vst.msk [vmem:[#allocation5 + $0x168] sm:$0xff] %vm6020_vm2, %v5919_v43  ;;  %6289 = vrot.lane.b32.xlu0 %v6123_v38, %s9813_s1  ;;  %v6471_v43 = vld [vmem:[#allocation4 + $0x22] sm:$0xff] }
 0x78d   :  { %6291 = vrot.lane.b32.xlu1 %v6124_v31, %s9813_s1 }
 0x78e   :  { %v5921_v9 = vpop.permute.xlu0 %5920 }
 0x78f   :  { %v5923_v0 = vpop.permute.xlu1 %5922  ;;  %6067 = vst.msk [vmem:[#allocation5 + $0x170] sm:$0xff] %vm6020_vm2, %v5921_v9  ;;  %v13748_v9 = vld [vmem:[#allocation4 + $0x32] sm:$0xff] }
 0x790   :  { %6068 = vst.msk [vmem:[#allocation5 + $0x178] sm:$0xff] %vm6020_vm2, %v5923_v0  ;;  %6293 = vrot.lane.b32.xlu0 %v6125_v20, %s9813_s1  ;;  %v13751_v0 = vld [vmem:[#allocation4 + $0x3a] sm:$0xff] }
 0x791   :  { %6295 = vrot.lane.b32.xlu1 %v6126_v36, %s9813_s1 }
 0x792   :  { %v5925_v62 = vpop.permute.xlu0 %5924 }
 0x793   :  { %v5927_v54 = vpop.permute.xlu1 %5926  ;;  %6069 = vst.msk [vmem:[#allocation5 + $0x180] sm:$0xff] %vm6020_vm2, %v5925_v62  ;;  %v13758_v62 = vld [vmem:[#allocation4 + $0x4a] sm:$0xff] }
 0x794   :  { %6070 = vst.msk [vmem:[#allocation5 + $0x188] sm:$0xff] %vm6020_vm2, %v5927_v54  ;;  %6297 = vrot.lane.b32.xlu0 %v6127_v39, %s9813_s1  ;;  %v13761_v54 = vld [vmem:[#allocation4 + $0x52] sm:$0xff] }
 0x795   :  { %6299 = vrot.lane.b32.xlu1 %v6128_v1, %s9813_s1 }
 0x796   :  { %v5929_v52 = vpop.permute.xlu0 %5928 }
 0x797   :  { %v5931_v63 = vpop.permute.xlu1 %5930  ;;  %6071 = vst.msk [vmem:[#allocation5 + $0x190] sm:$0xff] %vm6020_vm2, %v5929_v52  ;;  %v13768_v52 = vld [vmem:[#allocation4 + $0x62] sm:$0xff] }
 0x798   :  { %6072 = vst.msk [vmem:[#allocation5 + $0x198] sm:$0xff] %vm6020_vm2, %v5931_v63  ;;  %6301 = vrot.lane.b32.xlu0 %v6129_v51, %s9813_s1  ;;  %v13771_v63 = vld [vmem:[#allocation4 + $0x6a] sm:$0xff] }
 0x799   :  { %6303 = vrot.lane.b32.xlu1 %v6130_v19, %s9813_s1 }
 0x79a   :  { %v5933_v25 = vpop.permute.xlu0 %5932 }
 0x79b   :  { %v5935_v29 = vpop.permute.xlu1 %5934  ;;  %6073 = vst.msk [vmem:[#allocation5 + $0x1a0] sm:$0xff] %vm6020_vm2, %v5933_v25  ;;  %v13778_v25 = vld [vmem:[#allocation4 + $0x7a] sm:$0xff] }
 0x79c   :  { %6074 = vst.msk [vmem:[#allocation5 + $0x1a8] sm:$0xff] %vm6020_vm2, %v5935_v29  ;;  %6305 = vrot.lane.b32.xlu0 %v6131_v13, %s9813_s1  ;;  %v13781_v29 = vld [vmem:[#allocation4 + $0x82] sm:$0xff] }
 0x79d   :  { %6307 = vrot.lane.b32.xlu1 %v6132_v34, %s9813_s1 }
 0x79e   :  { %v5937_v41 = vpop.permute.xlu0 %5936 }
 0x79f   :  { %v5939_v57 = vpop.permute.xlu1 %5938  ;;  %6075 = vst.msk [vmem:[#allocation5 + $0x1b0] sm:$0xff] %vm6020_vm2, %v5937_v41  ;;  %v13788_v41 = vld [vmem:[#allocation4 + $0x92] sm:$0xff] }
 0x7a0   :  { %6076 = vst.msk [vmem:[#allocation5 + $0x1b8] sm:$0xff] %vm6020_vm2, %v5939_v57  ;;  %6309 = vrot.lane.b32.xlu0 %v6133_v50, %s9813_s1  ;;  %v13791_v57 = vld [vmem:[#allocation4 + $0x9a] sm:$0xff] }
 0x7a1   :  { %6311 = vrot.lane.b32.xlu1 %v6134_v23, %s9813_s1 }
 0x7a2   :  { %v5941_v22 = vpop.permute.xlu0 %5940 }
 0x7a3   :  { %v5943_v4 = vpop.permute.xlu1 %5942  ;;  %6077 = vst.msk [vmem:[#allocation5 + $0x1c0] sm:$0xff] %vm6020_vm2, %v5941_v22  ;;  %v13798_v22 = vld [vmem:[#allocation4 + $0xaa] sm:$0xff] }
 0x7a4   :  { %6078 = vst.msk [vmem:[#allocation5 + $0x1c8] sm:$0xff] %vm6020_vm2, %v5943_v4  ;;  %6313 = vrot.lane.b32.xlu0 %v6135_v6, %s9813_s1  ;;  %v13801_v4 = vld [vmem:[#allocation4 + $0xb2] sm:$0xff] }
 0x7a5   :  { %6315 = vrot.lane.b32.xlu1 %v6136_v18, %s9813_s1 }
 0x7a6   :  { %v5945_v61 = vpop.permute.xlu0 %5944 }
 0x7a7   :  { %v5947_v40 = vpop.permute.xlu1 %5946  ;;  %6079 = vst.msk [vmem:[#allocation5 + $0x1d0] sm:$0xff] %vm6020_vm2, %v5945_v61  ;;  %v13808_v61 = vld [vmem:[#allocation4 + $0xc2] sm:$0xff] }
 0x7a8   :  { %6080 = vst.msk [vmem:[#allocation5 + $0x1d8] sm:$0xff] %vm6020_vm2, %v5947_v40  ;;  %6317 = vrot.lane.b32.xlu0 %v6137_v26, %s9813_s1  ;;  %v13811_v40 = vld [vmem:[#allocation4 + $0xca] sm:$0xff] }
 0x7a9   :  { %6319 = vrot.lane.b32.xlu1 %v6138_v42, %s9813_s1 }
 0x7aa   :  { %v5949_v17 = vpop.permute.xlu0 %5948 }
 0x7ab   :  { %v5951_v10 = vpop.permute.xlu1 %5950  ;;  %6081 = vst.msk [vmem:[#allocation5 + $0x1e0] sm:$0xff] %vm6020_vm2, %v5949_v17  ;;  %v13818_v17 = vld [vmem:[#allocation4 + $0xda] sm:$0xff] }
 0x7ac   :  { %6082 = vst.msk [vmem:[#allocation5 + $0x1e8] sm:$0xff] %vm6020_vm2, %v5951_v10  ;;  %6321 = vrot.lane.b32.xlu0 %v6139_v33, %s9813_s1  ;;  %v13821_v10 = vld [vmem:[#allocation4 + $0xe2] sm:$0xff] }
 0x7ad   :  { %6323 = vrot.lane.b32.xlu1 %v6140_v8, %s9813_s1 }
 0x7ae   :  { %v5953_v21 = vpop.permute.xlu0 %5952 }
 0x7af   :  { %v5955_v14 = vpop.permute.xlu1 %5954  ;;  %6083 = vst.msk [vmem:[#allocation5 + $0x1f0] sm:$0xff] %vm6020_vm2, %v5953_v21  ;;  %v13828_v21 = vld [vmem:[#allocation4 + $0xf2] sm:$0xff] }
 0x7b0   :  { %6084 = vst.msk [vmem:[#allocation5 + $0x1f8] sm:$0xff] %vm6020_vm2, %v5955_v14  ;;  %6325 = vrot.lane.b32.xlu0 %v6141_v5, %s9813_s1  ;;  %v13831_v14 = vld [vmem:[#allocation4 + $0xfa] sm:$0xff] }
 0x7b1   :  { %6327 = vrot.lane.b32.xlu1 %v6142_v30, %s9813_s1 }
 0x7b2   :  { %v6214_v12 = vpop.permute.xlu0 %6213 }
 0x7b3   :  { %v6216_v47 = vpop.permute.xlu1 %6215  ;;  %6406 = vst.msk [vmem:[#allocation5] sm:$0xff] %vm6405_vm3, %v6214_v12  ;;  %v13838_v12 = vld [vmem:[#allocation4 + $0x10a] sm:$0xff] }
 0x7b4   :  { %6407 = vst.msk [vmem:[#allocation5 + $0x8] sm:$0xff] %vm6405_vm3, %v6216_v47  ;;  %6329 = vrot.lane.b32.xlu0 %v6143_v3, %s9813_s1  ;;  %v13841_v47 = vld [vmem:[#allocation4 + $0x112] sm:$0xff] }
 0x7b5   :  { %6331 = vrot.lane.b32.xlu1 %v6144_v58, %s9813_s1 }
 0x7b6   :  { %v6218_v28 = vpop.permute.xlu0 %6217 }
 0x7b7   :  { %v6220_v37 = vpop.permute.xlu1 %6219  ;;  %6408 = vst.msk [vmem:[#allocation5 + $0x10] sm:$0xff] %vm6405_vm3, %v6218_v28  ;;  %v13848_v28 = vld [vmem:[#allocation4 + $0x122] sm:$0xff] }
 0x7b8   :  { %6409 = vst.msk [vmem:[#allocation5 + $0x18] sm:$0xff] %vm6405_vm3, %v6220_v37  ;;  %6333 = vrot.lane.b32.xlu0 %v6145_v27, %s9813_s1  ;;  %v13851_v37 = vld [vmem:[#allocation4 + $0x12a] sm:$0xff] }
 0x7b9   :  { %6335 = vrot.lane.b32.xlu1 %v6146_v55, %s9813_s1 }
 0x7ba   :  { %v6222_v53 = vpop.permute.xlu0 %6221 }
 0x7bb   :  { %v6224_v32 = vpop.permute.xlu1 %6223  ;;  %6410 = vst.msk [vmem:[#allocation5 + $0x20] sm:$0xff] %vm6405_vm3, %v6222_v53  ;;  %v13858_v53 = vld [vmem:[#allocation4 + $0x13a] sm:$0xff] }
 0x7bc   :  { %6411 = vst.msk [vmem:[#allocation5 + $0x28] sm:$0xff] %vm6405_vm3, %v6224_v32  ;;  %6337 = vrot.lane.b32.xlu0 %v6147_v35, %s9813_s1  ;;  %v13861_v32 = vld [vmem:[#allocation4 + $0x142] sm:$0xff] }
 0x7bd   :  { %6339 = vrot.lane.b32.xlu1 %v6148_v11, %s9813_s1 }
 0x7be   :  { %v6226_v24 = vpop.permute.xlu0 %6225 }
 0x7bf   :  { %v6228_v2 = vpop.permute.xlu1 %6227  ;;  %6412 = vst.msk [vmem:[#allocation5 + $0x30] sm:$0xff] %vm6405_vm3, %v6226_v24  ;;  %v13868_v24 = vld [vmem:[#allocation4 + $0x152] sm:$0xff] }
 0x7c0   :  { %6413 = vst.msk [vmem:[#allocation5 + $0x38] sm:$0xff] %vm6405_vm3, %v6228_v2  ;;  %6598 = vrot.lane.b32.xlu0 %v6470_v56, %s9814_s2  ;;  %v13871_v2 = vld [vmem:[#allocation4 + $0x15a] sm:$0xff] }
 0x7c1   :  { %6600 = vrot.lane.b32.xlu1 %v6471_v43, %s9814_s2 }
 0x7c2   :  { %v6230_v38 = vpop.permute.xlu0 %6229 }
 0x7c3   :  { %v6232_v31 = vpop.permute.xlu1 %6231  ;;  %6414 = vst.msk [vmem:[#allocation5 + $0x40] sm:$0xff] %vm6405_vm3, %v6230_v38  ;;  %v13878_v38 = vld [vmem:[#allocation4 + $0x16a] sm:$0xff] }
 0x7c4   :  { %6415 = vst.msk [vmem:[#allocation5 + $0x48] sm:$0xff] %vm6405_vm3, %v6232_v31  ;;  %6602 = vrot.lane.b32.xlu0 %v13748_v9, %s9814_s2  ;;  %v13881_v31 = vld [vmem:[#allocation4 + $0x172] sm:$0xff] }
 0x7c5   :  { %6604 = vrot.lane.b32.xlu1 %v13751_v0, %s9814_s2 }
 0x7c6   :  { %v6234_v20 = vpop.permute.xlu0 %6233 }
 0x7c7   :  { %v6236_v36 = vpop.permute.xlu1 %6235  ;;  %6416 = vst.msk [vmem:[#allocation5 + $0x50] sm:$0xff] %vm6405_vm3, %v6234_v20 }
 0x7c8   :  { %6417 = vst.msk [vmem:[#allocation5 + $0x58] sm:$0xff] %vm6405_vm3, %v6236_v36  ;;  %6606 = vrot.lane.b32.xlu0 %v13758_v62, %s9814_s2 }
 0x7c9   :  { %6608 = vrot.lane.b32.xlu1 %v13761_v54, %s9814_s2 }
 0x7ca   :  { %v6238_v39 = vpop.permute.xlu0 %6237 }
 0x7cb   :  { %v6240_v1 = vpop.permute.xlu1 %6239  ;;  %6418 = vst.msk [vmem:[#allocation5 + $0x60] sm:$0xff] %vm6405_vm3, %v6238_v39  ;;  %v13888_v39 = vld [vmem:[#allocation4 + $0x182] sm:$0xff] }
 0x7cc   :  { %6419 = vst.msk [vmem:[#allocation5 + $0x68] sm:$0xff] %vm6405_vm3, %v6240_v1  ;;  %6610 = vrot.lane.b32.xlu0 %v13768_v52, %s9814_s2  ;;  %v13891_v1 = vld [vmem:[#allocation4 + $0x18a] sm:$0xff] }
 0x7cd   :  { %6612 = vrot.lane.b32.xlu1 %v13771_v63, %s9814_s2 }
 0x7ce   :  { %v6242_v51 = vpop.permute.xlu0 %6241 }
 0x7cf   :  { %v6244_v19 = vpop.permute.xlu1 %6243  ;;  %6420 = vst.msk [vmem:[#allocation5 + $0x70] sm:$0xff] %vm6405_vm3, %v6242_v51 }
 0x7d0   :  { %6421 = vst.msk [vmem:[#allocation5 + $0x78] sm:$0xff] %vm6405_vm3, %v6244_v19  ;;  %6614 = vrot.lane.b32.xlu0 %v13778_v25, %s9814_s2 }
 0x7d1   :  { %6616 = vrot.lane.b32.xlu1 %v13781_v29, %s9814_s2 }
 0x7d2   :  { %v6246_v13 = vpop.permute.xlu0 %6245 }
 0x7d3   :  { %v6248_v34 = vpop.permute.xlu1 %6247  ;;  %6422 = vst.msk [vmem:[#allocation5 + $0x80] sm:$0xff] %vm6405_vm3, %v6246_v13  ;;  %v6502_v13 = vld [vmem:[#allocation4 + $0x1ca] sm:$0xff] }
 0x7d4   :  { %6423 = vst.msk [vmem:[#allocation5 + $0x88] sm:$0xff] %vm6405_vm3, %v6248_v34  ;;  %6618 = vrot.lane.b32.xlu0 %v13788_v41, %s9814_s2  ;;  %v6503_v34 = vld [vmem:[#allocation4 + $0x1d2] sm:$0xff] }
 0x7d5   :  { %6620 = vrot.lane.b32.xlu1 %v13791_v57, %s9814_s2 }
 0x7d6   :  { %v6250_v50 = vpop.permute.xlu0 %6249 }
 0x7d7   :  { %v6252_v23 = vpop.permute.xlu1 %6251  ;;  %6424 = vst.msk [vmem:[#allocation5 + $0x90] sm:$0xff] %vm6405_vm3, %v6250_v50 }
 0x7d8   :  { %6425 = vst.msk [vmem:[#allocation5 + $0x98] sm:$0xff] %vm6405_vm3, %v6252_v23  ;;  %6622 = vrot.lane.b32.xlu0 %v13798_v22, %s9814_s2 }
 0x7d9   :  { %6624 = vrot.lane.b32.xlu1 %v13801_v4, %s9814_s2 }
 0x7da   :  { %v6254_v6 = vpop.permute.xlu0 %6253 }
 0x7db   :  { %v6256_v18 = vpop.permute.xlu1 %6255  ;;  %6426 = vst.msk [vmem:[#allocation5 + $0xa0] sm:$0xff] %vm6405_vm3, %v6254_v6  ;;  %v13902_v6 = vld [vmem:[#allocation4 + $0x1e2] sm:$0xff] }
 0x7dc   :  { %6427 = vst.msk [vmem:[#allocation5 + $0xa8] sm:$0xff] %vm6405_vm3, %v6256_v18  ;;  %6626 = vrot.lane.b32.xlu0 %v13808_v61, %s9814_s2  ;;  %v13905_v18 = vld [vmem:[#allocation4 + $0x1ea] sm:$0xff] }
 0x7dd   :  { %6628 = vrot.lane.b32.xlu1 %v13811_v40, %s9814_s2 }
 0x7de   :  { %v6258_v26 = vpop.permute.xlu0 %6257 }
 0x7df   :  { %v6260_v42 = vpop.permute.xlu1 %6259  ;;  %6428 = vst.msk [vmem:[#allocation5 + $0xb0] sm:$0xff] %vm6405_vm3, %v6258_v26 }
 0x7e0   :  { %6429 = vst.msk [vmem:[#allocation5 + $0xb8] sm:$0xff] %vm6405_vm3, %v6260_v42  ;;  %6630 = vrot.lane.b32.xlu0 %v13818_v17, %s9814_s2  ;;  %v8083_v42 = vld [vmem:[%s15844_s4 + $0x40] sm:$0xff] }
 0x7e1   :  { %6632 = vrot.lane.b32.xlu1 %v13821_v10, %s9814_s2  ;;  %9652 = vmatprep.subr.mxu0 %v8083_v42 }
 0x7e2   :  { %v6262_v33 = vpop.permute.xlu0 %6261  ;;  %9766 = vmatprep.subr.mxu1 %v8083_v42  ;;  %9653 = vmatpush3.msra.mxu0 %v8083_v42 }
 0x7e3   :  { %v6264_v8 = vpop.permute.xlu1 %6263  ;;  %6430 = vst.msk [vmem:[#allocation5 + $0xc0] sm:$0xff] %vm6405_vm3, %v6262_v33  ;;  %9775 = vmatpush3.msra.mxu1 %v8083_v42 }
 0x7e4   :  { %6431 = vst.msk [vmem:[#allocation5 + $0xc8] sm:$0xff] %vm6405_vm3, %v6264_v8  ;;  %6634 = vrot.lane.b32.xlu0 %v13828_v21, %s9814_s2  ;;  %v6506_v8 = vld [vmem:[#allocation4 + $0x1fa] sm:$0xff] }
 0x7e5   :  { %6636 = vrot.lane.b32.xlu1 %v13831_v14, %s9814_s2 }
 0x7e6   :  { %v6266_v5 = vpop.permute.xlu0 %6265 }
 0x7e7   :  { %v6268_v30 = vpop.permute.xlu1 %6267  ;;  %6432 = vst.msk [vmem:[#allocation5 + $0xd0] sm:$0xff] %vm6405_vm3, %v6266_v5  ;;  %v6507_v5 = vld [vmem:[#allocation4 + $0x202] sm:$0xff] }
 0x7e8   :  { %6433 = vst.msk [vmem:[#allocation5 + $0xd8] sm:$0xff] %vm6405_vm3, %v6268_v30  ;;  %6638 = vrot.lane.b32.xlu0 %v13838_v12, %s9814_s2  ;;  %v8082_v30 = vld [vmem:[%s15844_s4 + $0x38] sm:$0xff] }
 0x7e9   :  { %6640 = vrot.lane.b32.xlu1 %v13841_v47, %s9814_s2  ;;  %9654 = vmatprep.subr.mxu0 %v8082_v30 }
 0x7ea   :  { %v6270_v3 = vpop.permute.xlu0 %6269  ;;  %9655 = vmatpush3.msra.mxu0 %v8082_v30  ;;  %9767 = vmatprep.subr.mxu1 %v8082_v30 }
 0x7eb   :  { %v6272_v58 = vpop.permute.xlu1 %6271  ;;  %6434 = vst.msk [vmem:[#allocation5 + $0xe0] sm:$0xff] %vm6405_vm3, %v6270_v3  ;;  %v8081_v3 = vld [vmem:[%s15844_s4 + $0x30] sm:$0xff]  ;;  %9776 = vmatpush3.msra.mxu1 %v8082_v30 }
 0x7ec   :  { %6435 = vst.msk [vmem:[#allocation5 + $0xe8] sm:$0xff] %vm6405_vm3, %v6272_v58  ;;  %6642 = vrot.lane.b32.xlu0 %v13848_v28, %s9814_s2  ;;  %9656 = vmatprep.subr.mxu0 %v8081_v3 }
 0x7ed   :  { %6644 = vrot.lane.b32.xlu1 %v13851_v37, %s9814_s2  ;;  %9657 = vmatpush3.msra.mxu0 %v8081_v3 }
 0x7ee   :  { %v6274_v27 = vpop.permute.xlu0 %6273  ;;  %9768 = vmatprep.subr.mxu1 %v8081_v3 }
 0x7ef   :  { %v6276_v55 = vpop.permute.xlu1 %6275  ;;  %6436 = vst.msk [vmem:[#allocation5 + $0xf0] sm:$0xff] %vm6405_vm3, %v6274_v27  ;;  %9777 = vmatpush3.msra.mxu1 %v8081_v3 }
 0x7f0   :  { %6437 = vst.msk [vmem:[#allocation5 + $0xf8] sm:$0xff] %vm6405_vm3, %v6276_v55  ;;  %6646 = vrot.lane.b32.xlu0 %v13858_v53, %s9814_s2  ;;  %v6856_v55 = vld [vmem:[#allocation4 + $0x30] sm:$0xff] }
 0x7f1   :  { %6648 = vrot.lane.b32.xlu1 %v13861_v32, %s9814_s2 }
 0x7f2   :  { %v6278_v35 = vpop.permute.xlu0 %6277 }
 0x7f3   :  { %v6280_v11 = vpop.permute.xlu1 %6279  ;;  %6438 = vst.msk [vmem:[#allocation5 + $0x100] sm:$0xff] %vm6405_vm3, %v6278_v35  ;;  %v6857_v35 = vld [vmem:[#allocation4 + $0x38] sm:$0xff] }
 0x7f4   :  { %6439 = vst.msk [vmem:[#allocation5 + $0x108] sm:$0xff] %vm6405_vm3, %v6280_v11  ;;  %6650 = vrot.lane.b32.xlu0 %v13868_v24, %s9814_s2  ;;  %v8080_v11 = vld [vmem:[%s15844_s4 + $0x28] sm:$0xff] }
 0x7f5   :  { %6652 = vrot.lane.b32.xlu1 %v13871_v2, %s9814_s2  ;;  %9658 = vmatprep.subr.mxu0 %v8080_v11 }
 0x7f6   :  { %v6282_v56 = vpop.permute.xlu0 %6281  ;;  %9659 = vmatpush3.msra.mxu0 %v8080_v11  ;;  %9769 = vmatprep.subr.mxu1 %v8080_v11 }
 0x7f7   :  { %v6284_v43 = vpop.permute.xlu1 %6283  ;;  %6440 = vst.msk [vmem:[#allocation5 + $0x110] sm:$0xff] %vm6405_vm3, %v6282_v56  ;;  %v8079_v56 = vld [vmem:[%s15844_s4 + $0x20] sm:$0xff]  ;;  %9778 = vmatpush3.msra.mxu1 %v8080_v11 }
 0x7f8   :  { %6441 = vst.msk [vmem:[#allocation5 + $0x118] sm:$0xff] %vm6405_vm3, %v6284_v43  ;;  %6654 = vrot.lane.b32.xlu0 %v13878_v38, %s9814_s2  ;;  %9660 = vmatprep.subr.mxu0 %v8079_v56 }
 0x7f9   :  { %6656 = vrot.lane.b32.xlu1 %v13881_v31, %s9814_s2  ;;  %9661 = vmatpush3.msra.mxu0 %v8079_v56 }
 0x7fa   :  { %v6286_v20 = vpop.permute.xlu0 %6285  ;;  %9770 = vmatprep.subr.mxu1 %v8079_v56 }
 0x7fb   :  { %v6288_v36 = vpop.permute.xlu1 %6287  ;;  %6442 = vst.msk [vmem:[#allocation5 + $0x120] sm:$0xff] %vm6405_vm3, %v6286_v20  ;;  %9779 = vmatpush3.msra.mxu1 %v8079_v56 }
 0x7fc   :  { %6443 = vst.msk [vmem:[#allocation5 + $0x128] sm:$0xff] %vm6405_vm3, %v6288_v36  ;;  %6658 = vrot.lane.b32.xlu0 %v13888_v39, %s9814_s2  ;;  %v6858_v36 = vld [vmem:[#allocation4 + $0x48] sm:$0xff] }
 0x7fd   :  { %6660 = vrot.lane.b32.xlu1 %v13891_v1, %s9814_s2 }
 0x7fe   :  { %v6290_v51 = vpop.permute.xlu0 %6289 }
 0x7ff   :  { %v6292_v19 = vpop.permute.xlu1 %6291  ;;  %6444 = vst.msk [vmem:[#allocation5 + $0x130] sm:$0xff] %vm6405_vm3, %v6290_v51  ;;  %v8078_v51 = vld [vmem:[%s15844_s4 + $0x18] sm:$0xff] }
 0x800   :  { %6445 = vst.msk [vmem:[#allocation5 + $0x138] sm:$0xff] %vm6405_vm3, %v6292_v19  ;;  %6662 = vrot.lane.b32.xlu0 %v6502_v13, %s9814_s2  ;;  %v8077_v19 = vld [vmem:[%s15844_s4 + $0x10] sm:$0xff]  ;;  %9662 = vmatprep.subr.mxu0 %v8078_v51 }
 0x801   :  { %6664 = vrot.lane.b32.xlu1 %v6503_v34, %s9814_s2  ;;  %9663 = vmatpush3.msra.mxu0 %v8078_v51 }
 0x802   :  { %v6294_v50 = vpop.permute.xlu0 %6293  ;;  %9664 = vmatprep.subr.mxu0 %v8077_v19  ;;  %9771 = vmatprep.subr.mxu1 %v8078_v51 }
 0x803   :  { %v6296_v23 = vpop.permute.xlu1 %6295  ;;  %6446 = vst.msk [vmem:[#allocation5 + $0x140] sm:$0xff] %vm6405_vm3, %v6294_v50  ;;  %9665 = vmatpush3.msra.mxu0 %v8077_v19  ;;  %9780 = vmatpush3.msra.mxu1 %v8078_v51 }
 0x804   :  { %6447 = vst.msk [vmem:[#allocation5 + $0x148] sm:$0xff] %vm6405_vm3, %v6296_v23  ;;  %6666 = vrot.lane.b32.xlu0 %v13902_v6, %s9814_s2  ;;  %9772 = vmatprep.subr.mxu1 %v8077_v19 }
 0x805   :  { %6668 = vrot.lane.b32.xlu1 %v13905_v18, %s9814_s2  ;;  %9781 = vmatpush3.msra.mxu1 %v8077_v19 }
 0x806   :  { %v6298_v26 = vpop.permute.xlu0 %6297 }
 0x807   :  { %v6300_v33 = vpop.permute.xlu1 %6299  ;;  %6448 = vst.msk [vmem:[#allocation5 + $0x150] sm:$0xff] %vm6405_vm3, %v6298_v26  ;;  %v6859_v26 = vld [vmem:[#allocation4 + $0x50] sm:$0xff] }
 0x808   :  { %6449 = vst.msk [vmem:[#allocation5 + $0x158] sm:$0xff] %vm6405_vm3, %v6300_v33  ;;  %6670 = vrot.lane.b32.xlu0 %v6506_v8, %s9814_s2 }
 0x809   :  { %6672 = vrot.lane.b32.xlu1 %v6507_v5, %s9814_s2  ;;  %v6861_v5 = vld [vmem:[#allocation4 + $0x68] sm:$0xff] }
 0x80a   :  { %v6302_v58 = vpop.permute.xlu0 %6301 }
 0x80b   :  { %v6304_v27 = vpop.permute.xlu1 %6303  ;;  %6450 = vst.msk [vmem:[#allocation5 + $0x160] sm:$0xff] %vm6405_vm3, %v6302_v58 }
 0x80c   :  { %6451 = vst.msk [vmem:[#allocation5 + $0x168] sm:$0xff] %vm6405_vm3, %v6304_v27  ;;  %6984 = vrot.lane.b32.xlu0 %v6856_v55, %s9815_s0 }
 0x80d   :  { %6986 = vrot.lane.b32.xlu1 %v6857_v35, %s9815_s0 }
 0x80e   :  { %v6306_v43 = vpop.permute.xlu0 %6305 }
 0x80f   :  { %v6308_v20 = vpop.permute.xlu1 %6307  ;;  %6452 = vst.msk [vmem:[#allocation5 + $0x170] sm:$0xff] %vm6405_vm3, %v6306_v43 }
 0x810   :  { %6453 = vst.msk [vmem:[#allocation5 + $0x178] sm:$0xff] %vm6405_vm3, %v6308_v20  ;;  %7369 = vrot.lane.b32.xlu0 %v13590_v49, %s9816_s23  ;;  %v8076_v49 = vld [vmem:[%s15844_s4 + $0x8] sm:$0xff] }
 0x811   :  { %6988 = vrot.lane.b32.xlu1 %v6858_v36, %s9815_s0  ;;  %9666 = vmatprep.subr.mxu0 %v8076_v49 }
 0x812   :  { %v6310_v13 = vpop.permute.xlu0 %6309  ;;  %9667 = vmatpush3.msra.mxu0 %v8076_v49  ;;  %9773 = vmatprep.subr.mxu1 %v8076_v49 }
 0x813   :  { %v6312_v34 = vpop.permute.xlu1 %6311  ;;  %6454 = vst.msk [vmem:[#allocation5 + $0x180] sm:$0xff] %vm6405_vm3, %v6310_v13  ;;  %9782 = vmatpush3.msra.mxu1 %v8076_v49 }
 0x814   :  { %6455 = vst.msk [vmem:[#allocation5 + $0x188] sm:$0xff] %vm6405_vm3, %v6312_v34  ;;  %7371 = vrot.lane.b32.xlu0 %v13593_v16, %s9816_s23  ;;  %v8075_v16 = vld [vmem:[%s15844_s4] sm:$0xff] }
 0x815   :  { %7754 = vrot.lane.b32.xlu1 %v13748_v9, %s9817_s30  ;;  %9668 = vmatprep.subr.mxu0 %v8075_v16 }
 0x816   :  { %v6314_v50 = vpop.permute.xlu0 %6313  ;;  %9669 = vmatpush3.msra.mxu0 %v8075_v16  ;;  %9774 = vmatprep.subr.mxu1 %v8075_v16 }
 0x817   :  { %v6316_v23 = vpop.permute.xlu1 %6315  ;;  %6456 = vst.msk [vmem:[#allocation5 + $0x190] sm:$0xff] %vm6405_vm3, %v6314_v50  ;;  %9783 = vmatpush3.msra.mxu1 %v8075_v16  ;;  %v6869_v16 = vld [vmem:[#allocation4 + $0xc8] sm:$0xff] }
 0x818   :  { %6457 = vst.msk [vmem:[#allocation5 + $0x198] sm:$0xff] %vm6405_vm3, %v6316_v23  ;;  %6990 = vrot.lane.b32.xlu0 %v6859_v26, %s9815_s0  ;;  %v6868_v26 = vld [vmem:[#allocation4 + $0xc0] sm:$0xff] }
 0x819   :  { %7373 = vrot.lane.b32.xlu1 %v13600_v59, %s9816_s23 }
 0x81a   :  { %v6318_v9 = vpop.permute.xlu0 %6317 }
 0x81b   :  { %v6320_v42 = vpop.permute.xlu1 %6319  ;;  %6458 = vst.msk [vmem:[#allocation5 + $0x1a0] sm:$0xff] %vm6405_vm3, %v6318_v9 }
 0x81c   :  { %6459 = vst.msk [vmem:[#allocation5 + $0x1a8] sm:$0xff] %vm6405_vm3, %v6320_v42  ;;  %7756 = vrot.lane.b32.xlu0 %v13751_v0, %s9817_s30 }
 0x81d   :  { %7375 = vrot.lane.b32.xlu1 %v13603_v48, %s9816_s23  ;;  %v6860_v48 = vld [vmem:[#allocation4 + $0x60] sm:$0xff] }
 0x81e   :  { %v6322_v59 = vpop.permute.xlu0 %6321 }
 0x81f   :  { %v6324_v33 = vpop.permute.xlu1 %6323  ;;  %6460 = vst.msk [vmem:[#allocation5 + $0x1b0] sm:$0xff] %vm6405_vm3, %v6322_v59 }
 0x820   :  { %6461 = vst.msk [vmem:[#allocation5 + $0x1b8] sm:$0xff] %vm6405_vm3, %v6324_v33  ;;  %7758 = vrot.lane.b32.xlu0 %v13758_v62, %s9817_s30 }
 0x821   :  { %7760 = vrot.lane.b32.xlu1 %v13761_v54, %s9817_s30 }
 0x822   :  { %v6326_v0 = vpop.permute.xlu0 %6325 }
 0x823   :  { %v6328_v8 = vpop.permute.xlu1 %6327  ;;  %6462 = vst.msk [vmem:[#allocation5 + $0x1c0] sm:$0xff] %vm6405_vm3, %v6326_v0 }
 0x824   :  { %6463 = vst.msk [vmem:[#allocation5 + $0x1c8] sm:$0xff] %vm6405_vm3, %v6328_v8  ;;  %6992 = vrot.lane.b32.xlu0 %v6860_v48, %s9815_s0  ;;  %v6870_v48 = vld [vmem:[#allocation4 + $0xd8] sm:$0xff] }
 0x825   :  { %6994 = vrot.lane.b32.xlu1 %v6861_v5, %s9815_s0  ;;  %v6871_v5 = vld [vmem:[#allocation4 + $0xe0] sm:$0xff] }
 0x826   :  { %v6330_v30 = vpop.permute.xlu0 %6329 }
 0x827   :  { %v6332_v3 = vpop.permute.xlu1 %6331  ;;  %6464 = vst.msk [vmem:[#allocation5 + $0x1d0] sm:$0xff] %vm6405_vm3, %v6330_v30 }
 0x828   :  { %6465 = vst.msk [vmem:[#allocation5 + $0x1d8] sm:$0xff] %vm6405_vm3, %v6332_v3  ;;  %7377 = vrot.lane.b32.xlu0 %v13610_v45, %s9816_s23  ;;  %v6862_v45 = vld [vmem:[#allocation4 + $0x78] sm:$0xff] }
 0x829   :  { %7379 = vrot.lane.b32.xlu1 %v13613_v46, %s9816_s23  ;;  %v6863_v46 = vld [vmem:[#allocation4 + $0x80] sm:$0xff] }
 0x82a   :  { %v6334_v62 = vpop.permute.xlu0 %6333 }
 0x82b   :  { %v6336_v54 = vpop.permute.xlu1 %6335  ;;  %6466 = vst.msk [vmem:[#allocation5 + $0x1e0] sm:$0xff] %vm6405_vm3, %v6334_v62 }
 0x82c   :  { %6467 = vst.msk [vmem:[#allocation5 + $0x1e8] sm:$0xff] %vm6405_vm3, %v6336_v54  ;;  %7762 = vrot.lane.b32.xlu0 %v13768_v52, %s9817_s30 }
 0x82d   :  { %7764 = vrot.lane.b32.xlu1 %v13771_v63, %s9817_s30 }
 0x82e   :  { %v6338_v58 = vpop.permute.xlu0 %6337 }
 0x82f   :  { %v6340_v27 = vpop.permute.xlu1 %6339  ;;  %6468 = vst.msk [vmem:[#allocation5 + $0x1f0] sm:$0xff] %vm6405_vm3, %v6338_v58 }
 0x830   :  { %6469 = vst.msk [vmem:[#allocation5 + $0x1f8] sm:$0xff] %vm6405_vm3, %v6340_v27  ;;  %6996 = vrot.lane.b32.xlu0 %v6862_v45, %s9815_s0  ;;  %v6872_v45 = vld [vmem:[#allocation4 + $0xf0] sm:$0xff] }
 0x831   :  { %6998 = vrot.lane.b32.xlu1 %v6863_v46, %s9815_s0  ;;  %v6873_v46 = vld [vmem:[#allocation4 + $0xf8] sm:$0xff] }
 0x832   :  { %v6599_v55 = vpop.permute.xlu0 %6598 }
 0x833   :  { %v6601_v35 = vpop.permute.xlu1 %6600  ;;  %6791 = vst.msk [vmem:[#allocation5] sm:$0xff] %vm6790_vm4, %v6599_v55 }
 0x834   :  { %6792 = vst.msk [vmem:[#allocation5 + $0x8] sm:$0xff] %vm6790_vm4, %v6601_v35  ;;  %7381 = vrot.lane.b32.xlu0 %v13620_v15, %s9816_s23  ;;  %v6864_v15 = vld [vmem:[#allocation4 + $0x90] sm:$0xff] }
 0x835   :  { %7383 = vrot.lane.b32.xlu1 %v13623_v7, %s9816_s23  ;;  %v6865_v7 = vld [vmem:[#allocation4 + $0x98] sm:$0xff] }
 0x836   :  { %v6603_v52 = vpop.permute.xlu0 %6602 }
 0x837   :  { %v6605_v63 = vpop.permute.xlu1 %6604  ;;  %6793 = vst.msk [vmem:[#allocation5 + $0x10] sm:$0xff] %vm6790_vm4, %v6603_v52 }
 0x838   :  { %6794 = vst.msk [vmem:[#allocation5 + $0x18] sm:$0xff] %vm6790_vm4, %v6605_v63  ;;  %7766 = vrot.lane.b32.xlu0 %v13778_v25, %s9817_s30 }
 0x839   :  { %7768 = vrot.lane.b32.xlu1 %v13781_v29, %s9817_s30 }
 0x83a   :  { %v6607_v11 = vpop.permute.xlu0 %6606 }
 0x83b   :  { %v6609_v56 = vpop.permute.xlu1 %6608  ;;  %6795 = vst.msk [vmem:[#allocation5 + $0x20] sm:$0xff] %vm6790_vm4, %v6607_v11 }
 0x83c   :  { %6796 = vst.msk [vmem:[#allocation5 + $0x28] sm:$0xff] %vm6790_vm4, %v6609_v56  ;;  %7000 = vrot.lane.b32.xlu0 %v6864_v15, %s9815_s0  ;;  %v6874_v15 = vld [vmem:[#allocation4 + $0x108] sm:$0xff] }
 0x83d   :  { %7002 = vrot.lane.b32.xlu1 %v6865_v7, %s9815_s0  ;;  %v6875_v7 = vld [vmem:[#allocation4 + $0x110] sm:$0xff] }
 0x83e   :  { %v6611_v43 = vpop.permute.xlu0 %6610 }
 0x83f   :  { %v6613_v20 = vpop.permute.xlu1 %6612  ;;  %6797 = vst.msk [vmem:[#allocation5 + $0x30] sm:$0xff] %vm6790_vm4, %v6611_v43 }
 0x840   :  { %6798 = vst.msk [vmem:[#allocation5 + $0x38] sm:$0xff] %vm6790_vm4, %v6613_v20  ;;  %7385 = vrot.lane.b32.xlu0 %v13630_v44, %s9816_s23  ;;  %v6866_v44 = vld [vmem:[#allocation4 + $0xa8] sm:$0xff] }
 0x841   :  { %7387 = vrot.lane.b32.xlu1 %v13633_v60, %s9816_s23  ;;  %v6867_v60 = vld [vmem:[#allocation4 + $0xb0] sm:$0xff] }
 0x842   :  { %v6615_v25 = vpop.permute.xlu0 %6614 }
 0x843   :  { %v6617_v29 = vpop.permute.xlu1 %6616  ;;  %6799 = vst.msk [vmem:[#allocation5 + $0x40] sm:$0xff] %vm6790_vm4, %v6615_v25 }
 0x844   :  { %6800 = vst.msk [vmem:[#allocation5 + $0x48] sm:$0xff] %vm6790_vm4, %v6617_v29  ;;  %7770 = vrot.lane.b32.xlu0 %v13788_v41, %s9817_s30  ;;  %v9801_v41 = vld [vmem:[#allocation4 + $0xa9] sm:$0xff] }
 0x845   :  { %7772 = vrot.lane.b32.xlu1 %v13791_v57, %s9817_s30  ;;  %v9802_v57 = vld [vmem:[#allocation4 + $0xb1] sm:$0xff] }
 0x846   :  { %v6619_v36 = vpop.permute.xlu0 %6618 }
 0x847   :  { %v6621_v51 = vpop.permute.xlu1 %6620  ;;  %6801 = vst.msk [vmem:[#allocation5 + $0x50] sm:$0xff] %vm6790_vm4, %v6619_v36 }
 0x848   :  { %6802 = vst.msk [vmem:[#allocation5 + $0x58] sm:$0xff] %vm6790_vm4, %v6621_v51  ;;  %7004 = vrot.lane.b32.xlu0 %v6866_v44, %s9815_s0  ;;  %v6876_v44 = vld [vmem:[#allocation4 + $0x120] sm:$0xff] }
 0x849   :  { %7006 = vrot.lane.b32.xlu1 %v6867_v60, %s9815_s0  ;;  %v6877_v60 = vld [vmem:[#allocation4 + $0x128] sm:$0xff] }
 0x84a   :  { %v6623_v19 = vpop.permute.xlu0 %6622 }
 0x84b   :  { %v6625_v13 = vpop.permute.xlu1 %6624  ;;  %6803 = vst.msk [vmem:[#allocation5 + $0x60] sm:$0xff] %vm6790_vm4, %v6623_v19 }
 0x84c   :  { %6804 = vst.msk [vmem:[#allocation5 + $0x68] sm:$0xff] %vm6790_vm4, %v6625_v13  ;;  %7389 = vrot.lane.b32.xlu0 %v9801_v41, %s9816_s23 }
 0x84d   :  { %7391 = vrot.lane.b32.xlu1 %v9802_v57, %s9816_s23 }
 0x84e   :  { %v6627_v34 = vpop.permute.xlu0 %6626 }
 0x84f   :  { %v6629_v49 = vpop.permute.xlu1 %6628  ;;  %6805 = vst.msk [vmem:[#allocation5 + $0x70] sm:$0xff] %vm6790_vm4, %v6627_v34 }
 0x850   :  { %6806 = vst.msk [vmem:[#allocation5 + $0x78] sm:$0xff] %vm6790_vm4, %v6629_v49  ;;  %7774 = vrot.lane.b32.xlu0 %v13798_v22, %s9817_s30  ;;  %v9803_v22 = vld [vmem:[#allocation4 + $0xc1] sm:$0xff] }
 0x851   :  { %7776 = vrot.lane.b32.xlu1 %v13801_v4, %s9817_s30  ;;  %v9804_v4 = vld [vmem:[#allocation4 + $0xc9] sm:$0xff] }
 0x852   :  { %v6631_v50 = vpop.permute.xlu0 %6630 }
 0x853   :  { %v6633_v23 = vpop.permute.xlu1 %6632  ;;  %6807 = vst.msk [vmem:[#allocation5 + $0x80] sm:$0xff] %vm6790_vm4, %v6631_v50 }
 0x854   :  { %6808 = vst.msk [vmem:[#allocation5 + $0x88] sm:$0xff] %vm6790_vm4, %v6633_v23  ;;  %7008 = vrot.lane.b32.xlu0 %v6868_v26, %s9815_s0  ;;  %v6878_v23 = vld [vmem:[#allocation4 + $0x138] sm:$0xff]  ;;  %v6879_v26 = vld [vmem:[#allocation4 + $0x140] sm:$0xff] }
 0x855   :  { %7010 = vrot.lane.b32.xlu1 %v6869_v16, %s9815_s0 }
 0x856   :  { %v6635_v9 = vpop.permute.xlu0 %6634 }
 0x857   :  { %v6637_v42 = vpop.permute.xlu1 %6636  ;;  %6809 = vst.msk [vmem:[#allocation5 + $0x90] sm:$0xff] %vm6790_vm4, %v6635_v9  ;;  %v7264_v9 = vld [vmem:[#allocation4 + $0x141] sm:$0xff] }
 0x858   :  { %6810 = vst.msk [vmem:[#allocation5 + $0x98] sm:$0xff] %vm6790_vm4, %v6637_v42  ;;  %7393 = vrot.lane.b32.xlu0 %v9803_v22, %s9816_s23 }
 0x859   :  { %7395 = vrot.lane.b32.xlu1 %v9804_v4, %s9816_s23 }
 0x85a   :  { %v6639_v59 = vpop.permute.xlu0 %6638 }
 0x85b   :  { %v6641_v33 = vpop.permute.xlu1 %6640  ;;  %6811 = vst.msk [vmem:[#allocation5 + $0xa0] sm:$0xff] %vm6790_vm4, %v6639_v59 }
 0x85c   :  { %6812 = vst.msk [vmem:[#allocation5 + $0xa8] sm:$0xff] %vm6790_vm4, %v6641_v33  ;;  %7778 = vrot.lane.b32.xlu0 %v13808_v61, %s9817_s30  ;;  %v7255_v61 = vld [vmem:[#allocation4 + $0xd9] sm:$0xff] }
 0x85d   :  { %7780 = vrot.lane.b32.xlu1 %v13811_v40, %s9817_s30  ;;  %v7256_v40 = vld [vmem:[#allocation4 + $0xe1] sm:$0xff] }
 0x85e   :  { %v6643_v0 = vpop.permute.xlu0 %6642 }
 0x85f   :  { %v6645_v8 = vpop.permute.xlu1 %6644  ;;  %6813 = vst.msk [vmem:[#allocation5 + $0xb0] sm:$0xff] %vm6790_vm4, %v6643_v0 }
 0x860   :  { %6814 = vst.msk [vmem:[#allocation5 + $0xb8] sm:$0xff] %vm6790_vm4, %v6645_v8  ;;  %7012 = vrot.lane.b32.xlu0 %v6870_v48, %s9815_s0  ;;  %v6880_v8 = vld [vmem:[#allocation4 + $0x150] sm:$0xff] }
 0x861   :  { %7014 = vrot.lane.b32.xlu1 %v6871_v5, %s9815_s0  ;;  %v6881_v5 = vld [vmem:[#allocation4 + $0x158] sm:$0xff] }
 0x862   :  { %v6647_v30 = vpop.permute.xlu0 %6646 }
 0x863   :  { %v6649_v3 = vpop.permute.xlu1 %6648  ;;  %6815 = vst.msk [vmem:[#allocation5 + $0xc0] sm:$0xff] %vm6790_vm4, %v6647_v30  ;;  %v7265_v30 = vld [vmem:[#allocation4 + $0x151] sm:$0xff] }
 0x864   :  { %6816 = vst.msk [vmem:[#allocation5 + $0xc8] sm:$0xff] %vm6790_vm4, %v6649_v3  ;;  %7397 = vrot.lane.b32.xlu0 %v7255_v61, %s9816_s23  ;;  %v7266_v3 = vld [vmem:[#allocation4 + $0x159] sm:$0xff] }
 0x865   :  { %7399 = vrot.lane.b32.xlu1 %v7256_v40, %s9816_s23 }
 0x866   :  { %v6651_v62 = vpop.permute.xlu0 %6650 }
 0x867   :  { %v6653_v54 = vpop.permute.xlu1 %6652  ;;  %6817 = vst.msk [vmem:[#allocation5 + $0xd0] sm:$0xff] %vm6790_vm4, %v6651_v62 }
 0x868   :  { %6818 = vst.msk [vmem:[#allocation5 + $0xd8] sm:$0xff] %vm6790_vm4, %v6653_v54  ;;  %7782 = vrot.lane.b32.xlu0 %v13818_v17, %s9817_s30  ;;  %v7257_v17 = vld [vmem:[#allocation4 + $0xf1] sm:$0xff] }
 0x869   :  { %7784 = vrot.lane.b32.xlu1 %v13821_v10, %s9817_s30  ;;  %v7258_v10 = vld [vmem:[#allocation4 + $0xf9] sm:$0xff] }
 0x86a   :  { %v6655_v58 = vpop.permute.xlu0 %6654 }
 0x86b   :  { %v6657_v27 = vpop.permute.xlu1 %6656  ;;  %6819 = vst.msk [vmem:[#allocation5 + $0xe0] sm:$0xff] %vm6790_vm4, %v6655_v58 }
 0x86c   :  { %6820 = vst.msk [vmem:[#allocation5 + $0xe8] sm:$0xff] %vm6790_vm4, %v6657_v27  ;;  %7016 = vrot.lane.b32.xlu0 %v6872_v45, %s9815_s0  ;;  %v6882_v27 = vld [vmem:[#allocation4 + $0x168] sm:$0xff] }
 0x86d   :  { %7018 = vrot.lane.b32.xlu1 %v6873_v46, %s9815_s0  ;;  %v6883_v46 = vld [vmem:[#allocation4 + $0x170] sm:$0xff] }
 0x86e   :  { %v6659_v55 = vpop.permute.xlu0 %6658 }
 0x86f   :  { %v6661_v35 = vpop.permute.xlu1 %6660  ;;  %6821 = vst.msk [vmem:[#allocation5 + $0xf0] sm:$0xff] %vm6790_vm4, %v6659_v55  ;;  %v7267_v55 = vld [vmem:[#allocation4 + $0x169] sm:$0xff] }
 0x870   :  { %6822 = vst.msk [vmem:[#allocation5 + $0xf8] sm:$0xff] %vm6790_vm4, %v6661_v35  ;;  %7401 = vrot.lane.b32.xlu0 %v7257_v17, %s9816_s23  ;;  %v7268_v35 = vld [vmem:[#allocation4 + $0x171] sm:$0xff] }
 0x871   :  { %7403 = vrot.lane.b32.xlu1 %v7258_v10, %s9816_s23 }
 0x872   :  { %v6663_v52 = vpop.permute.xlu0 %6662 }
 0x873   :  { %v6665_v63 = vpop.permute.xlu1 %6664  ;;  %6823 = vst.msk [vmem:[#allocation5 + $0x100] sm:$0xff] %vm6790_vm4, %v6663_v52 }
 0x874   :  { %6824 = vst.msk [vmem:[#allocation5 + $0x108] sm:$0xff] %vm6790_vm4, %v6665_v63  ;;  %7786 = vrot.lane.b32.xlu0 %v13828_v21, %s9817_s30  ;;  %v7259_v21 = vld [vmem:[#allocation4 + $0x109] sm:$0xff] }
 0x875   :  { %7788 = vrot.lane.b32.xlu1 %v13831_v14, %s9817_s30  ;;  %v7260_v14 = vld [vmem:[#allocation4 + $0x111] sm:$0xff] }
 0x876   :  { %v6667_v11 = vpop.permute.xlu0 %6666 }
 0x877   :  { %v6669_v56 = vpop.permute.xlu1 %6668  ;;  %6825 = vst.msk [vmem:[#allocation5 + $0x110] sm:$0xff] %vm6790_vm4, %v6667_v11 }
 0x878   :  { %6826 = vst.msk [vmem:[#allocation5 + $0x118] sm:$0xff] %vm6790_vm4, %v6669_v56  ;;  %7020 = vrot.lane.b32.xlu0 %v6874_v15, %s9815_s0  ;;  %v6884_v56 = vld [vmem:[#allocation4 + $0x180] sm:$0xff] }
 0x879   :  { %7022 = vrot.lane.b32.xlu1 %v6875_v7, %s9815_s0  ;;  %v6885_v7 = vld [vmem:[#allocation4 + $0x188] sm:$0xff] }
 0x87a   :  { %v6671_v43 = vpop.permute.xlu0 %6670 }
 0x87b   :  { %v6673_v20 = vpop.permute.xlu1 %6672  ;;  %6827 = vst.msk [vmem:[#allocation5 + $0x120] sm:$0xff] %vm6790_vm4, %v6671_v43  ;;  %v7269_v43 = vld [vmem:[#allocation4 + $0x181] sm:$0xff] }
 0x87c   :  { %6828 = vst.msk [vmem:[#allocation5 + $0x128] sm:$0xff] %vm6790_vm4, %v6673_v20  ;;  %7405 = vrot.lane.b32.xlu0 %v7259_v21, %s9816_s23  ;;  %v7270_v20 = vld [vmem:[#allocation4 + $0x189] sm:$0xff] }
 0x87d   :  { %7407 = vrot.lane.b32.xlu1 %v7260_v14, %s9816_s23 }
 0x87e   :  { %v6985_v25 = vpop.permute.xlu0 %6984 }
 0x87f   :  { %v6987_v29 = vpop.permute.xlu1 %6986  ;;  %7177 = vst.msk [vmem:[#allocation5] sm:$0xff] %vm7176_vm5, %v6985_v25  ;;  %v6886_v25 = vld [vmem:[#allocation4 + $0x198] sm:$0xff] }
 0x880   :  { %7178 = vst.msk [vmem:[#allocation5 + $0x8] sm:$0xff] %vm7176_vm5, %v6987_v29  ;;  %7790 = vrot.lane.b32.xlu0 %v13838_v12, %s9817_s30  ;;  %v7261_v12 = vld [vmem:[#allocation4 + $0x121] sm:$0xff] }
 0x881   :  { %7792 = vrot.lane.b32.xlu1 %v13841_v47, %s9817_s30  ;;  %v7262_v47 = vld [vmem:[#allocation4 + $0x129] sm:$0xff] }
 0x882   :  { %v7370_v36 = vpop.permute.xlu0 %7369 }
 0x883   :  { %v6989_v51 = vpop.permute.xlu1 %6988  ;;  %7562 = vst.msk [vmem:[#allocation5] sm:$0xff] %vm7561_vm6, %v7370_v36 }
 0x884   :  { %7179 = vst.msk [vmem:[#allocation5 + $0x10] sm:$0xff] %vm7176_vm5, %v6989_v51  ;;  %7024 = vrot.lane.b32.xlu0 %v6876_v44, %s9815_s0  ;;  %v6887_v51 = vld [vmem:[#allocation4 + $0x1a0] sm:$0xff] }
 0x885   :  { %7026 = vrot.lane.b32.xlu1 %v6877_v60, %s9815_s0 }
 0x886   :  { %v7372_v19 = vpop.permute.xlu0 %7371 }
 0x887   :  { %v7755_v13 = vpop.permute.xlu1 %7754  ;;  %7563 = vst.msk [vmem:[#allocation5 + $0x8] sm:$0xff] %vm7561_vm6, %v7372_v19  ;;  %v7272_v19 = vld [vmem:[#allocation4 + $0x1a1] sm:$0xff] }
 0x888   :  { %7947 = vst.msk [vmem:[#allocation5] sm:$0xff] %vm7946_vm7, %v7755_v13  ;;  %7409 = vrot.lane.b32.xlu0 %v7261_v12, %s9816_s23  ;;  %v7656_v12 = vld [vmem:[#allocation4 + $0x19a] sm:$0xff] }
 0x889   :  { %7411 = vrot.lane.b32.xlu1 %v7262_v47, %s9816_s23 }
 0x88a   :  { %v6991_v41 = vpop.permute.xlu0 %6990 }
 0x88b   :  { %v7374_v57 = vpop.permute.xlu1 %7373  ;;  %7180 = vst.msk [vmem:[#allocation5 + $0x18] sm:$0xff] %vm7176_vm5, %v6991_v41  ;;  %v7657_v41 = vld [vmem:[#allocation4 + $0x1a2] sm:$0xff] }
 0x88c   :  { %7564 = vst.msk [vmem:[#allocation5 + $0x10] sm:$0xff] %vm7561_vm6, %v7374_v57  ;;  %7794 = vrot.lane.b32.xlu0 %v13848_v28, %s9817_s30 }
 0x88d   :  { %7796 = vrot.lane.b32.xlu1 %v13851_v37, %s9817_s30  ;;  %v7263_v37 = vld [vmem:[#allocation4 + $0x139] sm:$0xff] }
 0x88e   :  { %v7757_v34 = vpop.permute.xlu0 %7756 }
 0x88f   :  { %v7376_v49 = vpop.permute.xlu1 %7375  ;;  %7948 = vst.msk [vmem:[#allocation5 + $0x8] sm:$0xff] %vm7946_vm7, %v7757_v34  ;;  %v8011_v50 = vld [vmem:[#allocation5] sm:$0xff] }
 0x890   :  { %7565 = vst.msk [vmem:[#allocation5 + $0x18] sm:$0xff] %vm7561_vm6, %v7376_v49  ;;  %9670 = vmatprep.mubr.msk.f32.mxu0 %vm8084_vm8, %v8011_v50  ;;  %7028 = vrot.lane.b32.xlu0 %v6878_v23, %s9815_s0  ;;  %v6888_v23 = vld [vmem:[#allocation4 + $0x1e0] sm:$0xff] }
 0x891   :  { %7030 = vrot.lane.b32.xlu1 %v6879_v26, %s9815_s0 }
 0x892   :  { %v7759_v28 = vpop.permute.xlu0 %7758 }
 0x893   :  { %v7761_v16 = vpop.permute.xlu1 %7760  ;;  %7949 = vst.msk [vmem:[#allocation5 + $0x10] sm:$0xff] %vm7946_vm7, %v7759_v28  ;;  %v6889_v28 = vld [vmem:[#allocation4 + $0x1e8] sm:$0xff] }
 0x894   :  { %7950 = vst.msk [vmem:[#allocation5 + $0x18] sm:$0xff] %vm7946_vm7, %v7761_v16  ;;  %7413 = vrot.lane.b32.xlu0 %v7263_v37, %s9816_s23 }
 0x895   :  { %7415 = vrot.lane.b32.xlu1 %v7264_v9, %s9816_s23  ;;  %v7273_v9 = vld [vmem:[#allocation4 + $0x1e1] sm:$0xff] }
 0x896   :  { %v6993_v42 = vpop.permute.xlu0 %6992  ;;  %v8012_v22 = vld [vmem:[#allocation5 + $0x8] sm:$0xff] }
 0x897   :  { %v6995_v4 = vpop.permute.xlu1 %6994  ;;  %7181 = vst.msk [vmem:[#allocation5 + $0x20] sm:$0xff] %vm7176_vm5, %v6993_v42  ;;  %9671 = vmatmul.mubr.msk.f32.vlgmr.msra.gmra.mxu0 %vm8084_vm8, %v8012_v22  ;;  %v7274_v42 = vld [vmem:[#allocation4 + $0x1e9] sm:$0xff] }
 0x898   :  { %7182 = vst.msk [vmem:[#allocation5 + $0x28] sm:$0xff] %vm7176_vm5, %v6995_v4  ;;  %7798 = vrot.lane.b32.xlu0 %v13858_v53, %s9817_s30 }
 0x899   :  { %7800 = vrot.lane.b32.xlu1 %v13861_v32, %s9817_s30 }
 0x89a   :  { %v7378_v59 = vpop.permute.xlu0 %7377  ;;  %v8013_v33 = vld [vmem:[#allocation5 + $0x10] sm:$0xff] }
 0x89b   :  { %v7380_v0 = vpop.permute.xlu1 %7379  ;;  %7566 = vst.msk [vmem:[#allocation5 + $0x20] sm:$0xff] %vm7561_vm6, %v7378_v59  ;;  %9673 = vmatprep.mubr.msk.f32.mxu1 %vm8084_vm8, %v8013_v33  ;;  %v8014_v48 = vld [vmem:[#allocation5 + $0x18] sm:$0xff] }
 0x89c   :  { %7567 = vst.msk [vmem:[#allocation5 + $0x28] sm:$0xff] %vm7561_vm6, %v7380_v0  ;;  %7032 = vrot.lane.b32.xlu0 %v6880_v8, %s9815_s0  ;;  %9674 = vmatmul.mubr.msk.f32.vlgmr.msra.gmra.mxu1 %vm8084_vm8, %v8014_v48  ;;  %v6890_v8 = vld [vmem:[#allocation4 + $0x1f8] sm:$0xff] }
 0x89d   :  { %7034 = vrot.lane.b32.xlu1 %v6881_v5, %s9815_s0  ;;  %v6891_v5 = vld [vmem:[#allocation4 + $0x200] sm:$0xff] }
 0x89e   :  { %v7763_v53 = vpop.permute.xlu0 %7762 }
 0x89f   :  { %v7765_v32 = vpop.permute.xlu1 %7764  ;;  %7951 = vst.msk [vmem:[#allocation5 + $0x20] sm:$0xff] %vm7946_vm7, %v7763_v53  ;;  %v7275_v53 = vld [vmem:[#allocation4 + $0x1f9] sm:$0xff] }
 0x8a0   :  { %7952 = vst.msk [vmem:[#allocation5 + $0x28] sm:$0xff] %vm7946_vm7, %v7765_v32  ;;  %7417 = vrot.lane.b32.xlu0 %v7265_v30, %s9816_s23  ;;  %v7276_v32 = vld [vmem:[#allocation4 + $0x201] sm:$0xff] }
 0x8a1   :  { %7419 = vrot.lane.b32.xlu1 %v7266_v3, %s9816_s23 }
 0x8a2   :  { %v6997_v61 = vpop.permute.xlu0 %6996 }
 0x8a3   :  { %v6999_v40 = vpop.permute.xlu1 %6998  ;;  %7183 = vst.msk [vmem:[#allocation5 + $0x30] sm:$0xff] %vm7176_vm5, %v6997_v61  ;;  %v7660_v61 = vld [vmem:[#allocation4 + $0x1fa] sm:$0xff] }
 0x8a4   :  { %7184 = vst.msk [vmem:[#allocation5 + $0x38] sm:$0xff] %vm7176_vm5, %v6999_v40  ;;  %7802 = vrot.lane.b32.xlu0 %v13868_v24, %s9817_s30  ;;  %v7661_v40 = vld [vmem:[#allocation4 + $0x202] sm:$0xff] }
 0x8a5   :  { %7804 = vrot.lane.b32.xlu1 %v13871_v2, %s9817_s30 }
 0x8a6   :  { %v7382_v62 = vpop.permute.xlu0 %7381  ;;  %v8015_v54 = vld [vmem:[#allocation5 + $0x20] sm:$0xff] }
 0x8a7   :  { %v7384_v58 = vpop.permute.xlu1 %7383  ;;  %7568 = vst.msk [vmem:[#allocation5 + $0x30] sm:$0xff] %vm7561_vm6, %v7382_v62  ;;  %9676 = vmatprep.mubr.msk.f32.mxu1 %vm8084_vm8, %v8015_v54  ;;  %v8016_v45 = vld [vmem:[#allocation5 + $0x28] sm:$0xff] }
 0x8a8   :  { %7569 = vst.msk [vmem:[#allocation5 + $0x38] sm:$0xff] %vm7561_vm6, %v7384_v58  ;;  %7036 = vrot.lane.b32.xlu0 %v6882_v27, %s9815_s0  ;;  %9677 = vmatmul.mubr.msk.f32.gmra.mxu1 %vm8084_vm8, %v8016_v45  ;;  %v6892_v27 = vld [vmem:[#allocation4 + $0x210] sm:$0xff] }
 0x8a9   :  { %7038 = vrot.lane.b32.xlu1 %v6883_v46, %s9815_s0  ;;  %v6893_v46 = vld [vmem:[#allocation4 + $0x218] sm:$0xff] }
 0x8aa   :  { %v7767_v24 = vpop.permute.xlu0 %7766 }
 0x8ab   :  { %v7769_v2 = vpop.permute.xlu1 %7768  ;;  %7953 = vst.msk [vmem:[#allocation5 + $0x30] sm:$0xff] %vm7946_vm7, %v7767_v24 }
 0x8ac   :  { %7954 = vst.msk [vmem:[#allocation5 + $0x38] sm:$0xff] %vm7946_vm7, %v7769_v2  ;;  %7421 = vrot.lane.b32.xlu0 %v7267_v55, %s9816_s23  ;;  %v7277_v55 = vld [vmem:[#allocation4 + $0x211] sm:$0xff] }
 0x8ad   :  { %7423 = vrot.lane.b32.xlu1 %v7268_v35, %s9816_s23  ;;  %v7278_v35 = vld [vmem:[#allocation4 + $0x219] sm:$0xff] }
 0x8ae   :  { %v7001_v17 = vpop.permute.xlu0 %7000 }
 0x8af   :  { %v7003_v10 = vpop.permute.xlu1 %7002  ;;  %7185 = vst.msk [vmem:[#allocation5 + $0x40] sm:$0xff] %vm7176_vm5, %v7001_v17 }
 0x8b0   :  { %7186 = vst.msk [vmem:[#allocation5 + $0x48] sm:$0xff] %vm7176_vm5, %v7003_v10  ;;  %7806 = vrot.lane.b32.xlu0 %v13878_v38, %s9817_s30 }
 0x8b1   :  { %7808 = vrot.lane.b32.xlu1 %v13881_v31, %s9817_s30 }
 0x8b2   :  { %v7386_v52 = vpop.permute.xlu0 %7385  ;;  %v8017_v63 = vld [vmem:[#allocation5 + $0x30] sm:$0xff] }
 0x8b3   :  { %v7388_v11 = vpop.permute.xlu1 %7387  ;;  %7570 = vst.msk [vmem:[#allocation5 + $0x40] sm:$0xff] %vm7561_vm6, %v7386_v52  ;;  %9679 = vmatprep.mubr.msk.f32.mxu1 %vm8084_vm8, %v8017_v63  ;;  %v8018_v15 = vld [vmem:[#allocation5 + $0x38] sm:$0xff] }
 0x8b4   :  { %7571 = vst.msk [vmem:[#allocation5 + $0x48] sm:$0xff] %vm7561_vm6, %v7388_v11  ;;  %7040 = vrot.lane.b32.xlu0 %v6884_v56, %s9815_s0  ;;  %9680 = vmatmul.mubr.msk.f32.gmra.mxu1 %vm8084_vm8, %v8018_v15  ;;  %v6508_v52 = vld [vmem:[#allocation4 + $0x212] sm:$0xff]  ;;  %v6509_v15 = vld [vmem:[#allocation4 + $0x21a] sm:$0xff] }
 0x8b5   :  { %7042 = vrot.lane.b32.xlu1 %v6885_v7, %s9815_s0 }
 0x8b6   :  { %v7771_v38 = vpop.permute.xlu0 %7770 }
 0x8b7   :  { %v7773_v31 = vpop.permute.xlu1 %7772  ;;  %7955 = vst.msk [vmem:[#allocation5 + $0x40] sm:$0xff] %vm7946_vm7, %v7771_v38 }
 0x8b8   :  { %7956 = vst.msk [vmem:[#allocation5 + $0x48] sm:$0xff] %vm7946_vm7, %v7773_v31  ;;  %7425 = vrot.lane.b32.xlu0 %v7269_v43, %s9816_s23  ;;  %v6894_v43 = vld [vmem:[#allocation4 + $0x228] sm:$0xff] }
 0x8b9   :  { %7427 = vrot.lane.b32.xlu1 %v7270_v20, %s9816_s23  ;;  %v6895_v20 = vld [vmem:[#allocation4 + $0x230] sm:$0xff] }
 0x8ba   :  { %v7005_v21 = vpop.permute.xlu0 %7004 }
 0x8bb   :  { %v7007_v14 = vpop.permute.xlu1 %7006  ;;  %7187 = vst.msk [vmem:[#allocation5 + $0x50] sm:$0xff] %vm7176_vm5, %v7005_v21 }
 0x8bc   :  { %7188 = vst.msk [vmem:[#allocation5 + $0x58] sm:$0xff] %vm7176_vm5, %v7007_v14  ;;  %7810 = vrot.lane.b32.xlu0 %v13888_v39, %s9817_s30  ;;  %v7271_v39 = vld [vmem:[#allocation4 + $0x199] sm:$0xff] }
 0x8bd   :  { %7812 = vrot.lane.b32.xlu1 %v13891_v1, %s9817_s30 }
 0x8be   :  { %v7390_v29 = vpop.permute.xlu0 %7389  ;;  %v8019_v36 = vld [vmem:[#allocation5 + $0x40] sm:$0xff] }
 0x8bf   :  { %v7392_v44 = vpop.permute.xlu1 %7391  ;;  %7572 = vst.msk [vmem:[#allocation5 + $0x50] sm:$0xff] %vm7561_vm6, %v7390_v29  ;;  %9682 = vmatprep.mubr.msk.f32.mxu1 %vm8084_vm8, %v8019_v36  ;;  %v8020_v60 = vld [vmem:[#allocation5 + $0x48] sm:$0xff]  ;;  %v7280_v29 = vld [vmem:[#allocation4 + $0x231] sm:$0xff] }
 0x8c0   :  { %7573 = vst.msk [vmem:[#allocation5 + $0x58] sm:$0xff] %vm7561_vm6, %v7392_v44  ;;  %7044 = vrot.lane.b32.xlu0 %v6886_v25, %s9815_s0  ;;  %9683 = vmatmul.mubr.msk.f32.gmra.mxu1 %vm8084_vm8, %v8020_v60  ;;  %v7279_v25 = vld [vmem:[#allocation4 + $0x229] sm:$0xff] }
 0x8c1   :  { %7046 = vrot.lane.b32.xlu1 %v6887_v51, %s9815_s0  ;;  %v6510_v60 = vld [vmem:[#allocation4 + $0x22a] sm:$0xff] }
 0x8c2   :  { %v7775_v1 = vpop.permute.xlu0 %7774 }
 0x8c3   :  { %v7777_v13 = vpop.permute.xlu1 %7776  ;;  %7957 = vst.msk [vmem:[#allocation5 + $0x50] sm:$0xff] %vm7946_vm7, %v7775_v1 }
 0x8c4   :  { %7958 = vst.msk [vmem:[#allocation5 + $0x58] sm:$0xff] %vm7946_vm7, %v7777_v13  ;;  %7429 = vrot.lane.b32.xlu0 %v7271_v39, %s9816_s23  ;;  %v6511_v13 = vld [vmem:[#allocation4 + $0x232] sm:$0xff] }
 0x8c5   :  { %7431 = vrot.lane.b32.xlu1 %v7272_v19, %s9816_s23 }
 0x8c6   :  { %v7009_v47 = vpop.permute.xlu0 %7008 }
 0x8c7   :  { %v7011_v57 = vpop.permute.xlu1 %7010  ;;  %7189 = vst.msk [vmem:[#allocation5 + $0x60] sm:$0xff] %vm7176_vm5, %v7009_v47 }
 0x8c8   :  { %7190 = vst.msk [vmem:[#allocation5 + $0x68] sm:$0xff] %vm7176_vm5, %v7011_v57  ;;  %7814 = vrot.lane.b32.xlu0 %v7656_v12, %s9817_s30  ;;  %v6897_v57 = vld [vmem:[#allocation4 + $0x248] sm:$0xff] }
 0x8c9   :  { %7816 = vrot.lane.b32.xlu1 %v7657_v41, %s9817_s30  ;;  %v6896_v41 = vld [vmem:[#allocation4 + $0x240] sm:$0xff] }
 0x8ca   :  { %v7394_v34 = vpop.permute.xlu0 %7393  ;;  %v8021_v49 = vld [vmem:[#allocation5 + $0x50] sm:$0xff] }
 0x8cb   :  { %v7396_v50 = vpop.permute.xlu1 %7395  ;;  %7574 = vst.msk [vmem:[#allocation5 + $0x60] sm:$0xff] %vm7561_vm6, %v7394_v34  ;;  %9685 = vmatprep.mubr.msk.f32.mxu1 %vm8084_vm8, %v8021_v49  ;;  %v8022_v26 = vld [vmem:[#allocation5 + $0x58] sm:$0xff] }
 0x8cc   :  { %7575 = vst.msk [vmem:[#allocation5 + $0x68] sm:$0xff] %vm7561_vm6, %v7396_v50  ;;  %7048 = vrot.lane.b32.xlu0 %v6888_v23, %s9815_s0  ;;  %9686 = vmatmul.mubr.msk.f32.gmra.mxu1 %vm8084_vm8, %v8022_v26  ;;  %v7281_v23 = vld [vmem:[#allocation4 + $0x241] sm:$0xff] }
 0x8cd   :  { %7050 = vrot.lane.b32.xlu1 %v6889_v28, %s9815_s0  ;;  %v7282_v28 = vld [vmem:[#allocation4 + $0x249] sm:$0xff] }
 0x8ce   :  { %v7779_v16 = vpop.permute.xlu0 %7778 }
 0x8cf   :  { %v7781_v37 = vpop.permute.xlu1 %7780  ;;  %7959 = vst.msk [vmem:[#allocation5 + $0x60] sm:$0xff] %vm7946_vm7, %v7779_v16 }
 0x8d0   :  { %7960 = vst.msk [vmem:[#allocation5 + $0x68] sm:$0xff] %vm7946_vm7, %v7781_v37  ;;  %7433 = vrot.lane.b32.xlu0 %v7273_v9, %s9816_s23  ;;  %v6512_v9 = vld [vmem:[#allocation4 + $0x242] sm:$0xff] }
 0x8d1   :  { %7435 = vrot.lane.b32.xlu1 %v7274_v42, %s9816_s23 }
 0x8d2   :  { %v7013_v22 = vpop.permute.xlu0 %7012 }
 0x8d3   :  { %v7015_v4 = vpop.permute.xlu1 %7014  ;;  %7191 = vst.msk [vmem:[#allocation5 + $0x70] sm:$0xff] %vm7176_vm5, %v7013_v22 }
 0x8d4   :  { %7192 = vst.msk [vmem:[#allocation5 + $0x78] sm:$0xff] %vm7176_vm5, %v7015_v4  ;;  %7818 = vrot.lane.b32.xlu0 %v13902_v6, %s9817_s30  ;;  %v6513_v4 = vld [vmem:[#allocation4 + $0x24a] sm:$0xff] }
 0x8d5   :  { %7820 = vrot.lane.b32.xlu1 %v13905_v18, %s9817_s30 }
 0x8d6   :  { %v7398_v59 = vpop.permute.xlu0 %7397  ;;  %v8023_v33 = vld [vmem:[#allocation5 + $0x60] sm:$0xff] }
 0x8d7   :  { %v7400_v0 = vpop.permute.xlu1 %7399  ;;  %7576 = vst.msk [vmem:[#allocation5 + $0x70] sm:$0xff] %vm7561_vm6, %v7398_v59  ;;  %9688 = vmatprep.mubr.msk.f32.mxu1 %vm8084_vm8, %v8023_v33  ;;  %v8024_v48 = vld [vmem:[#allocation5 + $0x68] sm:$0xff] }
 0x8d8   :  { %7577 = vst.msk [vmem:[#allocation5 + $0x78] sm:$0xff] %vm7561_vm6, %v7400_v0  ;;  %7052 = vrot.lane.b32.xlu0 %v6890_v8, %s9815_s0  ;;  %9689 = vmatmul.mubr.msk.f32.gmra.mxu1 %vm8084_vm8, %v8024_v48  ;;  %v6898_v8 = vld [vmem:[#allocation4 + $0x258] sm:$0xff] }
 0x8d9   :  { %7054 = vrot.lane.b32.xlu1 %v6891_v5, %s9815_s0  ;;  %v6899_v5 = vld [vmem:[#allocation4 + $0x260] sm:$0xff] }
 0x8da   :  { %v7783_v6 = vpop.permute.xlu0 %7782 }
 0x8db   :  { %v7785_v18 = vpop.permute.xlu1 %7784  ;;  %7961 = vst.msk [vmem:[#allocation5 + $0x70] sm:$0xff] %vm7946_vm7, %v7783_v6 }
 0x8dc   :  { %7962 = vst.msk [vmem:[#allocation5 + $0x78] sm:$0xff] %vm7946_vm7, %v7785_v18  ;;  %7437 = vrot.lane.b32.xlu0 %v7275_v53, %s9816_s23  ;;  %v7283_v53 = vld [vmem:[#allocation4 + $0x259] sm:$0xff] }
 0x8dd   :  { %7439 = vrot.lane.b32.xlu1 %v7276_v32, %s9816_s23  ;;  %v7284_v32 = vld [vmem:[#allocation4 + $0x261] sm:$0xff] }
 0x8de   :  { %v7017_v30 = vpop.permute.xlu0 %7016 }
 0x8df   :  { %v7019_v3 = vpop.permute.xlu1 %7018  ;;  %7193 = vst.msk [vmem:[#allocation5 + $0x80] sm:$0xff] %vm7176_vm5, %v7017_v30 }
 0x8e0   :  { %7194 = vst.msk [vmem:[#allocation5 + $0x88] sm:$0xff] %vm7176_vm5, %v7019_v3  ;;  %7822 = vrot.lane.b32.xlu0 %v7660_v61, %s9817_s30  ;;  %v6514_v61 = vld [vmem:[#allocation4 + $0x25a] sm:$0xff] }
 0x8e1   :  { %7824 = vrot.lane.b32.xlu1 %v7661_v40, %s9817_s30 }
 0x8e2   :  { %v7402_v62 = vpop.permute.xlu0 %7401  ;;  %v8025_v54 = vld [vmem:[#allocation5 + $0x70] sm:$0xff] }
 0x8e3   :  { %v7404_v58 = vpop.permute.xlu1 %7403  ;;  %7578 = vst.msk [vmem:[#allocation5 + $0x80] sm:$0xff] %vm7561_vm6, %v7402_v62  ;;  %9691 = vmatprep.mubr.msk.f32.mxu1 %vm8084_vm8, %v8025_v54  ;;  %v8026_v45 = vld [vmem:[#allocation5 + $0x78] sm:$0xff] }
 0x8e4   :  { %7579 = vst.msk [vmem:[#allocation5 + $0x88] sm:$0xff] %vm7561_vm6, %v7404_v58  ;;  %7056 = vrot.lane.b32.xlu0 %v6892_v27, %s9815_s0  ;;  %9692 = vmatmul.mubr.msk.f32.gmra.mxu1 %vm8084_vm8, %v8026_v45  ;;  %v6515_v58 = vld [vmem:[#allocation4 + $0x262] sm:$0xff] }
 0x8e5   :  { %7058 = vrot.lane.b32.xlu1 %v6893_v46, %s9815_s0 }
 0x8e6   :  { %v7787_v24 = vpop.permute.xlu0 %7786 }
 0x8e7   :  { %v7789_v2 = vpop.permute.xlu1 %7788  ;;  %7963 = vst.msk [vmem:[#allocation5 + $0x80] sm:$0xff] %vm7946_vm7, %v7787_v24  ;;  %v6900_v24 = vld [vmem:[#allocation4 + $0x270] sm:$0xff] }
 0x8e8   :  { %7964 = vst.msk [vmem:[#allocation5 + $0x88] sm:$0xff] %vm7946_vm7, %v7789_v2  ;;  %7441 = vrot.lane.b32.xlu0 %v7277_v55, %s9816_s23  ;;  %v6901_v2 = vld [vmem:[#allocation4 + $0x278] sm:$0xff] }
 0x8e9   :  { %7443 = vrot.lane.b32.xlu1 %v7278_v35, %s9816_s23 }
 0x8ea   :  { %v7021_v17 = vpop.permute.xlu0 %7020 }
 0x8eb   :  { %v7023_v10 = vpop.permute.xlu1 %7022  ;;  %7195 = vst.msk [vmem:[#allocation5 + $0x90] sm:$0xff] %vm7176_vm5, %v7021_v17  ;;  %v7285_v17 = vld [vmem:[#allocation4 + $0x271] sm:$0xff] }
 0x8ec   :  { %7196 = vst.msk [vmem:[#allocation5 + $0x98] sm:$0xff] %vm7176_vm5, %v7023_v10  ;;  %7826 = vrot.lane.b32.xlu0 %v6508_v52, %s9817_s30  ;;  %v7286_v10 = vld [vmem:[#allocation4 + $0x279] sm:$0xff] }
 0x8ed   :  { %6674 = vrot.lane.b32.xlu1 %v6508_v52, %s9814_s2 }
 0x8ee   :  { %v7406_v63 = vpop.permute.xlu0 %7405  ;;  %v8027_v11 = vld [vmem:[#allocation5 + $0x80] sm:$0xff] }
 0x8ef   :  { %v7408_v56 = vpop.permute.xlu1 %7407  ;;  %7580 = vst.msk [vmem:[#allocation5 + $0x90] sm:$0xff] %vm7561_vm6, %v7406_v63  ;;  %9694 = vmatprep.mubr.msk.f32.mxu1 %vm8084_vm8, %v8027_v11  ;;  %v8028_v7 = vld [vmem:[#allocation5 + $0x88] sm:$0xff] }
 0x8f0   :  { %7581 = vst.msk [vmem:[#allocation5 + $0x98] sm:$0xff] %vm7561_vm6, %v7408_v56  ;;  %7828 = vrot.lane.b32.xlu0 %v6509_v15, %s9817_s30  ;;  %9695 = vmatmul.mubr.msk.f32.gmra.mxu1 %vm8084_vm8, %v8028_v7  ;;  %v6516_v56 = vld [vmem:[#allocation4 + $0x272] sm:$0xff] }
 0x8f1   :  { %6676 = vrot.lane.b32.xlu1 %v6509_v15, %s9814_s2 }
 0x8f2   :  { %v7791_v38 = vpop.permute.xlu0 %7790 }
 0x8f3   :  { %v7793_v31 = vpop.permute.xlu1 %7792  ;;  %7965 = vst.msk [vmem:[#allocation5 + $0x90] sm:$0xff] %vm7946_vm7, %v7791_v38 }
 0x8f4   :  { %7966 = vst.msk [vmem:[#allocation5 + $0x98] sm:$0xff] %vm7946_vm7, %v7793_v31  ;;  %7060 = vrot.lane.b32.xlu0 %v6894_v43, %s9815_s0  ;;  %v6517_v31 = vld [vmem:[#allocation4 + $0x27a] sm:$0xff] }
 0x8f5   :  { %7062 = vrot.lane.b32.xlu1 %v6895_v20, %s9815_s0 }
 0x8f6   :  { %v7025_v21 = vpop.permute.xlu0 %7024 }
 0x8f7   :  { %v7027_v14 = vpop.permute.xlu1 %7026  ;;  %7197 = vst.msk [vmem:[#allocation5 + $0xa0] sm:$0xff] %vm7176_vm5, %v7025_v21  ;;  %v6902_v21 = vld [vmem:[#allocation4 + $0x288] sm:$0xff] }
 0x8f8   :  { %7198 = vst.msk [vmem:[#allocation5 + $0xa8] sm:$0xff] %vm7176_vm5, %v7027_v14  ;;  %7445 = vrot.lane.b32.xlu0 %v7279_v25, %s9816_s23  ;;  %v6903_v14 = vld [vmem:[#allocation4 + $0x290] sm:$0xff] }
 0x8f9   :  { %7447 = vrot.lane.b32.xlu1 %v7280_v29, %s9816_s23 }
 0x8fa   :  { %v7410_v36 = vpop.permute.xlu0 %7409  ;;  %v8029_v51 = vld [vmem:[#allocation5 + $0x90] sm:$0xff] }
 0x8fb   :  { %v7412_v44 = vpop.permute.xlu1 %7411  ;;  %7582 = vst.msk [vmem:[#allocation5 + $0xa0] sm:$0xff] %vm7561_vm6, %v7410_v36  ;;  %9697 = vmatprep.mubr.msk.f32.mxu1 %vm8084_vm8, %v8029_v51  ;;  %v8030_v39 = vld [vmem:[#allocation5 + $0x98] sm:$0xff]  ;;  %v7287_v51 = vld [vmem:[#allocation4 + $0x289] sm:$0xff] }
 0x8fc   :  { %7583 = vst.msk [vmem:[#allocation5 + $0xa8] sm:$0xff] %vm7561_vm6, %v7412_v44  ;;  %7830 = vrot.lane.b32.xlu0 %v6510_v60, %s9817_s30  ;;  %9698 = vmatmul.mubr.msk.f32.gmra.mxu1 %vm8084_vm8, %v8030_v39 }
 0x8fd   :  { %6678 = vrot.lane.b32.xlu1 %v6510_v60, %s9814_s2  ;;  %v7288_v60 = vld [vmem:[#allocation4 + $0x291] sm:$0xff] }
 0x8fe   :  { %v7795_v1 = vpop.permute.xlu0 %7794 }
 0x8ff   :  { %v7797_v19 = vpop.permute.xlu1 %7796  ;;  %7967 = vst.msk [vmem:[#allocation5 + $0xa0] sm:$0xff] %vm7946_vm7, %v7795_v1 }
 0x900   :  { %7968 = vst.msk [vmem:[#allocation5 + $0xa8] sm:$0xff] %vm7946_vm7, %v7797_v19  ;;  %7832 = vrot.lane.b32.xlu0 %v6511_v13, %s9817_s30  ;;  %v6518_v19 = vld [vmem:[#allocation4 + $0x28a] sm:$0xff] }
 0x901   :  { %6680 = vrot.lane.b32.xlu1 %v6511_v13, %s9814_s2 }
 0x902   :  { %v7029_v12 = vpop.permute.xlu0 %7028 }
 0x903   :  { %v7031_v47 = vpop.permute.xlu1 %7030  ;;  %7199 = vst.msk [vmem:[#allocation5 + $0xb0] sm:$0xff] %vm7176_vm5, %v7029_v12 }
 0x904   :  { %7200 = vst.msk [vmem:[#allocation5 + $0xb8] sm:$0xff] %vm7176_vm5, %v7031_v47  ;;  %7064 = vrot.lane.b32.xlu0 %v6896_v41, %s9815_s0  ;;  %v6519_v47 = vld [vmem:[#allocation4 + $0x292] sm:$0xff] }
 0x905   :  { %7066 = vrot.lane.b32.xlu1 %v6897_v57, %s9815_s0 }
 0x906   :  { %v7414_v34 = vpop.permute.xlu0 %7413  ;;  %v8031_v49 = vld [vmem:[#allocation5 + $0xa0] sm:$0xff] }
 0x907   :  { %v7416_v50 = vpop.permute.xlu1 %7415  ;;  %7584 = vst.msk [vmem:[#allocation5 + $0xb0] sm:$0xff] %vm7561_vm6, %v7414_v34  ;;  %9700 = vmatprep.mubr.msk.f32.mxu1 %vm8084_vm8, %v8031_v49  ;;  %v8032_v26 = vld [vmem:[#allocation5 + $0xa8] sm:$0xff]  ;;  %v6904_v49 = vld [vmem:[#allocation4 + $0x2a0] sm:$0xff] }
 0x908   :  { %7585 = vst.msk [vmem:[#allocation5 + $0xb8] sm:$0xff] %vm7561_vm6, %v7416_v50  ;;  %7449 = vrot.lane.b32.xlu0 %v7281_v23, %s9816_s23  ;;  %9701 = vmatmul.mubr.msk.f32.gmra.mxu1 %vm8084_vm8, %v8032_v26  ;;  %v6905_v23 = vld [vmem:[#allocation4 + $0x2a8] sm:$0xff] }
 0x909   :  { %7451 = vrot.lane.b32.xlu1 %v7282_v28, %s9816_s23 }
 0x90a   :  { %v7799_v16 = vpop.permute.xlu0 %7798 }
 0x90b   :  { %v7801_v37 = vpop.permute.xlu1 %7800  ;;  %7969 = vst.msk [vmem:[#allocation5 + $0xb0] sm:$0xff] %vm7946_vm7, %v7799_v16  ;;  %v7289_v16 = vld [vmem:[#allocation4 + $0x2a1] sm:$0xff] }
 0x90c   :  { %7970 = vst.msk [vmem:[#allocation5 + $0xb8] sm:$0xff] %vm7946_vm7, %v7801_v37  ;;  %7834 = vrot.lane.b32.xlu0 %v6512_v9, %s9817_s30  ;;  %v7290_v37 = vld [vmem:[#allocation4 + $0x2a9] sm:$0xff] }
 0x90d   :  { %6682 = vrot.lane.b32.xlu1 %v6512_v9, %s9814_s2 }
 0x90e   :  { %v7033_v42 = vpop.permute.xlu0 %7032 }
 0x90f   :  { %v7035_v22 = vpop.permute.xlu1 %7034  ;;  %7201 = vst.msk [vmem:[#allocation5 + $0xc0] sm:$0xff] %vm7176_vm5, %v7033_v42 }
 0x910   :  { %7202 = vst.msk [vmem:[#allocation5 + $0xc8] sm:$0xff] %vm7176_vm5, %v7035_v22  ;;  %7836 = vrot.lane.b32.xlu0 %v6513_v4, %s9817_s30  ;;  %v6520_v22 = vld [vmem:[#allocation4 + $0x2a2] sm:$0xff] }
 0x911   :  { %6684 = vrot.lane.b32.xlu1 %v6513_v4, %s9814_s2 }
 0x912   :  { %v7418_v59 = vpop.permute.xlu0 %7417  ;;  %v8033_v33 = vld [vmem:[#allocation5 + $0xb0] sm:$0xff] }
 0x913   :  { %v7420_v0 = vpop.permute.xlu1 %7419  ;;  %7586 = vst.msk [vmem:[#allocation5 + $0xc0] sm:$0xff] %vm7561_vm6, %v7418_v59  ;;  %9703 = vmatprep.mubr.msk.f32.mxu1 %vm8084_vm8, %v8033_v33  ;;  %v8034_v48 = vld [vmem:[#allocation5 + $0xb8] sm:$0xff] }
 0x914   :  { %7587 = vst.msk [vmem:[#allocation5 + $0xc8] sm:$0xff] %vm7561_vm6, %v7420_v0  ;;  %7068 = vrot.lane.b32.xlu0 %v6898_v8, %s9815_s0  ;;  %9704 = vmatmul.mubr.msk.f32.gmra.mxu1 %vm8084_vm8, %v8034_v48  ;;  %v6521_v0 = vld [vmem:[#allocation4 + $0x2aa] sm:$0xff] }
 0x915   :  { %7070 = vrot.lane.b32.xlu1 %v6899_v5, %s9815_s0 }
 0x916   :  { %v7803_v6 = vpop.permute.xlu0 %7802 }
 0x917   :  { %v7805_v18 = vpop.permute.xlu1 %7804  ;;  %7971 = vst.msk [vmem:[#allocation5 + $0xc0] sm:$0xff] %vm7946_vm7, %v7803_v6  ;;  %v6906_v6 = vld [vmem:[#allocation4 + $0x2b8] sm:$0xff] }
 0x918   :  { %7972 = vst.msk [vmem:[#allocation5 + $0xc8] sm:$0xff] %vm7946_vm7, %v7805_v18  ;;  %7453 = vrot.lane.b32.xlu0 %v7283_v53, %s9816_s23  ;;  %v6907_v18 = vld [vmem:[#allocation4 + $0x2c0] sm:$0xff] }
 0x919   :  { %7455 = vrot.lane.b32.xlu1 %v7284_v32, %s9816_s23 }
 0x91a   :  { %v7037_v30 = vpop.permute.xlu0 %7036 }
 0x91b   :  { %v7039_v3 = vpop.permute.xlu1 %7038  ;;  %7203 = vst.msk [vmem:[#allocation5 + $0xd0] sm:$0xff] %vm7176_vm5, %v7037_v30  ;;  %v7291_v30 = vld [vmem:[#allocation4 + $0x2b9] sm:$0xff] }
 0x91c   :  { %7204 = vst.msk [vmem:[#allocation5 + $0xd8] sm:$0xff] %vm7176_vm5, %v7039_v3  ;;  %7838 = vrot.lane.b32.xlu0 %v6514_v61, %s9817_s30  ;;  %v7292_v3 = vld [vmem:[#allocation4 + $0x2c1] sm:$0xff] }
 0x91d   :  { %6686 = vrot.lane.b32.xlu1 %v6514_v61, %s9814_s2 }
 0x91e   :  { %v7422_v40 = vpop.permute.xlu0 %7421  ;;  %v8035_v62 = vld [vmem:[#allocation5 + $0xc0] sm:$0xff] }
 0x91f   :  { %v7424_v54 = vpop.permute.xlu1 %7423  ;;  %7588 = vst.msk [vmem:[#allocation5 + $0xd0] sm:$0xff] %vm7561_vm6, %v7422_v40  ;;  %9706 = vmatprep.mubr.msk.f32.mxu1 %vm8084_vm8, %v8035_v62  ;;  %v8036_v27 = vld [vmem:[#allocation5 + $0xc8] sm:$0xff] }
 0x920   :  { %7589 = vst.msk [vmem:[#allocation5 + $0xd8] sm:$0xff] %vm7561_vm6, %v7424_v54  ;;  %7840 = vrot.lane.b32.xlu0 %v6515_v58, %s9817_s30  ;;  %9707 = vmatmul.mubr.msk.f32.gmra.mxu1 %vm8084_vm8, %v8036_v27  ;;  %v6522_v54 = vld [vmem:[#allocation4 + $0x2ba] sm:$0xff] }
 0x921   :  { %6688 = vrot.lane.b32.xlu1 %v6515_v58, %s9814_s2 }
 0x922   :  { %v7807_v45 = vpop.permute.xlu0 %7806 }
 0x923   :  { %v7809_v46 = vpop.permute.xlu1 %7808  ;;  %7973 = vst.msk [vmem:[#allocation5 + $0xd0] sm:$0xff] %vm7946_vm7, %v7807_v45 }
 0x924   :  { %7974 = vst.msk [vmem:[#allocation5 + $0xd8] sm:$0xff] %vm7946_vm7, %v7809_v46  ;;  %7072 = vrot.lane.b32.xlu0 %v6900_v24, %s9815_s0  ;;  %v6523_v46 = vld [vmem:[#allocation4 + $0x2c2] sm:$0xff] }
 0x925   :  { %7074 = vrot.lane.b32.xlu1 %v6901_v2, %s9815_s0 }
 0x926   :  { %v7041_v55 = vpop.permute.xlu0 %7040 }
 0x927   :  { %v7043_v35 = vpop.permute.xlu1 %7042  ;;  %7205 = vst.msk [vmem:[#allocation5 + $0xe0] sm:$0xff] %vm7176_vm5, %v7041_v55  ;;  %v6908_v55 = vld [vmem:[#allocation4 + $0x2d0] sm:$0xff] }
 0x928   :  { %7206 = vst.msk [vmem:[#allocation5 + $0xe8] sm:$0xff] %vm7176_vm5, %v7043_v35  ;;  %7457 = vrot.lane.b32.xlu0 %v7285_v17, %s9816_s23  ;;  %v6909_v35 = vld [vmem:[#allocation4 + $0x2d8] sm:$0xff] }
 0x929   :  { %7459 = vrot.lane.b32.xlu1 %v7286_v10, %s9816_s23 }
 0x92a   :  { %v7426_v52 = vpop.permute.xlu0 %7425  ;;  %v8037_v63 = vld [vmem:[#allocation5 + $0xd0] sm:$0xff] }
 0x92b   :  { %v7428_v11 = vpop.permute.xlu1 %7427  ;;  %7590 = vst.msk [vmem:[#allocation5 + $0xe0] sm:$0xff] %vm7561_vm6, %v7426_v52  ;;  %9709 = vmatprep.mubr.msk.f32.mxu1 %vm8084_vm8, %v8037_v63  ;;  %v8038_v15 = vld [vmem:[#allocation5 + $0xd8] sm:$0xff] }
 0x92c   :  { %7591 = vst.msk [vmem:[#allocation5 + $0xe8] sm:$0xff] %vm7561_vm6, %v7428_v11  ;;  %7842 = vrot.lane.b32.xlu0 %v6516_v56, %s9817_s30  ;;  %9710 = vmatmul.mubr.msk.f32.gmra.mxu1 %vm8084_vm8, %v8038_v15  ;;  %v7293_v63 = vld [vmem:[#allocation4 + $0x2d1] sm:$0xff]  ;;  %v7294_v11 = vld [vmem:[#allocation4 + $0x2d9] sm:$0xff] }
 0x92d   :  { %6690 = vrot.lane.b32.xlu1 %v6516_v56, %s9814_s2 }
 0x92e   :  { %v7811_v7 = vpop.permute.xlu0 %7810 }
 0x92f   :  { %v7813_v38 = vpop.permute.xlu1 %7812  ;;  %7975 = vst.msk [vmem:[#allocation5 + $0xe0] sm:$0xff] %vm7946_vm7, %v7811_v7 }
 0x930   :  { %7976 = vst.msk [vmem:[#allocation5 + $0xe8] sm:$0xff] %vm7946_vm7, %v7813_v38  ;;  %7844 = vrot.lane.b32.xlu0 %v6517_v31, %s9817_s30  ;;  %v6524_v38 = vld [vmem:[#allocation4 + $0x2d2] sm:$0xff] }
 0x931   :  { %6692 = vrot.lane.b32.xlu1 %v6517_v31, %s9814_s2 }
 0x932   :  { %v7045_v43 = vpop.permute.xlu0 %7044 }
 0x933   :  { %v7047_v20 = vpop.permute.xlu1 %7046  ;;  %7207 = vst.msk [vmem:[#allocation5 + $0xf0] sm:$0xff] %vm7176_vm5, %v7045_v43 }
 0x934   :  { %7208 = vst.msk [vmem:[#allocation5 + $0xf8] sm:$0xff] %vm7176_vm5, %v7047_v20  ;;  %7076 = vrot.lane.b32.xlu0 %v6902_v21, %s9815_s0  ;;  %v6525_v20 = vld [vmem:[#allocation4 + $0x2da] sm:$0xff] }
 0x935   :  { %7078 = vrot.lane.b32.xlu1 %v6903_v14, %s9815_s0 }
 0x936   :  { %v7430_v25 = vpop.permute.xlu0 %7429  ;;  %v8039_v29 = vld [vmem:[#allocation5 + $0xe0] sm:$0xff] }
 0x937   :  { %v7432_v36 = vpop.permute.xlu1 %7431  ;;  %7592 = vst.msk [vmem:[#allocation5 + $0xf0] sm:$0xff] %vm7561_vm6, %v7430_v25  ;;  %9712 = vmatprep.mubr.msk.f32.mxu1 %vm8084_vm8, %v8039_v29  ;;  %v8040_v44 = vld [vmem:[#allocation5 + $0xe8] sm:$0xff]  ;;  %v6911_v29 = vld [vmem:[#allocation4 + $0x2f0] sm:$0xff] }
 0x938   :  { %7593 = vst.msk [vmem:[#allocation5 + $0xf8] sm:$0xff] %vm7561_vm6, %v7432_v36  ;;  %7461 = vrot.lane.b32.xlu0 %v7287_v51, %s9816_s23  ;;  %9713 = vmatmul.mubr.msk.f32.gmra.mxu1 %vm8084_vm8, %v8040_v44  ;;  %v6910_v25 = vld [vmem:[#allocation4 + $0x2e8] sm:$0xff] }
 0x939   :  { %7463 = vrot.lane.b32.xlu1 %v7288_v60, %s9816_s23  ;;  %v7295_v60 = vld [vmem:[#allocation4 + $0x2e9] sm:$0xff] }
 0x93a   :  { %v7815_v39 = vpop.permute.xlu0 %7814 }
 0x93b   :  { %v7817_v1 = vpop.permute.xlu1 %7816  ;;  %7977 = vst.msk [vmem:[#allocation5 + $0xf0] sm:$0xff] %vm7946_vm7, %v7815_v39  ;;  %v7296_v39 = vld [vmem:[#allocation4 + $0x2f1] sm:$0xff] }
 0x93c   :  { %7978 = vst.msk [vmem:[#allocation5 + $0xf8] sm:$0xff] %vm7946_vm7, %v7817_v1  ;;  %7846 = vrot.lane.b32.xlu0 %v6518_v19, %s9817_s30 }
 0x93d   :  { %6694 = vrot.lane.b32.xlu1 %v6518_v19, %s9814_s2 }
 0x93e   :  { %v7049_v13 = vpop.permute.xlu0 %7048 }
 0x93f   :  { %v7051_v12 = vpop.permute.xlu1 %7050  ;;  %7209 = vst.msk [vmem:[#allocation5 + $0x100] sm:$0xff] %vm7176_vm5, %v7049_v13 }
 0x940   :  { %7210 = vst.msk [vmem:[#allocation5 + $0x108] sm:$0xff] %vm7176_vm5, %v7051_v12  ;;  %7848 = vrot.lane.b32.xlu0 %v6519_v47, %s9817_s30  ;;  %v6526_v12 = vld [vmem:[#allocation4 + $0x2ea] sm:$0xff] }
 0x941   :  { %6696 = vrot.lane.b32.xlu1 %v6519_v47, %s9814_s2 }
 0x942   :  { %v7434_v41 = vpop.permute.xlu0 %7433  ;;  %v8041_v57 = vld [vmem:[#allocation5 + $0xf0] sm:$0xff] }
 0x943   :  { %v7436_v34 = vpop.permute.xlu1 %7435  ;;  %7594 = vst.msk [vmem:[#allocation5 + $0x100] sm:$0xff] %vm7561_vm6, %v7434_v41  ;;  %9715 = vmatprep.mubr.msk.f32.mxu1 %vm8084_vm8, %v8041_v57  ;;  %v8042_v50 = vld [vmem:[#allocation5 + $0xf8] sm:$0xff] }
 0x944   :  { %7595 = vst.msk [vmem:[#allocation5 + $0x108] sm:$0xff] %vm7561_vm6, %v7436_v34  ;;  %7080 = vrot.lane.b32.xlu0 %v6904_v49, %s9815_s0  ;;  %9716 = vmatmul.mubr.msk.f32.gmra.mxu1 %vm8084_vm8, %v8042_v50  ;;  %v6527_v57 = vld [vmem:[#allocation4 + $0x2f2] sm:$0xff]  ;;  %v6912_v50 = vld [vmem:[#allocation4 + $0x300] sm:$0xff] }
 0x945   :  { %7082 = vrot.lane.b32.xlu1 %v6905_v23, %s9815_s0  ;;  %v6913_v23 = vld [vmem:[#allocation4 + $0x308] sm:$0xff] }
 0x946   :  { %v7819_v26 = vpop.permute.xlu0 %7818 }
 0x947   :  { %v7821_v28 = vpop.permute.xlu1 %7820  ;;  %7979 = vst.msk [vmem:[#allocation5 + $0x100] sm:$0xff] %vm7946_vm7, %v7819_v26 }
 0x948   :  { %7980 = vst.msk [vmem:[#allocation5 + $0x108] sm:$0xff] %vm7946_vm7, %v7821_v28  ;;  %7465 = vrot.lane.b32.xlu0 %v7289_v16, %s9816_s23 }
 0x949   :  { %7467 = vrot.lane.b32.xlu1 %v7290_v37, %s9816_s23  ;;  %v7297_v37 = vld [vmem:[#allocation4 + $0x301] sm:$0xff] }
 0x94a   :  { %v7053_v9 = vpop.permute.xlu0 %7052 }
 0x94b   :  { %v7055_v42 = vpop.permute.xlu1 %7054  ;;  %7211 = vst.msk [vmem:[#allocation5 + $0x110] sm:$0xff] %vm7176_vm5, %v7053_v9  ;;  %v7298_v9 = vld [vmem:[#allocation4 + $0x309] sm:$0xff] }
 0x94c   :  { %7212 = vst.msk [vmem:[#allocation5 + $0x118] sm:$0xff] %vm7176_vm5, %v7055_v42  ;;  %7850 = vrot.lane.b32.xlu0 %v6520_v22, %s9817_s30 }
 0x94d   :  { %6698 = vrot.lane.b32.xlu1 %v6520_v22, %s9814_s2 }
 0x94e   :  { %v7438_v4 = vpop.permute.xlu0 %7437  ;;  %v8043_v59 = vld [vmem:[#allocation5 + $0x100] sm:$0xff] }
 0x94f   :  { %v7440_v33 = vpop.permute.xlu1 %7439  ;;  %7596 = vst.msk [vmem:[#allocation5 + $0x110] sm:$0xff] %vm7561_vm6, %v7438_v4  ;;  %9718 = vmatprep.mubr.msk.f32.mxu1 %vm8084_vm8, %v8043_v59  ;;  %v8044_v8 = vld [vmem:[#allocation5 + $0x108] sm:$0xff] }
 0x950   :  { %7597 = vst.msk [vmem:[#allocation5 + $0x118] sm:$0xff] %vm7561_vm6, %v7440_v33  ;;  %7852 = vrot.lane.b32.xlu0 %v6521_v0, %s9817_s30  ;;  %9719 = vmatmul.mubr.msk.f32.gmra.mxu1 %vm8084_vm8, %v8044_v8  ;;  %v6528_v59 = vld [vmem:[#allocation4 + $0x302] sm:$0xff]  ;;  %v6529_v8 = vld [vmem:[#allocation4 + $0x30a] sm:$0xff] }
 0x951   :  { %6700 = vrot.lane.b32.xlu1 %v6521_v0, %s9814_s2 }
 0x952   :  { %v7823_v48 = vpop.permute.xlu0 %7822 }
 0x953   :  { %v7825_v5 = vpop.permute.xlu1 %7824  ;;  %7981 = vst.msk [vmem:[#allocation5 + $0x110] sm:$0xff] %vm7946_vm7, %v7823_v48 }
 0x954   :  { %7982 = vst.msk [vmem:[#allocation5 + $0x118] sm:$0xff] %vm7946_vm7, %v7825_v5  ;;  %7084 = vrot.lane.b32.xlu0 %v6906_v6, %s9815_s0  ;;  %v6914_v6 = vld [vmem:[#allocation4 + $0x318] sm:$0xff] }
 0x955   :  { %7086 = vrot.lane.b32.xlu1 %v6907_v18, %s9815_s0  ;;  %v6915_v18 = vld [vmem:[#allocation4 + $0x320] sm:$0xff] }
 0x956   :  { %v7057_v53 = vpop.permute.xlu0 %7056 }
 0x957   :  { %v7059_v32 = vpop.permute.xlu1 %7058  ;;  %7213 = vst.msk [vmem:[#allocation5 + $0x120] sm:$0xff] %vm7176_vm5, %v7057_v53 }
 0x958   :  { %7214 = vst.msk [vmem:[#allocation5 + $0x128] sm:$0xff] %vm7176_vm5, %v7059_v32  ;;  %7469 = vrot.lane.b32.xlu0 %v7291_v30, %s9816_s23 }
 0x959   :  { %7471 = vrot.lane.b32.xlu1 %v7292_v3, %s9816_s23  ;;  %v7299_v3 = vld [vmem:[#allocation4 + $0x319] sm:$0xff] }
 0x95a   :  { %v7442_v61 = vpop.permute.xlu0 %7441  ;;  %v8045_v40 = vld [vmem:[#allocation5 + $0x110] sm:$0xff] }
 0x95b   :  { %v7444_v62 = vpop.permute.xlu1 %7443  ;;  %7598 = vst.msk [vmem:[#allocation5 + $0x120] sm:$0xff] %vm7561_vm6, %v7442_v61  ;;  %9721 = vmatprep.mubr.msk.f32.mxu1 %vm8084_vm8, %v8045_v40  ;;  %v8046_v58 = vld [vmem:[#allocation5 + $0x118] sm:$0xff]  ;;  %v7300_v61 = vld [vmem:[#allocation4 + $0x321] sm:$0xff] }
 0x95c   :  { %7599 = vst.msk [vmem:[#allocation5 + $0x128] sm:$0xff] %vm7561_vm6, %v7444_v62  ;;  %7854 = vrot.lane.b32.xlu0 %v6522_v54, %s9817_s30  ;;  %9722 = vmatmul.mubr.msk.f32.gmra.mxu1 %vm8084_vm8, %v8046_v58  ;;  %v6530_v58 = vld [vmem:[#allocation4 + $0x31a] sm:$0xff] }
 0x95d   :  { %6702 = vrot.lane.b32.xlu1 %v6522_v54, %s9814_s2 }
 0x95e   :  { %v7827_v27 = vpop.permute.xlu0 %7826 }
 0x95f   :  { %v6675_v45 = vpop.permute.xlu1 %6674  ;;  %7983 = vst.msk [vmem:[#allocation5 + $0x120] sm:$0xff] %vm7946_vm7, %v7827_v27 }
 0x960   :  { %6829 = vst.msk [vmem:[#allocation5 + $0x130] sm:$0xff] %vm6790_vm4, %v6675_v45  ;;  %7856 = vrot.lane.b32.xlu0 %v6523_v46, %s9817_s30 }
 0x961   :  { %6704 = vrot.lane.b32.xlu1 %v6523_v46, %s9814_s2  ;;  %v6531_v46 = vld [vmem:[#allocation4 + $0x322] sm:$0xff] }
 0x962   :  { %v7829_v24 = vpop.permute.xlu0 %7828 }
 0x963   :  { %v6677_v2 = vpop.permute.xlu1 %6676  ;;  %7984 = vst.msk [vmem:[#allocation5 + $0x128] sm:$0xff] %vm7946_vm7, %v7829_v24 }
 0x964   :  { %6830 = vst.msk [vmem:[#allocation5 + $0x138] sm:$0xff] %vm6790_vm4, %v6677_v2  ;;  %7088 = vrot.lane.b32.xlu0 %v6908_v55, %s9815_s0  ;;  %v6916_v55 = vld [vmem:[#allocation4 + $0x330] sm:$0xff] }
 0x965   :  { %7090 = vrot.lane.b32.xlu1 %v6909_v35, %s9815_s0  ;;  %v6917_v35 = vld [vmem:[#allocation4 + $0x338] sm:$0xff] }
 0x966   :  { %v7061_v17 = vpop.permute.xlu0 %7060  ;;  %v8047_v10 = vld [vmem:[#allocation5 + $0x120] sm:$0xff] }
 0x967   :  { %v7063_v52 = vpop.permute.xlu1 %7062  ;;  %7215 = vst.msk [vmem:[#allocation5 + $0x130] sm:$0xff] %vm7176_vm5, %v7061_v17  ;;  %9724 = vmatprep.mubr.msk.f32.mxu1 %vm8084_vm8, %v8047_v10 }
 0x968   :  { %7216 = vst.msk [vmem:[#allocation5 + $0x138] sm:$0xff] %vm7176_vm5, %v7063_v52  ;;  %7473 = vrot.lane.b32.xlu0 %v7293_v63, %s9816_s23  ;;  %v7301_v63 = vld [vmem:[#allocation4 + $0x331] sm:$0xff] }
 0x969   :  { %7475 = vrot.lane.b32.xlu1 %v7294_v11, %s9816_s23  ;;  %v7302_v11 = vld [vmem:[#allocation4 + $0x339] sm:$0xff] }
 0x96a   :  { %v7446_v56 = vpop.permute.xlu0 %7445  ;;  %v8048_v15 = vld [vmem:[#allocation5 + $0x128] sm:$0xff] }
 0x96b   :  { %v7448_v7 = vpop.permute.xlu1 %7447  ;;  %7600 = vst.msk [vmem:[#allocation5 + $0x130] sm:$0xff] %vm7561_vm6, %v7446_v56  ;;  %9725 = vmatmul.mubr.msk.f32.gmra.mxu1 %vm8084_vm8, %v8048_v15 }
 0x96c   :  { %7601 = vst.msk [vmem:[#allocation5 + $0x138] sm:$0xff] %vm7561_vm6, %v7448_v7  ;;  %7858 = vrot.lane.b32.xlu0 %v6524_v38, %s9817_s30 }
 0x96d   :  { %6706 = vrot.lane.b32.xlu1 %v6524_v38, %s9814_s2  ;;  %v6532_v38 = vld [vmem:[#allocation4 + $0x332] sm:$0xff] }
 0x96e   :  { %v7831_v31 = vpop.permute.xlu0 %7830 }
 0x96f   :  { %v6679_v43 = vpop.permute.xlu1 %6678  ;;  %7985 = vst.msk [vmem:[#allocation5 + $0x130] sm:$0xff] %vm7946_vm7, %v7831_v31 }
 0x970   :  { %6831 = vst.msk [vmem:[#allocation5 + $0x140] sm:$0xff] %vm6790_vm4, %v6679_v43  ;;  %7860 = vrot.lane.b32.xlu0 %v6525_v20, %s9817_s30 }
 0x971   :  { %6708 = vrot.lane.b32.xlu1 %v6525_v20, %s9814_s2  ;;  %v6533_v20 = vld [vmem:[#allocation4 + $0x33a] sm:$0xff] }
 0x972   :  { %v7833_v21 = vpop.permute.xlu0 %7832 }
 0x973   :  { %v6681_v14 = vpop.permute.xlu1 %6680  ;;  %7986 = vst.msk [vmem:[#allocation5 + $0x138] sm:$0xff] %vm7946_vm7, %v7833_v21  ;;  %v6918_v21 = vld [vmem:[#allocation4 + $0x348] sm:$0xff] }
 0x974   :  { %6832 = vst.msk [vmem:[#allocation5 + $0x148] sm:$0xff] %vm6790_vm4, %v6681_v14  ;;  %7092 = vrot.lane.b32.xlu0 %v6910_v25, %s9815_s0  ;;  %v6919_v25 = vld [vmem:[#allocation4 + $0x350] sm:$0xff] }
 0x975   :  { %7094 = vrot.lane.b32.xlu1 %v6911_v29, %s9815_s0 }
 0x976   :  { %v7065_v36 = vpop.permute.xlu0 %7064  ;;  %v8049_v51 = vld [vmem:[#allocation5 + $0x130] sm:$0xff] }
 0x977   :  { %v7067_v44 = vpop.permute.xlu1 %7066  ;;  %7217 = vst.msk [vmem:[#allocation5 + $0x140] sm:$0xff] %vm7176_vm5, %v7065_v36  ;;  %9727 = vmatprep.mubr.msk.f32.mxu1 %vm8084_vm8, %v8049_v51  ;;  %v7303_v36 = vld [vmem:[#allocation4 + $0x349] sm:$0xff] }
 0x978   :  { %7218 = vst.msk [vmem:[#allocation5 + $0x148] sm:$0xff] %vm7176_vm5, %v7067_v44  ;;  %7477 = vrot.lane.b32.xlu0 %v7295_v60, %s9816_s23  ;;  %v7304_v60 = vld [vmem:[#allocation4 + $0x351] sm:$0xff] }
 0x979   :  { %7479 = vrot.lane.b32.xlu1 %v7296_v39, %s9816_s23 }
 0x97a   :  { %v7450_v1 = vpop.permute.xlu0 %7449  ;;  %v8050_v19 = vld [vmem:[#allocation5 + $0x138] sm:$0xff] }
 0x97b   :  { %v7452_v13 = vpop.permute.xlu1 %7451  ;;  %7602 = vst.msk [vmem:[#allocation5 + $0x140] sm:$0xff] %vm7561_vm6, %v7450_v1  ;;  %9728 = vmatmul.mubr.msk.f32.gmra.mxu1 %vm8084_vm8, %v8050_v19  ;;  %v7688_v1 = vld [vmem:[#allocation4 + $0x34a] sm:$0xff] }
 0x97c   :  { %7603 = vst.msk [vmem:[#allocation5 + $0x148] sm:$0xff] %vm7561_vm6, %v7452_v13  ;;  %7862 = vrot.lane.b32.xlu0 %v6526_v12, %s9817_s30 }
 0x97d   :  { %6710 = vrot.lane.b32.xlu1 %v6526_v12, %s9814_s2  ;;  %v7689_v12 = vld [vmem:[#allocation4 + $0x352] sm:$0xff] }
 0x97e   :  { %v7835_v47 = vpop.permute.xlu0 %7834 }
 0x97f   :  { %v6683_v41 = vpop.permute.xlu1 %6682  ;;  %7987 = vst.msk [vmem:[#allocation5 + $0x140] sm:$0xff] %vm7946_vm7, %v7835_v47 }
 0x980   :  { %6833 = vst.msk [vmem:[#allocation5 + $0x150] sm:$0xff] %vm6790_vm4, %v6683_v41  ;;  %7864 = vrot.lane.b32.xlu0 %v6527_v57, %s9817_s30 }
 0x981   :  { %6712 = vrot.lane.b32.xlu1 %v6527_v57, %s9814_s2 }
 0x982   :  { %v7837_v34 = vpop.permute.xlu0 %7836 }
 0x983   :  { %v6685_v49 = vpop.permute.xlu1 %6684  ;;  %7988 = vst.msk [vmem:[#allocation5 + $0x148] sm:$0xff] %vm7946_vm7, %v7837_v34 }
 0x984   :  { %6834 = vst.msk [vmem:[#allocation5 + $0x158] sm:$0xff] %vm6790_vm4, %v6685_v49  ;;  %7096 = vrot.lane.b32.xlu0 %v6912_v50, %s9815_s0 }
 0x985   :  { %7098 = vrot.lane.b32.xlu1 %v6913_v23, %s9815_s0 }
 0x986   :  { %v7069_v26 = vpop.permute.xlu0 %7068  ;;  %v8051_v28 = vld [vmem:[#allocation5 + $0x140] sm:$0xff] }
 0x987   :  { %v7071_v16 = vpop.permute.xlu1 %7070  ;;  %7219 = vst.msk [vmem:[#allocation5 + $0x150] sm:$0xff] %vm7176_vm5, %v7069_v26  ;;  %9730 = vmatprep.mubr.msk.f32.mxu1 %vm8084_vm8, %v8051_v28 }
 0x988   :  { %7220 = vst.msk [vmem:[#allocation5 + $0x158] sm:$0xff] %vm7176_vm5, %v7071_v16  ;;  %7481 = vrot.lane.b32.xlu0 %v7297_v37, %s9816_s23 }
 0x989   :  { %7483 = vrot.lane.b32.xlu1 %v7298_v9, %s9816_s23 }
 0x98a   :  { %v7454_v42 = vpop.permute.xlu0 %7453  ;;  %v8052_v22 = vld [vmem:[#allocation5 + $0x148] sm:$0xff] }
 0x98b   :  { %v7456_v4 = vpop.permute.xlu1 %7455  ;;  %7604 = vst.msk [vmem:[#allocation5 + $0x150] sm:$0xff] %vm7561_vm6, %v7454_v42  ;;  %9731 = vmatmul.mubr.msk.f32.gmra.mxu1 %vm8084_vm8, %v8052_v22 }
 0x98c   :  { %7605 = vst.msk [vmem:[#allocation5 + $0x158] sm:$0xff] %vm7561_vm6, %v7456_v4  ;;  %7866 = vrot.lane.b32.xlu0 %v6528_v59, %s9817_s30 }
 0x98d   :  { %6714 = vrot.lane.b32.xlu1 %v6528_v59, %s9814_s2 }
 0x98e   :  { %v7839_v33 = vpop.permute.xlu0 %7838 }
 0x98f   :  { %v6687_v0 = vpop.permute.xlu1 %6686  ;;  %7989 = vst.msk [vmem:[#allocation5 + $0x150] sm:$0xff] %vm7946_vm7, %v7839_v33 }
 0x990   :  { %6835 = vst.msk [vmem:[#allocation5 + $0x160] sm:$0xff] %vm6790_vm4, %v6687_v0  ;;  %7868 = vrot.lane.b32.xlu0 %v6529_v8, %s9817_s30 }
 0x991   :  { %6716 = vrot.lane.b32.xlu1 %v6529_v8, %s9814_s2 }
 0x992   :  { %v7841_v48 = vpop.permute.xlu0 %7840 }
 0x993   :  { %v6689_v5 = vpop.permute.xlu1 %6688  ;;  %7990 = vst.msk [vmem:[#allocation5 + $0x158] sm:$0xff] %vm7946_vm7, %v7841_v48 }
 0x994   :  { %6836 = vst.msk [vmem:[#allocation5 + $0x168] sm:$0xff] %vm6790_vm4, %v6689_v5  ;;  %7100 = vrot.lane.b32.xlu0 %v6914_v6, %s9815_s0 }
 0x995   :  { %7102 = vrot.lane.b32.xlu1 %v6915_v18, %s9815_s0 }
 0x996   :  { %v7073_v53 = vpop.permute.xlu0 %7072  ;;  %v8053_v32 = vld [vmem:[#allocation5 + $0x150] sm:$0xff] }
 0x997   :  { %v7075_v30 = vpop.permute.xlu1 %7074  ;;  %7221 = vst.msk [vmem:[#allocation5 + $0x160] sm:$0xff] %vm7176_vm5, %v7073_v53  ;;  %9733 = vmatprep.mubr.msk.f32.mxu1 %vm8084_vm8, %v8053_v32 }
 0x998   :  { %7222 = vst.msk [vmem:[#allocation5 + $0x168] sm:$0xff] %vm7176_vm5, %v7075_v30  ;;  %7485 = vrot.lane.b32.xlu0 %v7299_v3, %s9816_s23 }
 0x999   :  { %7487 = vrot.lane.b32.xlu1 %v7300_v61, %s9816_s23 }
 0x99a   :  { %v7458_v40 = vpop.permute.xlu0 %7457  ;;  %v8054_v62 = vld [vmem:[#allocation5 + $0x158] sm:$0xff] }
 0x99b   :  { %v7460_v54 = vpop.permute.xlu1 %7459  ;;  %7606 = vst.msk [vmem:[#allocation5 + $0x160] sm:$0xff] %vm7561_vm6, %v7458_v40  ;;  %9734 = vmatmul.mubr.msk.f32.gmra.mxu1 %vm8084_vm8, %v8054_v62 }
 0x99c   :  { %7607 = vst.msk [vmem:[#allocation5 + $0x168] sm:$0xff] %vm7561_vm6, %v7460_v54  ;;  %7870 = vrot.lane.b32.xlu0 %v6530_v58, %s9817_s30 }
 0x99d   :  { %6718 = vrot.lane.b32.xlu1 %v6530_v58, %s9814_s2 }
 0x99e   :  { %v7843_v27 = vpop.permute.xlu0 %7842 }
 0x99f   :  { %v6691_v45 = vpop.permute.xlu1 %6690  ;;  %7991 = vst.msk [vmem:[#allocation5 + $0x160] sm:$0xff] %vm7946_vm7, %v7843_v27 }
 0x9a0   :  { %6837 = vst.msk [vmem:[#allocation5 + $0x170] sm:$0xff] %vm6790_vm4, %v6691_v45  ;;  %7872 = vrot.lane.b32.xlu0 %v6531_v46, %s9817_s30 }
 0x9a1   :  { %6720 = vrot.lane.b32.xlu1 %v6531_v46, %s9814_s2 }
 0x9a2   :  { %v7845_v24 = vpop.permute.xlu0 %7844 }
 0x9a3   :  { %v6693_v2 = vpop.permute.xlu1 %6692  ;;  %7992 = vst.msk [vmem:[#allocation5 + $0x168] sm:$0xff] %vm7946_vm7, %v7845_v24 }
 0x9a4   :  { %6838 = vst.msk [vmem:[#allocation5 + $0x178] sm:$0xff] %vm6790_vm4, %v6693_v2  ;;  %7104 = vrot.lane.b32.xlu0 %v6916_v55, %s9815_s0 }
 0x9a5   :  { %7106 = vrot.lane.b32.xlu1 %v6917_v35, %s9815_s0 }
 0x9a6   :  { %v7077_v17 = vpop.permute.xlu0 %7076  ;;  %v8055_v10 = vld [vmem:[#allocation5 + $0x160] sm:$0xff] }
 0x9a7   :  { %v7079_v52 = vpop.permute.xlu1 %7078  ;;  %7223 = vst.msk [vmem:[#allocation5 + $0x170] sm:$0xff] %vm7176_vm5, %v7077_v17  ;;  %9736 = vmatprep.mubr.msk.f32.mxu1 %vm8084_vm8, %v8055_v10 }
 0x9a8   :  { %7224 = vst.msk [vmem:[#allocation5 + $0x178] sm:$0xff] %vm7176_vm5, %v7079_v52  ;;  %7489 = vrot.lane.b32.xlu0 %v7301_v63, %s9816_s23 }
 0x9a9   :  { %7491 = vrot.lane.b32.xlu1 %v7302_v11, %s9816_s23 }
 0x9aa   :  { %v7462_v56 = vpop.permute.xlu0 %7461  ;;  %v8056_v15 = vld [vmem:[#allocation5 + $0x168] sm:$0xff] }
 0x9ab   :  { %v7464_v7 = vpop.permute.xlu1 %7463  ;;  %7608 = vst.msk [vmem:[#allocation5 + $0x170] sm:$0xff] %vm7561_vm6, %v7462_v56  ;;  %9737 = vmatmul.mubr.msk.f32.gmra.mxu1 %vm8084_vm8, %v8056_v15 }
 0x9ac   :  { %7609 = vst.msk [vmem:[#allocation5 + $0x178] sm:$0xff] %vm7561_vm6, %v7464_v7  ;;  %7874 = vrot.lane.b32.xlu0 %v6532_v38, %s9817_s30 }
 0x9ad   :  { %6722 = vrot.lane.b32.xlu1 %v6532_v38, %s9814_s2 }
 0x9ae   :  { %v7847_v31 = vpop.permute.xlu0 %7846 }
 0x9af   :  { %v6695_v43 = vpop.permute.xlu1 %6694  ;;  %7993 = vst.msk [vmem:[#allocation5 + $0x170] sm:$0xff] %vm7946_vm7, %v7847_v31 }
 0x9b0   :  { %6839 = vst.msk [vmem:[#allocation5 + $0x180] sm:$0xff] %vm6790_vm4, %v6695_v43  ;;  %7876 = vrot.lane.b32.xlu0 %v6533_v20, %s9817_s30 }
 0x9b1   :  { %6724 = vrot.lane.b32.xlu1 %v6533_v20, %s9814_s2 }
 0x9b2   :  { %v7849_v14 = vpop.permute.xlu0 %7848 }
 0x9b3   :  { %v6697_v29 = vpop.permute.xlu1 %6696  ;;  %7994 = vst.msk [vmem:[#allocation5 + $0x178] sm:$0xff] %vm7946_vm7, %v7849_v14 }
 0x9b4   :  { %6840 = vst.msk [vmem:[#allocation5 + $0x188] sm:$0xff] %vm6790_vm4, %v6697_v29  ;;  %7108 = vrot.lane.b32.xlu0 %v6918_v21, %s9815_s0 }
 0x9b5   :  { %7110 = vrot.lane.b32.xlu1 %v6919_v25, %s9815_s0 }
 0x9b6   :  { %v7081_v51 = vpop.permute.xlu0 %7080  ;;  %v8057_v44 = vld [vmem:[#allocation5 + $0x170] sm:$0xff] }
 0x9b7   :  { %v7083_v39 = vpop.permute.xlu1 %7082  ;;  %7225 = vst.msk [vmem:[#allocation5 + $0x180] sm:$0xff] %vm7176_vm5, %v7081_v51  ;;  %9739 = vmatprep.mubr.msk.f32.mxu1 %vm8084_vm8, %v8057_v44 }
 0x9b8   :  { %7226 = vst.msk [vmem:[#allocation5 + $0x188] sm:$0xff] %vm7176_vm5, %v7083_v39  ;;  %7493 = vrot.lane.b32.xlu0 %v7303_v36, %s9816_s23 }
 0x9b9   :  { %7495 = vrot.lane.b32.xlu1 %v7304_v60, %s9816_s23 }
 0x9ba   :  { %v7466_v19 = vpop.permute.xlu0 %7465  ;;  %v8058_v13 = vld [vmem:[#allocation5 + $0x178] sm:$0xff] }
 0x9bb   :  { %v7468_v47 = vpop.permute.xlu1 %7467  ;;  %7610 = vst.msk [vmem:[#allocation5 + $0x180] sm:$0xff] %vm7561_vm6, %v7466_v19  ;;  %9740 = vmatmul.mubr.msk.f32.gmra.mxu1 %vm8084_vm8, %v8058_v13 }
 0x9bc   :  { %7611 = vst.msk [vmem:[#allocation5 + $0x188] sm:$0xff] %vm7561_vm6, %v7468_v47  ;;  %7878 = vrot.lane.b32.xlu0 %v7688_v1, %s9817_s30 }
 0x9bd   :  { %7880 = vrot.lane.b32.xlu1 %v7689_v12, %s9817_s30 }
 0x9be   :  { %v7851_v41 = vpop.permute.xlu0 %7850 }
 0x9bf   :  { %v6699_v57 = vpop.permute.xlu1 %6698  ;;  %7995 = vst.msk [vmem:[#allocation5 + $0x180] sm:$0xff] %vm7946_vm7, %v7851_v41 }
 0x9c0   :  { %6841 = vst.msk [vmem:[#allocation5 + $0x190] sm:$0xff] %vm6790_vm4, %v6699_v57 }
 0x9c2   :  { %v7853_v34 = vpop.permute.xlu0 %7852 }
 0x9c3   :  { %v6701_v49 = vpop.permute.xlu1 %6700  ;;  %7996 = vst.msk [vmem:[#allocation5 + $0x188] sm:$0xff] %vm7946_vm7, %v7853_v34 }
 0x9c4   :  { %6842 = vst.msk [vmem:[#allocation5 + $0x198] sm:$0xff] %vm6790_vm4, %v6701_v49 }
 0x9c6   :  { %v7085_v50 = vpop.permute.xlu0 %7084  ;;  %v8059_v23 = vld [vmem:[#allocation5 + $0x180] sm:$0xff] }
 0x9c7   :  { %v7087_v26 = vpop.permute.xlu1 %7086  ;;  %7227 = vst.msk [vmem:[#allocation5 + $0x190] sm:$0xff] %vm7176_vm5, %v7085_v50  ;;  %9742 = vmatprep.mubr.msk.f32.mxu1 %vm8084_vm8, %v8059_v23 }
 0x9c8   :  { %7228 = vst.msk [vmem:[#allocation5 + $0x198] sm:$0xff] %vm7176_vm5, %v7087_v26 }
 0x9ca   :  { %v7470_v28 = vpop.permute.xlu0 %7469  ;;  %v8060_v16 = vld [vmem:[#allocation5 + $0x188] sm:$0xff] }
 0x9cb   :  { %v7472_v37 = vpop.permute.xlu1 %7471  ;;  %7612 = vst.msk [vmem:[#allocation5 + $0x190] sm:$0xff] %vm7561_vm6, %v7470_v28  ;;  %9743 = vmatmul.mubr.msk.f32.gmra.mxu1 %vm8084_vm8, %v8060_v16 }
 0x9cc   :  { %7613 = vst.msk [vmem:[#allocation5 + $0x198] sm:$0xff] %vm7561_vm6, %v7472_v37 }
 0x9ce   :  { %v7855_v9 = vpop.permute.xlu0 %7854 }
 0x9cf   :  { %v6703_v42 = vpop.permute.xlu1 %6702  ;;  %7997 = vst.msk [vmem:[#allocation5 + $0x190] sm:$0xff] %vm7946_vm7, %v7855_v9  ;;  %v14542_v9 = vpop.f32.mrf.mxu0 }
 0x9d0   :  { %6843 = vst.msk [vmem:[#allocation5 + $0x1a0] sm:$0xff] %vm6790_vm4, %v6703_v42  ;;  %v14544_v42 = vpop.f32.mrf.mxu1 }
 0x9d2   :  { %v7857_v22 = vpop.permute.xlu0 %7856 }
 0x9d3   :  { %v6705_v4 = vpop.permute.xlu1 %6704  ;;  %7998 = vst.msk [vmem:[#allocation5 + $0x198] sm:$0xff] %vm7946_vm7, %v7857_v22  ;;  %v14546_v22 = vpop.f32.mrf.mxu0 }
 0x9d4   :  { %6844 = vst.msk [vmem:[#allocation5 + $0x1a8] sm:$0xff] %vm6790_vm4, %v6705_v4  ;;  %v14548_v4 = vpop.f32.mrf.mxu1 }
 0x9d6   :  { %v7089_v59 = vpop.permute.xlu0 %7088  ;;  %v8061_v33 = vld [vmem:[#allocation5 + $0x190] sm:$0xff] }
 0x9d7   :  { %v7091_v0 = vpop.permute.xlu1 %7090  ;;  %7229 = vst.msk [vmem:[#allocation5 + $0x1a0] sm:$0xff] %vm7176_vm5, %v7089_v59  ;;  %9745 = vmatprep.mubr.msk.f32.mxu1 %vm8084_vm8, %v8061_v33  ;;  %v8796_v59 = vmul.f32 %v14546_v22, %v14546_v22  ;;  %v14552_v33 = vpop.f32.mrf.mxu1 }
 0x9d8   :  { %7230 = vst.msk [vmem:[#allocation5 + $0x1a8] sm:$0xff] %vm7176_vm5, %v7091_v0  ;;  %v8797_v0 = vmul.f32 %v14542_v9, %v14542_v9 }
 0x9da   :  { %v7474_v8 = vpop.permute.xlu0 %7473  ;;  %v8062_v48 = vld [vmem:[#allocation5 + $0x198] sm:$0xff] }
 0x9db   :  { %v7476_v5 = vpop.permute.xlu1 %7475  ;;  %7614 = vst.msk [vmem:[#allocation5 + $0x1a0] sm:$0xff] %vm7561_vm6, %v7474_v8  ;;  %9746 = vmatmul.mubr.msk.f32.gmra.mxu1 %vm8084_vm8, %v8062_v48  ;;  %v8662_v8 = vsel %vm4103_vm13, %v14546_v22, 0.0  ;;  %v8798_v48 = vmul.f32 %v14548_v4, %v14548_v4 }
 0x9dc   :  { %7615 = vst.msk [vmem:[#allocation5 + $0x1a8] sm:$0xff] %vm7561_vm6, %v7476_v5  ;;  %v8663_v5 = vsel %vm4103_vm13, %v14542_v9, 0.0 }
 0x9de   :  { %v7859_v6 = vpop.permute.xlu0 %7858 }
 0x9df   :  { %v6707_v18 = vpop.permute.xlu1 %6706  ;;  %7999 = vst.msk [vmem:[#allocation5 + $0x1a0] sm:$0xff] %vm7946_vm7, %v7859_v6  ;;  %v8860_v6 = vsel %vm4103_vm13, %v8796_v59, 0.0 }
 0x9e0   :  { %6845 = vst.msk [vmem:[#allocation5 + $0x1b0] sm:$0xff] %vm6790_vm4, %v6707_v18  ;;  %v8665_v18 = vsel %vm4103_vm13, %v14548_v4, 0.0 }
 0x9e2   :  { %v7861_v53 = vpop.permute.xlu0 %7860 }
 0x9e3   :  { %v6709_v32 = vpop.permute.xlu1 %6708  ;;  %8000 = vst.msk [vmem:[#allocation5 + $0x1a8] sm:$0xff] %vm7946_vm7, %v7861_v53  ;;  %v8664_v53 = vadd.f32 %v8663_v5, %v8662_v8 }
 0x9e4   :  { %6846 = vst.msk [vmem:[#allocation5 + $0x1b8] sm:$0xff] %vm6790_vm4, %v6709_v32  ;;  %v14565_v32 = vpop.f32.mrf.mxu1 }
 0x9e6   :  { %v7093_v30 = vpop.permute.xlu0 %7092  ;;  %v8063_v3 = vld [vmem:[#allocation5 + $0x1a0] sm:$0xff] }
 0x9e7   :  { %v7095_v61 = vpop.permute.xlu1 %7094  ;;  %7231 = vst.msk [vmem:[#allocation5 + $0x1b0] sm:$0xff] %vm7176_vm5, %v7093_v30  ;;  %9748 = vmatprep.mubr.msk.f32.mxu1 %vm8084_vm8, %v8063_v3  ;;  %v8861_v30 = vsel %vm4103_vm13, %v8797_v0, 0.0  ;;  %v8863_v3 = vsel %vm4103_vm13, %v8798_v48, 0.0 }
 0x9e8   :  { %7232 = vst.msk [vmem:[#allocation5 + $0x1b8] sm:$0xff] %vm7176_vm5, %v7095_v61  ;;  %v8862_v61 = vadd.f32 %v8861_v30, %v8860_v6 }
 0x9ea   :  { %v7478_v40 = vpop.permute.xlu0 %7477  ;;  %v8064_v62 = vld [vmem:[#allocation5 + $0x1a8] sm:$0xff] }
 0x9eb   :  { %v7480_v54 = vpop.permute.xlu1 %7479  ;;  %7616 = vst.msk [vmem:[#allocation5 + $0x1b0] sm:$0xff] %vm7561_vm6, %v7478_v40  ;;  %9749 = vmatmul.mubr.msk.f32.gmra.mxu1 %vm8084_vm8, %v8064_v62  ;;  %v8666_v40 = vadd.f32 %v8665_v18, %v8664_v53  ;;  %v14569_v62 = vpop.f32.mrf.mxu1 }
 0x9ec   :  { %7617 = vst.msk [vmem:[#allocation5 + $0x1b8] sm:$0xff] %vm7561_vm6, %v7480_v54  ;;  %v8799_v54 = vmul.f32 %v14544_v42, %v14544_v42 }
 0x9ee   :  { %v7863_v58 = vpop.permute.xlu0 %7862 }
 0x9ef   :  { %v6711_v27 = vpop.permute.xlu1 %6710  ;;  %8001 = vst.msk [vmem:[#allocation5 + $0x1b0] sm:$0xff] %vm7946_vm7, %v7863_v58  ;;  %v8800_v58 = vmul.f32 %v14565_v32, %v14565_v32 }
 0x9f0   :  { %6847 = vst.msk [vmem:[#allocation5 + $0x1c0] sm:$0xff] %vm6790_vm4, %v6711_v27  ;;  %v8864_v27 = vadd.f32 %v8863_v3, %v8862_v61 }
 0x9f2   :  { %v7865_v45 = vpop.permute.xlu0 %7864 }
 0x9f3   :  { %v6713_v46 = vpop.permute.xlu1 %6712  ;;  %8002 = vst.msk [vmem:[#allocation5 + $0x1b8] sm:$0xff] %vm7946_vm7, %v7865_v45  ;;  %v8667_v45 = vsel %vm4103_vm13, %v14544_v42, 0.0 }
 0x9f4   :  { %6848 = vst.msk [vmem:[#allocation5 + $0x1c8] sm:$0xff] %vm6790_vm4, %v6713_v46  ;;  %v8669_v46 = vsel %vm4103_vm13, %v14565_v32, 0.0 }
 0x9f6   :  { %v7097_v24 = vpop.permute.xlu0 %7096  ;;  %v8065_v2 = vld [vmem:[#allocation5 + $0x1b0] sm:$0xff] }
 0x9f7   :  { %v7099_v55 = vpop.permute.xlu1 %7098  ;;  %7233 = vst.msk [vmem:[#allocation5 + $0x1c0] sm:$0xff] %vm7176_vm5, %v7097_v24  ;;  %9751 = vmatprep.mubr.msk.f32.mxu1 %vm8084_vm8, %v8065_v2  ;;  %v8668_v24 = vadd.f32 %v8667_v45, %v8666_v40  ;;  %v14579_v2 = vpop.f32.mrf.mxu1 }
 0x9f8   :  { %7234 = vst.msk [vmem:[#allocation5 + $0x1c8] sm:$0xff] %vm7176_vm5, %v7099_v55  ;;  %v8865_v55 = vsel %vm4103_vm13, %v8799_v54, 0.0 }
 0x9fa   :  { %v7482_v35 = vpop.permute.xlu0 %7481  ;;  %v8066_v17 = vld [vmem:[#allocation5 + $0x1b8] sm:$0xff] }
 0x9fb   :  { %v7484_v10 = vpop.permute.xlu1 %7483  ;;  %7618 = vst.msk [vmem:[#allocation5 + $0x1c0] sm:$0xff] %vm7561_vm6, %v7482_v35  ;;  %9752 = vmatmul.mubr.msk.f32.gmra.mxu1 %vm8084_vm8, %v8066_v17  ;;  %v8867_v35 = vsel %vm4103_vm13, %v8800_v58, 0.0  ;;  %v8866_v17 = vadd.f32 %v8865_v55, %v8864_v27 }
 0x9fc   :  { %7619 = vst.msk [vmem:[#allocation5 + $0x1c8] sm:$0xff] %vm7561_vm6, %v7484_v10  ;;  %v8670_v10 = vadd.f32 %v8669_v46, %v8668_v24 }
 0x9fe   :  { %v7867_v52 = vpop.permute.xlu0 %7866 }
 0x9ff   :  { %v6715_v63 = vpop.permute.xlu1 %6714  ;;  %8003 = vst.msk [vmem:[#allocation5 + $0x1c0] sm:$0xff] %vm7946_vm7, %v7867_v52  ;;  %v14583_v52 = vpop.f32.mrf.mxu1 }
 0xa00   :  { %6849 = vst.msk [vmem:[#allocation5 + $0x1d0] sm:$0xff] %vm6790_vm4, %v6715_v63  ;;  %v8801_v63 = vmul.f32 %v14552_v33, %v14552_v33 }
 0xa02   :  { %v7869_v11 = vpop.permute.xlu0 %7868 }
 0xa03   :  { %v6717_v56 = vpop.permute.xlu1 %6716  ;;  %8004 = vst.msk [vmem:[#allocation5 + $0x1c8] sm:$0xff] %vm7946_vm7, %v7869_v11  ;;  %v8802_v11 = vmul.f32 %v14579_v2, %v14579_v2 }
 0xa04   :  { %6850 = vst.msk [vmem:[#allocation5 + $0x1d8] sm:$0xff] %vm6790_vm4, %v6717_v56  ;;  %v8868_v56 = vadd.f32 %v8867_v35, %v8866_v17 }
 0xa06   :  { %v7101_v15 = vpop.permute.xlu0 %7100  ;;  %v8067_v7 = vld [vmem:[#allocation5 + $0x1c0] sm:$0xff] }
 0xa07   :  { %v7103_v38 = vpop.permute.xlu1 %7102  ;;  %7235 = vst.msk [vmem:[#allocation5 + $0x1d0] sm:$0xff] %vm7176_vm5, %v7101_v15  ;;  %9754 = vmatprep.mubr.msk.f32.mxu1 %vm8084_vm8, %v8067_v7  ;;  %v8671_v15 = vsel %vm4103_vm13, %v14552_v33, 0.0  ;;  %v8673_v7 = vsel %vm4103_vm13, %v14579_v2, 0.0 }
 0xa08   :  { %7236 = vst.msk [vmem:[#allocation5 + $0x1d8] sm:$0xff] %vm7176_vm5, %v7103_v38  ;;  %v8672_v38 = vadd.f32 %v8671_v15, %v8670_v10 }
 0xa0a   :  { %v7486_v31 = vpop.permute.xlu0 %7485  ;;  %v8068_v43 = vld [vmem:[#allocation5 + $0x1c8] sm:$0xff] }
 0xa0b   :  { %v7488_v20 = vpop.permute.xlu1 %7487  ;;  %7620 = vst.msk [vmem:[#allocation5 + $0x1d0] sm:$0xff] %vm7561_vm6, %v7486_v31  ;;  %9755 = vmatmul.mubr.msk.f32.gmra.mxu1 %vm8084_vm8, %v8068_v43  ;;  %v14593_v31 = vpop.f32.mrf.mxu1  ;;  %v8869_v43 = vsel %vm4103_vm13, %v8801_v63, 0.0 }
 0xa0c   :  { %7621 = vst.msk [vmem:[#allocation5 + $0x1d8] sm:$0xff] %vm7561_vm6, %v7488_v20  ;;  %v8871_v20 = vsel %vm4103_vm13, %v8802_v11, 0.0 }
 0xa0e   :  { %v7871_v21 = vpop.permute.xlu0 %7870 }
 0xa0f   :  { %v6719_v14 = vpop.permute.xlu1 %6718  ;;  %8005 = vst.msk [vmem:[#allocation5 + $0x1d0] sm:$0xff] %vm7946_vm7, %v7871_v21  ;;  %v8674_v21 = vadd.f32 %v8673_v7, %v8672_v38 }
 0xa10   :  { %6851 = vst.msk [vmem:[#allocation5 + $0x1e0] sm:$0xff] %vm6790_vm4, %v6719_v14  ;;  %v8870_v14 = vadd.f32 %v8869_v43, %v8868_v56 }
 0xa12   :  { %v7873_v25 = vpop.permute.xlu0 %7872 }
 0xa13   :  { %v6721_v29 = vpop.permute.xlu1 %6720  ;;  %8006 = vst.msk [vmem:[#allocation5 + $0x1d8] sm:$0xff] %vm7946_vm7, %v7873_v25  ;;  %v14597_v25 = vpop.f32.mrf.mxu1 }
 0xa14   :  { %6852 = vst.msk [vmem:[#allocation5 + $0x1e8] sm:$0xff] %vm6790_vm4, %v6721_v29  ;;  %v8803_v29 = vmul.f32 %v14569_v62, %v14569_v62  ;;  %v8807_v48 = vmul.f32 %v14597_v25, %v14597_v25  ;;  %v8683_v18 = vsel %vm4103_vm13, %v14597_v25, 0.0 }
 0xa16   :  { %v7105_v36 = vpop.permute.xlu0 %7104  ;;  %v8069_v51 = vld [vmem:[#allocation5 + $0x1d0] sm:$0xff]  ;;  %v8881_v61 = vsel %vm4103_vm13, %v8807_v48, 0.0 }
 0xa17   :  { %v7107_v44 = vpop.permute.xlu1 %7106  ;;  %7237 = vst.msk [vmem:[#allocation5 + $0x1e0] sm:$0xff] %vm7176_vm5, %v7105_v36  ;;  %9757 = vmatprep.mubr.msk.f32.mxu1 %vm8084_vm8, %v8069_v51  ;;  %v8804_v36 = vmul.f32 %v14593_v31, %v14593_v31  ;;  %v8872_v51 = vadd.f32 %v8871_v20, %v8870_v14 }
 0xa18   :  { %7238 = vst.msk [vmem:[#allocation5 + $0x1e8] sm:$0xff] %vm7176_vm5, %v7107_v44  ;;  %v8675_v44 = vsel %vm4103_vm13, %v14569_v62, 0.0 }
 0xa1a   :  { %v7490_v60 = vpop.permute.xlu0 %7489  ;;  %v8070_v39 = vld [vmem:[#allocation5 + $0x1d8] sm:$0xff] }
 0xa1b   :  { %v7492_v1 = vpop.permute.xlu1 %7491  ;;  %7622 = vst.msk [vmem:[#allocation5 + $0x1e0] sm:$0xff] %vm7561_vm6, %v7490_v60  ;;  %9758 = vmatmul.mubr.msk.f32.gmra.mxu1 %vm8084_vm8, %v8070_v39  ;;  %v8677_v60 = vsel %vm4103_vm13, %v14593_v31, 0.0  ;;  %v8676_v39 = vadd.f32 %v8675_v44, %v8674_v21 }
 0xa1c   :  { %7623 = vst.msk [vmem:[#allocation5 + $0x1e8] sm:$0xff] %vm7561_vm6, %v7492_v1  ;;  %v14607_v1 = vpop.f32.mrf.mxu1 }
 0xa1e   :  { %v7875_v19 = vpop.permute.xlu0 %7874 }
 0xa1f   :  { %v6723_v13 = vpop.permute.xlu1 %6722  ;;  %8007 = vst.msk [vmem:[#allocation5 + $0x1e0] sm:$0xff] %vm7946_vm7, %v7875_v19  ;;  %v8873_v19 = vsel %vm4103_vm13, %v8803_v29, 0.0 }
 0xa20   :  { %6853 = vst.msk [vmem:[#allocation5 + $0x1f0] sm:$0xff] %vm6790_vm4, %v6723_v13  ;;  %v8875_v13 = vsel %vm4103_vm13, %v8804_v36, 0.0 }
 0xa22   :  { %v7877_v12 = vpop.permute.xlu0 %7876 }
 0xa23   :  { %v6725_v47 = vpop.permute.xlu1 %6724  ;;  %8008 = vst.msk [vmem:[#allocation5 + $0x1e8] sm:$0xff] %vm7946_vm7, %v7877_v12  ;;  %v8678_v12 = vadd.f32 %v8677_v60, %v8676_v39 }
 0xa24   :  { %6854 = vst.msk [vmem:[#allocation5 + $0x1f8] sm:$0xff] %vm6790_vm4, %v6725_v47  ;;  %v8874_v47 = vadd.f32 %v8873_v19, %v8872_v51 }
 0xa26   :  { %v7109_v41 = vpop.permute.xlu0 %7108  ;;  %v8071_v57 = vld [vmem:[#allocation5 + $0x1e0] sm:$0xff] }
 0xa27   :  { %7239 = vst.msk [vmem:[#allocation5 + $0x1f0] sm:$0xff] %vm7176_vm5, %v7109_v41  ;;  %v7111_v34 = vpop.permute.xlu1 %7110  ;;  %9760 = vmatprep.mubr.msk.f32.mxu1 %vm8084_vm8, %v8071_v57  ;;  %v14611_v41 = vpop.f32.mrf.mxu1  ;;  %v8805_v57 = vmul.f32 %v14583_v52, %v14583_v52 }
 0xa28   :  { %7240 = vst.msk [vmem:[#allocation5 + $0x1f8] sm:$0xff] %vm7176_vm5, %v7111_v34  ;;  %v8806_v34 = vmul.f32 %v14607_v1, %v14607_v1  ;;  %v8809_v45 = vmul.f32 %v14611_v41, %v14611_v41  ;;  %v8687_v55 = vsel %vm4103_vm13, %v14611_v41, 0.0 }
 0xa2a   :  { %v7494_v49 = vpop.permute.xlu0 %7493  ;;  %v8072_v50 = vld [vmem:[#allocation5 + $0x1e8] sm:$0xff]  ;;  %v8885_v63 = vsel %vm4103_vm13, %v8809_v45, 0.0 }
 0xa2b   :  { %7624 = vst.msk [vmem:[#allocation5 + $0x1f0] sm:$0xff] %vm7561_vm6, %v7494_v49  ;;  %v7496_v23 = vpop.permute.xlu1 %7495  ;;  %9761 = vmatmul.mubr.msk.f32.gmra.mxu1 %vm8084_vm8, %v8072_v50  ;;  %v8876_v49 = vadd.f32 %v8875_v13, %v8874_v47  ;;  %v8679_v50 = vsel %vm4103_vm13, %v14583_v52, 0.0 }
 0xa2c   :  { %7625 = vst.msk [vmem:[#allocation5 + $0x1f8] sm:$0xff] %vm7561_vm6, %v7496_v23  ;;  %v8681_v23 = vsel %vm4103_vm13, %v14607_v1, 0.0 }
 0xa2e   :  { %v7879_v26 = vpop.permute.xlu0 %7878 }
 0xa2f   :  { %8009 = vst.msk [vmem:[#allocation5 + $0x1f0] sm:$0xff] %vm7946_vm7, %v7879_v26  ;;  %v7881_v28 = vpop.permute.xlu1 %7880  ;;  %v8680_v26 = vadd.f32 %v8679_v50, %v8678_v12 }
 0xa30   :  { %8010 = vst.msk [vmem:[#allocation5 + $0x1f8] sm:$0xff] %vm7946_vm7, %v7881_v28  ;;  %v14621_v28 = vpop.f32.mrf.mxu1 }
 0xa31   :  { %v8682_v59 = vadd.f32 %v8681_v23, %v8680_v26  ;;  %v8808_v5 = vmul.f32 %v14621_v28, %v14621_v28  ;;  %v8685_v53 = vsel %vm4103_vm13, %v14621_v28, 0.0 }
 0xa32   :  { %v14625_v8 = vpop.f32.mrf.mxu1 }
 0xa33   :  { %v8684_v30 = vadd.f32 %v8683_v18, %v8682_v59  ;;  %v8883_v40 = vsel %vm4103_vm13, %v8808_v5, 0.0  ;;  %v8811_v38 = vmul.f32 %v14625_v8, %v14625_v8  ;;  %v8691_v21 = vsel %vm4103_vm13, %v14625_v8, 0.0 }
 0xa34   :  { %v14635_v3 = vpop.f32.mrf.mxu1 }
 0xa35   :  { %v8686_v54 = vadd.f32 %v8685_v53, %v8684_v30  ;;  %v8810_v46 = vmul.f32 %v14635_v3, %v14635_v3  ;;  %v8689_v35 = vsel %vm4103_vm13, %v14635_v3, 0.0  ;;  %v8889_v51 = vsel %vm4103_vm13, %v8811_v38, 0.0 }
 0xa36   :  { %v8073_v16 = vld [vmem:[#allocation5 + $0x1f0] sm:$0xff]  ;;  %v14639_v27 = vpop.f32.mrf.mxu1 }
 0xa37   :  { %9763 = vmatprep.mubr.msk.f32.mxu1 %vm8084_vm8, %v8073_v16  ;;  %v8074_v37 = vld [vmem:[#allocation5 + $0x1f8] sm:$0xff]  ;;  %v8877_v16 = vsel %vm4103_vm13, %v8805_v57, 0.0  ;;  %v8688_v17 = vadd.f32 %v8687_v55, %v8686_v54  ;;  %v8887_v11 = vsel %vm4103_vm13, %v8810_v46, 0.0  ;;  %v8813_v13 = vmul.f32 %v14639_v27, %v14639_v27 }
 0xa38   :  { %9764 = vmatmul.mubr.msk.f32.gmra.mxu1 %vm8084_vm8, %v8074_v37  ;;  %v8879_v37 = vsel %vm4103_vm13, %v8806_v34, 0.0  ;;  %v8878_v0 = vadd.f32 %v8877_v16, %v8876_v49  ;;  %v14649_v10 = vpop.f32.mrf.mxu1  ;;  %v8695_v57 = vsel %vm4103_vm13, %v14639_v27, 0.0 }
 0xa39   :  { %v8690_v56 = vadd.f32 %v8689_v35, %v8688_v17  ;;  %v8812_v43 = vmul.f32 %v14649_v10, %v14649_v10  ;;  %v8693_v14 = vsel %vm4103_vm13, %v14649_v10, 0.0  ;;  %v8893_v23 = vsel %vm4103_vm13, %v8813_v13, 0.0 }
 0xa3a   :  { %v8880_v6 = vadd.f32 %v8879_v37, %v8878_v0  ;;  %v14653_v7 = vpop.f32.mrf.mxu1 }
 0xa3b   :  { %v8692_v29 = vadd.f32 %v8691_v21, %v8690_v56  ;;  %v8891_v44 = vsel %vm4103_vm13, %v8812_v43, 0.0  ;;  %v8815_v0 = vmul.f32 %v14653_v7, %v14653_v7 }
 0xa3c   :  { %v8882_v58 = vadd.f32 %v8881_v61, %v8880_v6  ;;  %v14663_v36 = vpop.f32.mrf.mxu1  ;;  %v8699_v6 = vsel %vm4103_vm13, %v14653_v7, 0.0 }
 0xa3d   :  { %v8694_v60 = vadd.f32 %v8693_v14, %v8692_v29  ;;  %v8814_v12 = vmul.f32 %v14663_v36, %v14663_v36  ;;  %v8697_v34 = vsel %vm4103_vm13, %v14663_v36, 0.0  ;;  %v8897_v61 = vsel %vm4103_vm13, %v8815_v0, 0.0 }
 0xa3e   :  { %v8884_v24 = vadd.f32 %v8883_v40, %v8882_v58  ;;  %v14667_v19 = vpop.f32.mrf.mxu1 }
 0xa3f   :  { %v8696_v49 = vadd.f32 %v8695_v57, %v8694_v60  ;;  %v8895_v26 = vsel %vm4103_vm13, %v8814_v12, 0.0  ;;  %v8817_v46 = vmul.f32 %v14667_v19, %v14667_v19  ;;  %v8703_v35 = vsel %vm4103_vm13, %v14667_v19, 0.0 }
 0xa40   :  { %v8886_v15 = vadd.f32 %v8885_v63, %v8884_v24  ;;  %v14677_v50 = vpop.f32.mrf.mxu1 }
 0xa41   :  { %v8698_v16 = vadd.f32 %v8697_v34, %v8696_v49  ;;  %v8816_v48 = vmul.f32 %v14677_v50, %v14677_v50  ;;  %v8701_v18 = vsel %vm4103_vm13, %v14677_v50, 0.0  ;;  %v8901_v56 = vsel %vm4103_vm13, %v8817_v46, 0.0 }
 0xa42   :  { %v8888_v20 = vadd.f32 %v8887_v11, %v8886_v15  ;;  %v14681_v59 = vpop.f32.mrf.mxu1 }
 0xa43   :  { %v8700_v53 = vadd.f32 %v8699_v6, %v8698_v16  ;;  %v8899_v40 = vsel %vm4103_vm13, %v8816_v48, 0.0  ;;  %v8819_v21 = vmul.f32 %v14681_v59, %v14681_v59 }
 0xa44   :  { %v8890_v39 = vadd.f32 %v8889_v51, %v8888_v20  ;;  %v14691_v30 = vpop.f32.mrf.mxu1  ;;  %v8707_v51 = vsel %vm4103_vm13, %v14681_v59, 0.0 }
 0xa45   :  { %v8702_v54 = vadd.f32 %v8701_v18, %v8700_v53  ;;  %v8818_v24 = vmul.f32 %v14691_v30, %v14691_v30  ;;  %v8705_v17 = vsel %vm4103_vm13, %v14691_v30, 0.0  ;;  %v8905_v13 = vsel %vm4103_vm13, %v8819_v21, 0.0 }
 0xa46   :  { %v8892_v47 = vadd.f32 %v8891_v44, %v8890_v39  ;;  %v14695_v45 = vpop.f32.mrf.mxu1 }
 0xa47   :  { %v8704_v63 = vadd.f32 %v8703_v35, %v8702_v54  ;;  %v8903_v15 = vsel %vm4103_vm13, %v8818_v24, 0.0  ;;  %v8821_v49 = vmul.f32 %v14695_v45, %v14695_v45  ;;  %v8711_v16 = vsel %vm4103_vm13, %v14695_v45, 0.0 }
 0xa48   :  { %v8894_v37 = vadd.f32 %v8893_v23, %v8892_v47  ;;  %v14705_v11 = vpop.f32.mrf.mxu1 }
 0xa49   :  { %v8706_v38 = vadd.f32 %v8705_v17, %v8704_v63  ;;  %v8820_v14 = vmul.f32 %v14705_v11, %v14705_v11  ;;  %v8709_v44 = vsel %vm4103_vm13, %v14705_v11, 0.0 }
 0xa4a   :  { %v8896_v5 = vadd.f32 %v8895_v26, %v8894_v37  ;;  %v14709_v20 = vpop.f32.mrf.mxu1 }
 0xa4b   :  { %v8708_v60 = vadd.f32 %v8707_v51, %v8706_v38  ;;  %v8907_v12 = vsel %vm4103_vm13, %v8820_v14, 0.0  ;;  %v8715_v46 = vsel %vm4103_vm13, %v14709_v20, 0.0 }
 0xa4c   :  { %v8898_v58 = vadd.f32 %v8897_v61, %v8896_v5  ;;  %v14719_v39 = vpop.f32.mrf.mxu1  ;;  %v8909_v5 = vsel %vm4103_vm13, %v8821_v49, 0.0 }
 0xa4d   :  { %v8710_v47 = vadd.f32 %v8709_v44, %v8708_v60  ;;  %v8822_v23 = vmul.f32 %v14719_v39, %v14719_v39  ;;  %v8713_v37 = vsel %vm4103_vm13, %v14719_v39, 0.0 }
 0xa4e   :  { %v8900_v55 = vadd.f32 %v8899_v40, %v8898_v58  ;;  %v14723_v34 = vpop.f32.mrf.mxu1  ;;  %v8823_v40 = vmul.f32 %v14709_v20, %v14709_v20 }
 0xa4f   :  { %v8712_v0 = vadd.f32 %v8711_v16, %v8710_v47  ;;  %v8911_v6 = vsel %vm4103_vm13, %v8822_v23, 0.0 }
 0xa50   :  { %v8902_v43 = vadd.f32 %v8901_v56, %v8900_v55  ;;  %v14733_v48 = vpop.f32.mrf.mxu1  ;;  %v8913_v17 = vsel %vm4103_vm13, %v8823_v40, 0.0 }
 0xa51   :  { %v8714_v18 = vadd.f32 %v8713_v37, %v8712_v0  ;;  %v8824_v54 = vmul.f32 %v14733_v48, %v14733_v48  ;;  %v8717_v24 = vsel %vm4103_vm13, %v14733_v48, 0.0 }
 0xa52   :  { %v8904_v29 = vadd.f32 %v8903_v15, %v8902_v43  ;;  %v14737_v61 = vpop.f32.mrf.mxu1  ;;  %v8825_v43 = vmul.f32 %v14723_v34, %v14723_v34 }
 0xa53   :  { %v8716_v55 = vadd.f32 %v8715_v46, %v8714_v18  ;;  %v8915_v63 = vsel %vm4103_vm13, %v8824_v54, 0.0  ;;  %v8827_v23 = vmul.f32 %v14737_v61, %v14737_v61  ;;  %v8723_v37 = vsel %vm4103_vm13, %v14737_v61, 0.0 }
 0xa54   :  { %v8906_v57 = vadd.f32 %v8905_v13, %v8904_v29  ;;  %v14747_v35 = vpop.f32.mrf.mxu1  ;;  %v8719_v29 = vsel %vm4103_vm13, %v14723_v34, 0.0  ;;  %v8917_v13 = vsel %vm4103_vm13, %v8825_v43, 0.0 }
 0xa55   :  { %v8718_v56 = vadd.f32 %v8717_v24, %v8716_v55  ;;  %v8826_v21 = vmul.f32 %v14747_v35, %v14747_v35  ;;  %v8721_v51 = vsel %vm4103_vm13, %v14747_v35, 0.0  ;;  %v8921_v18 = vsel %vm4103_vm13, %v8827_v23, 0.0 }
 0xa56   :  { %v8908_v26 = vadd.f32 %v8907_v12, %v8906_v57  ;;  %v14751_v38 = vpop.f32.mrf.mxu1 }
 0xa57   :  { %v8720_v44 = vadd.f32 %v8719_v29, %v8718_v56  ;;  %v8919_v12 = vsel %vm4103_vm13, %v8826_v21, 0.0  ;;  %v8829_v46 = vmul.f32 %v14751_v38, %v14751_v38 }
 0xa58   :  { %v8910_v53 = vadd.f32 %v8909_v5, %v8908_v26  ;;  %v14761_v60 = vpop.f32.mrf.mxu1 }
 0xa59   :  { %v8722_v47 = vadd.f32 %v8721_v51, %v8720_v44  ;;  %v8828_v26 = vmul.f32 %v14761_v60, %v14761_v60  ;;  %v8725_v0 = vsel %vm4103_vm13, %v14761_v60, 0.0  ;;  %v8925_v43 = vsel %vm4103_vm13, %v8829_v46, 0.0 }
 0xa5a   :  { %v8912_v58 = vadd.f32 %v8911_v6, %v8910_v53  ;;  %v14765_v49 = vpop.f32.mrf.mxu1 }
 0xa5b   :  { %v8724_v5 = vadd.f32 %v8723_v37, %v8722_v47  ;;  %v8923_v53 = vsel %vm4103_vm13, %v8828_v26, 0.0  ;;  %v8831_v44 = vmul.f32 %v14765_v49, %v14765_v49  ;;  %v8731_v47 = vsel %vm4103_vm13, %v14765_v49, 0.0 }
 0xa5c   :  { %v8914_v15 = vadd.f32 %v8913_v17, %v8912_v58  ;;  %v14775_v6 = vpop.f32.mrf.mxu1  ;;  %v8727_v17 = vsel %vm4103_vm13, %v14751_v38, 0.0 }
 0xa5d   :  { %v8726_v40 = vadd.f32 %v8725_v0, %v8724_v5  ;;  %v8830_v24 = vmul.f32 %v14775_v6, %v14775_v6 }
 0xa5e   :  { %v8916_v14 = vadd.f32 %v8915_v63, %v8914_v15  ;;  %v14779_v58 = vpop.f32.mrf.mxu1  ;;  %v8729_v63 = vsel %vm4103_vm13, %v14775_v6, 0.0 }
 0xa5f   :  { %v8728_v56 = vadd.f32 %v8727_v17, %v8726_v40  ;;  %v8927_v21 = vsel %vm4103_vm13, %v8830_v24, 0.0  ;;  %v8735_v46 = vsel %vm4103_vm13, %v14779_v58, 0.0 }
 0xa60   :  { %v8918_v57 = vadd.f32 %v8917_v13, %v8916_v14  ;;  %v14789_v15 = vpop.f32.mrf.mxu1 }
 0xa61   :  { %v8730_v14 = vadd.f32 %v8729_v63, %v8728_v56  ;;  %v8832_v13 = vmul.f32 %v14789_v15, %v14789_v15 }
 0xa62   :  { %v8920_v16 = vadd.f32 %v8919_v12, %v8918_v57  ;;  %v14793_v51 = vpop.f32.mrf.mxu1  ;;  %v8733_v57 = vsel %vm4103_vm13, %v14789_v15, 0.0 }
 0xa63   :  { %v8732_v23 = vadd.f32 %v8731_v47, %v8730_v14  ;;  %v8931_v37 = vsel %vm4103_vm13, %v8832_v13, 0.0 }
 0xa64   :  { %v8922_v54 = vadd.f32 %v8921_v18, %v8920_v16  ;;  %v14803_v26 = vpop.f32.mrf.mxu1  ;;  %v8929_v16 = vsel %vm4103_vm13, %v8831_v44, 0.0 }
 0xa65   :  { %v8734_v0 = vadd.f32 %v8733_v57, %v8732_v23  ;;  %v8834_v40 = vmul.f32 %v14803_v26, %v14803_v26  ;;  %v8737_v24 = vsel %vm4103_vm13, %v14803_v26, 0.0 }
 0xa66   :  { %v8924_v55 = vadd.f32 %v8923_v53, %v8922_v54  ;;  %v14807_v18 = vpop.f32.mrf.mxu1  ;;  %v8833_v53 = vmul.f32 %v14779_v58, %v14779_v58 }
 0xa67   :  { %16018 = vst [vmem:[#allocation27_spill] sm:$0xff] %v14807_v18  ;;  %v8935_v56 = vsel %vm4103_vm13, %v8834_v40, 0.0  ;;  %v8837_v40 = vmul.f32 %v14807_v18, %v14807_v18 }
 0xa68   :  { %v8926_v29 = vadd.f32 %v8925_v43, %v8924_v55  ;;  %v8736_v55 = vadd.f32 %v8735_v46, %v8734_v0  ;;  %v14817_v17 = vpop.f32.mrf.mxu1  ;;  %v8933_v63 = vsel %vm4103_vm13, %v8833_v53, 0.0 }
 0xa69   :  { %16019 = vst [vmem:[#allocation29_spill] sm:$0xff] %v14817_v17  ;;  %v8836_v44 = vmul.f32 %v14817_v17, %v14817_v17  ;;  %v8741_v47 = vsel %vm4103_vm13, %v14817_v17, 0.0 }
 0xa6a   :  { %v8928_v12 = vadd.f32 %v8927_v21, %v8926_v29  ;;  %v8738_v43 = vadd.f32 %v8737_v24, %v8736_v55  ;;  %v14821_v14 = vpop.f32.mrf.mxu1  ;;  %v8835_v29 = vmul.f32 %v14793_v51, %v14793_v51  ;;  %v8743_v24 = vsel %vm4103_vm13, %v14807_v18, 0.0 }
 0xa6b   :  { %16020 = vst [vmem:[#allocation6_spill] sm:$0xff] %v14821_v14 }
 0xa6c   :  { %v8930_v5 = vadd.f32 %v8929_v16, %v8928_v12  ;;  %v8739_v12 = vsel %vm4103_vm13, %v14793_v51, 0.0  ;;  %v14831_v23 = vpop.f32.mrf.mxu1  ;;  %v8937_v16 = vsel %vm4103_vm13, %v8835_v29, 0.0 }
 0xa6d   :  { %v8740_v57 = vadd.f32 %v8739_v12, %v8738_v43  ;;  %16021 = vst [vmem:[#allocation8_spill] sm:$0xff] %v14831_v23  ;;  %v8745_v55 = vsel %vm4103_vm13, %v14831_v23, 0.0  ;;  %v8941_v43 = vsel %vm4103_vm13, %v8837_v40, 0.0  ;;  %v8839_v12 = vmul.f32 %v14821_v14, %v14821_v14 }
 0xa6e   :  { %v8932_v54 = vadd.f32 %v8931_v37, %v8930_v5  ;;  %v8939_v37 = vsel %vm4103_vm13, %v8836_v44, 0.0  ;;  %v14835_v53 = vpop.f32.mrf.mxu1 }
 0xa6f   :  { %v8742_v0 = vadd.f32 %v8741_v47, %v8740_v57  ;;  %16022 = vst [vmem:[#allocation7_spill] sm:$0xff] %v14835_v53  ;;  %v8945_v40 = vsel %vm4103_vm13, %v8839_v12, 0.0 }
 0xa70   :  { %v8934_v21 = vadd.f32 %v8933_v63, %v8932_v54  ;;  %v8838_v54 = vmul.f32 %v14831_v23, %v14831_v23 }
 0xa71   :  { %v8744_v63 = vadd.f32 %v8743_v24, %v8742_v0 }
 0xa72   :  { %v8936_v13 = vadd.f32 %v8935_v56, %v8934_v21  ;;  %v14845_v56 = vpop.f32.mrf.mxu1  ;;  %v8943_v21 = vsel %vm4103_vm13, %v8838_v54, 0.0 }
 0xa73   :  { %16023 = vst [vmem:[#allocation10_spill] sm:$0xff] %v14845_v56  ;;  %v8746_v29 = vadd.f32 %v8745_v55, %v8744_v63  ;;  %v8840_v47 = vmul.f32 %v14845_v56, %v14845_v56  ;;  %v8841_v63 = vmul.f32 %v14835_v53, %v14835_v53 }
 0xa74   :  { %v8938_v5 = vadd.f32 %v8937_v16, %v8936_v13  ;;  %v8747_v16 = vsel %vm4103_vm13, %v14821_v14, 0.0 }
 0xa75   :  { %v8748_v0 = vadd.f32 %v8747_v16, %v8746_v29  ;;  %v8947_v54 = vsel %vm4103_vm13, %v8840_v47, 0.0  ;;  %v8751_v29 = vsel %vm4103_vm13, %v14835_v53, 0.0  ;;  %v8949_v47 = vsel %vm4103_vm13, %v8841_v63, 0.0 }
 0xa76   :  { %v8940_v46 = vadd.f32 %v8939_v37, %v8938_v5  ;;  %v8749_v37 = vsel %vm4103_vm13, %v14845_v56, 0.0 }
 0xa78   :  { %v8942_v44 = vadd.f32 %v8941_v43, %v8940_v46  ;;  %v8750_v46 = vadd.f32 %v8749_v37, %v8748_v0 }
 0xa7a   :  { %v8944_v57 = vadd.f32 %v8943_v21, %v8942_v44  ;;  %v8752_v12 = vadd.f32 %v8751_v29, %v8750_v46 }
 0xa7b   :  { %v14849_v13 = vpop.f32.mrf.mxu1 }
 0xa7c   :  { %16024 = vst [vmem:[#allocation9_spill] sm:$0xff] %v14849_v13  ;;  %v8946_v24 = vadd.f32 %v8945_v40, %v8944_v57  ;;  %v8755_v46 = vsel %vm4103_vm13, %v14849_v13, 0.0 }
 0xa7d   :  { %v14859_v5 = vpop.f32.mrf.mxu1 }
 0xa7e   :  { %16025 = vst [vmem:[#allocation12_spill] sm:$0xff] %v14859_v5  ;;  %v8842_v43 = vmul.f32 %v14859_v5, %v14859_v5  ;;  %v8948_v21 = vadd.f32 %v8947_v54, %v8946_v24  ;;  %v8753_v44 = vsel %vm4103_vm13, %v14859_v5, 0.0  ;;  %v8843_v54 = vmul.f32 %v14849_v13, %v14849_v13 }
 0xa7f   :  { %v8754_v37 = vadd.f32 %v8753_v44, %v8752_v12 }
 0xa80   :  { %v8951_v57 = vsel %vm4103_vm13, %v8842_v43, 0.0  ;;  %v8950_v0 = vadd.f32 %v8949_v47, %v8948_v21  ;;  %v8953_v43 = vsel %vm4103_vm13, %v8843_v54, 0.0 }
 0xa81   :  { %v8756_v63 = vadd.f32 %v8755_v46, %v8754_v37 }
 0xa82   :  { %v8952_v53 = vadd.f32 %v8951_v57, %v8950_v0 }
 0xa84   :  { %v8954_v12 = vadd.f32 %v8953_v43, %v8952_v53 }
 0xa8b   :  { %v14863_v55 = vpop.f32.mrf.mxu1 }
 0xa8c   :  { %16026 = vst [vmem:[#allocation11_spill] sm:$0xff] %v14863_v55  ;;  %v8845_v57 = vmul.f32 %v14863_v55, %v14863_v55  ;;  %v8759_v37 = vsel %vm4103_vm13, %v14863_v55, 0.0 }
 0xa8d   :  { %v14873_v16 = vpop.f32.mrf.mxu1 }
 0xa8e   :  { %16027 = vst [vmem:[#allocation14_spill] sm:$0xff] %v14873_v16  ;;  %v8844_v24 = vmul.f32 %v14873_v16, %v14873_v16  ;;  %v8757_v29 = vsel %vm4103_vm13, %v14873_v16, 0.0  ;;  %v8957_v53 = vsel %vm4103_vm13, %v8845_v57, 0.0 }
 0xa8f   :  { %v8758_v44 = vadd.f32 %v8757_v29, %v8756_v63 }
 0xa90   :  { %v8955_v21 = vsel %vm4103_vm13, %v8844_v24, 0.0 }
 0xa91   :  { %v8956_v13 = vadd.f32 %v8955_v21, %v8954_v12  ;;  %v8760_v54 = vadd.f32 %v8759_v37, %v8758_v44 }
 0xa93   :  { %v8958_v63 = vadd.f32 %v8957_v53, %v8956_v13 }
 0xa9b   :  { %v14877_v40 = vpop.f32.mrf.mxu1 }
 0xa9c   :  { %16028 = vst [vmem:[#allocation13_spill] sm:$0xff] %v14877_v40  ;;  %v8847_v21 = vmul.f32 %v14877_v40, %v14877_v40  ;;  %v8763_v44 = vsel %vm4103_vm13, %v14877_v40, 0.0 }
 0xa9d   :  { %v14887_v5 = vpop.f32.mrf.mxu1 }
 0xa9e   :  { %16029 = vst [vmem:[#allocation16_spill] sm:$0xff] %v14887_v5  ;;  %v8846_v0 = vmul.f32 %v14887_v5, %v14887_v5  ;;  %v8761_v46 = vsel %vm4103_vm13, %v14887_v5, 0.0  ;;  %v8961_v13 = vsel %vm4103_vm13, %v8847_v21, 0.0 }
 0xa9f   :  { %v8762_v29 = vadd.f32 %v8761_v46, %v8760_v54 }
 0xaa0   :  { %v8959_v24 = vsel %vm4103_vm13, %v8846_v0, 0.0 }
 0xaa1   :  { %v8960_v55 = vadd.f32 %v8959_v24, %v8958_v63  ;;  %v8764_v57 = vadd.f32 %v8763_v44, %v8762_v29 }
 0xaa3   :  { %v8962_v54 = vadd.f32 %v8961_v13, %v8960_v55 }
 0xaab   :  { %v14891_v47 = vpop.f32.mrf.mxu1 }
 0xaac   :  { %16030 = vst [vmem:[#allocation15_spill] sm:$0xff] %v14891_v47  ;;  %v8849_v24 = vmul.f32 %v14891_v47, %v14891_v47  ;;  %v8767_v29 = vsel %vm4103_vm13, %v14891_v47, 0.0 }
 0xaad   :  { %v14901_v16 = vpop.f32.mrf.mxu1 }
 0xaae   :  { %16031 = vst [vmem:[#allocation18_spill] sm:$0xff] %v14901_v16  ;;  %v8848_v12 = vmul.f32 %v14901_v16, %v14901_v16  ;;  %v8765_v37 = vsel %vm4103_vm13, %v14901_v16, 0.0  ;;  %v8965_v55 = vsel %vm4103_vm13, %v8849_v24, 0.0 }
 0xaaf   :  { %v8766_v46 = vadd.f32 %v8765_v37, %v8764_v57 }
 0xab0   :  { %v8963_v0 = vsel %vm4103_vm13, %v8848_v12, 0.0 }
 0xab1   :  { %v8964_v40 = vadd.f32 %v8963_v0, %v8962_v54  ;;  %v8768_v21 = vadd.f32 %v8767_v29, %v8766_v46 }
 0xab3   :  { %v8966_v57 = vadd.f32 %v8965_v55, %v8964_v40 }
 0xabb   :  { %v14905_v43 = vpop.f32.mrf.mxu1 }
 0xabc   :  { %16032 = vst [vmem:[#allocation17_spill] sm:$0xff] %v14905_v43  ;;  %v8851_v0 = vmul.f32 %v14905_v43, %v14905_v43  ;;  %v8771_v46 = vsel %vm4103_vm13, %v14905_v43, 0.0 }
 0xabd   :  { %v14915_v5 = vpop.f32.mrf.mxu1 }
 0xabe   :  { %16033 = vst [vmem:[#allocation20_spill] sm:$0xff] %v14915_v5  ;;  %v8850_v63 = vmul.f32 %v14915_v5, %v14915_v5  ;;  %v8769_v44 = vsel %vm4103_vm13, %v14915_v5, 0.0  ;;  %v8969_v40 = vsel %vm4103_vm13, %v8851_v0, 0.0 }
 0xabf   :  { %v8770_v37 = vadd.f32 %v8769_v44, %v8768_v21 }
 0xac0   :  { %v8967_v12 = vsel %vm4103_vm13, %v8850_v63, 0.0 }
 0xac1   :  { %v8968_v47 = vadd.f32 %v8967_v12, %v8966_v57  ;;  %v8772_v24 = vadd.f32 %v8771_v46, %v8770_v37 }
 0xac3   :  { %v8970_v21 = vadd.f32 %v8969_v40, %v8968_v47 }
 0xacb   :  { %v14919_v53 = vpop.f32.mrf.mxu1 }
 0xacc   :  { %16034 = vst [vmem:[#allocation19_spill] sm:$0xff] %v14919_v53  ;;  %v8853_v55 = vmul.f32 %v14919_v53, %v14919_v53  ;;  %v8775_v37 = vsel %vm4103_vm13, %v14919_v53, 0.0 }
 0xacd   :  { %v14929_v16 = vpop.f32.mrf.mxu1 }
 0xace   :  { %16035 = vst [vmem:[#allocation22_spill] sm:$0xff] %v14929_v16  ;;  %v8852_v54 = vmul.f32 %v14929_v16, %v14929_v16  ;;  %v8773_v29 = vsel %vm4103_vm13, %v14929_v16, 0.0  ;;  %v8973_v47 = vsel %vm4103_vm13, %v8853_v55, 0.0 }
 0xacf   :  { %v8774_v44 = vadd.f32 %v8773_v29, %v8772_v24 }
 0xad0   :  { %v8971_v63 = vsel %vm4103_vm13, %v8852_v54, 0.0 }
 0xad1   :  { %v8972_v43 = vadd.f32 %v8971_v63, %v8970_v21  ;;  %v8776_v0 = vadd.f32 %v8775_v37, %v8774_v44 }
 0xad3   :  { %v8974_v24 = vadd.f32 %v8973_v47, %v8972_v43 }
 0xadb   :  { %v14933_v13 = vpop.f32.mrf.mxu1 }
 0xadc   :  { %16036 = vst [vmem:[#allocation24_spill] sm:$0xff] %v14933_v13  ;;  %v8855_v40 = vmul.f32 %v14933_v13, %v14933_v13  ;;  %v8779_v53 = vsel %vm4103_vm13, %v14933_v13, 0.0 }
 0xadd   :  { %v14943_v5 = vpop.f32.mrf.mxu1 }
 0xade   :  { %16037 = vst [vmem:[#allocation21_spill] sm:$0xff] %v14943_v5  ;;  %v8854_v12 = vmul.f32 %v14943_v5, %v14943_v5  ;;  %v8777_v46 = vsel %vm4103_vm13, %v14943_v5, 0.0  ;;  %v8977_v55 = vsel %vm4103_vm13, %v8855_v40, 0.0 }
 0xadf   :  { %v8778_v29 = vadd.f32 %v8777_v46, %v8776_v0 }
 0xae0   :  { %v8975_v54 = vsel %vm4103_vm13, %v8854_v12, 0.0 }
 0xae1   :  { %v8976_v21 = vadd.f32 %v8975_v54, %v8974_v24  ;;  %v8780_v37 = vadd.f32 %v8779_v53, %v8778_v29 }
 0xae3   :  { %v8978_v43 = vadd.f32 %v8977_v55, %v8976_v21 }
 0xaeb   :  { %v14951_v57 = vpop.f32.mrf.mxu1 }
 0xaec   :  { %16038 = vst [vmem:[#allocation26_spill] sm:$0xff] %v14951_v57  ;;  %v8857_v0 = vmul.f32 %v14951_v57, %v14951_v57  ;;  %v8783_v54 = vsel %vm4103_vm13, %v14951_v57, 0.0 }
 0xaed   :  { %v14957_v16 = vpop.f32.mrf.mxu1 }
 0xaee   :  { %16039 = vst [vmem:[#allocation23_spill] sm:$0xff] %v14957_v16  ;;  %v8856_v63 = vmul.f32 %v14957_v16, %v14957_v16  ;;  %v8781_v44 = vsel %vm4103_vm13, %v14957_v16, 0.0  ;;  %v8981_v53 = vsel %vm4103_vm13, %v8857_v0, 0.0 }
 0xaef   :  { %v8782_v46 = vadd.f32 %v8781_v44, %v8780_v37 }
 0xaf0   :  { %v8979_v12 = vsel %vm4103_vm13, %v8856_v63, 0.0 }
 0xaf1   :  { %v8980_v47 = vadd.f32 %v8979_v12, %v8978_v43  ;;  %v8784_v13 = vadd.f32 %v8783_v54, %v8782_v46 }
 0xaf3   :  { %v8982_v44 = vadd.f32 %v8981_v53, %v8980_v47 }
 0xaf8   :  { %v14973_v5 = vpop.f32.mrf.mxu1 }
 0xaf9   :  { %16040 = vst [vmem:[#allocation28_spill] sm:$0xff] %v14973_v5  ;;  %v8859_v29 = vmul.f32 %v14973_v5, %v14973_v5  ;;  %v8787_v37 = vsel %vm4103_vm13, %v14973_v5, 0.0 }
 0xafa   :  { %v14977_v24 = vpop.f32.mrf.mxu1 }
 0xafb   :  { %16041 = vst [vmem:[#allocation25_spill] sm:$0xff] %v14977_v24  ;;  %v8785_v40 = vsel %vm4103_vm13, %v14977_v24, 0.0  ;;  %v8858_v63 = vmul.f32 %v14977_v24, %v14977_v24  ;;  %v8985_v43 = vsel %vm4103_vm13, %v8859_v29, 0.0  ;;  %v8996_v29 = vld [vmem:[%s15845_s5] sm:$0x1] }
 0xafc   :  { %v8786_v21 = vadd.f32 %v8785_v40, %v8784_v13 }
 0xafd   :  { %v8983_v55 = vsel %vm4103_vm13, %v8858_v63, 0.0 }
 0xafe   :  { %v8788_v12 = vadd.f32 %v8787_v37, %v8786_v21  ;;  %v8984_v46 = vadd.f32 %v8983_v55, %v8982_v44 }
 0xb00   :  { %v8789_v0 = vrot.slane %v8788_v12, 4  ;;  %v8986_v54 = vadd.f32 %v8985_v43, %v8984_v46  ;;  %v16043_v46 = vld [vmem:[#allocation29_spill] sm:$0xff]  ;;  %v16044_v43 = vld [vmem:[#allocation27_spill] sm:$0xff] }
 0xb02   :  { %v8790_v57 = vadd.f32 %v8789_v0, %v8788_v12  ;;  %v8987_v16 = vrot.slane %v8986_v54, 4  ;;  %v16045_v0 = vld [vmem:[#allocation8_spill] sm:$0xff] }
 0xb04   :  { %v8791_v56 = vrot.slane %v8790_v57, 2  ;;  %v8988_v14 = vadd.f32 %v8987_v16, %v8986_v54  ;;  %v16046_v54 = vld [vmem:[#allocation6_spill] sm:$0xff] }
 0xb06   :  { %v8792_v23 = vadd.f32 %v8791_v56, %v8790_v57  ;;  %v8989_v18 = vrot.slane %v8988_v14, 2  ;;  %v14996_v56 = vld [vmem:[%s15846_s6] sm:$0x1] }
 0xb08   :  { %v8793_v24 = vrot.slane %v8792_v23, 1  ;;  %v8990_v13 = vadd.f32 %v8989_v18, %v8988_v14  ;;  %v16042_v14 = vld [vmem:[#allocation30_spill] sm:$0xff] }
 0xb0a   :  { %v8794_v47 = vadd.f32 %v8793_v24, %v8792_v23  ;;  %v8991_v53 = vrot.slane %v8990_v13, 1 }
 0xb0c   :  { %v8795_v40 = vmul.f32 0.001953125, %v8794_v47  ;;  %v8992_v5 = vadd.f32 %v8991_v53, %v8990_v13  ;;  %v16047_v13 = vld [vmem:[#allocation10_spill] sm:$0xff]  ;;  %v16048_v47 = vld [vmem:[#allocation7_spill] sm:$0xff] }
 0xb0e   :  { %v8993_v17 = vmul.f32 0.001953125, %v8992_v5  ;;  %v8994_v63 = vmul.f32 %v8795_v40, %v8795_v40 }
 0xb10   :  { %v8995_v21 = vsub.f32 %v8993_v17, %v8994_v63 }
 0xb12   :  { %v8997_v44 = vadd.f32 1e-05, %v8995_v21  ;;  %v16050_v21 = vld [vmem:[#allocation9_spill] sm:$0xff] }
 0xb14   :  { %9799 = vrsqrt.f32 %v8997_v44 }
 0xb21   :  { %v9800_v37 = vpop.eup %9799 }
 0xb22   :  { %v8999_v55 = vmul.f32 %v9800_v37, %v8996_v29  ;;  %v16051_v29 = vld [vmem:[#allocation14_spill] sm:$0xff] }
 0xb24   :  { %v14998_v18 = vmul.f32 %v8999_v55, %v8795_v40  ;;  %v15001_v23 = vrot.slane %v8999_v55, %v16042_v14  ;;  %v16049_v40 = vld [vmem:[#allocation12_spill] sm:$0xff]  ;;  %v16052_v55 = vld [vmem:[#allocation11_spill] sm:$0xff] }
 0xb26   :  { %v9002_v17 = vsub.f32 %v14996_v56, %v14998_v18  ;;  %v15007_v5 = vmul.f32 %v15001_v23, %v14546_v22  ;;  %v15011_v16 = vmul.f32 %v14542_v9, %v15001_v23  ;;  %v15015_v57 = vmul.f32 %v15001_v23, %v14548_v4  ;;  %v16053_v18 = vld [vmem:[#allocation16_spill] sm:$0xff] }
 0xb27   :  { %v15019_v24 = vmul.f32 %v14544_v42, %v15001_v23  ;;  %v15023_v12 = vmul.f32 %v15001_v23, %v14565_v32  ;;  %v15027_v22 = vmul.f32 %v14552_v33, %v15001_v23  ;;  %v15031_v9 = vmul.f32 %v15001_v23, %v14579_v2 }
 0xb28   :  { %v15035_v4 = vmul.f32 %v14569_v62, %v15001_v23  ;;  %v15039_v42 = vmul.f32 %v15001_v23, %v14593_v31  ;;  %v15043_v32 = vmul.f32 %v14583_v52, %v15001_v23  ;;  %v15047_v33 = vmul.f32 %v15001_v23, %v14607_v1 }
 0xb29   :  { %v15051_v2 = vmul.f32 %v14597_v25, %v15001_v23  ;;  %v15055_v62 = vmul.f32 %v15001_v23, %v14621_v28  ;;  %v15059_v31 = vmul.f32 %v14611_v41, %v15001_v23  ;;  %v15063_v52 = vmul.f32 %v15001_v23, %v14635_v3 }
 0xb2a   :  { %v15067_v1 = vmul.f32 %v14625_v8, %v15001_v23  ;;  %v15071_v25 = vmul.f32 %v15001_v23, %v14649_v10  ;;  %v15075_v28 = vmul.f32 %v14639_v27, %v15001_v23  ;;  %v15079_v41 = vmul.f32 %v15001_v23, %v14663_v36 }
 0xb2b   :  { %v15083_v3 = vmul.f32 %v14653_v7, %v15001_v23  ;;  %v15087_v8 = vmul.f32 %v15001_v23, %v14677_v50  ;;  %v15091_v10 = vmul.f32 %v14667_v19, %v15001_v23  ;;  %v15095_v27 = vmul.f32 %v15001_v23, %v14691_v30 }
 0xb2c   :  { %v15099_v36 = vmul.f32 %v14681_v59, %v15001_v23  ;;  %v15103_v7 = vmul.f32 %v15001_v23, %v14705_v11  ;;  %v15107_v50 = vmul.f32 %v14695_v45, %v15001_v23  ;;  %v15111_v19 = vmul.f32 %v15001_v23, %v14719_v39 }
 0xb2d   :  { %v15115_v30 = vmul.f32 %v14709_v20, %v15001_v23  ;;  %v15119_v59 = vmul.f32 %v15001_v23, %v14733_v48  ;;  %v15123_v11 = vmul.f32 %v14723_v34, %v15001_v23  ;;  %v15127_v45 = vmul.f32 %v15001_v23, %v14747_v35 }
 0xb2e   :  { %v15131_v39 = vmul.f32 %v14737_v61, %v15001_v23  ;;  %v15135_v20 = vmul.f32 %v15001_v23, %v14761_v60  ;;  %v15139_v48 = vmul.f32 %v14751_v38, %v15001_v23  ;;  %v15143_v34 = vmul.f32 %v15001_v23, %v14775_v6 }
 0xb2f   :  { %v15147_v35 = vmul.f32 %v14765_v49, %v15001_v23  ;;  %v15151_v61 = vmul.f32 %v15001_v23, %v14789_v15  ;;  %v15155_v60 = vmul.f32 %v14779_v58, %v15001_v23  ;;  %v15159_v38 = vmul.f32 %v15001_v23, %v14803_v26 }
 0xb30   :  { %v15163_v6 = vmul.f32 %v14793_v51, %v15001_v23  ;;  %v15167_v49 = vmul.f32 %v15001_v23, %v16043_v46  ;;  %v15171_v15 = vmul.f32 %v16044_v43, %v15001_v23  ;;  %v15175_v58 = vmul.f32 %v15001_v23, %v16045_v0  ;;  %v16055_v43 = vld [vmem:[#allocation13_spill] sm:$0xff] }
 0xb31   :  { %v15179_v26 = vmul.f32 %v16046_v54, %v15001_v23  ;;  %v15183_v51 = vmul.f32 %v15001_v23, %v16047_v13  ;;  %v15187_v53 = vmul.f32 %v16048_v47, %v15001_v23  ;;  %v15191_v63 = vmul.f32 %v15001_v23, %v16049_v40  ;;  %v16057_v54 = vld [vmem:[#allocation18_spill] sm:$0xff]  ;;  %v16059_v47 = vld [vmem:[#allocation15_spill] sm:$0xff] }
 0xb32   :  { %v15195_v44 = vmul.f32 %v16050_v21, %v15001_v23  ;;  %v15199_v37 = vmul.f32 %v15001_v23, %v16051_v29  ;;  %v15203_v56 = vmul.f32 %v16052_v55, %v15001_v23  ;;  %v15207_v46 = vmul.f32 %v15001_v23, %v16053_v18  ;;  %v16061_v21 = vld [vmem:[#allocation20_spill] sm:$0xff]  ;;  %v16063_v55 = vld [vmem:[#allocation17_spill] sm:$0xff] }
 0xb33   :  { %v15211_v0 = vmul.f32 %v16055_v43, %v15001_v23  ;;  %v15215_v13 = vmul.f32 %v15001_v23, %v16057_v54  ;;  %v15219_v40 = vmul.f32 %v16059_v47, %v15001_v23  ;;  %v15223_v29 = vmul.f32 %v15001_v23, %v16061_v21 }
 0xb34   :  { %16054 = vst [vmem:[#allocation30_spill] sm:$0xff] %v15207_v46  ;;  %v15227_v18 = vmul.f32 %v16063_v55, %v15001_v23  ;;  %v16065_v46 = vld [vmem:[#allocation22_spill] sm:$0xff]  ;;  %v16072_v55 = vld [vmem:[#allocation23_spill] sm:$0xff] }
 0xb35   :  { %16056 = vst [vmem:[#allocation29_spill] sm:$0xff] %v15211_v0  ;;  %16058 = vst [vmem:[#allocation27_spill] sm:$0xff] %v15215_v13  ;;  %v15231_v43 = vmul.f32 %v15001_v23, %v16065_v46  ;;  %v16067_v0 = vld [vmem:[#allocation19_spill] sm:$0xff]  ;;  %v16069_v13 = vld [vmem:[#allocation21_spill] sm:$0xff] }
 0xb36   :  { %16060 = vst [vmem:[#allocation8_spill] sm:$0xff] %v15219_v40  ;;  %16062 = vst [vmem:[#allocation6_spill] sm:$0xff] %v15223_v29  ;;  %v15235_v54 = vmul.f32 %v16067_v0, %v15001_v23  ;;  %v15239_v47 = vmul.f32 %v15001_v23, %v16069_v13  ;;  %v16071_v40 = vld [vmem:[#allocation24_spill] sm:$0xff]  ;;  %v15246_v29 = vrot.slane %v9002_v17, %v16042_v14  ;;  %v16073_v46 = vld [vmem:[#allocation26_spill] sm:$0xff] }
 0xb37   :  { %16064 = vst [vmem:[#allocation10_spill] sm:$0xff] %v15227_v18  ;;  %16066 = vst [vmem:[#allocation7_spill] sm:$0xff] %v15231_v43  ;;  %v15243_v21 = vmul.f32 %v16071_v40, %v15001_v23  ;;  %v15250_v18 = vmul.f32 %v15001_v23, %v16072_v55  ;;  %v15254_v43 = vmul.f32 %v16073_v46, %v15001_v23  ;;  %v16074_v0 = vld [vmem:[#allocation25_spill] sm:$0xff]  ;;  %v16075_v13 = vld [vmem:[#allocation28_spill] sm:$0xff] }
 0xb38   :  { %16068 = vst [vmem:[#allocation12_spill] sm:$0xff] %v15235_v54  ;;  %16070 = vst [vmem:[#allocation9_spill] sm:$0xff] %v15239_v47  ;;  %v15258_v54 = vmul.f32 %v15001_v23, %v16074_v0  ;;  %v15262_v47 = vmul.f32 %v16075_v13, %v15001_v23  ;;  %v15266_v14 = vadd.f32 %v15246_v29, %v15007_v5 }
 0xb39   :  { %v15270_v17 = vadd.f32 %v15246_v29, %v15011_v16  ;;  %v15274_v40 = vadd.f32 %v15246_v29, %v15015_v57  ;;  %v15278_v55 = vadd.f32 %v15246_v29, %v15019_v24  ;;  %v15282_v23 = vadd.f32 %v15246_v29, %v15023_v12 }
 0xb3a   :  { %v15286_v5 = vadd.f32 %v15246_v29, %v15027_v22  ;;  %v15290_v16 = vadd.f32 %v15246_v29, %v15031_v9  ;;  %v15294_v57 = vadd.f32 %v15246_v29, %v15035_v4  ;;  %v15298_v24 = vadd.f32 %v15246_v29, %v15039_v42 }
 0xb3b   :  { %v15302_v12 = vadd.f32 %v15246_v29, %v15043_v32  ;;  %v15306_v22 = vadd.f32 %v15246_v29, %v15047_v33  ;;  %v15310_v9 = vadd.f32 %v15246_v29, %v15051_v2  ;;  %v15314_v4 = vadd.f32 %v15246_v29, %v15055_v62  ;;  %v16079_v46 = vld [vmem:[#allocation30_spill] sm:$0xff] }
 0xb3c   :  { %v15318_v42 = vadd.f32 %v15246_v29, %v15059_v31  ;;  %v15322_v32 = vadd.f32 %v15246_v29, %v15063_v52  ;;  %v15326_v33 = vadd.f32 %v15246_v29, %v15067_v1  ;;  %v15330_v2 = vadd.f32 %v15246_v29, %v15071_v25  ;;  %v16081_v0 = vld [vmem:[#allocation29_spill] sm:$0xff]  ;;  %v16083_v13 = vld [vmem:[#allocation27_spill] sm:$0xff] }
 0xb3d   :  { %v15334_v62 = vadd.f32 %v15246_v29, %v15075_v28  ;;  %v15338_v31 = vadd.f32 %v15246_v29, %v15079_v41  ;;  %v15342_v52 = vadd.f32 %v15246_v29, %v15083_v3  ;;  %v15346_v1 = vadd.f32 %v15246_v29, %v15087_v8 }
 0xb3e   :  { %v15350_v25 = vadd.f32 %v15246_v29, %v15091_v10  ;;  %v15354_v28 = vadd.f32 %v15246_v29, %v15095_v27  ;;  %v15358_v41 = vadd.f32 %v15246_v29, %v15099_v36  ;;  %v15362_v3 = vadd.f32 %v15246_v29, %v15103_v7 }
 0xb3f   :  { %v15366_v8 = vadd.f32 %v15246_v29, %v15107_v50  ;;  %v15370_v10 = vadd.f32 %v15246_v29, %v15111_v19  ;;  %v15374_v27 = vadd.f32 %v15246_v29, %v15115_v30  ;;  %v15378_v36 = vadd.f32 %v15246_v29, %v15119_v59 }
 0xb40   :  { %v15382_v7 = vadd.f32 %v15246_v29, %v15123_v11  ;;  %v15386_v50 = vadd.f32 %v15246_v29, %v15127_v45  ;;  %v15390_v19 = vadd.f32 %v15246_v29, %v15131_v39  ;;  %v15394_v30 = vadd.f32 %v15246_v29, %v15135_v20 }
 0xb41   :  { %v15398_v59 = vadd.f32 %v15246_v29, %v15139_v48  ;;  %v15402_v11 = vadd.f32 %v15246_v29, %v15143_v34  ;;  %v15406_v45 = vadd.f32 %v15246_v29, %v15147_v35  ;;  %v15410_v39 = vadd.f32 %v15246_v29, %v15151_v61 }
 0xb42   :  { %v15414_v20 = vadd.f32 %v15246_v29, %v15155_v60  ;;  %v15418_v48 = vadd.f32 %v15246_v29, %v15159_v38  ;;  %v15422_v34 = vadd.f32 %v15246_v29, %v15163_v6  ;;  %v15426_v35 = vadd.f32 %v15246_v29, %v15167_v49 }
 0xb43   :  { %v15430_v61 = vadd.f32 %v15246_v29, %v15171_v15  ;;  %v15434_v60 = vadd.f32 %v15246_v29, %v15175_v58  ;;  %v15438_v38 = vadd.f32 %v15246_v29, %v15179_v26  ;;  %v15442_v6 = vadd.f32 %v15246_v29, %v15183_v51 }
 0xb44   :  { %v15446_v49 = vadd.f32 %v15246_v29, %v15187_v53  ;;  %v15450_v15 = vadd.f32 %v15246_v29, %v15191_v63  ;;  %v15454_v58 = vadd.f32 %v15246_v29, %v15195_v44  ;;  %v15458_v26 = vadd.f32 %v15246_v29, %v15199_v37 }
 0xb45   :  { %v15462_v51 = vadd.f32 %v15246_v29, %v15203_v56  ;;  %v15466_v53 = vadd.f32 %v15246_v29, %v16079_v46  ;;  %v15470_v63 = vadd.f32 %v15246_v29, %v16081_v0  ;;  %v15474_v44 = vadd.f32 %v15246_v29, %v16083_v13 }
 0xb46   :  { %16076 = vst [vmem:[#allocation14_spill] sm:$0xff] %v15454_v58  ;;  %16077 = vst [vmem:[#allocation11_spill] sm:$0xff] %v15458_v26  ;;  %v16085_v58 = vld [vmem:[#allocation8_spill] sm:$0xff]  ;;  %v16086_v26 = vld [vmem:[#allocation6_spill] sm:$0xff] }
 0xb47   :  { %16078 = vst [vmem:[#allocation16_spill] sm:$0xff] %v15462_v51  ;;  %16080 = vst [vmem:[#allocation13_spill] sm:$0xff] %v15466_v53  ;;  %v15478_v37 = vadd.f32 %v15246_v29, %v16085_v58  ;;  %v15482_v56 = vadd.f32 %v15246_v29, %v16086_v26  ;;  %v16087_v51 = vld [vmem:[#allocation10_spill] sm:$0xff]  ;;  %v16088_v53 = vld [vmem:[#allocation7_spill] sm:$0xff]  ;;  %v15502_v26 = vadd.f32 %v15246_v29, %v15243_v21  ;;  %v9144_v21 = vmax.f32 %v15270_v17, 0.0 }
 0xb48   :  { %16082 = vst [vmem:[#allocation18_spill] sm:$0xff] %v15470_v63  ;;  %16084 = vst [vmem:[#allocation15_spill] sm:$0xff] %v15474_v44  ;;  %v15486_v46 = vadd.f32 %v15246_v29, %v16087_v51  ;;  %v15490_v0 = vadd.f32 %v15246_v29, %v16088_v53  ;;  %v16089_v63 = vld [vmem:[#allocation12_spill] sm:$0xff]  ;;  %v16090_v44 = vld [vmem:[#allocation9_spill] sm:$0xff]  ;;  %v15506_v51 = vadd.f32 %v15246_v29, %v15250_v18  ;;  %v9146_v18 = vmax.f32 %v15278_v55, 0.0 }
 0xb49   :  { %v15494_v13 = vadd.f32 %v15246_v29, %v16089_v63  ;;  %v15498_v58 = vadd.f32 %v15246_v29, %v16090_v44  ;;  %16092 = vst [vmem:[#allocation17_spill] sm:$0xff] %v15502_v26  ;;  %v15510_v53 = vadd.f32 %v15246_v29, %v15254_v43  ;;  %v15514_v63 = vadd.f32 %v15246_v29, %v15258_v54 }
 0xb4a   :  { %16093 = vst [vmem:[#allocation22_spill] sm:$0xff] %v15506_v51  ;;  %v15518_v44 = vadd.f32 %v15246_v29, %v15262_v47  ;;  %v9145_v26 = vmax.f32 %v15274_v40, 0.0  ;;  %v9147_v51 = vmax.f32 %v15282_v23, 0.0  ;;  %v9148_v43 = vmax.f32 %v15286_v5, 0.0  ;;  %9208 = vst.msk [vmem:[%s15847_s7 + $0x8] sm:$0xff] %vm4103_vm13, %v9144_v21 }
 0xb4b   :  { %16091 = vst [vmem:[#allocation20_spill] sm:$0xff] %v15498_v58  ;;  %16094 = vst [vmem:[#allocation19_spill] sm:$0xff] %v15510_v53  ;;  %v9143_v58 = vmax.f32 %v15266_v14, 0.0  ;;  %v9149_v53 = vmax.f32 %v15290_v16, 0.0  ;;  %v9150_v54 = vmax.f32 %v15294_v57, 0.0  ;;  %v9152_v29 = vmax.f32 %v15302_v12, 0.0 }
 0xb4c   :  { %16095 = vst [vmem:[#allocation21_spill] sm:$0xff] %v15514_v63  ;;  %v9151_v63 = vmax.f32 %v15298_v24, 0.0  ;;  %v9153_v47 = vmax.f32 %v15306_v22, 0.0  ;;  %v9154_v14 = vmax.f32 %v15310_v9, 0.0  ;;  %9209 = vst.msk [vmem:[%s15847_s7 + $0x10] sm:$0xff] %vm4103_vm13, %v9145_v26  ;;  %v9155_v17 = vmax.f32 %v15314_v4, 0.0 }
 0xb4d   :  { %9207 = vst.msk [vmem:[%s15847_s7] sm:$0xff] %vm4103_vm13, %v9143_v58  ;;  %9210 = vst.msk [vmem:[%s15847_s7 + $0x18] sm:$0xff] %vm4103_vm13, %v9146_v18  ;;  %v9156_v40 = vmax.f32 %v15318_v42, 0.0  ;;  %v9157_v55 = vmax.f32 %v15322_v32, 0.0  ;;  %v9158_v23 = vmax.f32 %v15326_v33, 0.0  ;;  %v9159_v5 = vmax.f32 %v15330_v2, 0.0 }
 0xb4e   :  { %9211 = vst.msk [vmem:[%s15847_s7 + $0x20] sm:$0xff] %vm4103_vm13, %v9147_v51  ;;  %9212 = vst.msk [vmem:[%s15847_s7 + $0x28] sm:$0xff] %vm4103_vm13, %v9148_v43  ;;  %v9160_v16 = vmax.f32 %v15334_v62, 0.0  ;;  %v9161_v57 = vmax.f32 %v15338_v31, 0.0  ;;  %v9162_v24 = vmax.f32 %v15342_v52, 0.0  ;;  %v9163_v12 = vmax.f32 %v15346_v1, 0.0 }
 0xb4f   :  { %9213 = vst.msk [vmem:[%s15847_s7 + $0x30] sm:$0xff] %vm4103_vm13, %v9149_v53  ;;  %9214 = vst.msk [vmem:[%s15847_s7 + $0x38] sm:$0xff] %vm4103_vm13, %v9150_v54  ;;  %v9164_v22 = vmax.f32 %v15350_v25, 0.0  ;;  %v9165_v9 = vmax.f32 %v15354_v28, 0.0  ;;  %v9166_v4 = vmax.f32 %v15358_v41, 0.0  ;;  %v9167_v42 = vmax.f32 %v15362_v3, 0.0 }
 0xb50   :  { %9215 = vst.msk [vmem:[%s15847_s7 + $0x40] sm:$0xff] %vm4103_vm13, %v9151_v63  ;;  %9216 = vst.msk [vmem:[%s15847_s7 + $0x48] sm:$0xff] %vm4103_vm13, %v9152_v29  ;;  %v9168_v32 = vmax.f32 %v15366_v8, 0.0  ;;  %v9169_v33 = vmax.f32 %v15370_v10, 0.0  ;;  %v9170_v2 = vmax.f32 %v15374_v27, 0.0  ;;  %v9171_v62 = vmax.f32 %v15378_v36, 0.0 }
 0xb51   :  { %9217 = vst.msk [vmem:[%s15847_s7 + $0x50] sm:$0xff] %vm4103_vm13, %v9153_v47  ;;  %9218 = vst.msk [vmem:[%s15847_s7 + $0x58] sm:$0xff] %vm4103_vm13, %v9154_v14  ;;  %v9172_v31 = vmax.f32 %v15382_v7, 0.0  ;;  %v9173_v52 = vmax.f32 %v15386_v50, 0.0  ;;  %v9174_v1 = vmax.f32 %v15390_v19, 0.0  ;;  %v9175_v25 = vmax.f32 %v15394_v30, 0.0 }
 0xb52   :  { %9219 = vst.msk [vmem:[%s15847_s7 + $0x60] sm:$0xff] %vm4103_vm13, %v9155_v17  ;;  %9220 = vst.msk [vmem:[%s15847_s7 + $0x68] sm:$0xff] %vm4103_vm13, %v9156_v40  ;;  %v9176_v28 = vmax.f32 %v15398_v59, 0.0  ;;  %v9177_v41 = vmax.f32 %v15402_v11, 0.0  ;;  %v9178_v3 = vmax.f32 %v15406_v45, 0.0  ;;  %v9179_v8 = vmax.f32 %v15410_v39, 0.0 }
 0xb53   :  { %9221 = vst.msk [vmem:[%s15847_s7 + $0x70] sm:$0xff] %vm4103_vm13, %v9157_v55  ;;  %9222 = vst.msk [vmem:[%s15847_s7 + $0x78] sm:$0xff] %vm4103_vm13, %v9158_v23  ;;  %v9180_v10 = vmax.f32 %v15414_v20, 0.0  ;;  %v9181_v27 = vmax.f32 %v15418_v48, 0.0  ;;  %v9182_v36 = vmax.f32 %v15422_v34, 0.0  ;;  %v9183_v7 = vmax.f32 %v15426_v35, 0.0 }
 0xb54   :  { %9223 = vst.msk [vmem:[%s15847_s7 + $0x80] sm:$0xff] %vm4103_vm13, %v9159_v5  ;;  %9224 = vst.msk [vmem:[%s15847_s7 + $0x88] sm:$0xff] %vm4103_vm13, %v9160_v16  ;;  %v9184_v50 = vmax.f32 %v15430_v61, 0.0  ;;  %v9185_v19 = vmax.f32 %v15434_v60, 0.0  ;;  %v9186_v30 = vmax.f32 %v15438_v38, 0.0  ;;  %v9187_v59 = vmax.f32 %v15442_v6, 0.0 }
 0xb55   :  { %9225 = vst.msk [vmem:[%s15847_s7 + $0x90] sm:$0xff] %vm4103_vm13, %v9161_v57  ;;  %9226 = vst.msk [vmem:[%s15847_s7 + $0x98] sm:$0xff] %vm4103_vm13, %v9162_v24  ;;  %v9188_v11 = vmax.f32 %v15446_v49, 0.0  ;;  %v9189_v45 = vmax.f32 %v15450_v15, 0.0  ;;  %v16096_v39 = vld [vmem:[#allocation14_spill] sm:$0xff]  ;;  %v16097_v48 = vld [vmem:[#allocation11_spill] sm:$0xff] }
 0xb56   :  { %9227 = vst.msk [vmem:[%s15847_s7 + $0xa0] sm:$0xff] %vm4103_vm13, %v9163_v12  ;;  %9228 = vst.msk [vmem:[%s15847_s7 + $0xa8] sm:$0xff] %vm4103_vm13, %v9164_v22  ;;  %v9190_v20 = vmax.f32 %v16096_v39, 0.0  ;;  %v9191_v34 = vmax.f32 %v16097_v48, 0.0  ;;  %v16098_v35 = vld [vmem:[#allocation16_spill] sm:$0xff]  ;;  %v16099_v60 = vld [vmem:[#allocation13_spill] sm:$0xff] }
 0xb57   :  { %9229 = vst.msk [vmem:[%s15847_s7 + $0xb0] sm:$0xff] %vm4103_vm13, %v9165_v9  ;;  %9230 = vst.msk [vmem:[%s15847_s7 + $0xb8] sm:$0xff] %vm4103_vm13, %v9166_v4  ;;  %v9192_v61 = vmax.f32 %v16098_v35, 0.0  ;;  %v9193_v38 = vmax.f32 %v16099_v60, 0.0  ;;  %v16100_v6 = vld [vmem:[#allocation18_spill] sm:$0xff]  ;;  %v16101_v15 = vld [vmem:[#allocation15_spill] sm:$0xff] }
 0xb58   :  { %9231 = vst.msk [vmem:[%s15847_s7 + $0xc0] sm:$0xff] %vm4103_vm13, %v9167_v42  ;;  %9232 = vst.msk [vmem:[%s15847_s7 + $0xc8] sm:$0xff] %vm4103_vm13, %v9168_v32  ;;  %v9194_v49 = vmax.f32 %v16100_v6, 0.0  ;;  %v9195_v58 = vmax.f32 %v16101_v15, 0.0  ;;  %v9196_v26 = vmax.f32 %v15478_v37, 0.0  ;;  %v9197_v51 = vmax.f32 %v15482_v56, 0.0 }
 0xb59   :  { %9233 = vst.msk [vmem:[%s15847_s7 + $0xd0] sm:$0xff] %vm4103_vm13, %v9169_v33  ;;  %9234 = vst.msk [vmem:[%s15847_s7 + $0xd8] sm:$0xff] %vm4103_vm13, %v9170_v2  ;;  %v9198_v53 = vmax.f32 %v15486_v46, 0.0  ;;  %v9199_v37 = vmax.f32 %v15490_v0, 0.0  ;;  %v9200_v56 = vmax.f32 %v15494_v13, 0.0  ;;  %v16102_v46 = vld [vmem:[#allocation20_spill] sm:$0xff] }
 0xb5a   :  { %9235 = vst.msk [vmem:[%s15847_s7 + $0xe0] sm:$0xff] %vm4103_vm13, %v9171_v62  ;;  %9236 = vst.msk [vmem:[%s15847_s7 + $0xe8] sm:$0xff] %vm4103_vm13, %v9172_v31  ;;  %v9201_v63 = vmax.f32 %v16102_v46, 0.0  ;;  %v16103_v21 = vld [vmem:[#allocation17_spill] sm:$0xff]  ;;  %v16104_v0 = vld [vmem:[#allocation22_spill] sm:$0xff]  ;;  %v9206_v14 = vmax.f32 %v15518_v44, 0.0 }
 0xb5b   :  { %9237 = vst.msk [vmem:[%s15847_s7 + $0xf0] sm:$0xff] %vm4103_vm13, %v9173_v52  ;;  %9238 = vst.msk [vmem:[%s15847_s7 + $0xf8] sm:$0xff] %vm4103_vm13, %v9174_v1  ;;  %v9202_v18 = vmax.f32 %v16103_v21, 0.0  ;;  %v9203_v13 = vmax.f32 %v16104_v0, 0.0  ;;  %v16105_v43 = vld [vmem:[#allocation19_spill] sm:$0xff]  ;;  %v16106_v29 = vld [vmem:[#allocation21_spill] sm:$0xff] }
 0xb5c   :  { %9239 = vst.msk [vmem:[%s15847_s7 + $0x100] sm:$0xff] %vm4103_vm13, %v9175_v25  ;;  %9240 = vst.msk [vmem:[%s15847_s7 + $0x108] sm:$0xff] %vm4103_vm13, %v9176_v28  ;;  %v9204_v54 = vmax.f32 %v16105_v43, 0.0  ;;  %v9205_v47 = vmax.f32 %v16106_v29, 0.0 }
 0xb5d   :  { %9241 = vst.msk [vmem:[%s15847_s7 + $0x110] sm:$0xff] %vm4103_vm13, %v9177_v41  ;;  %9242 = vst.msk [vmem:[%s15847_s7 + $0x118] sm:$0xff] %vm4103_vm13, %v9178_v3 }
 0xb5e   :  { %9243 = vst.msk [vmem:[%s15847_s7 + $0x120] sm:$0xff] %vm4103_vm13, %v9179_v8  ;;  %9244 = vst.msk [vmem:[%s15847_s7 + $0x128] sm:$0xff] %vm4103_vm13, %v9180_v10 }
 0xb5f   :  { %9245 = vst.msk [vmem:[%s15847_s7 + $0x130] sm:$0xff] %vm4103_vm13, %v9181_v27  ;;  %9246 = vst.msk [vmem:[%s15847_s7 + $0x138] sm:$0xff] %vm4103_vm13, %v9182_v36 }
 0xb60   :  { %9247 = vst.msk [vmem:[%s15847_s7 + $0x140] sm:$0xff] %vm4103_vm13, %v9183_v7  ;;  %9248 = vst.msk [vmem:[%s15847_s7 + $0x148] sm:$0xff] %vm4103_vm13, %v9184_v50 }
 0xb61   :  { %9249 = vst.msk [vmem:[%s15847_s7 + $0x150] sm:$0xff] %vm4103_vm13, %v9185_v19  ;;  %9250 = vst.msk [vmem:[%s15847_s7 + $0x158] sm:$0xff] %vm4103_vm13, %v9186_v30 }
 0xb62   :  { %9251 = vst.msk [vmem:[%s15847_s7 + $0x160] sm:$0xff] %vm4103_vm13, %v9187_v59  ;;  %9252 = vst.msk [vmem:[%s15847_s7 + $0x168] sm:$0xff] %vm4103_vm13, %v9188_v11 }
 0xb63   :  { %9253 = vst.msk [vmem:[%s15847_s7 + $0x170] sm:$0xff] %vm4103_vm13, %v9189_v45  ;;  %9254 = vst.msk [vmem:[%s15847_s7 + $0x178] sm:$0xff] %vm4103_vm13, %v9190_v20 }
 0xb64   :  { %9255 = vst.msk [vmem:[%s15847_s7 + $0x180] sm:$0xff] %vm4103_vm13, %v9191_v34  ;;  %9256 = vst.msk [vmem:[%s15847_s7 + $0x188] sm:$0xff] %vm4103_vm13, %v9192_v61 }
 0xb65   :  { %9257 = vst.msk [vmem:[%s15847_s7 + $0x190] sm:$0xff] %vm4103_vm13, %v9193_v38  ;;  %9258 = vst.msk [vmem:[%s15847_s7 + $0x198] sm:$0xff] %vm4103_vm13, %v9194_v49 }
 0xb66   :  { %9259 = vst.msk [vmem:[%s15847_s7 + $0x1a0] sm:$0xff] %vm4103_vm13, %v9195_v58  ;;  %9260 = vst.msk [vmem:[%s15847_s7 + $0x1a8] sm:$0xff] %vm4103_vm13, %v9196_v26 }
 0xb67   :  { %9261 = vst.msk [vmem:[%s15847_s7 + $0x1b0] sm:$0xff] %vm4103_vm13, %v9197_v51  ;;  %9262 = vst.msk [vmem:[%s15847_s7 + $0x1b8] sm:$0xff] %vm4103_vm13, %v9198_v53 }
 0xb68   :  { %9263 = vst.msk [vmem:[%s15847_s7 + $0x1c0] sm:$0xff] %vm4103_vm13, %v9199_v37  ;;  %9264 = vst.msk [vmem:[%s15847_s7 + $0x1c8] sm:$0xff] %vm4103_vm13, %v9200_v56 }
 0xb69   :  { %9265 = vst.msk [vmem:[%s15847_s7 + $0x1d0] sm:$0xff] %vm4103_vm13, %v9201_v63  ;;  %9266 = vst.msk [vmem:[%s15847_s7 + $0x1d8] sm:$0xff] %vm4103_vm13, %v9202_v18 }
 0xb6a   :  { %9267 = vst.msk [vmem:[%s15847_s7 + $0x1e0] sm:$0xff] %vm4103_vm13, %v9203_v13  ;;  %9268 = vst.msk [vmem:[%s15847_s7 + $0x1e8] sm:$0xff] %vm4103_vm13, %v9204_v54 }
 0xb6b   :  { %9269 = vst.msk [vmem:[%s15847_s7 + $0x1f0] sm:$0xff] %vm4103_vm13, %v9205_v47  ;;  %9270 = vst.msk [vmem:[%s15847_s7 + $0x1f8] sm:$0xff] %vm4103_vm13, %v9206_v14 }

</bundles_post_ra>
